<compile_context>
chip_gen: v7x
topology: tpu7x:2x2x1
jax: 0.10.0
libtpu: 0.0.40
codegen_flags: <defaults>
</compile_context>

<pallas_src>
import numpy as np
import jax
import jax.numpy as jnp
from jax.experimental import pallas as pl
from jax.experimental.pallas import tpu as pltpu

HIDDEN = 256                 # per-direction hidden size
H2 = 2 * HIDDEN              # 512  : [fwd | bwd] packed hidden
G6 = 6 * HIDDEN              # 1536 : [r_f|r_b|z_f|z_b|n_f|n_b] packed gates
EMB = 1024
NUM_LAYERS = 6
LRELU_SLOPE = 0.01           # PyTorch nn.LeakyReLU default
BN_EPS = 1e-5


# ----------------------------------------------------------------------------
# The single fused kernel.  Grid axis = GRU layer (sequential, "arbitrary").
# Per step l:
#   h_l  = GRU cell (both directions at once) on the previous layer's output
#   acc += h_l @ W1eff[l]                      (incremental first MLP Linear)
# At the last step the remaining MLP (w2..w6, BN folded, LeakyReLU) runs and
# writes the padded (N, 128) output block.
# ----------------------------------------------------------------------------
def _fused_kernel(x_ref, w0_ref, s0_ref, wr_ref, sr_ref, ba_ref, bhhn_ref,
                  w1_ref, s1_ref, b1_ref, w2_ref, b2_ref, w3_ref, b3_ref,
                  w4_ref, b4_ref, w5_ref, b5_ref, w6_ref, b6_ref,
                  o_ref, carry_ref, acc_ref):
    l = pl.program_id(0)

    def dequant(q):
        # int8 -> bf16 via f32 (|q| <= 127 is exact in bf16's 8-bit mantissa).
        return q.astype(jnp.float32).astype(jnp.bfloat16)

    def cell(inp_bf16, wq, scale):
        # g = inp @ W + b   with   W ~= Wq * scale  (per-column scale)
        g = jnp.dot(inp_bf16, dequant(wq), preferred_element_type=jnp.float32)
        g = g * scale + ba_ref[0]                         # (1, 1536) broadcasts
        r = jax.nn.sigmoid(g[:, :H2])
        z = jax.nn.sigmoid(g[:, H2:2 * H2])
        n = jnp.tanh(g[:, 2 * H2:] + r * bhhn_ref[0])     # (1, 512) broadcasts
        # h_prev = 0 and seq_len = 1  =>  h = (1 - z) * n
        return ((1.0 - z) * n).astype(jnp.bfloat16)

    @pl.when(l == 0)
    def _():
        acc_ref[...] = jnp.zeros_like(acc_ref)
        carry_ref[...] = cell(x_ref[...].astype(jnp.bfloat16),
                              w0_ref[...], s0_ref[...])

    @pl.when(l > 0)
    def _():
        carry_ref[...] = cell(carry_ref[...], wr_ref[0], sr_ref[0])

    # Incremental first MLP Linear: acc += h_l @ W1eff[l]  (W1 streams with GRU).
    acc_ref[...] += jnp.dot(carry_ref[...], dequant(w1_ref[0]),
                            preferred_element_type=jnp.float32) * s1_ref[0]

    @pl.when(l == NUM_LAYERS - 1)
    def _():
        def leaky(v):
            return jnp.where(v >= 0.0, v, LRELU_SLOPE * v)

        y = leaky(acc_ref[...] + b1_ref[...])                     # 3584 -> 1024
        for w_ref, b_ref in ((w2_ref, b2_ref), (w3_ref, b3_ref),
                             (w4_ref, b4_ref), (w5_ref, b5_ref)): # ->512->256->128->64
            y = leaky(jnp.dot(y.astype(jnp.bfloat16), w_ref[...],
                              preferred_element_type=jnp.float32) + b_ref[...])
        o_ref[...] = jnp.dot(y.astype(jnp.bfloat16), w6_ref[...],  # 64 -> 2 (pad 128)
                             preferred_element_type=jnp.float32) + b6_ref[...]


def forward(params, x):
    gru, mlp = params["gru"], params["mlp"]
    N = x.shape[0]
    out = pl.pallas_call(
        _fused_kernel,
        out_shape=jax.ShapeDtypeStruct((N, 128), jnp.float32),
        grid_spec=pltpu.PrefetchScalarGridSpec(
            num_scalar_prefetch=0,
            grid=(NUM_LAYERS,),
            in_specs=[
                pl.BlockSpec((N, EMB), lambda l: (0, 0)),                   # x
                pl.BlockSpec((EMB, G6), lambda l: (0, 0)),                  # W0 (int8)
                pl.BlockSpec((1, G6), lambda l: (0, 0)),                    # W0 scales
                pl.BlockSpec((1, H2, G6),                                   # Wr (int8)
                             lambda l: (jnp.maximum(l - 1, 0), 0, 0)),
                pl.BlockSpec((1, 1, G6),                                    # Wr scales
                             lambda l: (jnp.maximum(l - 1, 0), 0, 0)),
                pl.BlockSpec((1, 1, G6), lambda l: (l, 0, 0)),              # b_a
                pl.BlockSpec((1, 1, H2), lambda l: (l, 0, 0)),              # b_hh_n
                pl.BlockSpec((1, H2, 1024), lambda l: (l, 0, 0)),           # W1eff (int8)
                pl.BlockSpec((1, 1, 1024), lambda l: (l, 0, 0)),            # W1eff scales
                pl.BlockSpec((1, 1024), lambda l: (0, 0)),                  # b1
                pl.BlockSpec((1024, 512), lambda l: (0, 0)),                # w2 (bf16)
                pl.BlockSpec((1, 512), lambda l: (0, 0)),                   # b2
                pl.BlockSpec((512, 256), lambda l: (0, 0)),                 # w3
                pl.BlockSpec((1, 256), lambda l: (0, 0)),                   # b3
                pl.BlockSpec((256, 128), lambda l: (0, 0)),                 # w4
                pl.BlockSpec((1, 128), lambda l: (0, 0)),                   # b4
                pl.BlockSpec((128, 64), lambda l: (0, 0)),                  # w5
                pl.BlockSpec((1, 64), lambda l: (0, 0)),                    # b5
                pl.BlockSpec((64, 128), lambda l: (0, 0)),                  # w6 (padded)
                pl.BlockSpec((1, 128), lambda l: (0, 0)),                   # b6 (padded)
            ],
            out_specs=pl.BlockSpec((N, 128), lambda l: (0, 0)),
            scratch_shapes=[pltpu.VMEM((N, H2), jnp.bfloat16),    # layer carry (bf16)
                            pltpu.VMEM((N, 1024), jnp.float32)],  # first-Linear acc
        ),
        compiler_params=pltpu.CompilerParams(
            dimension_semantics=("arbitrary",),       # layers are sequential
            vmem_limit_bytes=32 * 1024 * 1024),
    )(x, gru["w0q"], gru["s0"], gru["wrq"], gru["sr"], gru["b_a"], gru["b_hhn"],
      mlp["w1q"], mlp["s1"], mlp["b1"], mlp["w2"], mlp["b2"], mlp["w3"], mlp["b3"],
      mlp["w4"], mlp["b4"], mlp["w5"], mlp["b5"], mlp["w6"], mlp["b6"])
    return out[:, :2]


# ----------------------------------------------------------------------------
# Deterministic parameter init + host-side packing / folding / quantization.
# ----------------------------------------------------------------------------
def init_params(key):
    keys = iter(jax.random.split(key, 256))

    def u(shape, scale=0.05):
        return jax.random.uniform(next(keys), shape, jnp.float32, -scale, scale)

    def quant_cols(w):
        # Symmetric per-output-column int8 quantization: W ~= q * s.
        s = jnp.maximum(jnp.max(jnp.abs(w), axis=0, keepdims=True), 1e-6) / 127.0
        q = jnp.clip(jnp.round(w / s), -127.0, 127.0).astype(jnp.int8)
        return q, s

    H = HIDDEN
    wr_q, wr_s, ba_list, bhhn_list = [], [], [], []
    w0q = s0 = None
    for l in range(NUM_LAYERS):
        in_dim = EMB if l == 0 else H2
        # Per-direction raw params (PyTorch layout, transposed): gates [r|z|n].
        Wf, Wb = u((in_dim, 3 * H)), u((in_dim, 3 * H))
        bih_f, bih_b = u((3 * H,)), u((3 * H,))
        bhh_f, bhh_b = u((3 * H,)), u((3 * H,))
        # Pack both directions column-wise: [r_f | r_b | z_f | z_b | n_f | n_b].
        Wcat = jnp.concatenate(
            [Wf[:, 0:H], Wb[:, 0:H], Wf[:, H:2 * H], Wb[:, H:2 * H],
             Wf[:, 2 * H:], Wb[:, 2 * H:]], axis=1)
        # r,z gates: b_ih + b_hh combined; n gate: keep b_hh_n separate (gets r*).
        b_a = jnp.concatenate(
            [bih_f[0:H] + bhh_f[0:H], bih_b[0:H] + bhh_b[0:H],
             bih_f[H:2 * H] + bhh_f[H:2 * H], bih_b[H:2 * H] + bhh_b[H:2 * H],
             bih_f[2 * H:], bih_b[2 * H:]])
        b_hhn = jnp.concatenate([bhh_f[2 * H:], bhh_b[2 * H:]])
        q, s = quant_cols(Wcat)
        if l == 0:
            w0q, s0 = q, s
        else:
            wr_q.append(q)
            wr_s.append(s)
        ba_list.append(b_a)
        bhhn_list.append(b_hhn)

    gru = dict(
        w0q=w0q,                                              # (1024, 1536) int8
        s0=s0,                                                # (1, 1536) f32
        wrq=jnp.stack(wr_q),                                  # (5, 512, 1536) int8
        sr=jnp.stack(wr_s),                                   # (5, 1, 1536) f32
        b_a=jnp.stack(ba_list).reshape(NUM_LAYERS, 1, G6),    # (6, 1, 1536) f32
        b_hhn=jnp.stack(bhhn_list).reshape(NUM_LAYERS, 1, H2))  # (6, 1, 512) f32

    # Linear layers; BN (eval mode) folded into weight columns / bias.
    dims = [(3584, 1024), (1024, 512), (512, 256), (256, 128), (128, 64), (64, 2)]
    lins = []
    for i, (fi, fo) in enumerate(dims):
        w_t, b = u((fi, fo)), u((fo,))
        if i < 5:                                             # last Linear has no BN/act
            gamma, beta = 1.0 + u((fo,)), u((fo,))
            mean, var = u((fo,)), 1.0 + jnp.abs(u((fo,)))
            scale = gamma / jnp.sqrt(var + BN_EPS)
            shift = beta - mean * scale
            w_t = w_t * scale[None, :]
            b = b * scale + shift
        lins.append((w_t, b))

    # First Linear re-blocked for feat = [h5 | h0 | h1 | h2 | h3 | h4 | h5].
    W1, b1 = lins[0]
    blocks = [W1[H2 * (l + 1):H2 * (l + 2), :] for l in range(5)]
    blocks.append(W1[0:H2, :] + W1[6 * H2:7 * H2, :])         # h5 appears twice
    q1, s1 = zip(*[quant_cols(blk) for blk in blocks])
    w1q = jnp.stack(q1)                                       # (6, 512, 1024) int8
    s1 = jnp.stack(s1)                                        # (6, 1, 1024) f32

    # Final Linear padded 2 -> 128 output lanes (lane-dense store; slice later).
    W6, b6 = lins[5]
    W6p = jnp.zeros((64, 128), jnp.float32).at[:, :2].set(W6)
    b6p = jnp.zeros((128,), jnp.float32).at[:2].set(b6)

    mlp = dict(
        w1q=w1q, s1=s1, b1=b1.reshape(1, -1),
        w2=lins[1][0].astype(jnp.bfloat16), b2=lins[1][1].reshape(1, -1),
        w3=lins[2][0].astype(jnp.bfloat16), b3=lins[2][1].reshape(1, -1),
        w4=lins[3][0].astype(jnp.bfloat16), b4=lins[3][1].reshape(1, -1),
        w5=lins[4][0].astype(jnp.bfloat16), b5=lins[4][1].reshape(1, -1),
        w6=W6p.astype(jnp.bfloat16), b6=b6p.reshape(1, -1))
    return dict(gru=gru, mlp=mlp)


# ----------------------------------------------------------------------------
# Pure-JAX reference (same packed / folded / quantized params, same math).
# ----------------------------------------------------------------------------
def forward_ref(params, x):
    gru, mlp = params["gru"], params["mlp"]

    def qdot(inp_bf16, q, s):
        w = q.astype(jnp.float32).astype(jnp.bfloat16)
        return jnp.dot(inp_bf16, w, preferred_element_type=jnp.float32) * s

    def leaky(v):
        return jnp.where(v >= 0.0, v, LRELU_SLOPE * v)

    hs = []
    inp = x.astype(jnp.bfloat16)
    for l in range(NUM_LAYERS):
        if l == 0:
            g = qdot(inp, gru["w0q"], gru["s0"])
        else:
            g = qdot(inp, gru["wrq"][l - 1], gru["sr"][l - 1])
        g = g + gru["b_a"][l]
        r = jax.nn.sigmoid(g[:, :H2])
        z = jax.nn.sigmoid(g[:, H2:2 * H2])
        n = jnp.tanh(g[:, 2 * H2:] + r * gru["b_hhn"][l])
        h = ((1.0 - z) * n).astype(jnp.bfloat16)
        hs.append(h)
        inp = h

    acc = jnp.zeros((x.shape[0], 1024), jnp.float32)
    for l in range(NUM_LAYERS):
        acc = acc + qdot(hs[l], mlp["w1q"][l], mlp["s1"][l])
    y = leaky(acc + mlp["b1"])
    for wk, bk in (("w2", "b2"), ("w3", "b3"), ("w4", "b4"), ("w5", "b5")):
        y = leaky(jnp.dot(y.astype(jnp.bfloat16), mlp[wk],
                          preferred_element_type=jnp.float32) + mlp[bk])
    y = jnp.dot(y.astype(jnp.bfloat16), mlp["w6"],
                preferred_element_type=jnp.float32) + mlp["b6"]
    return y[:, :2]


if __name__ == "__main__":
    key = jax.random.PRNGKey(0)
    pkey, xkey = jax.random.split(key)
    params = init_params(pkey)

    N = 8  # small batch; emb_dim=1024 is fixed by the GRU input size
    x = jax.random.normal(xkey, (N, EMB), jnp.float32)

    out = jax.block_until_ready(jax.jit(forward)(params, x))
    assert out.shape == (N, 2)

    ref = forward_ref(params, x)
    np.testing.assert_allclose(np.asarray(out), np.asarray(ref),
                               atol=2e-3, rtol=2e-3)
    print("KERNEL_OK")
</pallas_src>

<mosaic_0001>
module attributes {stable_mosaic.version = 11 : i64} {
  func.func @_fused_kernel(%arg0: i32, %arg1: memref<8x1024xf32, #tpu.memory_space<vmem>>, %arg2: memref<1024x1536xi8, #tpu.memory_space<vmem>>, %arg3: memref<1x1536xf32, #tpu.memory_space<vmem>>, %arg4: memref<1x512x1536xi8, #tpu.memory_space<vmem>>, %arg5: memref<1x1x1536xf32, #tpu.memory_space<vmem>>, %arg6: memref<1x1x1536xf32, #tpu.memory_space<vmem>>, %arg7: memref<1x1x512xf32, #tpu.memory_space<vmem>>, %arg8: memref<1x512x1024xi8, #tpu.memory_space<vmem>>, %arg9: memref<1x1x1024xf32, #tpu.memory_space<vmem>>, %arg10: memref<1x1024xf32, #tpu.memory_space<vmem>>, %arg11: memref<1024x512xbf16, #tpu.memory_space<vmem>>, %arg12: memref<1x512xf32, #tpu.memory_space<vmem>>, %arg13: memref<512x256xbf16, #tpu.memory_space<vmem>>, %arg14: memref<1x256xf32, #tpu.memory_space<vmem>>, %arg15: memref<256x128xbf16, #tpu.memory_space<vmem>>, %arg16: memref<1x128xf32, #tpu.memory_space<vmem>>, %arg17: memref<128x64xbf16, #tpu.memory_space<vmem>>, %arg18: memref<1x64xf32, #tpu.memory_space<vmem>>, %arg19: memref<64x128xbf16, #tpu.memory_space<vmem>>, %arg20: memref<1x128xf32, #tpu.memory_space<vmem>>, %arg21: memref<8x128xf32, #tpu.memory_space<vmem>>, %arg22: memref<8x512xbf16, #tpu.memory_space<vmem>>, %arg23: memref<8x1024xf32, #tpu.memory_space<vmem>>) attributes {dimension_semantics = [#tpu.dimension_semantics<arbitrary>], iteration_bounds = array<i64: 6>, scalar_prefetch = 0 : i64, scratch_operands = 2 : i64, tpu.core_type = #tpu.core_type<tc>, window_params = [{pipeline_mode = #tpu.pipeline_mode<synchronous>, transform_indices = @transform_0, window_bounds = array<i64: 8, 1024>}, {pipeline_mode = #tpu.pipeline_mode<synchronous>, transform_indices = @transform_1, window_bounds = array<i64: 1024, 1536>}, {pipeline_mode = #tpu.pipeline_mode<synchronous>, transform_indices = @transform_2, window_bounds = array<i64: 1, 1536>}, {transform_indices = @transform_3, window_bounds = array<i64: 1, 512, 1536>}, {transform_indices = @transform_4, window_bounds = array<i64: 1, 1, 1536>}, {transform_indices = @transform_5, window_bounds = array<i64: 1, 1, 1536>}, {transform_indices = @transform_6, window_bounds = array<i64: 1, 1, 512>}, {transform_indices = @transform_7, window_bounds = array<i64: 1, 512, 1024>}, {transform_indices = @transform_8, window_bounds = array<i64: 1, 1, 1024>}, {pipeline_mode = #tpu.pipeline_mode<synchronous>, transform_indices = @transform_9, window_bounds = array<i64: 1, 1024>}, {pipeline_mode = #tpu.pipeline_mode<synchronous>, transform_indices = @transform_10, window_bounds = array<i64: 1024, 512>}, {pipeline_mode = #tpu.pipeline_mode<synchronous>, transform_indices = @transform_11, window_bounds = array<i64: 1, 512>}, {pipeline_mode = #tpu.pipeline_mode<synchronous>, transform_indices = @transform_12, window_bounds = array<i64: 512, 256>}, {pipeline_mode = #tpu.pipeline_mode<synchronous>, transform_indices = @transform_13, window_bounds = array<i64: 1, 256>}, {pipeline_mode = #tpu.pipeline_mode<synchronous>, transform_indices = @transform_14, window_bounds = array<i64: 256, 128>}, {pipeline_mode = #tpu.pipeline_mode<synchronous>, transform_indices = @transform_15, window_bounds = array<i64: 1, 128>}, {pipeline_mode = #tpu.pipeline_mode<synchronous>, transform_indices = @transform_16, window_bounds = array<i64: 128, 64>}, {pipeline_mode = #tpu.pipeline_mode<synchronous>, transform_indices = @transform_17, window_bounds = array<i64: 1, 64>}, {pipeline_mode = #tpu.pipeline_mode<synchronous>, transform_indices = @transform_18, window_bounds = array<i64: 64, 128>}, {pipeline_mode = #tpu.pipeline_mode<synchronous>, transform_indices = @transform_19, window_bounds = array<i64: 1, 128>}, {pipeline_mode = #tpu.pipeline_mode<synchronous>, transform_indices = @transform_20, window_bounds = array<i64: 8, 128>}]} {
    %c0_i32 = arith.constant 0 : i32
    %0 = arith.cmpi eq, %arg0, %c0_i32 : i32
    %1 = arith.extui %0 : i1 to i32
    %c0_i32_0 = arith.constant 0 : i32
    %2 = arith.cmpi ne, %1, %c0_i32_0 : i32
    scf.if %2 {
      %cst_15 = arith.constant 0.000000e+00 : f32
      %22 = vector.broadcast %cst_15 : f32 to vector<8x1024xf32>
      %c0_16 = arith.constant 0 : index
      %c0_17 = arith.constant 0 : index
      %23 = vector.load %arg23[%c0_16, %c0_17] : memref<8x1024xf32, #tpu.memory_space<vmem>>, vector<8x1024xf32>
      tpu.vector_store %arg23[%c0_16, %c0_17], %22 {strides = array<i32>} : memref<8x1024xf32, #tpu.memory_space<vmem>>, vector<8x1024xf32>,
      %c0_18 = arith.constant 0 : index
      %c0_19 = arith.constant 0 : index
      %24 = vector.load %arg1[%c0_18, %c0_19] : memref<8x1024xf32, #tpu.memory_space<vmem>>, vector<8x1024xf32>
      %25 = arith.truncf %24 : vector<8x1024xf32> to vector<8x1024xbf16>
      %c0_20 = arith.constant 0 : index
      %c0_21 = arith.constant 0 : index
      %26 = vector.load %arg2[%c0_20, %c0_21] : memref<1024x1536xi8, #tpu.memory_space<vmem>>, vector<1024x1536xi8>
      %c0_22 = arith.constant 0 : index
      %c0_23 = arith.constant 0 : index
      %27 = vector.load %arg3[%c0_22, %c0_23] : memref<1x1536xf32, #tpu.memory_space<vmem>>, vector<1x1536xf32>
      %28 = arith.sitofp %26 : vector<1024x1536xi8> to vector<1024x1536xf32>
      %29 = arith.truncf %28 : vector<1024x1536xf32> to vector<1024x1536xbf16>
      %cst_24 = arith.constant dense<0.000000e+00> : vector<8x1536xf32>
      %30 = tpu.matmul %25, %29, %cst_24 {dimension_numbers = #tpu.dot_dimension_numbers<[1], [0], [0], [1], [0, 0, 1, 1], [], []>} : vector<8x1024xbf16>, vector<1024x1536xbf16>, vector<8x1536xf32> -> vector<8x1536xf32>
      %31 = vector.broadcast %27 : vector<1x1536xf32> to vector<8x1536xf32>
      %32 = arith.mulf %30, %31 : vector<8x1536xf32>
      %c0_25 = arith.constant 0 : index
      %c0_26 = arith.constant 0 : index
      %c0_27 = arith.constant 0 : index
      %33 = vector.load %arg6[%c0_25, %c0_26, %c0_27] : memref<1x1x1536xf32, #tpu.memory_space<vmem>>, vector<1x1x1536xf32>
      %34 = vector.shape_cast %33 : vector<1x1x1536xf32> to vector<1x1536xf32>
      %35 = vector.broadcast %34 : vector<1x1536xf32> to vector<8x1536xf32>
      %36 = arith.addf %32, %35 : vector<8x1536xf32>
      %37 = vector.extract_strided_slice %36 {offsets = [0, 0], sizes = [8, 512], strides = [1, 1]} : vector<8x1536xf32> to vector<8x512xf32>
      %38 = arith.negf %37 : vector<8x512xf32>
      %39 = math.exp %38 : vector<8x512xf32>
      %cst_28 = arith.constant 1.000000e+00 : f32
      %40 = vector.broadcast %cst_28 : f32 to vector<8x512xf32>
      %41 = arith.addf %40, %39 : vector<8x512xf32>
      %42 = arith.divf %40, %41 : vector<8x512xf32>
      %43 = vector.extract_strided_slice %36 {offsets = [0, 512], sizes = [8, 512], strides = [1, 1]} : vector<8x1536xf32> to vector<8x512xf32>
      %44 = arith.negf %43 : vector<8x512xf32>
      %45 = math.exp %44 : vector<8x512xf32>
      %cst_29 = arith.constant 1.000000e+00 : f32
      %46 = vector.broadcast %cst_29 : f32 to vector<8x512xf32>
      %47 = arith.addf %46, %45 : vector<8x512xf32>
      %48 = arith.divf %46, %47 : vector<8x512xf32>
      %49 = vector.extract_strided_slice %36 {offsets = [0, 1024], sizes = [8, 512], strides = [1, 1]} : vector<8x1536xf32> to vector<8x512xf32>
      %c0_30 = arith.constant 0 : index
      %c0_31 = arith.constant 0 : index
      %c0_32 = arith.constant 0 : index
      %50 = vector.load %arg7[%c0_30, %c0_31, %c0_32] : memref<1x1x512xf32, #tpu.memory_space<vmem>>, vector<1x1x512xf32>
      %51 = vector.shape_cast %50 : vector<1x1x512xf32> to vector<1x512xf32>
      %52 = vector.broadcast %51 : vector<1x512xf32> to vector<8x512xf32>
      %53 = arith.mulf %42, %52 : vector<8x512xf32>
      %54 = arith.addf %49, %53 : vector<8x512xf32>
      %55 = math.tanh %54 : vector<8x512xf32>
      %cst_33 = arith.constant 1.000000e+00 : f32
      %56 = vector.broadcast %cst_33 : f32 to vector<8x512xf32>
      %57 = arith.subf %56, %48 : vector<8x512xf32>
      %58 = arith.mulf %57, %55 : vector<8x512xf32>
      %59 = arith.truncf %58 : vector<8x512xf32> to vector<8x512xbf16>
      %c0_34 = arith.constant 0 : index
      %c0_35 = arith.constant 0 : index
      %60 = vector.load %arg22[%c0_34, %c0_35] : memref<8x512xbf16, #tpu.memory_space<vmem>>, vector<8x512xbf16>
      tpu.vector_store %arg22[%c0_34, %c0_35], %59 {strides = array<i32>} : memref<8x512xbf16, #tpu.memory_space<vmem>>, vector<8x512xbf16>,
    } else {
    }
    %c0_i32_1 = arith.constant 0 : i32
    %3 = arith.cmpi sgt, %arg0, %c0_i32_1 : i32
    %4 = arith.extui %3 : i1 to i32
    %c0_i32_2 = arith.constant 0 : i32
    %5 = arith.cmpi ne, %4, %c0_i32_2 : i32
    scf.if %5 {
      %c0_15 = arith.constant 0 : index
      %c0_16 = arith.constant 0 : index
      %22 = vector.load %arg22[%c0_15, %c0_16] : memref<8x512xbf16, #tpu.memory_space<vmem>>, vector<8x512xbf16>
      %c0_17 = arith.constant 0 : index
      %c0_18 = arith.constant 0 : index
      %c0_19 = arith.constant 0 : index
      %23 = vector.load %arg4[%c0_17, %c0_18, %c0_19] : memref<1x512x1536xi8, #tpu.memory_space<vmem>>, vector<1x512x1536xi8>
      %24 = vector.shape_cast %23 : vector<1x512x1536xi8> to vector<512x1536xi8>
      %c0_20 = arith.constant 0 : index
      %c0_21 = arith.constant 0 : index
      %c0_22 = arith.constant 0 : index
      %25 = vector.load %arg5[%c0_20, %c0_21, %c0_22] : memref<1x1x1536xf32, #tpu.memory_space<vmem>>, vector<1x1x1536xf32>
      %26 = vector.shape_cast %25 : vector<1x1x1536xf32> to vector<1x1536xf32>
      %27 = arith.sitofp %24 : vector<512x1536xi8> to vector<512x1536xf32>
      %28 = arith.truncf %27 : vector<512x1536xf32> to vector<512x1536xbf16>
      %cst_23 = arith.constant dense<0.000000e+00> : vector<8x1536xf32>
      %29 = tpu.matmul %22, %28, %cst_23 {dimension_numbers = #tpu.dot_dimension_numbers<[1], [0], [0], [1], [0, 0, 1, 1], [], []>} : vector<8x512xbf16>, vector<512x1536xbf16>, vector<8x1536xf32> -> vector<8x1536xf32>
      %30 = vector.broadcast %26 : vector<1x1536xf32> to vector<8x1536xf32>
      %31 = arith.mulf %29, %30 : vector<8x1536xf32>
      %c0_24 = arith.constant 0 : index
      %c0_25 = arith.constant 0 : index
      %c0_26 = arith.constant 0 : index
      %32 = vector.load %arg6[%c0_24, %c0_25, %c0_26] : memref<1x1x1536xf32, #tpu.memory_space<vmem>>, vector<1x1x1536xf32>
      %33 = vector.shape_cast %32 : vector<1x1x1536xf32> to vector<1x1536xf32>
      %34 = vector.broadcast %33 : vector<1x1536xf32> to vector<8x1536xf32>
      %35 = arith.addf %31, %34 : vector<8x1536xf32>
      %36 = vector.extract_strided_slice %35 {offsets = [0, 0], sizes = [8, 512], strides = [1, 1]} : vector<8x1536xf32> to vector<8x512xf32>
      %37 = arith.negf %36 : vector<8x512xf32>
      %38 = math.exp %37 : vector<8x512xf32>
      %cst_27 = arith.constant 1.000000e+00 : f32
      %39 = vector.broadcast %cst_27 : f32 to vector<8x512xf32>
      %40 = arith.addf %39, %38 : vector<8x512xf32>
      %41 = arith.divf %39, %40 : vector<8x512xf32>
      %42 = vector.extract_strided_slice %35 {offsets = [0, 512], sizes = [8, 512], strides = [1, 1]} : vector<8x1536xf32> to vector<8x512xf32>
      %43 = arith.negf %42 : vector<8x512xf32>
      %44 = math.exp %43 : vector<8x512xf32>
      %cst_28 = arith.constant 1.000000e+00 : f32
      %45 = vector.broadcast %cst_28 : f32 to vector<8x512xf32>
      %46 = arith.addf %45, %44 : vector<8x512xf32>
      %47 = arith.divf %45, %46 : vector<8x512xf32>
      %48 = vector.extract_strided_slice %35 {offsets = [0, 1024], sizes = [8, 512], strides = [1, 1]} : vector<8x1536xf32> to vector<8x512xf32>
      %c0_29 = arith.constant 0 : index
      %c0_30 = arith.constant 0 : index
      %c0_31 = arith.constant 0 : index
      %49 = vector.load %arg7[%c0_29, %c0_30, %c0_31] : memref<1x1x512xf32, #tpu.memory_space<vmem>>, vector<1x1x512xf32>
      %50 = vector.shape_cast %49 : vector<1x1x512xf32> to vector<1x512xf32>
      %51 = vector.broadcast %50 : vector<1x512xf32> to vector<8x512xf32>
      %52 = arith.mulf %41, %51 : vector<8x512xf32>
      %53 = arith.addf %48, %52 : vector<8x512xf32>
      %54 = math.tanh %53 : vector<8x512xf32>
      %cst_32 = arith.constant 1.000000e+00 : f32
      %55 = vector.broadcast %cst_32 : f32 to vector<8x512xf32>
      %56 = arith.subf %55, %47 : vector<8x512xf32>
      %57 = arith.mulf %56, %54 : vector<8x512xf32>
      %58 = arith.truncf %57 : vector<8x512xf32> to vector<8x512xbf16>
      %c0_33 = arith.constant 0 : index
      %c0_34 = arith.constant 0 : index
      %59 = vector.load %arg22[%c0_33, %c0_34] : memref<8x512xbf16, #tpu.memory_space<vmem>>, vector<8x512xbf16>
      tpu.vector_store %arg22[%c0_33, %c0_34], %58 {strides = array<i32>} : memref<8x512xbf16, #tpu.memory_space<vmem>>, vector<8x512xbf16>,
    } else {
    }
    %c0 = arith.constant 0 : index
    %c0_3 = arith.constant 0 : index
    %6 = vector.load %arg23[%c0, %c0_3] : memref<8x1024xf32, #tpu.memory_space<vmem>>, vector<8x1024xf32>
    %c0_4 = arith.constant 0 : index
    %c0_5 = arith.constant 0 : index
    %7 = vector.load %arg22[%c0_4, %c0_5] : memref<8x512xbf16, #tpu.memory_space<vmem>>, vector<8x512xbf16>
    %c0_6 = arith.constant 0 : index
    %c0_7 = arith.constant 0 : index
    %c0_8 = arith.constant 0 : index
    %8 = vector.load %arg8[%c0_6, %c0_7, %c0_8] : memref<1x512x1024xi8, #tpu.memory_space<vmem>>, vector<1x512x1024xi8>
    %9 = vector.shape_cast %8 : vector<1x512x1024xi8> to vector<512x1024xi8>
    %10 = arith.sitofp %9 : vector<512x1024xi8> to vector<512x1024xf32>
    %11 = arith.truncf %10 : vector<512x1024xf32> to vector<512x1024xbf16>
    %cst = arith.constant dense<0.000000e+00> : vector<8x1024xf32>
    %12 = tpu.matmul %7, %11, %cst {dimension_numbers = #tpu.dot_dimension_numbers<[1], [0], [0], [1], [0, 0, 1, 1], [], []>} : vector<8x512xbf16>, vector<512x1024xbf16>, vector<8x1024xf32> -> vector<8x1024xf32>
    %c0_9 = arith.constant 0 : index
    %c0_10 = arith.constant 0 : index
    %c0_11 = arith.constant 0 : index
    %13 = vector.load %arg9[%c0_9, %c0_10, %c0_11] : memref<1x1x1024xf32, #tpu.memory_space<vmem>>, vector<1x1x1024xf32>
    %14 = vector.shape_cast %13 : vector<1x1x1024xf32> to vector<1x1024xf32>
    %15 = vector.broadcast %14 : vector<1x1024xf32> to vector<8x1024xf32>
    %16 = arith.mulf %12, %15 : vector<8x1024xf32>
    %17 = arith.addf %6, %16 : vector<8x1024xf32>
    %c0_12 = arith.constant 0 : index
    %c0_13 = arith.constant 0 : index
    %18 = vector.load %arg23[%c0_12, %c0_13] : memref<8x1024xf32, #tpu.memory_space<vmem>>, vector<8x1024xf32>
    tpu.vector_store %arg23[%c0_12, %c0_13], %17 {strides = array<i32>} : memref<8x1024xf32, #tpu.memory_space<vmem>>, vector<8x1024xf32>,
    %c5_i32 = arith.constant 5 : i32
    %19 = arith.cmpi eq, %arg0, %c5_i32 : i32
    %20 = arith.extui %19 : i1 to i32
    %c0_i32_14 = arith.constant 0 : i32
    %21 = arith.cmpi ne, %20, %c0_i32_14 : i32
    scf.if %21 {
      %c0_15 = arith.constant 0 : index
      %c0_16 = arith.constant 0 : index
      %22 = vector.load %arg23[%c0_15, %c0_16] : memref<8x1024xf32, #tpu.memory_space<vmem>>, vector<8x1024xf32>
      %c0_17 = arith.constant 0 : index
      %c0_18 = arith.constant 0 : index
      %23 = vector.load %arg10[%c0_17, %c0_18] : memref<1x1024xf32, #tpu.memory_space<vmem>>, vector<1x1024xf32>
      %24 = vector.broadcast %23 : vector<1x1024xf32> to vector<8x1024xf32>
      %25 = arith.addf %22, %24 : vector<8x1024xf32>
      %cst_19 = arith.constant 0.000000e+00 : f32
      %26 = vector.broadcast %cst_19 : f32 to vector<8x1024xf32>
      %27 = arith.cmpf oge, %25, %26 : vector<8x1024xf32>
      %cst_20 = arith.constant 0.00999999977 : f32
      %28 = vector.broadcast %cst_20 : f32 to vector<8x1024xf32>
      %29 = arith.mulf %28, %25 : vector<8x1024xf32>
      %30 = arith.select %27, %25, %29 : vector<8x1024xi1>, vector<8x1024xf32>
      %31 = arith.truncf %30 : vector<8x1024xf32> to vector<8x1024xbf16>
      %c0_21 = arith.constant 0 : index
      %c0_22 = arith.constant 0 : index
      %32 = vector.load %arg11[%c0_21, %c0_22] : memref<1024x512xbf16, #tpu.memory_space<vmem>>, vector<1024x512xbf16>
      %cst_23 = arith.constant dense<0.000000e+00> : vector<8x512xf32>
      %33 = tpu.matmul %31, %32, %cst_23 {dimension_numbers = #tpu.dot_dimension_numbers<[1], [0], [0], [1], [0, 0, 1, 1], [], []>} : vector<8x1024xbf16>, vector<1024x512xbf16>, vector<8x512xf32> -> vector<8x512xf32>
      %c0_24 = arith.constant 0 : index
      %c0_25 = arith.constant 0 : index
      %34 = vector.load %arg12[%c0_24, %c0_25] : memref<1x512xf32, #tpu.memory_space<vmem>>, vector<1x512xf32>
      %35 = vector.broadcast %34 : vector<1x512xf32> to vector<8x512xf32>
      %36 = arith.addf %33, %35 : vector<8x512xf32>
      %cst_26 = arith.constant 0.000000e+00 : f32
      %37 = vector.broadcast %cst_26 : f32 to vector<8x512xf32>
      %38 = arith.cmpf oge, %36, %37 : vector<8x512xf32>
      %cst_27 = arith.constant 0.00999999977 : f32
      %39 = vector.broadcast %cst_27 : f32 to vector<8x512xf32>
      %40 = arith.mulf %39, %36 : vector<8x512xf32>
      %41 = arith.select %38, %36, %40 : vector<8x512xi1>, vector<8x512xf32>
      %42 = arith.truncf %41 : vector<8x512xf32> to vector<8x512xbf16>
      %c0_28 = arith.constant 0 : index
      %c0_29 = arith.constant 0 : index
      %43 = vector.load %arg13[%c0_28, %c0_29] : memref<512x256xbf16, #tpu.memory_space<vmem>>, vector<512x256xbf16>
      %cst_30 = arith.constant dense<0.000000e+00> : vector<8x256xf32>
      %44 = tpu.matmul %42, %43, %cst_30 {dimension_numbers = #tpu.dot_dimension_numbers<[1], [0], [0], [1], [0, 0, 1, 1], [], []>} : vector<8x512xbf16>, vector<512x256xbf16>, vector<8x256xf32> -> vector<8x256xf32>
      %c0_31 = arith.constant 0 : index
      %c0_32 = arith.constant 0 : index
      %45 = vector.load %arg14[%c0_31, %c0_32] : memref<1x256xf32, #tpu.memory_space<vmem>>, vector<1x256xf32>
      %46 = vector.broadcast %45 : vector<1x256xf32> to vector<8x256xf32>
      %47 = arith.addf %44, %46 : vector<8x256xf32>
      %cst_33 = arith.constant 0.000000e+00 : f32
      %48 = vector.broadcast %cst_33 : f32 to vector<8x256xf32>
      %49 = arith.cmpf oge, %47, %48 : vector<8x256xf32>
      %cst_34 = arith.constant 0.00999999977 : f32
      %50 = vector.broadcast %cst_34 : f32 to vector<8x256xf32>
      %51 = arith.mulf %50, %47 : vector<8x256xf32>
      %52 = arith.select %49, %47, %51 : vector<8x256xi1>, vector<8x256xf32>
      %53 = arith.truncf %52 : vector<8x256xf32> to vector<8x256xbf16>
      %c0_35 = arith.constant 0 : index
      %c0_36 = arith.constant 0 : index
      %54 = vector.load %arg15[%c0_35, %c0_36] : memref<256x128xbf16, #tpu.memory_space<vmem>>, vector<256x128xbf16>
      %cst_37 = arith.constant dense<0.000000e+00> : vector<8x128xf32>
      %55 = tpu.matmul %53, %54, %cst_37 {dimension_numbers = #tpu.dot_dimension_numbers<[1], [0], [0], [1], [0, 0, 1, 1], [], []>} : vector<8x256xbf16>, vector<256x128xbf16>, vector<8x128xf32> -> vector<8x128xf32>
      %c0_38 = arith.constant 0 : index
      %c0_39 = arith.constant 0 : index
      %56 = vector.load %arg16[%c0_38, %c0_39] : memref<1x128xf32, #tpu.memory_space<vmem>>, vector<1x128xf32>
      %57 = vector.broadcast %56 : vector<1x128xf32> to vector<8x128xf32>
      %58 = arith.addf %55, %57 : vector<8x128xf32>
      %cst_40 = arith.constant 0.000000e+00 : f32
      %59 = vector.broadcast %cst_40 : f32 to vector<8x128xf32>
      %60 = arith.cmpf oge, %58, %59 : vector<8x128xf32>
      %cst_41 = arith.constant 0.00999999977 : f32
      %61 = vector.broadcast %cst_41 : f32 to vector<8x128xf32>
      %62 = arith.mulf %61, %58 : vector<8x128xf32>
      %63 = arith.select %60, %58, %62 : vector<8x128xi1>, vector<8x128xf32>
      %64 = arith.truncf %63 : vector<8x128xf32> to vector<8x128xbf16>
      %c0_42 = arith.constant 0 : index
      %c0_43 = arith.constant 0 : index
      %65 = vector.load %arg17[%c0_42, %c0_43] : memref<128x64xbf16, #tpu.memory_space<vmem>>, vector<128x64xbf16>
      %cst_44 = arith.constant dense<0.000000e+00> : vector<8x64xf32>
      %66 = tpu.matmul %64, %65, %cst_44 {dimension_numbers = #tpu.dot_dimension_numbers<[1], [0], [0], [1], [0, 0, 1, 1], [], []>} : vector<8x128xbf16>, vector<128x64xbf16>, vector<8x64xf32> -> vector<8x64xf32>
      %c0_45 = arith.constant 0 : index
      %c0_46 = arith.constant 0 : index
      %67 = vector.load %arg18[%c0_45, %c0_46] : memref<1x64xf32, #tpu.memory_space<vmem>>, vector<1x64xf32>
      %68 = vector.broadcast %67 : vector<1x64xf32> to vector<8x64xf32>
      %69 = arith.addf %66, %68 : vector<8x64xf32>
      %cst_47 = arith.constant 0.000000e+00 : f32
      %70 = vector.broadcast %cst_47 : f32 to vector<8x64xf32>
      %71 = arith.cmpf oge, %69, %70 : vector<8x64xf32>
      %cst_48 = arith.constant 0.00999999977 : f32
      %72 = vector.broadcast %cst_48 : f32 to vector<8x64xf32>
      %73 = arith.mulf %72, %69 : vector<8x64xf32>
      %74 = arith.select %71, %69, %73 : vector<8x64xi1>, vector<8x64xf32>
      %75 = arith.truncf %74 : vector<8x64xf32> to vector<8x64xbf16>
      %c0_49 = arith.constant 0 : index
      %c0_50 = arith.constant 0 : index
      %76 = vector.load %arg19[%c0_49, %c0_50] : memref<64x128xbf16, #tpu.memory_space<vmem>>, vector<64x128xbf16>
      %cst_51 = arith.constant dense<0.000000e+00> : vector<8x128xf32>
      %77 = tpu.matmul %75, %76, %cst_51 {dimension_numbers = #tpu.dot_dimension_numbers<[1], [0], [0], [1], [0, 0, 1, 1], [], []>} : vector<8x64xbf16>, vector<64x128xbf16>, vector<8x128xf32> -> vector<8x128xf32>
      %c0_52 = arith.constant 0 : index
      %c0_53 = arith.constant 0 : index
      %78 = vector.load %arg20[%c0_52, %c0_53] : memref<1x128xf32, #tpu.memory_space<vmem>>, vector<1x128xf32>
      %79 = vector.broadcast %78 : vector<1x128xf32> to vector<8x128xf32>
      %80 = arith.addf %77, %79 : vector<8x128xf32>
      %c0_54 = arith.constant 0 : index
      %c0_55 = arith.constant 0 : index
      %81 = vector.load %arg21[%c0_54, %c0_55] : memref<8x128xf32, #tpu.memory_space<vmem>>, vector<8x128xf32>
      tpu.vector_store %arg21[%c0_54, %c0_55], %80 {strides = array<i32>} : memref<8x128xf32, #tpu.memory_space<vmem>>, vector<8x128xf32>,
    } else {
    }
    return
  }
  func.func @transform_0(%arg0: i32) -> (i32, i32) {
    %c0_i32 = arith.constant 0 : i32
    %c0_i32_0 = arith.constant 0 : i32
    %c0_i32_1 = arith.constant 0 : i32
    return %c0_i32, %c0_i32_0 : i32, i32
  }
  func.func @transform_1(%arg0: i32) -> (i32, i32) {
    %c0_i32 = arith.constant 0 : i32
    %c0_i32_0 = arith.constant 0 : i32
    %c0_i32_1 = arith.constant 0 : i32
    return %c0_i32, %c0_i32_0 : i32, i32
  }
  func.func @transform_2(%arg0: i32) -> (i32, i32) {
    %c0_i32 = arith.constant 0 : i32
    %c0_i32_0 = arith.constant 0 : i32
    %c0_i32_1 = arith.constant 0 : i32
    return %c0_i32, %c0_i32_0 : i32, i32
  }
  func.func @transform_3(%arg0: i32) -> (i32, i32, i32) {
    %c1_i32 = arith.constant 1 : i32
    %0 = arith.subi %arg0, %c1_i32 : i32
    %c0_i32 = arith.constant 0 : i32
    %1 = arith.maxsi %0, %c0_i32 : i32
    %c0_i32_0 = arith.constant 0 : i32
    %c0_i32_1 = arith.constant 0 : i32
    %c0_i32_2 = arith.constant 0 : i32
    return %1, %c0_i32_0, %c0_i32_1 : i32, i32, i32
  }
  func.func @transform_4(%arg0: i32) -> (i32, i32, i32) {
    %c1_i32 = arith.constant 1 : i32
    %0 = arith.subi %arg0, %c1_i32 : i32
    %c0_i32 = arith.constant 0 : i32
    %1 = arith.maxsi %0, %c0_i32 : i32
    %c0_i32_0 = arith.constant 0 : i32
    %c0_i32_1 = arith.constant 0 : i32
    %c0_i32_2 = arith.constant 0 : i32
    return %1, %c0_i32_0, %c0_i32_1 : i32, i32, i32
  }
  func.func @transform_5(%arg0: i32) -> (i32, i32, i32) {
    %c0_i32 = arith.constant 0 : i32
    %c0_i32_0 = arith.constant 0 : i32
    %c0_i32_1 = arith.constant 0 : i32
    return %arg0, %c0_i32, %c0_i32_0 : i32, i32, i32
  }
  func.func @transform_6(%arg0: i32) -> (i32, i32, i32) {
    %c0_i32 = arith.constant 0 : i32
    %c0_i32_0 = arith.constant 0 : i32
    %c0_i32_1 = arith.constant 0 : i32
    return %arg0, %c0_i32, %c0_i32_0 : i32, i32, i32
  }
  func.func @transform_7(%arg0: i32) -> (i32, i32, i32) {
    %c0_i32 = arith.constant 0 : i32
    %c0_i32_0 = arith.constant 0 : i32
    %c0_i32_1 = arith.constant 0 : i32
    return %arg0, %c0_i32, %c0_i32_0 : i32, i32, i32
  }
  func.func @transform_8(%arg0: i32) -> (i32, i32, i32) {
    %c0_i32 = arith.constant 0 : i32
    %c0_i32_0 = arith.constant 0 : i32
    %c0_i32_1 = arith.constant 0 : i32
    return %arg0, %c0_i32, %c0_i32_0 : i32, i32, i32
  }
  func.func @transform_9(%arg0: i32) -> (i32, i32) {
    %c0_i32 = arith.constant 0 : i32
    %c0_i32_0 = arith.constant 0 : i32
    %c0_i32_1 = arith.constant 0 : i32
    return %c0_i32, %c0_i32_0 : i32, i32
  }
  func.func @transform_10(%arg0: i32) -> (i32, i32) {
    %c0_i32 = arith.constant 0 : i32
    %c0_i32_0 = arith.constant 0 : i32
    %c0_i32_1 = arith.constant 0 : i32
    return %c0_i32, %c0_i32_0 : i32, i32
  }
  func.func @transform_11(%arg0: i32) -> (i32, i32) {
    %c0_i32 = arith.constant 0 : i32
    %c0_i32_0 = arith.constant 0 : i32
    %c0_i32_1 = arith.constant 0 : i32
    return %c0_i32, %c0_i32_0 : i32, i32
  }
  func.func @transform_12(%arg0: i32) -> (i32, i32) {
    %c0_i32 = arith.constant 0 : i32
    %c0_i32_0 = arith.constant 0 : i32
    %c0_i32_1 = arith.constant 0 : i32
    return %c0_i32, %c0_i32_0 : i32, i32
  }
  func.func @transform_13(%arg0: i32) -> (i32, i32) {
    %c0_i32 = arith.constant 0 : i32
    %c0_i32_0 = arith.constant 0 : i32
    %c0_i32_1 = arith.constant 0 : i32
    return %c0_i32, %c0_i32_0 : i32, i32
  }
  func.func @transform_14(%arg0: i32) -> (i32, i32) {
    %c0_i32 = arith.constant 0 : i32
    %c0_i32_0 = arith.constant 0 : i32
    %c0_i32_1 = arith.constant 0 : i32
    return %c0_i32, %c0_i32_0 : i32, i32
  }
  func.func @transform_15(%arg0: i32) -> (i32, i32) {
    %c0_i32 = arith.constant 0 : i32
    %c0_i32_0 = arith.constant 0 : i32
    %c0_i32_1 = arith.constant 0 : i32
    return %c0_i32, %c0_i32_0 : i32, i32
  }
  func.func @transform_16(%arg0: i32) -> (i32, i32) {
    %c0_i32 = arith.constant 0 : i32
    %c0_i32_0 = arith.constant 0 : i32
    %c0_i32_1 = arith.constant 0 : i32
    return %c0_i32, %c0_i32_0 : i32, i32
  }
  func.func @transform_17(%arg0: i32) -> (i32, i32) {
    %c0_i32 = arith.constant 0 : i32
    %c0_i32_0 = arith.constant 0 : i32
    %c0_i32_1 = arith.constant 0 : i32
    return %c0_i32, %c0_i32_0 : i32, i32
  }
  func.func @transform_18(%arg0: i32) -> (i32, i32) {
    %c0_i32 = arith.constant 0 : i32
    %c0_i32_0 = arith.constant 0 : i32
    %c0_i32_1 = arith.constant 0 : i32
    return %c0_i32, %c0_i32_0 : i32, i32
  }
  func.func @transform_19(%arg0: i32) -> (i32, i32) {
    %c0_i32 = arith.constant 0 : i32
    %c0_i32_0 = arith.constant 0 : i32
    %c0_i32_1 = arith.constant 0 : i32
    return %c0_i32, %c0_i32_0 : i32, i32
  }
  func.func @transform_20(%arg0: i32) -> (i32, i32) {
    %c0_i32 = arith.constant 0 : i32
    %c0_i32_0 = arith.constant 0 : i32
    %c0_i32_1 = arith.constant 0 : i32
    return %c0_i32, %c0_i32_0 : i32, i32
  }
}

</mosaic_0001>

<bundles_post_ra>
// kernel: forward.1
= control target key start
LH: loop header
LB: loop body
LE: loop exit
PB: predicated region body
PF: predicated region fallthrough
CT: control target
= control target key end

     0   :  { %s12334_s0 = inlined_call_operand.hbm [shape: f32[8,1024], index: 0, kind: input, shape index: {}]   ;;  %s12335_s1 = inlined_call_operand.hbm [shape: s8[1024,1536], index: 1, kind: input, shape index: {}]   ;;  %s12336_s2 = inlined_call_operand.hbm [shape: f32[1,1536], index: 2, kind: input, shape index: {}]   ;;  %s12337_s3 = inlined_call_operand.hbm [shape: s8[5,512,1536], index: 3, kind: input, shape index: {}]   ;;  %s12338_s4 = inlined_call_operand.hbm [shape: f32[5,1,1536], index: 4, kind: input, shape index: {}]   ;;  %s12339_s5 = inlined_call_operand.hbm [shape: f32[6,1,1536], index: 5, kind: input, shape index: {}]   ;;  %s12340_s6 = inlined_call_operand.hbm [shape: f32[6,1,512], index: 6, kind: input, shape index: {}]   ;;  %s12341_s7 = inlined_call_operand.hbm [shape: s8[6,512,1024], index: 7, kind: input, shape index: {}]   ;;  %s12342_s8 = inlined_call_operand.hbm [shape: f32[6,1,1024], index: 8, kind: input, shape index: {}]   ;;  %s12343_s9 = inlined_call_operand.hbm [shape: f32[1,1024], index: 9, kind: input, shape index: {}]   ;;  %s12344_s10 = inlined_call_operand.hbm [shape: bf16[1024,512], index: 10, kind: input, shape index: {}]   ;;  %s12345_s11 = inlined_call_operand.hbm [shape: f32[1,512], index: 11, kind: input, shape index: {}]   ;;  %s12346_s12 = inlined_call_operand.hbm [shape: bf16[512,256], index: 12, kind: input, shape index: {}]   ;;  %s12347_s13 = inlined_call_operand.hbm [shape: f32[1,256], index: 13, kind: input, shape index: {}]   ;;  %s12348_s14 = inlined_call_operand.hbm [shape: bf16[256,128], index: 14, kind: input, shape index: {}]   ;;  %s12349_s15 = inlined_call_operand.hbm [shape: f32[1,128], index: 15, kind: input, shape index: {}]   ;;  %s12350_s16 = inlined_call_operand.vmem [shape: bf16[128,64], index: 16, kind: input, shape index: {}]   ;;  %s12351_s17 = inlined_call_operand.hbm [shape: f32[1,64], index: 17, kind: input, shape index: {}]   ;;  %s12352_s18 = inlined_call_operand.hbm [shape: bf16[64,128], index: 18, kind: input, shape index: {}]   ;;  %s12353_s19 = inlined_call_operand.hbm [shape: f32[1,128], index: 19, kind: input, shape index: {}]   ;;  %s12354_s20 = inlined_call_operand.vmem [shape: f32[8,128], index: 20, kind: output, shape index: {}]  }
   0x1   :  { %12410 = sst [smem:[#allocation51_spill]] %s12334_s0 }
   0x2   :  { %12411 = sst [smem:[#allocation52_spill]] %s12335_s1 }
   0x3   :  { %12412 = sst [smem:[#allocation53_spill]] %s12336_s2 }
   0x4   :  { %12413 = sst [smem:[#allocation54_spill]] %s12337_s3 }
   0x5   :  { %12414 = sst [smem:[#allocation55_spill]] %s12338_s4 }
   0x6   :  { %12415 = sst [smem:[#allocation56_spill]] %s12339_s5 }
   0x7   :  { %12416 = sst [smem:[#allocation57_spill]] %s12340_s6 }
   0x8   :  { %12417 = sst [smem:[#allocation58_spill]] %s12341_s7 }
   0x9   :  { %12418 = sst [smem:[#allocation59_spill]] %s12342_s8 }
   0xa   :  { %12419 = sst [smem:[#allocation60_spill]] %s12343_s9 }
   0xb   :  { %12420 = sst [smem:[#allocation61_spill]] %s12344_s10 }
   0xc   :  { %12421 = sst [smem:[#allocation62_spill]] %s12345_s11 }
   0xd   :  { %12422 = sst [smem:[#allocation63_spill]] %s12346_s12 }
   0xe   :  { %12423 = sst [smem:[#allocation64_spill]] %s12347_s13 }
   0xf   :  { %12424 = sst [smem:[#allocation65_spill]] %s12348_s14 }
  0x10   :  { %12425 = sst [smem:[#allocation66_spill]] %s12349_s15 }
  0x11   :  { %12426 = sst [smem:[#allocation67_spill]] %s12350_s16 }
  0x12   :  { %12427 = sst [smem:[#allocation68_spill]] %s12351_s17 }
  0x13   :  { %12428 = sst [smem:[#allocation69_spill]] %s12352_s18 }
  0x14   :  { %12429 = sst [smem:[#allocation70_spill]] %s12353_s19 }
  0x15   :  { %12430 = sst [smem:[#allocation71_spill]] %s12354_s20 }
  0x16   :  { %25 = vsyncpa [#allocation5], 0 }
  0x17   :  { %26 = vsyncpa [#allocation7], 0 }
  0x18   :  { %27 = vsyncpa [#allocation10], 0 }
  0x19   :  { %29 = vsyncpa [#allocation10 + $0x1], 0 }
  0x1a   :  { %30 = vsyncpa [#allocation13], 0 }
  0x1b   :  { %32 = vsyncpa [#allocation13 + $0x1], 0 }
  0x1c   :  { %33 = vsyncpa [#allocation16], 0 }
  0x1d   :  { %35 = vsyncpa [#allocation16 + $0x1], 0 }
  0x1e   :  { %36 = vsyncpa [#allocation19], 0 }
  0x1f   :  { %37 = vsyncpa [#allocation22], 0 }
  0x20   :  { %38 = vsyncpa [#allocation25], 0 }
  0x21   :  { %39 = vsyncpa [#allocation28], 0 }
  0x22   :  { %40 = vsyncpa [#allocation31], 0  ;;  %s10991_s1 = smov 0   ;;  %s10993_s22 = smov 0  }
  0x23   :  { %s10995_s23 = smov 0   ;;  %s10997_s24 = smov 0  }
  0x24   :  { %s10999_s2 = smov 0   ;;  %s11001_s25 = smov 0  }
  0x25   :  { %s11003_s3 = smov 0  }
  0x26 LB: > { %12431 = sst [smem:[#allocation43_spill]] %s10833_s22  ;;  %s10855_s26 = smov [#allocation6]   ;;  %s10853_s3 = sphi %s11003_s3, %s12512_s3   ;;  %s10849_s25 = sphi %s11001_s25, %s12519_s25   ;;  %s10845_s2 = sphi %s10999_s2, %s12518_s2   ;;  %s10841_s24 = sphi %s10997_s24, %s12517_s24   ;;  %s10837_s23 = sphi %s10995_s23, %s12515_s23   ;;  %s10833_s22 = sphi %s10993_s22, %s12514_s22   ;;  %s10829_s1 = sphi %s10991_s1, %s12513_s1  }
  0x27   : > { %12432 = sst [smem:[#allocation44_spill]] %s10837_s23  ;;  %s557_s27 = sshll.u32 %s10855_s26, 4  ;;  %s11033_s27 = int_to_ptr.vmem [resolvable:$true] %s557_s27 }
  0x28   : > { %s11027_s28 = sadd.s32 4294967295, %s10853_s3   ;;  %p8726_p0 = scmp.ge.s32.totalorder %s10853_s3, 1 }
  0x29   : > { %p12371_p1 = scmp.eq.s32.totalorder %s11027_s28, 0  ;;  %p534_p2 = scmp.lt.s32.totalorder %s10853_s3, 7 }
  0x2a   : > { %s10856_s29 = smov [#allocation18]   ;;  %s10857_s21 = smov [#allocation21]  }
  0x2b   : > { %p11035_p4 = pnand %p8726_p0, %p534_p2  ;;  %s582_s30 = sshll.u32 %s10856_s29, 4  ;;  %s11047_s30 = int_to_ptr.vmem [resolvable:$true] %s582_s30 }
  0x2c   : > { %s606_s26 = sshll.u32 %s10857_s21, 4  ;;  %s12436_s8 = sld [smem:[#allocation52_spill]]  ;;  %s11049_s26 = int_to_ptr.vmem [resolvable:$true] %s606_s26 }
  0x2d   : > { %s12433_s4 = scalar_select %p11035_p4, 1, 0 }
  0x2e   : > { %p9451_p5 = pneg %p11035_p4 }
  0x2f   : > { %12434 = sst [smem:[#allocation45_spill]] %s12433_s4 }
  0x30   : > { %p11043_p6 = pnand %p9451_p5, %p12371_p1 }
  0x32   : > { %s12435_s0 = scalar_select %p11043_p6, 1, 0 }
  0x33   : > { %s10215_s6 = scalar_lea.hbm %s12436_s8, 49152  ;;  %p11059_p8 = pneg %p11043_p6 }
  0x34   : > { %p10216_p7 = scmp.ne.s32.totalorder %s12436_s8, %s10215_s6  ;;  %p10222_p11 = scmp.lt.u32.totalorder %s10215_s6, %s12436_s8 }
  0x35   : > { %s12437_s29 = scalar_select %p11059_p8, 1, 0 }
  0x36   : > { %p10218_p9 = pnand %p11059_p8, %p10216_p7 }
  0x38   : > { %p10219_p10 = pneg %p10218_p9 }
  0x3a   : > { %p10224_p12 = pnand %p10222_p11, %p10219_p10 }
  0x3c   : > { %10227 = shalt.err (!%p10224_p12)
}
  0x3d   : > { %s10228_s16 = scalar_lea.vmem %s11033_s27, 49152  ;;  %p10236_p5 = scmp.lt.s32.totalorder %s11033_s27, %s11033_s27 }
  0x3e   : > { %p10229_p13 = scmp.ne.s32.totalorder %s11033_s27, %s10228_s16  ;;  %p10237_p3 = scmp.lt.s32.totalorder %s10228_s16, %s10228_s16 }
  0x40   : > { %p10231_p0 = pnand %p10229_p13, %p11059_p8  ;;  %p10238_p7 = por %p10237_p3, %p10236_p5 }
  0x42   : > { %p10232_p2 = pneg %p10231_p0 }
  0x44   : > { %p10239_p9 = pnand %p10238_p7, %p10232_p2 }
  0x46   : > { %10242 = shalt.err (!%p10239_p9)
}
  0x47   : > { %s12370_s19 = smov 1536   ;;  %s12376_s6 = smov 96  }
  0x48   : > { %9457 = dma.hbm_to_vmem [thread:$0]  (!%p11043_p6), %s12436_s8, 49152, %s11033_s27, [#allocation7], %s12370_s19, %s12370_s19, %s12376_s6  }
  0x49   : > { %s12438_s9 = sld [smem:[#allocation60_spill]] }
  0x4f   : > { %s10243_s16 = scalar_lea.hbm %s12438_s9, 128 }
  0x50   : > { %p10244_p3 = scmp.ne.s32.totalorder %s12438_s9, %s10243_s16  ;;  %p10250_p12 = scmp.lt.u32.totalorder %s10243_s16, %s12438_s9 }
  0x52   : > { %p10246_p10 = pnand %p10244_p3, %p11059_p8 }
  0x54   : > { %p10247_p11 = pneg %p10246_p10 }
  0x56   : > { %p10252_p13 = pnand %p10250_p12, %p10247_p11 }
  0x58   : > { %10255 = shalt.err (!%p10252_p13)
}
  0x59   : > { %s10256_s27 = scalar_lea.vmem %s11047_s30, 128  ;;  %p10264_p7 = scmp.lt.s32.totalorder %s11047_s30, %s11047_s30 }
  0x5a   : > { %p10257_p0 = scmp.ne.s32.totalorder %s11047_s30, %s10256_s27  ;;  %p10265_p9 = scmp.lt.s32.totalorder %s10256_s27, %s10256_s27 }
  0x5c   : > { %p10259_p2 = pnand %p10257_p0, %p11059_p8  ;;  %p10266_p3 = por %p10265_p9, %p10264_p7 }
  0x5e   : > { %p10260_p5 = pneg %p10259_p2 }
  0x60   : > { %p10267_p10 = pnand %p10266_p3, %p10260_p5 }
  0x62   : > { %10270 = shalt.err (!%p10267_p10)
}
  0x63   : > { %9463 = dma.hbm_to_vmem [thread:$0]  (!%p11043_p6), %s12438_s9, 128, %s11047_s30, [#allocation19]  }
  0x64   : > { %s12439_s11 = sld [smem:[#allocation62_spill]] }
  0x6a   : > { %s10271_s17 = scalar_lea.hbm %s12439_s11, 64 }
  0x6b   : > { %p10272_p11 = scmp.ne.s32.totalorder %s12439_s11, %s10271_s17  ;;  %p10278_p0 = scmp.lt.u32.totalorder %s10271_s17, %s12439_s11 }
  0x6d   : > { %p10274_p12 = pnand %p10272_p11, %p11059_p8 }
  0x6f   : > { %p10275_p13 = pneg %p10274_p12 }
  0x71   : > { %p10280_p2 = pnand %p10278_p0, %p10275_p13 }
  0x73   : > { %10283 = shalt.err (!%p10280_p2)
}
  0x74   : > { %s10284_s30 = scalar_lea.vmem %s11049_s26, 64  ;;  %p10292_p3 = scmp.lt.s32.totalorder %s11049_s26, %s11049_s26 }
  0x75   : > { %p10285_p5 = scmp.ne.s32.totalorder %s11049_s26, %s10284_s30  ;;  %p10293_p10 = scmp.lt.s32.totalorder %s10284_s30, %s10284_s30 }
  0x77   : > { %p10287_p7 = pnand %p10285_p5, %p11059_p8  ;;  %p10294_p11 = por %p10293_p10, %p10292_p3 }
  0x79   : > { %p10288_p9 = pneg %p10287_p7 }
  0x7b   : > { %p10295_p12 = pnand %p10294_p11, %p10288_p9 }
  0x7d   : > { %10298 = shalt.err (!%p10295_p12)
}
  0x7e   : > { %9469 = dma.hbm_to_vmem [thread:$0]  (!%p11043_p6), %s12439_s11, 64, %s11049_s26, [#allocation22]  }
  0x7f   : > { %s10860_s10 = smov [#allocation24]   ;;  %s10861_s14 = smov [#allocation27]  }
  0x80   : > { %s630_s12 = sshll.u32 %s10860_s10, 4  ;;  %s654_s17 = sshll.u32 %s10861_s14, 4  ;;  %s631_s12 = int_to_ptr.vmem [resolvable:$true] %s630_s12  ;;  %s655_s17 = int_to_ptr.vmem [resolvable:$true] %s654_s17 }
  0x81   : > { %s12440_s13 = sld [smem:[#allocation64_spill]] }
  0x87   : > { %s10299_s21 = scalar_lea.hbm %s12440_s13, 32 }
  0x88   : > { %p10300_p13 = scmp.ne.s32.totalorder %s12440_s13, %s10299_s21  ;;  %p10306_p5 = scmp.lt.u32.totalorder %s10299_s21, %s12440_s13 }
  0x8a   : > { %p10302_p0 = pnand %p10300_p13, %p11059_p8 }
  0x8c   : > { %p10303_p2 = pneg %p10302_p0 }
  0x8e   : > { %p10308_p7 = pnand %p10306_p5, %p10303_p2 }
  0x90   : > { %10311 = shalt.err (!%p10308_p7)
}
  0x91   : > { %s10312_s26 = scalar_lea.vmem %s631_s12, 32  ;;  %p10320_p11 = scmp.lt.s32.totalorder %s631_s12, %s631_s12 }
  0x92   : > { %p10313_p9 = scmp.ne.s32.totalorder %s631_s12, %s10312_s26  ;;  %p10321_p12 = scmp.lt.s32.totalorder %s10312_s26, %s10312_s26 }
  0x94   : > { %p10315_p3 = pnand %p10313_p9, %p11059_p8  ;;  %p10322_p1 = por %p10321_p12, %p10320_p11 }
  0x96   : > { %p10316_p10 = pneg %p10315_p3 }
  0x98   : > { %p10323_p4 = pnand %p10322_p1, %p10316_p10 }
  0x9a   : > { %10326 = shalt.err (!%p10323_p4)
}
  0x9b   : > { %9475 = dma.hbm_to_vmem [thread:$0]  (!%p11043_p6), %s12440_s13, 32, %s631_s12, [#allocation25]  }
  0x9c   : > { %s12441_s15 = sld [smem:[#allocation66_spill]] }
  0xa2   : > { %s10327_s20 = scalar_lea.hbm %s12441_s15, 16 }
  0xa3   : > { %p10328_p13 = scmp.ne.s32.totalorder %s12441_s15, %s10327_s20  ;;  %p10334_p4 = scmp.lt.u32.totalorder %s10327_s20, %s12441_s15 }
  0xa5   : > { %p10330_p0 = pnand %p10328_p13, %p11059_p8 }
  0xa7   : > { %p10331_p1 = pneg %p10330_p0 }
  0xa9   : > { %p10336_p2 = pnand %p10334_p4, %p10331_p1 }
  0xab   : > { %10339 = shalt.err (!%p10336_p2)
}
  0xac   : > { %s10340_s27 = scalar_lea.vmem %s655_s17, 16  ;;  %s10347_s12 = scalar_lea.vmem %s655_s17, 32 }
  0xad   : > { %p10341_p5 = scmp.ne.s32.totalorder %s655_s17, %s10340_s27  ;;  %p10348_p3 = scmp.lt.s32.totalorder %s655_s17, %s655_s17 }
  0xae   : > { %p10349_p10 = scmp.lt.s32.totalorder %s10347_s12, %s10340_s27 }
  0xaf   : > { %p10343_p7 = pnand %p10341_p5, %p11059_p8 }
  0xb0   : > { %p10350_p11 = por %p10349_p10, %p10348_p3 }
  0xb1   : > { %p10344_p9 = pneg %p10343_p7 }
  0xb3   : > { %p10351_p12 = pnand %p10350_p11, %p10344_p9 }
  0xb5   : > { %10354 = shalt.err (!%p10351_p12)
}
  0xb6   : > { %9481 = dma.hbm_to_vmem [thread:$0]  (!%p11043_p6), %s12441_s15, 16, %s655_s17, [#allocation28]  }
  0xb7   : > { %s10862_s10 = smov [#allocation30]   ;;  %s12442_s18 = sld [smem:[#allocation69_spill]] }
  0xb8   : > { %s678_s19 = sshll.u32 %s10862_s10, 4  ;;  %s679_s19 = int_to_ptr.vmem [resolvable:$true] %s678_s19 }
  0xbd   : > { %s10355_s4 = scalar_lea.hbm %s12442_s18, 512 }
  0xbe   : > { %p10356_p13 = scmp.ne.s32.totalorder %s12442_s18, %s10355_s4  ;;  %p10362_p4 = scmp.lt.u32.totalorder %s10355_s4, %s12442_s18 }
  0xc0   : > { %p10358_p0 = pnand %p10356_p13, %p11059_p8 }
  0xc2   : > { %p10359_p1 = pneg %p10358_p0 }
  0xc4   : > { %p10364_p2 = pnand %p10362_p4, %p10359_p1 }
  0xc6   : > { %10367 = shalt.err (!%p10364_p2)
}
  0xc7   : > { %s10368_s17 = scalar_lea.vmem %s679_s19, 512  ;;  %p10376_p3 = scmp.lt.s32.totalorder %s679_s19, %s679_s19 }
  0xc8   : > { %p10369_p5 = scmp.ne.s32.totalorder %s679_s19, %s10368_s17  ;;  %p10377_p10 = scmp.lt.s32.totalorder %s10368_s17, %s10368_s17 }
  0xca   : > { %p10371_p7 = pnand %p10369_p5, %p11059_p8  ;;  %p10378_p11 = por %p10377_p10, %p10376_p3 }
  0xcc   : > { %p10372_p9 = pneg %p10371_p7 }
  0xce   : > { %p10379_p12 = pnand %p10378_p11, %p10372_p9 }
  0xd0   : > { %10382 = shalt.err (!%p10379_p12)
}
  0xd1   : > { %s12374_s12 = smov 64   ;;  %s12373_s26 = smov 4  }
  0xd2   : > { %9487 = dma.hbm_to_vmem [thread:$0]  (!%p11043_p6), %s12442_s18, 512, %s679_s19, [#allocation31], %s12374_s12, %s12374_s12, %s12373_s26  }
  0xd3   : > { %s11187_s14 = sadd.s32 1, %s10853_s3   ;;  %p114_p13 = scmp.gt.s32.totalorder %s11027_s28, 0 }
  0xd4   : > { %12443 = sst [smem:[#allocation46_spill]] %s11187_s14  ;;  %s8723_s20 = sadd.s32 4294967295, %s11187_s14 }
  0xd5   : > { %s122_s4 = sadd.s32 1, %s10849_s25  ;;  %p117_p0 = scmp.gt.s32.totalorder %s8723_s20, 0 }
  0xd6   : > { %s11193_s21 = scalar_select %p114_p13, %s11027_s28, 0 }
  0xd7   : > { %p129_p1 = scmp.ne.s32.totalorder %s10849_s25, %s10845_s2  ;;  %p12380_p4 = scmp.eq.s32.totalorder %s10853_s3, 0 }
  0xd8   : > { %p135_p2 = scmp.ne.s32.totalorder %s10845_s2, %s10841_s24  ;;  %s12521_s20 = smov (!%p117_p0, %s8723_s20), 0 }
  0xd9   : > { %p131_p5 = por %p12380_p4, %p129_p1  ;;  %p12444_p7 = scmp.eq.s32.totalorder %s11027_s28, 0 }
  0xda   : > { %s119_s16 = ssub.s32 %s11193_s21, %s12521_s20  ;;  %p12379_p3 = scmp.lt.s32.totalorder %s10853_s3, 6 }
  0xdb   : > { %p11204_p9 = por %p12444_p7, %p135_p2  ;;  %p120_p10 = scmp.eq.s32.totalorder %s119_s16, 0 }
  0xdc   : > { %s11211_s30 = sand.u32 1, %s10853_s3   ;;  %s12377_s27 = sand.u32 1, %s10849_s25  }
  0xdd   : > { %s12445_s19 = scalar_select %p11204_p9, 1, 0 }
  0xde   : > { %s11215_s17 = scalar_select %p120_p10, %s10849_s25, %s122_s4  }
  0xdf   : > { %12446 = sst [smem:[#allocation47_spill]] %s12445_s19  ;;  %s9378_s7 = smul.u32 1536, %s12377_s27 }
  0xe0   : > { %12447 = sst [smem:[#allocation48_spill]] %s11215_s17  ;;  %p11221_p11 = pnand %p12379_p3, %p131_p5 }
  0xe1   : > { %s9379_s10 = smul.u32 24576, %s11193_s21  ;;  %s12449_s12 = sld [smem:[#allocation54_spill]] }
  0xe2   : > { %s12448_s24 = scalar_select %p11221_p11, 1, 0 }
  0xe3   : > { %s707_s4 = scalar_lea.vmem [#allocation9], %s9378_s7  ;;  %s12384_s27 = scalar_lea.sflag [#allocation10], %s11211_s30 }
  0xe4   : > { %s717_s6 = sshll.u32 %s707_s4, 4  ;;  %p12386_p13 = pneg %p11221_p11  ;;  %s11231_s6 = int_to_ptr.vmem [resolvable:$true] %s717_s6 }
  0xe7   : > { %s11229_s16 = scalar_lea.hbm %s12449_s12, %s9379_s10  ;;  %s10388_s20 = scalar_lea.hbm %s12449_s12, 122880 }
  0xe8   : > { %s10383_s8 = scalar_lea.hbm %s11229_s16, 24576  ;;  %p10389_p2 = scmp.lt.u32.totalorder %s11229_s16, %s12449_s12 }
  0xe9   : > { %p10384_p12 = scmp.ne.s32.totalorder %s11229_s16, %s10383_s8  ;;  %p10390_p5 = scmp.lt.u32.totalorder %s10388_s20, %s10383_s8 }
  0xea   : > { %p10392_p10 = scmp.lt.u32.totalorder %s10383_s8, %s11229_s16 }
  0xeb   : > { %p10386_p0 = pnand %p12386_p13, %p10384_p12  ;;  %p10391_p7 = por %p10390_p5, %p10389_p2 }
  0xed   : > { %p10387_p1 = pneg %p10386_p0  ;;  %p10393_p3 = por %p10392_p10, %p10391_p7 }
  0xef   : > { %p10394_p4 = pnand %p10393_p3, %p10387_p1 }
  0xf1   : > { %10397 = shalt.err (!%p10394_p4)
}
  0xf2   : > { %s10398_s7 = scalar_lea.vmem %s11231_s6, 24576  ;;  %s10865_s4 = smov [#allocation9]  }
  0xf3   : > { %p10399_p12 = scmp.ne.s32.totalorder %s11231_s6, %s10398_s7  ;;  %s10403_s26 = sshll.u32 %s10865_s4, 4  ;;  %s10404_s26 = int_to_ptr.vmem [resolvable:$false] %s10403_s26 }
  0xf4   : > { %s10405_s9 = scalar_lea.vmem %s10404_s26, 49152  ;;  %p10406_p6 = scmp.lt.s32.totalorder %s11231_s6, %s10404_s26 }
  0xf5   : > { %p10401_p0 = pnand %p10399_p12, %p12386_p13  ;;  %p10407_p2 = scmp.lt.s32.totalorder %s10405_s9, %s10398_s7 }
  0xf7   : > { %p10402_p9 = pneg %p10401_p0  ;;  %p10408_p5 = por %p10407_p2, %p10406_p6 }
  0xf9   : > { %p10409_p7 = pnand %p10408_p5, %p10402_p9 }
  0xfb   : > { %10412 = shalt.err (!%p10409_p7)
}
  0xfc   : > { %s12450_s8 = smov 96   ;;  %s12451_s11 = smov 1536  }
  0xfd   : > { %9494 = dma.hbm_to_vmem [thread:$0]  (!%p11221_p11), %s11229_s16, 24576, %s11231_s6, %s12384_s27, %s12451_s11, %s12451_s11, %s12450_s8  }
  0xfe   : > { %s177_s10 = ssub.s32 %s10853_s3, %s11187_s14  ;;  %s180_s20 = sadd.s32 1, %s10837_s23 }
  0xff   : > { %p178_p6 = scmp.eq.s32.totalorder %s177_s10, 0  ;;  %p187_p4 = scmp.ne.s32.totalorder %s10837_s23, %s10833_s22 }
 0x100   : > { %p193_p9 = scmp.ne.s32.totalorder %s10833_s22, %s10829_s1  ;;  %p12453_p3 = scmp.eq.s32.totalorder %s10853_s3, 0 }
 0x101   : > { %s11272_s7 = scalar_select %p178_p6, %s10837_s23, %s180_s20  }
 0x102   : > { %p189_p1 = por %p187_p4, %p12453_p3  ;;  %p12454_p10 = scmp.eq.s32.totalorder %s11027_s28, 0 }
 0x103   : > { %12452 = sst [smem:[#allocation49_spill]] %s11272_s7  ;;  %s11283_s26 = sand.u32 1, %s10837_s23  }
 0x104   : > { %p11278_p12 = por %p193_p9, %p12454_p10  ;;  %s9383_s6 = smul.u32 192, %s10853_s3 }
 0x105   : > { %s9382_s16 = smul.u32 12, %s11283_s26  ;;  %p12457_p0 = scmp.lt.s32.totalorder %s10853_s3, 6 }
 0x106   : > { %s12455_s4 = scalar_select %p11278_p12, 1, 0 }
 0x107   : > { %p11289_p2 = pnand %p12457_p0, %p189_p1  ;;  %s12459_s5 = sld [smem:[#allocation56_spill]] }
 0x108   : > { %12456 = sst [smem:[#allocation50_spill]] %s12455_s4  ;;  %s753_s10 = scalar_lea.vmem [#allocation12], %s9382_s16 }
 0x109   : > { %s12458_s9 = scalar_select %p11289_p2, 1, 0 }
 0x10a   : > { %s761_s20 = sshll.u32 %s753_s10, 4  ;;  %s12392_s12 = scalar_lea.sflag [#allocation13], %s11211_s30  ;;  %s11299_s20 = int_to_ptr.vmem [resolvable:$true] %s761_s20 }
 0x10b   : > { %p11306_p7 = pneg %p11289_p2 }
 0x10d   : > { %s11296_s11 = scalar_lea.hbm %s12459_s5, %s9383_s6  ;;  %s10418_s16 = scalar_lea.hbm %s12459_s5, 1152 }
 0x10e   : > { %s10413_s13 = scalar_lea.hbm %s11296_s11, 192  ;;  %p10419_p9 = scmp.lt.u32.totalorder %s11296_s11, %s12459_s5 }
 0x10f   : > { %p10414_p5 = scmp.ne.s32.totalorder %s11296_s11, %s10413_s13  ;;  %p10420_p3 = scmp.lt.u32.totalorder %s10418_s16, %s10413_s13 }
 0x110   : > { %s12460_s15 = scalar_select %p11306_p7, 1, 0 }
 0x111   : > { %p10416_p6 = pnand %p11306_p7, %p10414_p5  ;;  %p10421_p1 = por %p10420_p3, %p10419_p9 }
 0x112   : > { %p10422_p10 = scmp.lt.u32.totalorder %s10413_s13, %s11296_s11 }
 0x113   : > { %p10417_p4 = pneg %p10416_p6 }
 0x114   : > { %p10423_p0 = por %p10422_p10, %p10421_p1 }
 0x116   : > { %p10424_p13 = pnand %p10423_p0, %p10417_p4 }
 0x118   : > { %10427 = shalt.err (!%p10424_p13)
}
 0x119   : > { %s10428_s27 = scalar_lea.vmem %s11299_s20, 192  ;;  %s10866_s6 = smov [#allocation12]  }
 0x11a   : > { %p10429_p5 = scmp.ne.s32.totalorder %s11299_s20, %s10428_s27  ;;  %s10433_s1 = sshll.u32 %s10866_s6, 4  ;;  %s10434_s1 = int_to_ptr.vmem [resolvable:$false] %s10433_s1 }
 0x11b   : > { %s10435_s8 = scalar_lea.vmem %s10434_s1, 384  ;;  %p10436_p11 = scmp.lt.s32.totalorder %s11299_s20, %s10434_s1 }
 0x11c   : > { %p10431_p6 = pnand %p10429_p5, %p11306_p7  ;;  %p10437_p8 = scmp.lt.s32.totalorder %s10435_s8, %s10428_s27 }
 0x11e   : > { %p10432_p12 = pneg %p10431_p6  ;;  %p10438_p9 = por %p10437_p8, %p10436_p11 }
 0x120   : > { %p10439_p3 = pnand %p10438_p9, %p10432_p12 }
 0x122   : > { %10442 = shalt.err (!%p10439_p3)
}
 0x123   : > { %9500 = dma.hbm_to_vmem [thread:$0]  (!%p11289_p2), %s11296_s11, 192, %s11299_s20, %s12392_s12  }
 0x124   : > { %s9158_s13 = sshll.u32 %s10853_s3, 14  ;;  %s12461_s16 = sshll.u32 %s11283_s26, 10 }
 0x125   : > { %s791_s10 = scalar_lea.vmem [#allocation15], %s12461_s16  ;;  %s12462_s8 = sld [smem:[#allocation58_spill]] }
 0x126   : > { %s798_s6 = sshll.u32 %s791_s10, 4  ;;  %s12403_s18 = scalar_lea.sflag [#allocation16], %s11211_s30  ;;  %s11339_s6 = int_to_ptr.vmem [resolvable:$true] %s798_s6 }
 0x12b   : > { %s11337_s5 = scalar_lea.hbm %s12462_s8, %s9158_s13  ;;  %s10448_s16 = scalar_lea.hbm %s12462_s8, 98304 }
 0x12c   : > { %s10443_s17 = scalar_lea.hbm %s11337_s5, 16384  ;;  %p10449_p12 = scmp.lt.u32.totalorder %s11337_s5, %s12462_s8 }
 0x12d   : > { %p10444_p8 = scmp.ne.s32.totalorder %s11337_s5, %s10443_s17  ;;  %p10450_p4 = scmp.lt.u32.totalorder %s10448_s16, %s10443_s17 }
 0x12e   : > { %p10452_p10 = scmp.lt.u32.totalorder %s10443_s17, %s11337_s5 }
 0x12f   : > { %p10446_p11 = pnand %p10444_p8, %p11306_p7  ;;  %p10451_p1 = por %p10450_p4, %p10449_p12 }
 0x131   : > { %p10447_p13 = pneg %p10446_p11  ;;  %p10453_p0 = por %p10452_p10, %p10451_p1 }
 0x133   : > { %p10454_p5 = pnand %p10453_p0, %p10447_p13 }
 0x135   : > { %10457 = shalt.err (!%p10454_p5)
}
 0x136   : > { %s10458_s13 = scalar_lea.vmem %s11339_s6, 16384  ;;  %s10867_s27 = smov [#allocation15]  }
 0x137   : > { %p10459_p6 = scmp.ne.s32.totalorder %s11339_s6, %s10458_s13  ;;  %s10463_s11 = sshll.u32 %s10867_s27, 4  ;;  %s10464_s11 = int_to_ptr.vmem [resolvable:$false] %s10463_s11 }
 0x138   : > { %s10465_s20 = scalar_lea.vmem %s10464_s11, 32768  ;;  %p10466_p8 = scmp.lt.s32.totalorder %s11339_s6, %s10464_s11 }
 0x139   : > { %p10461_p9 = pnand %p10459_p6, %p11306_p7  ;;  %p10467_p11 = scmp.lt.s32.totalorder %s10465_s20, %s10458_s13 }
 0x13b   : > { %p10462_p3 = pneg %p10461_p9  ;;  %p10468_p12 = por %p10467_p11, %p10466_p8 }
 0x13d   : > { %p10469_p4 = pnand %p10468_p12, %p10462_p3 }
 0x13f   : > { %10472 = shalt.err (!%p10469_p4)
}
 0x140   : > { %s10868_s17 = smov 1024   ;;  %s12463_s16 = smov 64  }
 0x141   : > { %9506 = dma.hbm_to_vmem [thread:$0]  (!%p11289_p2), %s11337_s5, 16384, %s11339_s6, %s12403_s18, %s10868_s17, %s10868_s17, %s12463_s16  }
 0x142   : > { %s10869_s10 = smov [#allocation4]   ;;  %s10870_s27 = smov [#allocation8]  }
 0x143   : > { %s547_s1 = sshll.u32 %s10869_s10, 4  ;;  %s571_s12 = sshll.u32 %s10870_s27, 4  ;;  %s548_s1 = int_to_ptr.vmem [resolvable:$true] %s547_s1  ;;  %s572_s12 = int_to_ptr.vmem [resolvable:$true] %s571_s12 }
 0x144   : > { %s12464_s20 = sld [smem:[#allocation51_spill]]  ;;  %p12465_p1 = scmp.ne.s32.totalorder %s12437_s29, 0 }
 0x14a   : > { %s10473_s8 = scalar_lea.hbm %s12464_s20, 1024 }
 0x14b   : > { %p10474_p13 = scmp.ne.s32.totalorder %s12464_s20, %s10473_s8  ;;  %p10480_p5 = scmp.lt.u32.totalorder %s10473_s8, %s12464_s20 }
 0x14d   : > { %p10476_p10 = pnand %p10474_p13, %p12465_p1 }
 0x14f   : > { %p10477_p0 = pneg %p10476_p10 }
 0x151   : > { %p10482_p6 = pnand %p10480_p5, %p10477_p0 }
 0x153   : > { %10485 = shalt.err (!%p10482_p6)
}
 0x154   : > { %s10486_s5 = scalar_lea.vmem %s548_s1, 1024  ;;  %p10494_p11 = scmp.lt.s32.totalorder %s548_s1, %s548_s1 }
 0x155   : > { %p10487_p9 = scmp.ne.s32.totalorder %s548_s1, %s10486_s5  ;;  %p10495_p12 = scmp.lt.s32.totalorder %s10486_s5, %s10486_s5 }
 0x157   : > { %p10489_p3 = pnand %p10487_p9, %p12465_p1  ;;  %p10496_p4 = por %p10495_p12, %p10494_p11 }
 0x159   : > { %p10490_p8 = pneg %p10489_p3 }
 0x15b   : > { %p10497_p2 = pnand %p10496_p4, %p10490_p8 }
 0x15d   : > { %10500 = shalt.err (!%p10497_p2)
}
 0x15e   : > { %p12466_p13 = scmp.ne.s32.totalorder %s12435_s0, 0  ;;  %s12467_s6 = sld [smem:[#allocation53_spill]] }
 0x160   : > { %9454 = dma.hbm_to_vmem [thread:$0]  (!%p12466_p13), %s12464_s20, 1024, %s548_s1, [#allocation5]  }
 0x164   : > { %s10501_s8 = scalar_lea.hbm %s12467_s6, 192 }
 0x165   : > { %p10502_p10 = scmp.ne.s32.totalorder %s12467_s6, %s10501_s8  ;;  %p10508_p2 = scmp.lt.u32.totalorder %s10501_s8, %s12467_s6 }
 0x167   : > { %p10504_p0 = pnand %p10502_p10, %p12465_p1 }
 0x169   : > { %p10505_p5 = pneg %p10504_p0 }
 0x16b   : > { %p10510_p6 = pnand %p10508_p2, %p10505_p5 }
 0x16d   : > { %10513 = shalt.err (!%p10510_p6)
}
 0x16e   : > { %s10514_s13 = scalar_lea.vmem %s572_s12, 192  ;;  %p10522_p11 = scmp.lt.s32.totalorder %s572_s12, %s572_s12 }
 0x16f   : > { %p10515_p9 = scmp.ne.s32.totalorder %s572_s12, %s10514_s13  ;;  %p10523_p12 = scmp.lt.s32.totalorder %s10514_s13, %s10514_s13 }
 0x171   : > { %p10517_p3 = pnand %p10515_p9, %p12465_p1  ;;  %p10524_p4 = por %p10523_p12, %p10522_p11 }
 0x173   : > { %p10518_p8 = pneg %p10517_p3 }
 0x175   : > { %p10525_p7 = pnand %p10524_p4, %p10518_p8 }
 0x177   : > { %10528 = shalt.err (!%p10525_p7)
}
 0x178   : > { %9460 = dma.hbm_to_vmem [thread:$0]  (!%p12466_p13), %s12467_s6, 192, %s572_s12, [#allocation7]  }
 0x179   : > { %s10871_s23 = smov [#allocation20]   ;;  %s12468_s8 = sld [smem:[#allocation61_spill]] }
 0x17a   : > { %s592_s7 = sshll.u32 %s10871_s23, 4  ;;  %s593_s7 = int_to_ptr.vmem [resolvable:$true] %s592_s7 }
 0x17f   : > { %s10529_s17 = scalar_lea.hbm %s12468_s8, 32768 }
 0x180   : > { %p10530_p10 = scmp.ne.s32.totalorder %s12468_s8, %s10529_s17  ;;  %p10536_p5 = scmp.lt.u32.totalorder %s10529_s17, %s12468_s8 }
 0x182   : > { %p10532_p7 = pnand %p10530_p10, %p12465_p1 }
 0x184   : > { %p10533_p0 = pneg %p10532_p7 }
 0x186   : > { %p10538_p2 = pnand %p10536_p5, %p10533_p0 }
 0x188   : > { %10541 = shalt.err (!%p10538_p2)
}
 0x189   : > { %s10542_s12 = scalar_lea.vmem %s593_s7, 32768  ;;  %p10550_p8 = scmp.lt.s32.totalorder %s593_s7, %s593_s7 }
 0x18a   : > { %p10543_p6 = scmp.ne.s32.totalorder %s593_s7, %s10542_s12  ;;  %p10551_p11 = scmp.lt.s32.totalorder %s10542_s12, %s10542_s12 }
 0x18c   : > { %p10545_p9 = pnand %p10543_p6, %p12465_p1  ;;  %p10552_p12 = por %p10551_p11, %p10550_p8 }
 0x18e   : > { %p10546_p3 = pneg %p10545_p9 }
 0x190   : > { %p10553_p4 = pnand %p10552_p12, %p10546_p3 }
 0x192   : > { %10556 = shalt.err (!%p10553_p4)
}
 0x193   : > { %s10872_s1 = smov 256   ;;  %s10873_s5 = smov 16  }
 0x194   : > { %9466 = dma.hbm_to_vmem [thread:$0]  (!%p12466_p13), %s12468_s8, 32768, %s593_s7, [#allocation19], %s10872_s1, %s10872_s1, %s10873_s5  }
 0x195   : > { %s10874_s4 = smov [#allocation23]   ;;  %s12469_s11 = sld [smem:[#allocation63_spill]] }
 0x196   : > { %s616_s17 = sshll.u32 %s10874_s4, 4  ;;  %s617_s17 = int_to_ptr.vmem [resolvable:$true] %s616_s17 }
 0x19b   : > { %s10557_s13 = scalar_lea.hbm %s12469_s11, 8192 }
 0x19c   : > { %p10558_p10 = scmp.ne.s32.totalorder %s12469_s11, %s10557_s13  ;;  %p10564_p5 = scmp.lt.u32.totalorder %s10557_s13, %s12469_s11 }
 0x19e   : > { %p10560_p7 = pnand %p10558_p10, %p12465_p1 }
 0x1a0   : > { %p10561_p0 = pneg %p10560_p7 }
 0x1a2   : > { %p10566_p2 = pnand %p10564_p5, %p10561_p0 }
 0x1a4   : > { %10569 = shalt.err (!%p10566_p2)
}
 0x1a5   : > { %s10570_s7 = scalar_lea.vmem %s617_s17, 8192  ;;  %p10578_p8 = scmp.lt.s32.totalorder %s617_s17, %s617_s17 }
 0x1a6   : > { %p10571_p6 = scmp.ne.s32.totalorder %s617_s17, %s10570_s7  ;;  %p10579_p11 = scmp.lt.s32.totalorder %s10570_s7, %s10570_s7 }
 0x1a8   : > { %p10573_p9 = pnand %p10571_p6, %p12465_p1  ;;  %p10580_p12 = por %p10579_p11, %p10578_p8 }
 0x1aa   : > { %p10574_p3 = pneg %p10573_p9 }
 0x1ac   : > { %p10581_p4 = pnand %p10580_p12, %p10574_p3 }
 0x1ae   : > { %10584 = shalt.err (!%p10581_p4)
}
 0x1af   : > { %s10875_s18 = smov 128   ;;  %s10876_s1 = smov 8  }
 0x1b0   : > { %9472 = dma.hbm_to_vmem [thread:$0]  (!%p12466_p13), %s12469_s11, 8192, %s617_s17, [#allocation22], %s10875_s18, %s10875_s18, %s10876_s1  }
 0x1b1   : > { %s10877_s5 = smov [#allocation26]   ;;  %s10878_s14 = smov [#allocation29]  }
 0x1b2   : > { %s640_s23 = sshll.u32 %s10877_s5, 4  ;;  %s668_s4 = sshll.u32 %s10878_s14, 4  ;;  %s641_s23 = int_to_ptr.vmem [resolvable:$true] %s640_s23  ;;  %s669_s4 = int_to_ptr.vmem [resolvable:$true] %s668_s4 }
 0x1b3   : > { %s12470_s13 = sld [smem:[#allocation65_spill]] }
 0x1b9   : > { %s10585_s12 = scalar_lea.hbm %s12470_s13, 2048 }
 0x1ba   : > { %p10586_p10 = scmp.ne.s32.totalorder %s12470_s13, %s10585_s12  ;;  %p10592_p5 = scmp.lt.u32.totalorder %s10585_s12, %s12470_s13 }
 0x1bc   : > { %p10588_p7 = pnand %p10586_p10, %p12465_p1 }
 0x1be   : > { %p10589_p0 = pneg %p10588_p7 }
 0x1c0   : > { %p10594_p2 = pnand %p10592_p5, %p10589_p0 }
 0x1c2   : > { %10597 = shalt.err (!%p10594_p2)
}
 0x1c3   : > { %s10598_s17 = scalar_lea.vmem %s641_s23, 2048  ;;  %p10606_p8 = scmp.lt.s32.totalorder %s641_s23, %s641_s23 }
 0x1c4   : > { %p10599_p6 = scmp.ne.s32.totalorder %s641_s23, %s10598_s17  ;;  %p10607_p11 = scmp.lt.s32.totalorder %s10598_s17, %s10598_s17 }
 0x1c6   : > { %p10601_p9 = pnand %p10599_p6, %p12465_p1  ;;  %p10608_p12 = por %p10607_p11, %p10606_p8 }
 0x1c8   : > { %p10602_p3 = pneg %p10601_p9 }
 0x1ca   : > { %p10609_p4 = pnand %p10608_p12, %p10602_p3 }
 0x1cc   : > { %10612 = shalt.err (!%p10609_p4)
}
 0x1cd   : > { %s12471_s8 = smov 4   ;;  %s12472_s20 = sld [smem:[#allocation68_spill]] }
 0x1ce   : > { %9478 = dma.hbm_to_vmem [thread:$0]  (!%p12466_p13), %s12470_s13, 2048, %s641_s23, [#allocation25], %s12463_s16, %s12463_s16, %s12471_s8  }
 0x1d3   : > { %s10613_s6 = scalar_lea.hbm %s12472_s20, 16 }
 0x1d4   : > { %p10614_p10 = scmp.ne.s32.totalorder %s12472_s20, %s10613_s6  ;;  %p10620_p5 = scmp.lt.u32.totalorder %s10613_s6, %s12472_s20 }
 0x1d6   : > { %p10616_p7 = pnand %p10614_p10, %p12465_p1 }
 0x1d8   : > { %p10617_p0 = pneg %p10616_p7 }
 0x1da   : > { %p10622_p2 = pnand %p10620_p5, %p10617_p0 }
 0x1dc   : > { %10625 = shalt.err (!%p10622_p2)
}
 0x1dd   : > { %s10626_s12 = scalar_lea.vmem %s669_s4, 16  ;;  %s10633_s16 = scalar_lea.vmem %s669_s4, 32 }
 0x1de   : > { %p10627_p6 = scmp.ne.s32.totalorder %s669_s4, %s10626_s12  ;;  %p10634_p8 = scmp.lt.s32.totalorder %s669_s4, %s669_s4 }
 0x1df   : > { %p10635_p11 = scmp.lt.s32.totalorder %s10633_s16, %s10626_s12 }
 0x1e0   : > { %p10629_p9 = pnand %p10627_p6, %p12465_p1 }
 0x1e1   : > { %p10636_p12 = por %p10635_p11, %p10634_p8 }
 0x1e2   : > { %p10630_p3 = pneg %p10629_p9 }
 0x1e4   : > { %p10637_p4 = pnand %p10636_p12, %p10630_p3 }
 0x1e6   : > { %10640 = shalt.err (!%p10637_p4)
}
 0x1e7   : > { %9484 = dma.hbm_to_vmem [thread:$0]  (!%p12466_p13), %s12472_s20, 16, %s669_s4, [#allocation28]  }
 0x1e8   : > { %s10879_s17 = smov [#allocation32]   ;;  %s12473_s22 = sand.u32 1, %s10849_s25  }
 0x1e9   : > { %s692_s8 = sshll.u32 %s10879_s17, 4  ;;  %s9380_s19 = smul.u32 12, %s12473_s22  ;;  %s693_s8 = int_to_ptr.vmem [resolvable:$true] %s692_s8 }
 0x1ea   : > { %s9381_s18 = smul.u32 192, %s11193_s21  ;;  %s12474_s5 = sld [smem:[#allocation70_spill]] }
 0x1f0   : > { %s10641_s14 = scalar_lea.hbm %s12474_s5, 16 }
 0x1f1   : > { %p10642_p10 = scmp.ne.s32.totalorder %s12474_s5, %s10641_s14  ;;  %p10648_p5 = scmp.lt.u32.totalorder %s10641_s14, %s12474_s5 }
 0x1f3   : > { %p10644_p7 = pnand %p10642_p10, %p12465_p1 }
 0x1f5   : > { %p10645_p0 = pneg %p10644_p7 }
 0x1f7   : > { %p10650_p2 = pnand %p10648_p5, %p10645_p0 }
 0x1f9   : > { %10653 = shalt.err (!%p10650_p2)
}
 0x1fa   : > { %s10654_s4 = scalar_lea.vmem %s693_s8, 16  ;;  %s10661_s21 = scalar_lea.vmem %s693_s8, 32 }
 0x1fb   : > { %p10655_p6 = scmp.ne.s32.totalorder %s693_s8, %s10654_s4  ;;  %p10662_p8 = scmp.lt.s32.totalorder %s693_s8, %s693_s8 }
 0x1fc   : > { %p10663_p11 = scmp.lt.s32.totalorder %s10661_s21, %s10654_s4 }
 0x1fd   : > { %p10657_p9 = pnand %p10655_p6, %p12465_p1 }
 0x1fe   : > { %p10664_p12 = por %p10663_p11, %p10662_p8 }
 0x1ff   : > { %p10658_p3 = pneg %p10657_p9 }
 0x201   : > { %p10665_p4 = pnand %p10664_p12, %p10658_p3 }
 0x203   : > { %10668 = shalt.err (!%p10665_p4)
}
 0x204   : > { %9490 = dma.hbm_to_vmem [thread:$0]  (!%p12466_p13), %s12474_s5, 16, %s693_s8, [#allocation31]  }
 0x205   : > { %s12475_s1 = sld [smem:[#allocation55_spill]]  ;;  %s731_s14 = scalar_lea.vmem [#allocation11], %s9380_s19 }
 0x206   : > { %s742_s10 = sshll.u32 %s731_s14, 4  ;;  %s8746_s27 = sshll.u32 %s11283_s26, 2  ;;  %s743_s10 = int_to_ptr.vmem [resolvable:$true] %s742_s10 }
 0x207   : > { %p12477_p10 = scmp.ne.s32.totalorder %s12448_s24, 0 }
 0x209   : > { %p12478_p7 = pneg %p12477_p10 }
 0x20b   : > { %s12476_s6 = smov %s12475_s1  ;;  %s11501_s29 = scalar_lea.hbm %s12475_s1, %s9381_s18 }
 0x20c   : > { %s10669_s0 = scalar_lea.hbm %s11501_s29, 192  ;;  %s10674_s16 = scalar_lea.hbm %s12476_s6, 960 }
 0x20d   : > { %p10670_p1 = scmp.ne.s32.totalorder %s11501_s29, %s10669_s0  ;;  %p10675_p13 = scmp.lt.u32.totalorder %s11501_s29, %s12476_s6 }
 0x20e   : > { %p10676_p2 = scmp.lt.u32.totalorder %s10674_s16, %s10669_s0  ;;  %p10678_p9 = scmp.lt.u32.totalorder %s10669_s0, %s11501_s29 }
 0x20f   : > { %p10672_p0 = pnand %p10670_p1, %p12478_p7 }
 0x210   : > { %p10677_p6 = por %p10676_p2, %p10675_p13 }
 0x211   : > { %p10673_p5 = pneg %p10672_p0 }
 0x212   : > { %p10679_p3 = por %p10678_p9, %p10677_p6 }
 0x214   : > { %p10680_p8 = pnand %p10679_p3, %p10673_p5 }
 0x216   : > { %10683 = shalt.err (!%p10680_p8)
}
 0x217   : > { %s10684_s19 = scalar_lea.vmem %s743_s10, 192  ;;  %p12479_p12 = pmov %p12478_p7 }
 0x218   : > { %p10685_p11 = scmp.ne.s32.totalorder %s743_s10, %s10684_s19  ;;  %s10880_s21 = smov [#allocation11]  }
 0x219   : > { %s10689_s23 = sshll.u32 %s10880_s21, 4  ;;  %s10690_s23 = int_to_ptr.vmem [resolvable:$false] %s10689_s23 }
 0x21a   : > { %p10687_p4 = pnand %p10685_p11, %p12479_p12  ;;  %s10691_s7 = scalar_lea.vmem %s10690_s23, 384 }
 0x21b   : > { %p10692_p7 = scmp.lt.s32.totalorder %s743_s10, %s10690_s23  ;;  %p10693_p0 = scmp.lt.s32.totalorder %s10691_s7, %s10684_s19 }
 0x21c   : > { %p10688_p1 = pneg %p10687_p4 }
 0x21d   : > { %p10694_p2 = por %p10693_p0, %p10692_p7 }
 0x21f   : > { %p10695_p13 = pnand %p10694_p2, %p10688_p1 }
 0x221   : > { %10698 = shalt.err (!%p10695_p13)
}
 0x222   : > { %s12480_s17 = scalar_lea.sflag [#allocation10], %s11211_s30  ;;  %s9157_s22 = sshll.u32 %s10853_s3, 6 }
 0x223   : > { %9497 = dma.hbm_to_vmem [thread:$0]  (!%p12477_p10), %s11501_s29, 192, %s743_s10, %s12480_s17  }
 0x224   : > { %s772_s1 = scalar_lea.vmem [#allocation14], %s8746_s27  ;;  %s12481_s12 = sld [smem:[#allocation57_spill]] }
 0x225   : > { %s780_s14 = sshll.u32 %s772_s1, 4  ;;  %p12482_p6 = scmp.ne.s32.totalorder %s12460_s15, 0  ;;  %s781_s14 = int_to_ptr.vmem [resolvable:$true] %s780_s14 }
 0x22a   : > { %s778_s16 = scalar_lea.hbm %s12481_s12, %s9157_s22  ;;  %s10704_s19 = scalar_lea.hbm %s12481_s12, 384 }
 0x22b   : > { %s10699_s18 = scalar_lea.hbm %s778_s16, 64  ;;  %p10705_p10 = scmp.lt.u32.totalorder %s778_s16, %s12481_s12 }
 0x22c   : > { %p10700_p5 = scmp.ne.s32.totalorder %s778_s16, %s10699_s18  ;;  %p10706_p8 = scmp.lt.u32.totalorder %s10704_s19, %s10699_s18 }
 0x22d   : > { %p10708_p12 = scmp.lt.u32.totalorder %s10699_s18, %s778_s16 }
 0x22e   : > { %p10702_p9 = pnand %p10700_p5, %p12482_p6  ;;  %p10707_p11 = por %p10706_p8, %p10705_p10 }
 0x230   : > { %p10703_p3 = pneg %p10702_p9  ;;  %p10709_p4 = por %p10708_p12, %p10707_p11 }
 0x232   : > { %p10710_p1 = pnand %p10709_p4, %p10703_p3 }
 0x234   : > { %10713 = shalt.err (!%p10710_p1)
}
 0x235   : > { %s10714_s10 = scalar_lea.vmem %s781_s14, 64  ;;  %s10881_s27 = smov [#allocation14]  }
 0x236   : > { %p10715_p7 = scmp.ne.s32.totalorder %s781_s14, %s10714_s10  ;;  %s10719_s23 = sshll.u32 %s10881_s27, 4  ;;  %s10720_s23 = int_to_ptr.vmem [resolvable:$false] %s10719_s23 }
 0x237   : > { %s10721_s7 = scalar_lea.vmem %s10720_s23, 128  ;;  %p10722_p13 = scmp.lt.s32.totalorder %s781_s14, %s10720_s23 }
 0x238   : > { %p10717_p0 = pnand %p10715_p7, %p12482_p6  ;;  %p10723_p5 = scmp.lt.s32.totalorder %s10721_s7, %s10714_s10 }
 0x23a   : > { %p10718_p2 = pneg %p10717_p0  ;;  %p10724_p9 = por %p10723_p5, %p10722_p13 }
 0x23c   : > { %p10725_p8 = pnand %p10724_p9, %p10718_p2 }
 0x23e   : > { %10728 = shalt.err (!%p10725_p8)
}
 0x23f   : > { %p12483_p10 = scmp.ne.s32.totalorder %s12458_s9, 0  ;;  %s12484_s17 = scalar_lea.sflag [#allocation13], %s11211_s30 }
 0x240   : > { %s8752_s22 = sshll.u32 %s11283_s26, 3  ;;  %s9159_s1 = sshll.u32 %s10853_s3, 7 }
 0x241   : > { %9503 = dma.hbm_to_vmem [thread:$0]  (!%p12483_p10), %s778_s16, 64, %s781_s14, %s12484_s17  }
 0x242   : > { %s12485_s18 = sld [smem:[#allocation59_spill]]  ;;  %s812_s4 = scalar_lea.vmem [#allocation17], %s8752_s22 }
 0x243   : > { %s820_s19 = sshll.u32 %s812_s4, 4  ;;  %s821_s19 = int_to_ptr.vmem [resolvable:$true] %s820_s19 }
 0x248   : > { %s11550_s24 = scalar_lea.hbm %s12485_s18, %s9159_s1  ;;  %s10734_s3 = scalar_lea.hbm %s12485_s18, 768 }
 0x249   : > { %s10729_s21 = scalar_lea.hbm %s11550_s24, 128  ;;  %p10735_p4 = scmp.lt.u32.totalorder %s11550_s24, %s12485_s18 }
 0x24a   : > { %p10730_p3 = scmp.ne.s32.totalorder %s11550_s24, %s10729_s21  ;;  %p10736_p1 = scmp.lt.u32.totalorder %s10734_s3, %s10729_s21 }
 0x24b   : > { %p10738_p0 = scmp.lt.u32.totalorder %s10729_s21, %s11550_s24 }
 0x24c   : > { %p10732_p11 = pnand %p10730_p3, %p12482_p6  ;;  %p10737_p7 = por %p10736_p1, %p10735_p4 }
 0x24e   : > { %p10733_p12 = pneg %p10732_p11  ;;  %p10739_p2 = por %p10738_p0, %p10737_p7 }
 0x250   : > { %p10740_p13 = pnand %p10739_p2, %p10733_p12 }
 0x252   : > { %10743 = shalt.err (!%p10740_p13)
}
 0x253   : > { %s10744_s10 = scalar_lea.vmem %s821_s19, 128  ;;  %s10882_s27 = smov [#allocation17]  }
 0x254   : > { %p10745_p5 = scmp.ne.s32.totalorder %s821_s19, %s10744_s10  ;;  %s10749_s23 = sshll.u32 %s10882_s27, 4  ;;  %s10750_s23 = int_to_ptr.vmem [resolvable:$false] %s10749_s23 }
 0x255   : > { %s10751_s7 = scalar_lea.vmem %s10750_s23, 256  ;;  %p10752_p3 = scmp.lt.s32.totalorder %s821_s19, %s10750_s23 }
 0x256   : > { %p10747_p9 = pnand %p10745_p5, %p12482_p6  ;;  %p10753_p11 = scmp.lt.s32.totalorder %s10751_s7, %s10744_s10 }
 0x258   : > { %p10748_p8 = pneg %p10747_p9  ;;  %p10754_p10 = por %p10753_p11, %p10752_p3 }
 0x25a   : > { %p10755_p1 = pnand %p10754_p10, %p10748_p8 }
 0x25c   : > { %10758 = shalt.err (!%p10755_p1)
}
 0x25d   : > { %p12486_p4 = scmp.ne.s32.totalorder %s12458_s9, 0  ;;  %s12487_s17 = scalar_lea.sflag [#allocation16], %s11211_s30 }
 0x25e   : > { %s12488_s22 = sld [smem:[#allocation45_spill]] }
 0x25f   : > { %9509 = dma.hbm_to_vmem [thread:$0]  (!%p12486_p4), %s11550_s24, 128, %s821_s19, %s12487_s17  }
 0x264   : > { %p12489_p12 = scmp.ne.s32.totalorder %s12488_s22, 0 }
 0x265   : > { %p12490_p6 = scmp.eq.s32.totalorder (!%p12489_p12), %s11027_s28, 0 }
 0x266   : > { %829 = sbr.rel (%p12489_p12) target bundleno = 4156 (0x103c), region = 100 }
 0x26d   : > { %10788 = dma.done.wait (%p12490_p6), [#allocation5], 1024   ;;  %p12491_p7 = pmov %p12490_p6 }
 0x26e   : > { %p12492_p0 = pmov %p12490_p6 }
 0x26f   : > { %10790 = vsyncadd (%p12491_p7), [#allocation5], 4294966272 }
 0x270   : > { %10792 = dma.done.wait (%p12492_p0), [#allocation7], 49344   ;;  %p12493_p10 = pmov %p12492_p0 }
 0x271   : > { %s12494_s15 = sld [smem:[#allocation47_spill]]  ;;  %s843_s30 = sand.u32 1, %s11027_s28  }
 0x272   : > { %10794 = vsyncadd (%p12493_p10), [#allocation7], 4294917952  ;;  %s845_s9 = sand.u32 1, %s10845_s2   ;;  %s844_s0 = scalar_lea.sflag [#allocation10], %s843_s30 }
 0x273   : > { %s9384_s1 = smul.u32 1536, %s845_s9 }
 0x275   : > { %s11583_s8 = scalar_lea.vmem [#allocation9], %s9384_s1 }
 0x277   : > { %p12495_p2 = scmp.ne.s32.totalorder %s12494_s15, 0 }
 0x279   : > { %10796 = dma.done.wait (%p12495_p2), %s844_s0, 24768  }
 0x27a   : > { %10798 = vsyncadd (%p12495_p2), %s844_s0, 4294942528  ;;  %s12496_s24 = sld [smem:[#allocation43_spill]]  ;;  %s12497_s4 = sld [smem:[#allocation50_spill]] }
 0x27b   : > { %s11589_s19 = smul.u32 12, %s845_s9  ;;  %s862_s3 = scalar_lea.sflag [#allocation13], %s843_s30 }
 0x27d   : > { %s856_s26 = scalar_lea.vmem [#allocation11], %s11589_s19 }
 0x280   : > { %s863_s21 = sand.u32 1, %s12496_s24   ;;  %p12498_p13 = scmp.ne.s32.totalorder %s12497_s4, 0 }
 0x281   : > { %s9386_s14 = smul.u32 12, %s863_s21 }
 0x283   : > { %s11593_s16 = scalar_lea.vmem [#allocation12], %s9386_s14 }
 0x284   : > { %10800 = dma.done.wait (%p12498_p13), %s862_s3, 256  }
 0x285   : > { %10802 = vsyncadd (%p12498_p13), %s862_s3, 4294967040  ;;  %s8759_s29 = sshll.u32 %s863_s21, 2  ;;  %s8760_s10 = sshll.u32 %s863_s21, 10 }
 0x286   : > { %s11599_s27 = scalar_lea.vmem [#allocation14], %s8759_s29  ;;  %s880_s23 = scalar_lea.sflag [#allocation16], %s843_s30 }
 0x287   : > { %s11601_s7 = scalar_lea.vmem [#allocation15], %s8760_s10 }
 0x288   : > { %10804 = dma.done.wait (%p12498_p13), %s880_s23, 16512  }
 0x289   : > { %10806 = vsyncadd (%p12498_p13), %s880_s23, 4294950784  ;;  %s8761_s17 = sshll.u32 %s863_s21, 3  ;;  %p12499_p5 = pmov %p12492_p0 }
 0x28a   : > { %s11607_s22 = scalar_lea.vmem [#allocation17], %s8761_s17 }
 0x28b   : > { %10808 = dma.done.wait (%p12499_p5), [#allocation19], 32896   ;;  %p12500_p9 = pmov %p12492_p0 }
 0x28c   : > { %p12501_p8 = pmov %p12492_p0 }
 0x28d   : > { %10810 = vsyncadd (%p12500_p9), [#allocation19], 4294934400 }
 0x28e   : > { %10812 = dma.done.wait (%p12501_p8), [#allocation22], 8256   ;;  %p12502_p3 = pmov %p12492_p0 }
 0x28f   : > { %p12503_p11 = pmov %p12492_p0 }
 0x290   : > { %10814 = vsyncadd (%p12502_p3), [#allocation22], 4294959040 }
 0x291   : > { %10816 = dma.done.wait (%p12503_p11), [#allocation25], 2080   ;;  %p12504_p1 = pmov %p12492_p0 }
 0x292   : > { %p12505_p4 = pmov %p12492_p0 }
 0x293   : > { %10818 = vsyncadd (%p12504_p1), [#allocation25], 4294965216 }
 0x294   : > { %10820 = dma.done.wait (%p12505_p4), [#allocation28], 32   ;;  %p12506_p12 = pmov %p12492_p0 }
 0x295   : > { %p12507_p6 = pmov %p12492_p0 }
 0x296   : > { %10822 = vsyncadd (%p12506_p12), [#allocation28], 4294967264 }
 0x297   : > { %10824 = dma.done.wait (%p12507_p6), [#allocation31], 528   ;;  %p12508_p7 = pmov %p12492_p0 }
 0x298   : > { %p12509_p0 = scmp.ne.s32.totalorder %s11027_s28, 0 }
 0x299   : > { %10826 = vsyncadd (%p12508_p7), [#allocation31], 4294966768  ;;  %v1045_v0 = vld [vmem:[#allocation6 + $0x8] sm:$0xff] (!%p12509_p0)  ;;  %v1047_v1 = vld [vmem:[#allocation6 + $0x18] sm:$0xff] (!%p12509_p0)  ;;  %v10883_v3 = vmov (!%p12509_p0), 0.0  }
 0x29a   : > { %1019 = sbr.rel (%p12509_p0) target bundleno = 1673 (0x689), region = 180  ;;  %v1044_v2 = vld [vmem:[#allocation6] sm:$0xff] (!%p12509_p0)  ;;  %1020 = vst [vmem:[#allocation3] sm:$0xff] (!%p12509_p0), %v10883_v3  ;;  %1021 = vst [vmem:[#allocation3 + $0x8] sm:$0xff] (!%p12509_p0), %v10883_v3  ;;  %v1431_v4 = vunpack.c.l.s8.bf16 (!%p12509_p0), %v1045_v0  ;;  %v1443_v5 = vunpack.c.h.s8.bf16 (!%p12509_p0), %v1045_v0  ;;  %v1433_v6 = vunpack.c.l.s8.bf16 (!%p12509_p0), %v1047_v1  ;;  %v1445_v7 = vunpack.c.h.s8.bf16 (!%p12509_p0), %v1047_v1  ;;  %v1046_v8 = vld [vmem:[#allocation6 + $0x10] sm:$0xff] (!%p12509_p0) }
 0x29b   : > { %1022 = vst [vmem:[#allocation3 + $0x10] sm:$0xff] (!%p12509_p0), %v10883_v3  ;;  %1023 = vst [vmem:[#allocation3 + $0x18] sm:$0xff] (!%p12509_p0), %v10883_v3  ;;  %v1430_v9 = vunpack.c.l.s8.bf16 (!%p12509_p0), %v1044_v2  ;;  %v1432_v10 = vunpack.c.l.s8.bf16 (!%p12509_p0), %v1046_v8  ;;  %v1057_v11 = vld [vmem:[#allocation6 + $0x68] sm:$0xff] (!%p12509_p0)  ;;  %v1059_v12 = vld [vmem:[#allocation6 + $0x78] sm:$0xff] (!%p12509_p0)  ;;  %v1442_v13 = vunpack.c.h.s8.bf16 (!%p12509_p0), %v1044_v2  ;;  %v1444_v14 = vunpack.c.h.s8.bf16 (!%p12509_p0), %v1046_v8 }
 0x29c   : > { %1024 = vst [vmem:[#allocation3 + $0x20] sm:$0xff] (!%p12509_p0), %v10883_v3  ;;  %1025 = vst [vmem:[#allocation3 + $0x28] sm:$0xff] (!%p12509_p0), %v10883_v3  ;;  %2198 = vmatprep.subr.bf16.mxu0 (!%p12509_p0), %v1431_v4  ;;  %2362 = vmatprep.subr.bf16.mxu1 (!%p12509_p0), %v1433_v6  ;;  %v1455_v15 = vunpack.c.l.s8.bf16 (!%p12509_p0), %v1057_v11  ;;  %v1457_v16 = vunpack.c.l.s8.bf16 (!%p12509_p0), %v1059_v12  ;;  %v1056_v17 = vld [vmem:[#allocation6 + $0x60] sm:$0xff] (!%p12509_p0)  ;;  %v1058_v18 = vld [vmem:[#allocation6 + $0x70] sm:$0xff] (!%p12509_p0)  ;;  %v1467_v21 = vunpack.c.h.s8.bf16 (!%p12509_p0), %v1057_v11  ;;  %v1469_v22 = vunpack.c.h.s8.bf16 (!%p12509_p0), %v1059_v12 }
 0x29d   : > { %1026 = vst [vmem:[#allocation3 + $0x30] sm:$0xff] (!%p12509_p0), %v10883_v3  ;;  %1027 = vst [vmem:[#allocation3 + $0x38] sm:$0xff] (!%p12509_p0), %v10883_v3  ;;  %2199 = vmatpush1.bf16.msra.mxu0 (!%p12509_p0), %v1430_v9  ;;  %2363 = vmatpush1.bf16.msra.mxu1 (!%p12509_p0), %v1432_v10  ;;  %v1454_v19 = vunpack.c.l.s8.bf16 (!%p12509_p0), %v1056_v17  ;;  %v1456_v20 = vunpack.c.l.s8.bf16 (!%p12509_p0), %v1058_v18  ;;  %v1069_v23 = vld [vmem:[#allocation6 + $0xc8] sm:$0xff] (!%p12509_p0)  ;;  %v1071_v24 = vld [vmem:[#allocation6 + $0xd8] sm:$0xff] (!%p12509_p0)  ;;  %v1466_v25 = vunpack.c.h.s8.bf16 (!%p12509_p0), %v1056_v17  ;;  %v1468_v26 = vunpack.c.h.s8.bf16 (!%p12509_p0), %v1058_v18 }
 0x29e   : > { %2200 = vmatprep.subr.bf16.mxu0 (!%p12509_p0), %v1443_v5  ;;  %2364 = vmatprep.subr.bf16.mxu1 (!%p12509_p0), %v1445_v7  ;;  %v1479_v27 = vunpack.c.l.s8.bf16 (!%p12509_p0), %v1069_v23  ;;  %v1481_v28 = vunpack.c.l.s8.bf16 (!%p12509_p0), %v1071_v24  ;;  %v1068_v29 = vld [vmem:[#allocation6 + $0xc0] sm:$0xff] (!%p12509_p0)  ;;  %v1070_v30 = vld [vmem:[#allocation6 + $0xd0] sm:$0xff] (!%p12509_p0)  ;;  %v1029_v31 = vld [vmem:[#allocation4 + $0x8] sm:$0xff] (!%p12509_p0)  ;;  %v1491_v34 = vunpack.c.h.s8.bf16 (!%p12509_p0), %v1069_v23  ;;  %v1493_v35 = vunpack.c.h.s8.bf16 (!%p12509_p0), %v1071_v24 }
 0x29f   : > { %v1478_v32 = vunpack.c.l.s8.bf16 (!%p12509_p0), %v1068_v29  ;;  %v1480_v33 = vunpack.c.l.s8.bf16 (!%p12509_p0), %v1070_v30  ;;  %v11631_v36 = vpack.c.bf16 (!%p12509_p0), %v1029_v31, %v1029_v31  ;;  %v1081_v37 = vld [vmem:[#allocation6 + $0x128] sm:$0xff] (!%p12509_p0)  ;;  %v1083_v38 = vld [vmem:[#allocation6 + $0x138] sm:$0xff] (!%p12509_p0)  ;;  %v1490_v39 = vunpack.c.h.s8.bf16 (!%p12509_p0), %v1068_v29  ;;  %v1080_v43 = vld [vmem:[#allocation6 + $0x120] sm:$0xff] (!%p12509_p0) }
 0x2a0   : > { %v1492_v40 = vunpack.c.h.s8.bf16 (!%p12509_p0), %v1070_v30  ;;  %v1503_v41 = vunpack.c.l.s8.bf16 (!%p12509_p0), %v1081_v37  ;;  %v1505_v42 = vunpack.c.l.s8.bf16 (!%p12509_p0), %v1083_v38  ;;  %v1082_v44 = vld [vmem:[#allocation6 + $0x130] sm:$0xff] (!%p12509_p0)  ;;  %v1502_v45 = vunpack.c.l.s8.bf16 (!%p12509_p0), %v1080_v43  ;;  %v1093_v49 = vld [vmem:[#allocation6 + $0x188] sm:$0xff] (!%p12509_p0)  ;;  %v1095_v50 = vld [vmem:[#allocation6 + $0x198] sm:$0xff] (!%p12509_p0) }
 0x2a1   : > { %2201 = vmatpush1.bf16.msra.mxu0 %v1442_v13  ;;  %2365 = vmatpush1.bf16.msra.mxu1 %v1444_v14  ;;  %v1504_v46 = vunpack.c.l.s8.bf16 %v1082_v44  ;;  %v1515_v47 = vunpack.c.h.s8.bf16 %v1081_v37  ;;  %v1517_v48 = vunpack.c.h.s8.bf16 %v1083_v38  ;;  %v1514_v51 = vunpack.c.h.s8.bf16 %v1080_v43  ;;  %v1092_v55 = vld [vmem:[#allocation6 + $0x180] sm:$0xff]  ;;  %v1094_v56 = vld [vmem:[#allocation6 + $0x190] sm:$0xff]  ;;  %v1105_v61 = vld [vmem:[#allocation6 + $0x1e8] sm:$0xff] }
 0x2a2   : > { %2202 = vmatprep.subr.bf16.mxu0 %v1455_v15  ;;  %2366 = vmatprep.subr.bf16.mxu1 %v1457_v16  ;;  %v1516_v52 = vunpack.c.h.s8.bf16 %v1082_v44  ;;  %v1527_v53 = vunpack.c.l.s8.bf16 %v1093_v49  ;;  %v1529_v54 = vunpack.c.l.s8.bf16 %v1095_v50  ;;  %v1526_v57 = vunpack.c.l.s8.bf16 %v1092_v55  ;;  %v1107_v62 = vld [vmem:[#allocation6 + $0x1f8] sm:$0xff]  ;;  %v1104_v3 = vld [vmem:[#allocation6 + $0x1e0] sm:$0xff]  ;;  %v1106_v4 = vld [vmem:[#allocation6 + $0x1f0] sm:$0xff] }
 0x2a3   : > { %2230 = vmatprep.mubr.bf16.mxu0 %v11631_v36  ;;  %2394 = vmatprep.mubr.bf16.mxu1 %v11631_v36  ;;  %v1528_v58 = vunpack.c.l.s8.bf16 %v1094_v56  ;;  %v1539_v59 = vunpack.c.h.s8.bf16 %v1093_v49  ;;  %v1541_v60 = vunpack.c.h.s8.bf16 %v1095_v50  ;;  %v1538_v63 = vunpack.c.h.s8.bf16 %v1092_v55  ;;  %v1117_v9 = vld [vmem:[#allocation6 + $0x248] sm:$0xff]  ;;  %v1119_v10 = vld [vmem:[#allocation6 + $0x258] sm:$0xff]  ;;  %v1116_v15 = vld [vmem:[#allocation6 + $0x240] sm:$0xff] }
 0x2a4   : > { %v1540_v0 = vunpack.c.h.s8.bf16 %v1094_v56  ;;  %v1551_v1 = vunpack.c.l.s8.bf16 %v1105_v61  ;;  %v1553_v2 = vunpack.c.l.s8.bf16 %v1107_v62  ;;  %v1550_v5 = vunpack.c.l.s8.bf16 %v1104_v3  ;;  %v1118_v16 = vld [vmem:[#allocation6 + $0x250] sm:$0xff]  ;;  %v1028_v38 = vld [vmem:[#allocation4] sm:$0xff]  ;;  %v1031_v44 = vld [vmem:[#allocation4 + $0x18] sm:$0xff] }
 0x2a5   : > { %2203 = vmatpush1.bf16.msra.mxu0 %v1454_v19  ;;  %2367 = vmatpush1.bf16.msra.mxu1 %v1456_v20  ;;  %v1552_v6 = vunpack.c.l.s8.bf16 %v1106_v4  ;;  %v1563_v7 = vunpack.c.h.s8.bf16 %v1105_v61  ;;  %v1565_v8 = vunpack.c.h.s8.bf16 %v1107_v62  ;;  %v1562_v11 = vunpack.c.h.s8.bf16 %v1104_v3  ;;  %v1153_v49 = vld [vmem:[#allocation6 + $0x368] sm:$0xff]  ;;  %v1155_v50 = vld [vmem:[#allocation6 + $0x378] sm:$0xff]  ;;  %v1152_v56 = vld [vmem:[#allocation6 + $0x360] sm:$0xff] }
 0x2a6   : > { %2204 = vmatprep.subr.bf16.mxu0 %v1467_v21  ;;  %2368 = vmatprep.subr.bf16.mxu1 %v1469_v22  ;;  %v1564_v12 = vunpack.c.h.s8.bf16 %v1106_v4  ;;  %v1575_v13 = vunpack.c.l.s8.bf16 %v1117_v9  ;;  %v1577_v14 = vunpack.c.l.s8.bf16 %v1119_v10  ;;  %v1574_v17 = vunpack.c.l.s8.bf16 %v1116_v15  ;;  %v1129_v21 = vld [vmem:[#allocation6 + $0x2a8] sm:$0xff]  ;;  %v1131_v22 = vld [vmem:[#allocation6 + $0x2b8] sm:$0xff]  ;;  %v1164_v4 = vld [vmem:[#allocation6 + $0x3c0] sm:$0xff] }
 0x2a7   : > { %v1576_v18 = vunpack.c.l.s8.bf16 %v1118_v16  ;;  %v1587_v19 = vunpack.c.h.s8.bf16 %v1117_v9  ;;  %v1589_v20 = vunpack.c.h.s8.bf16 %v1119_v10  ;;  %v1586_v23 = vunpack.c.h.s8.bf16 %v1116_v15  ;;  %v1165_v62 = vld [vmem:[#allocation6 + $0x3c8] sm:$0xff] }
 0x2a8   : > { %v1588_v24 = vunpack.c.h.s8.bf16 %v1118_v16  ;;  %v1611_v31 = vunpack.c.h.s8.bf16 %v1129_v21  ;;  %v11635_v43 = vpack.c.bf16 %v1028_v38, %v1028_v38  ;;  %v1649_v55 = vunpack.c.l.s8.bf16 %v1155_v50  ;;  %v1177_v10 = vld [vmem:[#allocation6 + $0x428] sm:$0xff]  ;;  %v1176_v16 = vld [vmem:[#allocation6 + $0x420] sm:$0xff] }
 0x2a9   : > { %2205 = vmatpush1.bf16.msra.mxu0 %v1466_v25  ;;  %2369 = vmatpush1.bf16.msra.mxu1 %v1468_v26  ;;  %v1599_v25 = vunpack.c.l.s8.bf16 %v1129_v21  ;;  %v1601_v26 = vunpack.c.l.s8.bf16 %v1131_v22  ;;  %v1661_v61 = vunpack.c.h.s8.bf16 %v1155_v50 }
 0x2aa   : > { %2206 = vmatprep.subr.bf16.mxu0 %v1479_v27  ;;  %2370 = vmatprep.subr.bf16.mxu1 %v1481_v28  ;;  %v1128_v27 = vld [vmem:[#allocation6 + $0x2a0] sm:$0xff]  ;;  %v1130_v28 = vld [vmem:[#allocation6 + $0x2b0] sm:$0xff] }
 0x2ab   : > { %v1598_v29 = vunpack.c.l.s8.bf16 %v1128_v27  ;;  %v1600_v30 = vunpack.c.l.s8.bf16 %v1130_v28  ;;  %v1612_v37 = vunpack.c.h.s8.bf16 %v1130_v28  ;;  %v1188_v28 = vld [vmem:[#allocation6 + $0x480] sm:$0xff] }
 0x2ad   : > { %2207 = vmatpush1.bf16.msra.mxu0 %v1478_v32  ;;  %2371 = vmatpush1.bf16.msra.mxu1 %v1480_v33  ;;  %v1613_v32 = vunpack.c.h.s8.bf16 %v1131_v22  ;;  %v1141_v33 = vld [vmem:[#allocation6 + $0x308] sm:$0xff] }
 0x2ae   : > { %2208 = vmatprep.subr.bf16.mxu0 %v1491_v34  ;;  %2372 = vmatprep.subr.bf16.mxu1 %v1493_v35  ;;  %v1143_v34 = vld [vmem:[#allocation6 + $0x318] sm:$0xff]  ;;  %v1610_v35 = vunpack.c.h.s8.bf16 %v1128_v27  ;;  %v1189_v22 = vld [vmem:[#allocation6 + $0x488] sm:$0xff] }
 0x2b1   : > { %2209 = vmatpush1.bf16.msra.mxu0 %v1490_v39  ;;  %2373 = vmatpush1.bf16.msra.mxu1 %v1492_v40  ;;  %v1623_v39 = vunpack.c.l.s8.bf16 %v1141_v33  ;;  %v1625_v40 = vunpack.c.l.s8.bf16 %v1143_v34 }
 0x2b2   : > { %2210 = vmatprep.subr.bf16.mxu0 %v1503_v41  ;;  %2374 = vmatprep.subr.bf16.mxu1 %v1505_v42  ;;  %v1140_v41 = vld [vmem:[#allocation6 + $0x300] sm:$0xff]  ;;  %v1142_v42 = vld [vmem:[#allocation6 + $0x310] sm:$0xff] }
 0x2b5   : > { %2211 = vmatpush1.bf16.msra.mxu0 %v1502_v45  ;;  %2375 = vmatpush1.bf16.msra.mxu1 %v1504_v46  ;;  %v1622_v45 = vunpack.c.l.s8.bf16 %v1140_v41  ;;  %v1624_v46 = vunpack.c.l.s8.bf16 %v1142_v42 }
 0x2b6   : > { %2212 = vmatprep.subr.bf16.mxu0 %v1515_v47  ;;  %2376 = vmatprep.subr.bf16.mxu1 %v1517_v48  ;;  %v1635_v47 = vunpack.c.h.s8.bf16 %v1141_v33  ;;  %v1637_v48 = vunpack.c.h.s8.bf16 %v1143_v34  ;;  %v1201_v34 = vld [vmem:[#allocation6 + $0x4e8] sm:$0xff] }
 0x2b9   : > { %2213 = vmatpush1.bf16.msra.mxu0 %v1514_v51  ;;  %2377 = vmatpush1.bf16.msra.mxu1 %v1516_v52  ;;  %v11637_v51 = vpack.c.bf16 %v1031_v44, %v1031_v44  ;;  %v1634_v52 = vunpack.c.h.s8.bf16 %v1140_v41  ;;  %v1200_v41 = vld [vmem:[#allocation6 + $0x4e0] sm:$0xff] }
 0x2ba   : > { %2214 = vmatprep.subr.bf16.mxu0 %v1527_v53  ;;  %2378 = vmatprep.subr.bf16.mxu1 %v1529_v54  ;;  %v1636_v53 = vunpack.c.h.s8.bf16 %v1142_v42  ;;  %v1647_v54 = vunpack.c.l.s8.bf16 %v1153_v49  ;;  %v1202_v42 = vld [vmem:[#allocation6 + $0x4f0] sm:$0xff]  ;;  %v1742_v44 = vunpack.c.l.s8.bf16 %v1200_v41  ;;  %v1754_v50 = vunpack.c.h.s8.bf16 %v1200_v41 }
 0x2bd   : > { %2215 = vmatpush1.bf16.msra.mxu0 %v1526_v57  ;;  %2379 = vmatpush1.bf16.msra.mxu1 %v1528_v58  ;;  %v1154_v57 = vld [vmem:[#allocation6 + $0x370] sm:$0xff]  ;;  %v1646_v58 = vunpack.c.l.s8.bf16 %v1152_v56 }
 0x2be   : > { %2216 = vmatprep.subr.bf16.mxu0 %v1539_v59  ;;  %2380 = vmatprep.subr.bf16.mxu1 %v1541_v60  ;;  %v1648_v59 = vunpack.c.l.s8.bf16 %v1154_v57  ;;  %v1659_v60 = vunpack.c.h.s8.bf16 %v1153_v49  ;;  %v1215_v49 = vld [vmem:[#allocation6 + $0x558] sm:$0xff] }
 0x2c1   : > { %2217 = vmatpush1.bf16.msra.mxu0 %v1538_v63  ;;  %2381 = vmatpush1.bf16.msra.mxu1 %v1540_v0  ;;  %v1167_v63 = vld [vmem:[#allocation6 + $0x3d8] sm:$0xff]  ;;  %v1658_v0 = vunpack.c.h.s8.bf16 %v1152_v56  ;;  %v1214_v56 = vld [vmem:[#allocation6 + $0x550] sm:$0xff] }
 0x2c2   : > { %2218 = vmatprep.subr.bf16.mxu0 %v1551_v1  ;;  %2382 = vmatprep.subr.bf16.mxu1 %v1553_v2  ;;  %v1660_v1 = vunpack.c.h.s8.bf16 %v1154_v57  ;;  %v1671_v2 = vunpack.c.l.s8.bf16 %v1165_v62  ;;  %v1673_v3 = vunpack.c.l.s8.bf16 %v1167_v63  ;;  %v1685_v9 = vunpack.c.h.s8.bf16 %v1167_v63 }
 0x2c5   : > { %2219 = vmatpush1.bf16.msra.mxu0 %v1550_v5  ;;  %2383 = vmatpush1.bf16.msra.mxu1 %v1552_v6  ;;  %v1166_v5 = vld [vmem:[#allocation6 + $0x3d0] sm:$0xff]  ;;  %v1670_v6 = vunpack.c.l.s8.bf16 %v1164_v4 }
 0x2c6   : > { %2220 = vmatprep.subr.bf16.mxu0 %v1563_v7  ;;  %2384 = vmatprep.subr.bf16.mxu1 %v1565_v8  ;;  %v1672_v7 = vunpack.c.l.s8.bf16 %v1166_v5  ;;  %v1683_v8 = vunpack.c.h.s8.bf16 %v1165_v62  ;;  %v1227_v62 = vld [vmem:[#allocation6 + $0x5b8] sm:$0xff] }
 0x2c9   : > { %2221 = vmatpush1.bf16.msra.mxu0 %v1562_v11  ;;  %2385 = vmatpush1.bf16.msra.mxu1 %v1564_v12  ;;  %v1179_v11 = vld [vmem:[#allocation6 + $0x438] sm:$0xff]  ;;  %v1682_v12 = vunpack.c.h.s8.bf16 %v1164_v4  ;;  %v1226_v4 = vld [vmem:[#allocation6 + $0x5b0] sm:$0xff] }
 0x2ca   : > { %2222 = vmatprep.subr.bf16.mxu0 %v1575_v13  ;;  %2386 = vmatprep.subr.bf16.mxu1 %v1577_v14  ;;  %v1684_v13 = vunpack.c.h.s8.bf16 %v1166_v5  ;;  %v1695_v14 = vunpack.c.l.s8.bf16 %v1177_v10  ;;  %v1697_v15 = vunpack.c.l.s8.bf16 %v1179_v11  ;;  %v1709_v21 = vunpack.c.h.s8.bf16 %v1179_v11 }
 0x2cd   : > { %2223 = vmatpush1.bf16.msra.mxu0 %v1574_v17  ;;  %2387 = vmatpush1.bf16.msra.mxu1 %v1576_v18  ;;  %v1178_v17 = vld [vmem:[#allocation6 + $0x430] sm:$0xff]  ;;  %v1694_v18 = vunpack.c.l.s8.bf16 %v1176_v16 }
 0x2ce   : > { %2224 = vmatprep.subr.bf16.mxu0 %v1587_v19  ;;  %2388 = vmatprep.subr.bf16.mxu1 %v1589_v20  ;;  %v1696_v19 = vunpack.c.l.s8.bf16 %v1178_v17  ;;  %v1707_v20 = vunpack.c.h.s8.bf16 %v1177_v10  ;;  %v1239_v10 = vld [vmem:[#allocation6 + $0x618] sm:$0xff] }
 0x2d1   : > { %2225 = vmatpush1.bf16.msra.mxu0 %v1586_v23  ;;  %2389 = vmatpush1.bf16.msra.mxu1 %v1588_v24  ;;  %v1191_v23 = vld [vmem:[#allocation6 + $0x498] sm:$0xff]  ;;  %v1706_v24 = vunpack.c.h.s8.bf16 %v1176_v16  ;;  %v1236_v16 = vld [vmem:[#allocation6 + $0x600] sm:$0xff] }
 0x2d2   : > { %2226 = vmatprep.subr.bf16.mxu0 %v1599_v25  ;;  %2390 = vmatprep.subr.bf16.mxu1 %v1601_v26  ;;  %v1708_v25 = vunpack.c.h.s8.bf16 %v1178_v17  ;;  %v1719_v26 = vunpack.c.l.s8.bf16 %v1189_v22  ;;  %v1721_v27 = vunpack.c.l.s8.bf16 %v1191_v23  ;;  %v1733_v33 = vunpack.c.h.s8.bf16 %v1191_v23  ;;  %v1238_v17 = vld [vmem:[#allocation6 + $0x610] sm:$0xff] }
 0x2d3   : > { %v1829_v23 = vunpack.c.h.s8.bf16 %v1239_v10 }
 0x2d5   : > { %2227 = vmatpush1.bf16.msra.mxu0 %v1598_v29  ;;  %2391 = vmatpush1.bf16.msra.mxu1 %v1600_v30  ;;  %v1190_v29 = vld [vmem:[#allocation6 + $0x490] sm:$0xff]  ;;  %v1718_v30 = vunpack.c.l.s8.bf16 %v1188_v28 }
 0x2d6   : > { %2228 = vmatprep.subr.bf16.mxu0 %v1611_v31  ;;  %2392 = vmatprep.subr.bf16.mxu1 %v1613_v32  ;;  %v1720_v31 = vunpack.c.l.s8.bf16 %v1190_v29  ;;  %v1731_v32 = vunpack.c.h.s8.bf16 %v1189_v22  ;;  %v1732_v38 = vunpack.c.h.s8.bf16 %v1190_v29 }
 0x2d9   : > { %2229 = vmatpush1.bf16.msra.mxu0 %v1610_v35  ;;  %2393 = vmatpush1.bf16.msra.mxu1 %v1612_v37  ;;  %v1203_v35 = vld [vmem:[#allocation6 + $0x4f8] sm:$0xff]  ;;  %v1730_v37 = vunpack.c.h.s8.bf16 %v1188_v28  ;;  %v1828_v28 = vunpack.c.h.s8.bf16 %v1238_v17 }
 0x2da   : > { %2239 = vmatprep.subr.bf16.mxu0 %v1623_v39  ;;  %2403 = vmatprep.subr.bf16.mxu1 %v1625_v40  ;;  %v1743_v39 = vunpack.c.l.s8.bf16 %v1201_v34  ;;  %v1745_v40 = vunpack.c.l.s8.bf16 %v1203_v35 }
 0x2dc   : > { %2231 = vmatmul.mubr.bf16.vlgmr.msra.gmra.mrb[0].mxu0 %v11635_v43  ;;  %2395 = vmatmul.mubr.bf16.vlgmr.msra.gmra.mrb[0].mxu1 %v11635_v43 }
 0x2dd   : > { %2240 = vmatpush1.bf16.msra.mxu0 %v1622_v45  ;;  %2404 = vmatpush1.bf16.msra.mxu1 %v1624_v46  ;;  %v1744_v45 = vunpack.c.l.s8.bf16 %v1202_v42  ;;  %v1755_v46 = vunpack.c.h.s8.bf16 %v1201_v34 }
 0x2de   : > { %2241 = vmatprep.subr.bf16.mxu0 %v1635_v47  ;;  %2405 = vmatprep.subr.bf16.mxu1 %v1637_v48  ;;  %v1757_v47 = vunpack.c.h.s8.bf16 %v1203_v35  ;;  %v1213_v48 = vld [vmem:[#allocation6 + $0x548] sm:$0xff] }
 0x2df   : > { %2271 = vmatprep.mubr.bf16.mxu0 %v11637_v51  ;;  %2435 = vmatprep.mubr.bf16.mxu1 %v11637_v51 }
 0x2e1   : > { %2242 = vmatpush1.bf16.msra.mxu0 %v1634_v52  ;;  %2406 = vmatpush1.bf16.msra.mxu1 %v1636_v53  ;;  %v1756_v52 = vunpack.c.h.s8.bf16 %v1202_v42  ;;  %v1767_v53 = vunpack.c.l.s8.bf16 %v1213_v48 }
 0x2e2   : > { %2243 = vmatprep.subr.bf16.mxu0 %v1647_v54  ;;  %2407 = vmatprep.subr.bf16.mxu1 %v1649_v55  ;;  %v1769_v54 = vunpack.c.l.s8.bf16 %v1215_v49  ;;  %v1212_v55 = vld [vmem:[#allocation6 + $0x540] sm:$0xff] }
 0x2e3   : > { %v1766_v57 = vunpack.c.l.s8.bf16 %v1212_v55  ;;  %v1778_v63 = vunpack.c.h.s8.bf16 %v1212_v55 }
 0x2e5   : > { %2244 = vmatpush1.bf16.msra.mxu0 %v1646_v58  ;;  %2408 = vmatpush1.bf16.msra.mxu1 %v1648_v59  ;;  %v1768_v58 = vunpack.c.l.s8.bf16 %v1214_v56  ;;  %v1779_v59 = vunpack.c.h.s8.bf16 %v1213_v48 }
 0x2e6   : > { %2245 = vmatprep.subr.bf16.mxu0 %v1659_v60  ;;  %2409 = vmatprep.subr.bf16.mxu1 %v1661_v61  ;;  %v1781_v60 = vunpack.c.h.s8.bf16 %v1215_v49  ;;  %v1225_v61 = vld [vmem:[#allocation6 + $0x5a8] sm:$0xff] }
 0x2e9   : > { %2246 = vmatpush1.bf16.msra.mxu0 %v1658_v0  ;;  %2410 = vmatpush1.bf16.msra.mxu1 %v1660_v1  ;;  %v1780_v0 = vunpack.c.h.s8.bf16 %v1214_v56  ;;  %v1791_v1 = vunpack.c.l.s8.bf16 %v1225_v61 }
 0x2ea   : > { %2247 = vmatprep.subr.bf16.mxu0 %v1671_v2  ;;  %2411 = vmatprep.subr.bf16.mxu1 %v1673_v3  ;;  %v1793_v2 = vunpack.c.l.s8.bf16 %v1227_v62  ;;  %v1224_v3 = vld [vmem:[#allocation6 + $0x5a0] sm:$0xff] }
 0x2eb   : > { %v1790_v5 = vunpack.c.l.s8.bf16 %v1224_v3  ;;  %v1802_v11 = vunpack.c.h.s8.bf16 %v1224_v3 }
 0x2ed   : > { %2248 = vmatpush1.bf16.msra.mxu0 %v1670_v6  ;;  %2412 = vmatpush1.bf16.msra.mxu1 %v1672_v7  ;;  %v1792_v6 = vunpack.c.l.s8.bf16 %v1226_v4  ;;  %v1803_v7 = vunpack.c.h.s8.bf16 %v1225_v61 }
 0x2ee   : > { %2249 = vmatprep.subr.bf16.mxu0 %v1683_v8  ;;  %2413 = vmatprep.subr.bf16.mxu1 %v1685_v9  ;;  %v1805_v8 = vunpack.c.h.s8.bf16 %v1227_v62  ;;  %v1237_v9 = vld [vmem:[#allocation6 + $0x608] sm:$0xff] }
 0x2ef   : > { %v1827_v22 = vunpack.c.h.s8.bf16 %v1237_v9 }
 0x2f1   : > { %2250 = vmatpush1.bf16.msra.mxu0 %v1682_v12  ;;  %2414 = vmatpush1.bf16.msra.mxu1 %v1684_v13  ;;  %v1804_v12 = vunpack.c.h.s8.bf16 %v1226_v4  ;;  %v1030_v13 = vld [vmem:[#allocation4 + $0x10] sm:$0xff] }
 0x2f2   : > { %2251 = vmatprep.subr.bf16.mxu0 %v1695_v14  ;;  %2415 = vmatprep.subr.bf16.mxu1 %v1697_v15  ;;  %v1815_v14 = vunpack.c.l.s8.bf16 %v1237_v9  ;;  %v1817_v15 = vunpack.c.l.s8.bf16 %v1239_v10 }
 0x2f5   : > { %2252 = vmatpush1.bf16.msra.mxu0 %v1694_v18  ;;  %2416 = vmatpush1.bf16.msra.mxu1 %v1696_v19  ;;  %v11643_v18 = vpack.c.bf16 %v1030_v13, %v1030_v13  ;;  %v1033_v19 = vld [vmem:[#allocation4 + $0x28] sm:$0xff]  ;;  %v1299_v13 = vld [vmem:[#allocation6 + $0x7f8] sm:$0xff] }
 0x2f6   : > { %2253 = vmatprep.subr.bf16.mxu0 %v1707_v20  ;;  %2417 = vmatprep.subr.bf16.mxu1 %v1709_v21  ;;  %v1814_v20 = vunpack.c.l.s8.bf16 %v1236_v16  ;;  %v1816_v21 = vunpack.c.l.s8.bf16 %v1238_v17  ;;  %v1937_v17 = vunpack.c.l.s8.bf16 %v1299_v13 }
 0x2f9   : > { %2254 = vmatpush1.bf16.msra.mxu0 %v1706_v24  ;;  %2418 = vmatpush1.bf16.msra.mxu1 %v1708_v25  ;;  %v1249_v24 = vld [vmem:[#allocation6 + $0x668] sm:$0xff]  ;;  %v1251_v25 = vld [vmem:[#allocation6 + $0x678] sm:$0xff] }
 0x2fa   : > { %2255 = vmatprep.subr.bf16.mxu0 %v1719_v26  ;;  %2419 = vmatprep.subr.bf16.mxu1 %v1721_v27  ;;  %v11645_v26 = vpack.c.bf16 %v1033_v19, %v1033_v19  ;;  %v1826_v27 = vunpack.c.h.s8.bf16 %v1236_v16  ;;  %v1839_v29 = vunpack.c.l.s8.bf16 %v1249_v24  ;;  %v1851_v35 = vunpack.c.h.s8.bf16 %v1249_v24  ;;  %v1296_v19 = vld [vmem:[#allocation6 + $0x7e0] sm:$0xff] }
 0x2fb   : > { %v1949_v24 = vunpack.c.h.s8.bf16 %v1299_v13 }
 0x2fd   : > { %2256 = vmatpush1.bf16.msra.mxu0 %v1718_v30  ;;  %2420 = vmatpush1.bf16.msra.mxu1 %v1720_v31  ;;  %v1841_v30 = vunpack.c.l.s8.bf16 %v1251_v25  ;;  %v1248_v31 = vld [vmem:[#allocation6 + $0x660] sm:$0xff] }
 0x2fe   : > { %2257 = vmatprep.subr.bf16.mxu0 %v1731_v32  ;;  %2421 = vmatprep.subr.bf16.mxu1 %v1733_v33  ;;  %v1250_v32 = vld [vmem:[#allocation6 + $0x670] sm:$0xff]  ;;  %v1838_v33 = vunpack.c.l.s8.bf16 %v1248_v31 }
 0x2ff   : > { %v1840_v34 = vunpack.c.l.s8.bf16 %v1250_v32  ;;  %v1852_v41 = vunpack.c.h.s8.bf16 %v1250_v32  ;;  %v1308_v32 = vld [vmem:[#allocation6 + $0x840] sm:$0xff] }
 0x301   : > { %2258 = vmatpush1.bf16.msra.mxu0 %v1730_v37  ;;  %2422 = vmatpush1.bf16.msra.mxu1 %v1732_v38  ;;  %v1853_v37 = vunpack.c.h.s8.bf16 %v1251_v25  ;;  %v1261_v38 = vld [vmem:[#allocation6 + $0x6c8] sm:$0xff] }
 0x302   : > { %2259 = vmatprep.subr.bf16.mxu0 %v1743_v39  ;;  %2423 = vmatprep.subr.bf16.mxu1 %v1745_v40  ;;  %v1263_v39 = vld [vmem:[#allocation6 + $0x6d8] sm:$0xff]  ;;  %v1850_v40 = vunpack.c.h.s8.bf16 %v1248_v31  ;;  %v1863_v42 = vunpack.c.l.s8.bf16 %v1261_v38  ;;  %v1875_v49 = vunpack.c.h.s8.bf16 %v1261_v38  ;;  %v1309_v25 = vld [vmem:[#allocation6 + $0x848] sm:$0xff] }
 0x305   : > { %2260 = vmatpush1.bf16.msra.mxu0 %v1742_v44  ;;  %2424 = vmatpush1.bf16.msra.mxu1 %v1744_v45  ;;  %v1865_v44 = vunpack.c.l.s8.bf16 %v1263_v39  ;;  %v1260_v45 = vld [vmem:[#allocation6 + $0x6c0] sm:$0xff] }
 0x306   : > { %2261 = vmatprep.subr.bf16.mxu0 %v1755_v46  ;;  %2425 = vmatprep.subr.bf16.mxu1 %v1757_v47  ;;  %v1262_v46 = vld [vmem:[#allocation6 + $0x6d0] sm:$0xff]  ;;  %v1862_v47 = vunpack.c.l.s8.bf16 %v1260_v45 }
 0x307   : > { %v1864_v48 = vunpack.c.l.s8.bf16 %v1262_v46  ;;  %v1876_v55 = vunpack.c.h.s8.bf16 %v1262_v46  ;;  %v1320_v46 = vld [vmem:[#allocation6 + $0x8a0] sm:$0xff] }
 0x309   : > { %2262 = vmatpush1.bf16.msra.mxu0 %v1754_v50  ;;  %2426 = vmatpush1.bf16.msra.mxu1 %v1756_v52  ;;  %v1877_v50 = vunpack.c.h.s8.bf16 %v1263_v39  ;;  %v1273_v52 = vld [vmem:[#allocation6 + $0x728] sm:$0xff] }
 0x30a   : > { %2263 = vmatprep.subr.bf16.mxu0 %v1767_v53  ;;  %2427 = vmatprep.subr.bf16.mxu1 %v1769_v54  ;;  %v1275_v53 = vld [vmem:[#allocation6 + $0x738] sm:$0xff]  ;;  %v1874_v54 = vunpack.c.h.s8.bf16 %v1260_v45  ;;  %v1887_v56 = vunpack.c.l.s8.bf16 %v1273_v52  ;;  %v1899_v62 = vunpack.c.h.s8.bf16 %v1273_v52  ;;  %v1321_v39 = vld [vmem:[#allocation6 + $0x8a8] sm:$0xff] }
 0x30d   : > { %2264 = vmatpush1.bf16.msra.mxu0 %v1766_v57  ;;  %2428 = vmatpush1.bf16.msra.mxu1 %v1768_v58  ;;  %v1889_v57 = vunpack.c.l.s8.bf16 %v1275_v53  ;;  %v1272_v58 = vld [vmem:[#allocation6 + $0x720] sm:$0xff] }
 0x30e   : > { %2265 = vmatprep.subr.bf16.mxu0 %v1779_v59  ;;  %2429 = vmatprep.subr.bf16.mxu1 %v1781_v60  ;;  %v1274_v59 = vld [vmem:[#allocation6 + $0x730] sm:$0xff]  ;;  %v1886_v60 = vunpack.c.l.s8.bf16 %v1272_v58 }
 0x30f   : > { %v1888_v61 = vunpack.c.l.s8.bf16 %v1274_v59  ;;  %v1900_v3 = vunpack.c.h.s8.bf16 %v1274_v59 }
 0x311   : > { %2266 = vmatpush1.bf16.msra.mxu0 %v1778_v63  ;;  %2430 = vmatpush1.bf16.msra.mxu1 %v1780_v0  ;;  %v1901_v63 = vunpack.c.h.s8.bf16 %v1275_v53  ;;  %v1285_v0 = vld [vmem:[#allocation6 + $0x788] sm:$0xff] }
 0x312   : > { %2267 = vmatprep.subr.bf16.mxu0 %v1791_v1  ;;  %2431 = vmatprep.subr.bf16.mxu1 %v1793_v2  ;;  %v1287_v1 = vld [vmem:[#allocation6 + $0x798] sm:$0xff]  ;;  %v1898_v2 = vunpack.c.h.s8.bf16 %v1272_v58  ;;  %v1911_v4 = vunpack.c.l.s8.bf16 %v1285_v0  ;;  %v1923_v10 = vunpack.c.h.s8.bf16 %v1285_v0  ;;  %v1333_v53 = vld [vmem:[#allocation6 + $0x908] sm:$0xff] }
 0x313   : > { %v2007_v58 = vunpack.c.l.s8.bf16 %v1333_v53 }
 0x315   : > { %2268 = vmatpush1.bf16.msra.mxu0 %v1790_v5  ;;  %2432 = vmatpush1.bf16.msra.mxu1 %v1792_v6  ;;  %v1913_v5 = vunpack.c.l.s8.bf16 %v1287_v1  ;;  %v1284_v6 = vld [vmem:[#allocation6 + $0x780] sm:$0xff] }
 0x316   : > { %2269 = vmatprep.subr.bf16.mxu0 %v1803_v7  ;;  %2433 = vmatprep.subr.bf16.mxu1 %v1805_v8  ;;  %v1286_v7 = vld [vmem:[#allocation6 + $0x790] sm:$0xff]  ;;  %v1910_v8 = vunpack.c.l.s8.bf16 %v1284_v6 }
 0x317   : > { %v1912_v9 = vunpack.c.l.s8.bf16 %v1286_v7 }
 0x319   : > { %2270 = vmatpush1.bf16.msra.mxu0 %v1802_v11  ;;  %2434 = vmatpush1.bf16.msra.mxu1 %v1804_v12  ;;  %v1925_v11 = vunpack.c.h.s8.bf16 %v1287_v1  ;;  %v1297_v12 = vld [vmem:[#allocation6 + $0x7e8] sm:$0xff] }
 0x31a   : > { %2280 = vmatprep.subr.bf16.mxu0 %v1815_v14  ;;  %2444 = vmatprep.subr.bf16.mxu1 %v1817_v15  ;;  %v1922_v14 = vunpack.c.h.s8.bf16 %v1284_v6  ;;  %v1924_v15 = vunpack.c.h.s8.bf16 %v1286_v7  ;;  %v1935_v16 = vunpack.c.l.s8.bf16 %v1297_v12 }
 0x31c   : > { %2272 = vmatmul.mubr.bf16.vlgmr.msra.gmra.mrb[0].mxu0 %v11643_v18  ;;  %2436 = vmatmul.mubr.bf16.vlgmr.msra.gmra.mrb[0].mxu1 %v11643_v18 }
 0x31d   : > { %2281 = vmatpush1.bf16.msra.mxu0 %v1814_v20  ;;  %2445 = vmatpush1.bf16.msra.mxu1 %v1816_v21  ;;  %v1298_v20 = vld [vmem:[#allocation6 + $0x7f0] sm:$0xff]  ;;  %v1934_v21 = vunpack.c.l.s8.bf16 %v1296_v19 }
 0x31e   : > { %2282 = vmatprep.subr.bf16.mxu0 %v1827_v22  ;;  %2446 = vmatprep.subr.bf16.mxu1 %v1829_v23  ;;  %v1936_v22 = vunpack.c.l.s8.bf16 %v1298_v20  ;;  %v1947_v23 = vunpack.c.h.s8.bf16 %v1297_v12  ;;  %v1346_v12 = vld [vmem:[#allocation6 + $0x970] sm:$0xff] }
 0x31f   : > { %2312 = vmatprep.mubr.bf16.mxu0 %v11645_v26  ;;  %2476 = vmatprep.mubr.bf16.mxu1 %v11645_v26 }
 0x321   : > { %2283 = vmatpush1.bf16.msra.mxu0 %v1826_v27  ;;  %2447 = vmatpush1.bf16.msra.mxu1 %v1828_v28  ;;  %v1311_v27 = vld [vmem:[#allocation6 + $0x858] sm:$0xff]  ;;  %v1946_v28 = vunpack.c.h.s8.bf16 %v1296_v19 }
 0x322   : > { %2284 = vmatprep.subr.bf16.mxu0 %v1839_v29  ;;  %2448 = vmatprep.subr.bf16.mxu1 %v1841_v30  ;;  %v1948_v29 = vunpack.c.h.s8.bf16 %v1298_v20  ;;  %v1959_v30 = vunpack.c.l.s8.bf16 %v1309_v25  ;;  %v1961_v31 = vunpack.c.l.s8.bf16 %v1311_v27  ;;  %v1973_v38 = vunpack.c.h.s8.bf16 %v1311_v27  ;;  %v1359_v19 = vld [vmem:[#allocation6 + $0x9d8] sm:$0xff] }
 0x325   : > { %2285 = vmatpush1.bf16.msra.mxu0 %v1838_v33  ;;  %2449 = vmatpush1.bf16.msra.mxu1 %v1840_v34  ;;  %v1310_v33 = vld [vmem:[#allocation6 + $0x850] sm:$0xff]  ;;  %v1958_v34 = vunpack.c.l.s8.bf16 %v1308_v32 }
 0x326   : > { %2286 = vmatprep.subr.bf16.mxu0 %v1851_v35  ;;  %2450 = vmatprep.subr.bf16.mxu1 %v1853_v37  ;;  %v1960_v35 = vunpack.c.l.s8.bf16 %v1310_v33  ;;  %v1971_v37 = vunpack.c.h.s8.bf16 %v1309_v25  ;;  %v1358_v25 = vld [vmem:[#allocation6 + $0x9d0] sm:$0xff] }
 0x329   : > { %2287 = vmatpush1.bf16.msra.mxu0 %v1850_v40  ;;  %2451 = vmatpush1.bf16.msra.mxu1 %v1852_v41  ;;  %v1323_v40 = vld [vmem:[#allocation6 + $0x8b8] sm:$0xff]  ;;  %v1970_v41 = vunpack.c.h.s8.bf16 %v1308_v32 }
 0x32a   : > { %2288 = vmatprep.subr.bf16.mxu0 %v1863_v42  ;;  %2452 = vmatprep.subr.bf16.mxu1 %v1865_v44  ;;  %v1972_v42 = vunpack.c.h.s8.bf16 %v1310_v33  ;;  %v1983_v44 = vunpack.c.l.s8.bf16 %v1321_v39  ;;  %v1985_v45 = vunpack.c.l.s8.bf16 %v1323_v40  ;;  %v1997_v52 = vunpack.c.h.s8.bf16 %v1323_v40  ;;  %v1371_v32 = vld [vmem:[#allocation6 + $0xa38] sm:$0xff] }
 0x32d   : > { %2289 = vmatpush1.bf16.msra.mxu0 %v1862_v47  ;;  %2453 = vmatpush1.bf16.msra.mxu1 %v1864_v48  ;;  %v1322_v47 = vld [vmem:[#allocation6 + $0x8b0] sm:$0xff]  ;;  %v1982_v48 = vunpack.c.l.s8.bf16 %v1320_v46 }
 0x32e   : > { %2290 = vmatprep.subr.bf16.mxu0 %v1875_v49  ;;  %2454 = vmatprep.subr.bf16.mxu1 %v1877_v50  ;;  %v1984_v49 = vunpack.c.l.s8.bf16 %v1322_v47  ;;  %v1995_v50 = vunpack.c.h.s8.bf16 %v1321_v39  ;;  %v1370_v39 = vld [vmem:[#allocation6 + $0xa30] sm:$0xff] }
 0x331   : > { %2291 = vmatpush1.bf16.msra.mxu0 %v1874_v54  ;;  %2455 = vmatpush1.bf16.msra.mxu1 %v1876_v55  ;;  %v1335_v54 = vld [vmem:[#allocation6 + $0x918] sm:$0xff]  ;;  %v1994_v55 = vunpack.c.h.s8.bf16 %v1320_v46 }
 0x332   : > { %2292 = vmatprep.subr.bf16.mxu0 %v1887_v56  ;;  %2456 = vmatprep.subr.bf16.mxu1 %v1889_v57  ;;  %v1996_v56 = vunpack.c.h.s8.bf16 %v1322_v47  ;;  %v1032_v57 = vld [vmem:[#allocation4 + $0x20] sm:$0xff]  ;;  %v2009_v59 = vunpack.c.l.s8.bf16 %v1335_v54  ;;  %v1383_v46 = vld [vmem:[#allocation6 + $0xa98] sm:$0xff] }
 0x335   : > { %2293 = vmatpush1.bf16.msra.mxu0 %v1886_v60  ;;  %2457 = vmatpush1.bf16.msra.mxu1 %v1888_v61  ;;  %v1332_v60 = vld [vmem:[#allocation6 + $0x900] sm:$0xff]  ;;  %v1334_v61 = vld [vmem:[#allocation6 + $0x910] sm:$0xff] }
 0x336   : > { %2294 = vmatprep.subr.bf16.mxu0 %v1899_v62  ;;  %2458 = vmatprep.subr.bf16.mxu1 %v1901_v63  ;;  %v11651_v62 = vpack.c.bf16 %v1032_v57, %v1032_v57  ;;  %v1035_v63 = vld [vmem:[#allocation4 + $0x38] sm:$0xff]  ;;  %v2006_v0 = vunpack.c.l.s8.bf16 %v1332_v60  ;;  %v2008_v1 = vunpack.c.l.s8.bf16 %v1334_v61  ;;  %v2018_v7 = vunpack.c.h.s8.bf16 %v1332_v60 }
 0x337   : > { %v11653_v6 = vpack.c.bf16 %v1035_v63, %v1035_v63  ;;  %v2117_v57 = vunpack.c.h.s8.bf16 %v1383_v46 }
 0x339   : > { %2295 = vmatpush1.bf16.msra.mxu0 %v1898_v2  ;;  %2459 = vmatpush1.bf16.msra.mxu1 %v1900_v3  ;;  %v2019_v2 = vunpack.c.h.s8.bf16 %v1333_v53  ;;  %v2021_v3 = vunpack.c.h.s8.bf16 %v1335_v54  ;;  %v1382_v53 = vld [vmem:[#allocation6 + $0xa90] sm:$0xff] }
 0x33a   : > { %2296 = vmatprep.subr.bf16.mxu0 %v1911_v4  ;;  %2460 = vmatprep.subr.bf16.mxu1 %v1913_v5  ;;  %v1345_v4 = vld [vmem:[#allocation6 + $0x968] sm:$0xff]  ;;  %v1347_v5 = vld [vmem:[#allocation6 + $0x978] sm:$0xff] }
 0x33d   : > { %2297 = vmatpush1.bf16.msra.mxu0 %v1910_v8  ;;  %2461 = vmatpush1.bf16.msra.mxu1 %v1912_v9  ;;  %v2020_v8 = vunpack.c.h.s8.bf16 %v1334_v61  ;;  %v2031_v9 = vunpack.c.l.s8.bf16 %v1345_v4  ;;  %v2116_v61 = vunpack.c.h.s8.bf16 %v1382_v53 }
 0x33e   : > { %2298 = vmatprep.subr.bf16.mxu0 %v1923_v10  ;;  %2462 = vmatprep.subr.bf16.mxu1 %v1925_v11  ;;  %v2033_v10 = vunpack.c.l.s8.bf16 %v1347_v5  ;;  %v1344_v11 = vld [vmem:[#allocation6 + $0x960] sm:$0xff] }
 0x33f   : > { %v2030_v13 = vunpack.c.l.s8.bf16 %v1344_v11  ;;  %v2042_v20 = vunpack.c.h.s8.bf16 %v1344_v11 }
 0x341   : > { %2299 = vmatpush1.bf16.msra.mxu0 %v1922_v14  ;;  %2463 = vmatpush1.bf16.msra.mxu1 %v1924_v15  ;;  %v2032_v14 = vunpack.c.l.s8.bf16 %v1346_v12  ;;  %v2043_v15 = vunpack.c.h.s8.bf16 %v1345_v4 }
 0x342   : > { %2300 = vmatprep.subr.bf16.mxu0 %v1935_v16  ;;  %2464 = vmatprep.subr.bf16.mxu1 %v1937_v17  ;;  %v2045_v16 = vunpack.c.h.s8.bf16 %v1347_v5  ;;  %v1357_v17 = vld [vmem:[#allocation6 + $0x9c8] sm:$0xff] }
 0x345   : > { %2301 = vmatpush1.bf16.msra.mxu0 %v1934_v21  ;;  %2465 = vmatpush1.bf16.msra.mxu1 %v1936_v22  ;;  %v2044_v21 = vunpack.c.h.s8.bf16 %v1346_v12  ;;  %v2055_v22 = vunpack.c.l.s8.bf16 %v1357_v17 }
 0x346   : > { %2302 = vmatprep.subr.bf16.mxu0 %v1947_v23  ;;  %2466 = vmatprep.subr.bf16.mxu1 %v1949_v24  ;;  %v2057_v23 = vunpack.c.l.s8.bf16 %v1359_v19  ;;  %v1356_v24 = vld [vmem:[#allocation6 + $0x9c0] sm:$0xff] }
 0x347   : > { %v2054_v27 = vunpack.c.l.s8.bf16 %v1356_v24  ;;  %v2066_v33 = vunpack.c.h.s8.bf16 %v1356_v24 }
 0x349   : > { %2303 = vmatpush1.bf16.msra.mxu0 %v1946_v28  ;;  %2467 = vmatpush1.bf16.msra.mxu1 %v1948_v29  ;;  %v2056_v28 = vunpack.c.l.s8.bf16 %v1358_v25  ;;  %v2067_v29 = vunpack.c.h.s8.bf16 %v1357_v17 }
 0x34a   : > { %2304 = vmatprep.subr.bf16.mxu0 %v1959_v30  ;;  %2468 = vmatprep.subr.bf16.mxu1 %v1961_v31  ;;  %v2069_v30 = vunpack.c.h.s8.bf16 %v1359_v19  ;;  %v1369_v31 = vld [vmem:[#allocation6 + $0xa28] sm:$0xff] }
 0x34d   : > { %2305 = vmatpush1.bf16.msra.mxu0 %v1958_v34  ;;  %2469 = vmatpush1.bf16.msra.mxu1 %v1960_v35  ;;  %v2068_v34 = vunpack.c.h.s8.bf16 %v1358_v25  ;;  %v2079_v35 = vunpack.c.l.s8.bf16 %v1369_v31 }
 0x34e   : > { %2306 = vmatprep.subr.bf16.mxu0 %v1971_v37  ;;  %2470 = vmatprep.subr.bf16.mxu1 %v1973_v38  ;;  %v2081_v37 = vunpack.c.l.s8.bf16 %v1371_v32  ;;  %v1368_v38 = vld [vmem:[#allocation6 + $0xa20] sm:$0xff] }
 0x34f   : > { %v2078_v40 = vunpack.c.l.s8.bf16 %v1368_v38  ;;  %v2090_v47 = vunpack.c.h.s8.bf16 %v1368_v38 }
 0x351   : > { %2307 = vmatpush1.bf16.msra.mxu0 %v1970_v41  ;;  %2471 = vmatpush1.bf16.msra.mxu1 %v1972_v42  ;;  %v2080_v41 = vunpack.c.l.s8.bf16 %v1370_v39  ;;  %v2091_v42 = vunpack.c.h.s8.bf16 %v1369_v31 }
 0x352   : > { %2308 = vmatprep.subr.bf16.mxu0 %v1983_v44  ;;  %2472 = vmatprep.subr.bf16.mxu1 %v1985_v45  ;;  %v2093_v44 = vunpack.c.h.s8.bf16 %v1371_v32  ;;  %v1381_v45 = vld [vmem:[#allocation6 + $0xa88] sm:$0xff] }
 0x355   : > { %2309 = vmatpush1.bf16.msra.mxu0 %v1982_v48  ;;  %2473 = vmatpush1.bf16.msra.mxu1 %v1984_v49  ;;  %v2092_v48 = vunpack.c.h.s8.bf16 %v1370_v39  ;;  %v2103_v49 = vunpack.c.l.s8.bf16 %v1381_v45  ;;  %v1034_v39 = vld [vmem:[#allocation4 + $0x30] sm:$0xff] }
 0x356   : > { %2310 = vmatprep.subr.bf16.mxu0 %v1995_v50  ;;  %2474 = vmatprep.subr.bf16.mxu1 %v1997_v52  ;;  %v2105_v50 = vunpack.c.l.s8.bf16 %v1383_v46  ;;  %v1380_v52 = vld [vmem:[#allocation6 + $0xa80] sm:$0xff] }
 0x357   : > { %v2102_v54 = vunpack.c.l.s8.bf16 %v1380_v52  ;;  %v2114_v60 = vunpack.c.h.s8.bf16 %v1380_v52  ;;  %v1063_v52 = vld [vmem:[#allocation6 + $0x98] sm:$0xff] }
 0x359   : > { %2311 = vmatpush1.bf16.msra.mxu0 %v1994_v55  ;;  %2475 = vmatpush1.bf16.msra.mxu1 %v1996_v56  ;;  %v2104_v55 = vunpack.c.l.s8.bf16 %v1382_v53  ;;  %v2115_v56 = vunpack.c.h.s8.bf16 %v1381_v45  ;;  %v11659_v45 = vpack.c.bf16 %v1034_v39, %v1034_v39 }
 0x35a   : > { %2321 = vmatprep.subr.bf16.mxu0 %v2007_v58  ;;  %2485 = vmatprep.subr.bf16.mxu1 %v2009_v59  ;;  %v1393_v58 = vld [vmem:[#allocation6 + $0xae8] sm:$0xff]  ;;  %v1395_v59 = vld [vmem:[#allocation6 + $0xaf8] sm:$0xff] }
 0x35b   : > { %v2127_v63 = vunpack.c.l.s8.bf16 %v1393_v58  ;;  %v2139_v5 = vunpack.c.h.s8.bf16 %v1393_v58  ;;  %v1062_v58 = vld [vmem:[#allocation6 + $0x90] sm:$0xff] }
 0x35c   : > { %2313 = vmatmul.mubr.bf16.vlgmr.msra.gmra.mrb[0].mxu0 %v11651_v62  ;;  %2477 = vmatmul.mubr.bf16.vlgmr.msra.gmra.mrb[0].mxu1 %v11651_v62 }
 0x35d   : > { %2322 = vmatpush1.bf16.msra.mxu0 %v2006_v0  ;;  %2486 = vmatpush1.bf16.msra.mxu1 %v2008_v1  ;;  %v2129_v0 = vunpack.c.l.s8.bf16 %v1395_v59  ;;  %v1392_v1 = vld [vmem:[#allocation6 + $0xae0] sm:$0xff] }
 0x35e   : > { %2323 = vmatprep.subr.bf16.mxu0 %v2019_v2  ;;  %2487 = vmatprep.subr.bf16.mxu1 %v2021_v3  ;;  %v1394_v2 = vld [vmem:[#allocation6 + $0xaf0] sm:$0xff]  ;;  %v2126_v3 = vunpack.c.l.s8.bf16 %v1392_v1 }
 0x35f   : > { %2353 = vmatprep.mubr.bf16.mxu0 %v11653_v6  ;;  %2517 = vmatprep.mubr.bf16.mxu1 %v11653_v6  ;;  %v2128_v4 = vunpack.c.l.s8.bf16 %v1394_v2  ;;  %v2140_v11 = vunpack.c.h.s8.bf16 %v1394_v2 }
 0x361   : > { %2324 = vmatpush1.bf16.msra.mxu0 %v2018_v7  ;;  %2488 = vmatpush1.bf16.msra.mxu1 %v2020_v8  ;;  %v2141_v7 = vunpack.c.h.s8.bf16 %v1395_v59  ;;  %v1405_v8 = vld [vmem:[#allocation6 + $0xb48] sm:$0xff] }
 0x362   : > { %2325 = vmatprep.subr.bf16.mxu0 %v2031_v9  ;;  %2489 = vmatprep.subr.bf16.mxu1 %v2033_v10  ;;  %v1407_v9 = vld [vmem:[#allocation6 + $0xb58] sm:$0xff]  ;;  %v2138_v10 = vunpack.c.h.s8.bf16 %v1392_v1  ;;  %v2151_v12 = vunpack.c.l.s8.bf16 %v1405_v8  ;;  %v2163_v19 = vunpack.c.h.s8.bf16 %v1405_v8  ;;  %v1074_v8 = vld [vmem:[#allocation6 + $0xf0] sm:$0xff] }
 0x363   : > { %v1075_v1 = vld [vmem:[#allocation6 + $0xf8] sm:$0xff] }
 0x365   : > { %2326 = vmatpush1.bf16.msra.mxu0 %v2030_v13  ;;  %2490 = vmatpush1.bf16.msra.mxu1 %v2032_v14  ;;  %v2153_v13 = vunpack.c.l.s8.bf16 %v1407_v9  ;;  %v1404_v14 = vld [vmem:[#allocation6 + $0xb40] sm:$0xff] }
 0x366   : > { %2327 = vmatprep.subr.bf16.mxu0 %v2043_v15  ;;  %2491 = vmatprep.subr.bf16.mxu1 %v2045_v16  ;;  %v1406_v15 = vld [vmem:[#allocation6 + $0xb50] sm:$0xff]  ;;  %v2150_v16 = vunpack.c.l.s8.bf16 %v1404_v14 }
 0x367   : > { %v2152_v17 = vunpack.c.l.s8.bf16 %v1406_v15  ;;  %v2164_v24 = vunpack.c.h.s8.bf16 %v1406_v15 }
 0x369   : > { %2328 = vmatpush1.bf16.msra.mxu0 %v2042_v20  ;;  %2492 = vmatpush1.bf16.msra.mxu1 %v2044_v21  ;;  %v2165_v20 = vunpack.c.h.s8.bf16 %v1407_v9  ;;  %v1417_v21 = vld [vmem:[#allocation6 + $0xba8] sm:$0xff] }
 0x36a   : > { %2329 = vmatprep.subr.bf16.mxu0 %v2055_v22  ;;  %2493 = vmatprep.subr.bf16.mxu1 %v2057_v23  ;;  %v1419_v22 = vld [vmem:[#allocation6 + $0xbb8] sm:$0xff]  ;;  %v2162_v23 = vunpack.c.h.s8.bf16 %v1404_v14  ;;  %v2175_v25 = vunpack.c.l.s8.bf16 %v1417_v21  ;;  %v2187_v32 = vunpack.c.h.s8.bf16 %v1417_v21  ;;  %v1086_v21 = vld [vmem:[#allocation6 + $0x150] sm:$0xff] }
 0x36b   : > { %v1087_v14 = vld [vmem:[#allocation6 + $0x158] sm:$0xff] }
 0x36d   : > { %2330 = vmatpush1.bf16.msra.mxu0 %v2054_v27  ;;  %2494 = vmatpush1.bf16.msra.mxu1 %v2056_v28  ;;  %v2177_v27 = vunpack.c.l.s8.bf16 %v1419_v22  ;;  %v1416_v28 = vld [vmem:[#allocation6 + $0xba0] sm:$0xff] }
 0x36e   : > { %2331 = vmatprep.subr.bf16.mxu0 %v2067_v29  ;;  %2495 = vmatprep.subr.bf16.mxu1 %v2069_v30  ;;  %v1418_v29 = vld [vmem:[#allocation6 + $0xbb0] sm:$0xff]  ;;  %v2174_v30 = vunpack.c.l.s8.bf16 %v1416_v28 }
 0x36f   : > { %v2176_v31 = vunpack.c.l.s8.bf16 %v1418_v29  ;;  %v2188_v38 = vunpack.c.h.s8.bf16 %v1418_v29 }
 0x371   : > { %2332 = vmatpush1.bf16.msra.mxu0 %v2066_v33  ;;  %2496 = vmatpush1.bf16.msra.mxu1 %v2068_v34  ;;  %v2189_v33 = vunpack.c.h.s8.bf16 %v1419_v22  ;;  %v1049_v34 = vld [vmem:[#allocation6 + $0x28] sm:$0xff] }
 0x372   : > { %2333 = vmatprep.subr.bf16.mxu0 %v2079_v35  ;;  %2497 = vmatprep.subr.bf16.mxu1 %v2081_v37  ;;  %v1051_v35 = vld [vmem:[#allocation6 + $0x38] sm:$0xff]  ;;  %v2186_v37 = vunpack.c.h.s8.bf16 %v1416_v28 }
 0x373   : > { %v1099_v28 = vld [vmem:[#allocation6 + $0x1b8] sm:$0xff] }
 0x374   : > { %v1545_v39 = vunpack.c.h.s8.bf16 %v1099_v28 }
 0x375   : > { %2334 = vmatpush1.bf16.msra.mxu0 %v2078_v40  ;;  %2498 = vmatpush1.bf16.msra.mxu1 %v2080_v41  ;;  %v1435_v40 = vunpack.c.l.s8.bf16 %v1049_v34  ;;  %v1437_v41 = vunpack.c.l.s8.bf16 %v1051_v35 }
 0x376   : > { %2335 = vmatprep.subr.bf16.mxu0 %v2091_v42  ;;  %2499 = vmatprep.subr.bf16.mxu1 %v2093_v44  ;;  %v1048_v42 = vld [vmem:[#allocation6 + $0x20] sm:$0xff]  ;;  %v1050_v44 = vld [vmem:[#allocation6 + $0x30] sm:$0xff] }
 0x377   : > { %v1434_v46 = vunpack.c.l.s8.bf16 %v1048_v42  ;;  %v1446_v53 = vunpack.c.h.s8.bf16 %v1048_v42 }
 0x379   : > { %2336 = vmatpush1.bf16.msra.mxu0 %v2090_v47  ;;  %2500 = vmatpush1.bf16.msra.mxu1 %v2092_v48  ;;  %v1436_v47 = vunpack.c.l.s8.bf16 %v1050_v44  ;;  %v1447_v48 = vunpack.c.h.s8.bf16 %v1049_v34  ;;  %v1098_v34 = vld [vmem:[#allocation6 + $0x1b0] sm:$0xff] }
 0x37a   : > { %2337 = vmatprep.subr.bf16.mxu0 %v2103_v49  ;;  %2501 = vmatprep.subr.bf16.mxu1 %v2105_v50  ;;  %v1449_v49 = vunpack.c.h.s8.bf16 %v1051_v35  ;;  %v1061_v50 = vld [vmem:[#allocation6 + $0x88] sm:$0xff] }
 0x37d   : > { %2338 = vmatpush1.bf16.msra.mxu0 %v2102_v54  ;;  %2502 = vmatpush1.bf16.msra.mxu1 %v2104_v55  ;;  %v1448_v54 = vunpack.c.h.s8.bf16 %v1050_v44  ;;  %v1459_v55 = vunpack.c.l.s8.bf16 %v1061_v50  ;;  %v1544_v44 = vunpack.c.h.s8.bf16 %v1098_v34 }
 0x37e   : > { %2339 = vmatprep.subr.bf16.mxu0 %v2115_v56  ;;  %2503 = vmatprep.subr.bf16.mxu1 %v2117_v57  ;;  %v1461_v56 = vunpack.c.l.s8.bf16 %v1063_v52  ;;  %v1060_v57 = vld [vmem:[#allocation6 + $0x80] sm:$0xff] }
 0x37f   : > { %v1458_v59 = vunpack.c.l.s8.bf16 %v1060_v57  ;;  %v1470_v2 = vunpack.c.h.s8.bf16 %v1060_v57 }
 0x381   : > { %2340 = vmatpush1.bf16.msra.mxu0 %v2114_v60  ;;  %2504 = vmatpush1.bf16.msra.mxu1 %v2116_v61  ;;  %v1460_v60 = vunpack.c.l.s8.bf16 %v1062_v58  ;;  %v1471_v61 = vunpack.c.h.s8.bf16 %v1061_v50 }
 0x382   : > { %2341 = vmatprep.subr.bf16.mxu0 %v2127_v63  ;;  %2505 = vmatprep.subr.bf16.mxu1 %v2129_v0  ;;  %v1473_v63 = vunpack.c.h.s8.bf16 %v1063_v52  ;;  %v1073_v0 = vld [vmem:[#allocation6 + $0xe8] sm:$0xff] }
 0x385   : > { %2342 = vmatpush1.bf16.msra.mxu0 %v2126_v3  ;;  %2506 = vmatpush1.bf16.msra.mxu1 %v2128_v4  ;;  %v1472_v3 = vunpack.c.h.s8.bf16 %v1062_v58  ;;  %v1483_v4 = vunpack.c.l.s8.bf16 %v1073_v0 }
 0x386   : > { %2343 = vmatprep.subr.bf16.mxu0 %v2139_v5  ;;  %2507 = vmatprep.subr.bf16.mxu1 %v2141_v7  ;;  %v1485_v5 = vunpack.c.l.s8.bf16 %v1075_v1  ;;  %v1072_v7 = vld [vmem:[#allocation6 + $0xe0] sm:$0xff] }
 0x387   : > { %v1482_v9 = vunpack.c.l.s8.bf16 %v1072_v7  ;;  %v1494_v15 = vunpack.c.h.s8.bf16 %v1072_v7 }
 0x389   : > { %2344 = vmatpush1.bf16.msra.mxu0 %v2138_v10  ;;  %2508 = vmatpush1.bf16.msra.mxu1 %v2140_v11  ;;  %v1484_v10 = vunpack.c.l.s8.bf16 %v1074_v8  ;;  %v1495_v11 = vunpack.c.h.s8.bf16 %v1073_v0 }
 0x38a   : > { %2345 = vmatprep.subr.bf16.mxu0 %v2151_v12  ;;  %2509 = vmatprep.subr.bf16.mxu1 %v2153_v13  ;;  %v1497_v12 = vunpack.c.h.s8.bf16 %v1075_v1  ;;  %v1085_v13 = vld [vmem:[#allocation6 + $0x148] sm:$0xff] }
 0x38d   : > { %2346 = vmatpush1.bf16.msra.mxu0 %v2150_v16  ;;  %2510 = vmatpush1.bf16.msra.mxu1 %v2152_v17  ;;  %v1496_v16 = vunpack.c.h.s8.bf16 %v1074_v8  ;;  %v1507_v17 = vunpack.c.l.s8.bf16 %v1085_v13 }
 0x38e   : > { %2347 = vmatprep.subr.bf16.mxu0 %v2163_v19  ;;  %2511 = vmatprep.subr.bf16.mxu1 %v2165_v20  ;;  %v1509_v19 = vunpack.c.l.s8.bf16 %v1087_v14  ;;  %v1084_v20 = vld [vmem:[#allocation6 + $0x140] sm:$0xff] }
 0x38f   : > { %v1506_v22 = vunpack.c.l.s8.bf16 %v1084_v20  ;;  %v1518_v29 = vunpack.c.h.s8.bf16 %v1084_v20 }
 0x391   : > { %2348 = vmatpush1.bf16.msra.mxu0 %v2162_v23  ;;  %2512 = vmatpush1.bf16.msra.mxu1 %v2164_v24  ;;  %v1508_v23 = vunpack.c.l.s8.bf16 %v1086_v21  ;;  %v1519_v24 = vunpack.c.h.s8.bf16 %v1085_v13 }
 0x392   : > { %2349 = vmatprep.subr.bf16.mxu0 %v2175_v25  ;;  %2513 = vmatprep.subr.bf16.mxu1 %v2177_v27  ;;  %v1521_v25 = vunpack.c.h.s8.bf16 %v1087_v14  ;;  %v1097_v27 = vld [vmem:[#allocation6 + $0x1a8] sm:$0xff] }
 0x395   : > { %2350 = vmatpush1.bf16.msra.mxu0 %v2174_v30  ;;  %2514 = vmatpush1.bf16.msra.mxu1 %v2176_v31  ;;  %v1520_v30 = vunpack.c.h.s8.bf16 %v1086_v21  ;;  %v1531_v31 = vunpack.c.l.s8.bf16 %v1097_v27 }
 0x396   : > { %2351 = vmatprep.subr.bf16.mxu0 %v2187_v32  ;;  %2515 = vmatprep.subr.bf16.mxu1 %v2189_v33  ;;  %v1533_v32 = vunpack.c.l.s8.bf16 %v1099_v28  ;;  %v1096_v33 = vld [vmem:[#allocation6 + $0x1a0] sm:$0xff] }
 0x397   : > { %v1530_v35 = vunpack.c.l.s8.bf16 %v1096_v33  ;;  %v1542_v42 = vunpack.c.h.s8.bf16 %v1096_v33 }
 0x399   : > { %2352 = vmatpush1.bf16.msra.mxu0 %v2186_v37  ;;  %2516 = vmatpush1.bf16.msra.mxu1 %v2188_v38  ;;  %v1532_v37 = vunpack.c.l.s8.bf16 %v1098_v34  ;;  %v1543_v38 = vunpack.c.h.s8.bf16 %v1097_v27 }
 0x39a   : > { %2526 = vmatprep.subr.bf16.mxu0 %v1435_v40  ;;  %2690 = vmatprep.subr.bf16.mxu1 %v1437_v41  ;;  %v1109_v40 = vld [vmem:[#allocation6 + $0x208] sm:$0xff]  ;;  %v1111_v41 = vld [vmem:[#allocation6 + $0x218] sm:$0xff] }
 0x39c   : > { %2354 = vmatmul.mubr.bf16.vlgmr.msra.gmra.mrb[0].mxu0 %v11659_v45  ;;  %2518 = vmatmul.mubr.bf16.vlgmr.msra.gmra.mrb[0].mxu1 %v11659_v45 }
 0x39d   : > { %2527 = vmatpush1.bf16.msra.mxu0 %v1434_v46  ;;  %2691 = vmatpush1.bf16.msra.mxu1 %v1436_v47  ;;  %v1555_v46 = vunpack.c.l.s8.bf16 %v1109_v40  ;;  %v1557_v47 = vunpack.c.l.s8.bf16 %v1111_v41 }
 0x39e   : > { %2528 = vmatprep.subr.bf16.mxu0 %v1447_v48  ;;  %2692 = vmatprep.subr.bf16.mxu1 %v1449_v49  ;;  %v1108_v48 = vld [vmem:[#allocation6 + $0x200] sm:$0xff]  ;;  %v1110_v49 = vld [vmem:[#allocation6 + $0x210] sm:$0xff] }
 0x39f   : > { %2558 = vmatprep.mubr.bf16.mxu0 %v11631_v36  ;;  %2722 = vmatprep.mubr.bf16.mxu1 %v11631_v36  ;;  %v1554_v50 = vunpack.c.l.s8.bf16 %v1108_v48  ;;  %v1556_v52 = vunpack.c.l.s8.bf16 %v1110_v49  ;;  %v1566_v57 = vunpack.c.h.s8.bf16 %v1108_v48  ;;  %v1568_v58 = vunpack.c.h.s8.bf16 %v1110_v49 }
 0x3a1   : > { %2529 = vmatpush1.bf16.msra.mxu0 %v1446_v53  ;;  %2693 = vmatpush1.bf16.msra.mxu1 %v1448_v54  ;;  %v1567_v53 = vunpack.c.h.s8.bf16 %v1109_v40  ;;  %v1569_v54 = vunpack.c.h.s8.bf16 %v1111_v41 }
 0x3a2   : > { %2530 = vmatprep.subr.bf16.mxu0 %v1459_v55  ;;  %2694 = vmatprep.subr.bf16.mxu1 %v1461_v56  ;;  %v1121_v55 = vld [vmem:[#allocation6 + $0x268] sm:$0xff]  ;;  %v1123_v56 = vld [vmem:[#allocation6 + $0x278] sm:$0xff] }
 0x3a5   : > { %2531 = vmatpush1.bf16.msra.mxu0 %v1458_v59  ;;  %2695 = vmatpush1.bf16.msra.mxu1 %v1460_v60  ;;  %v1579_v59 = vunpack.c.l.s8.bf16 %v1121_v55  ;;  %v1581_v60 = vunpack.c.l.s8.bf16 %v1123_v56 }
 0x3a6   : > { %2532 = vmatprep.subr.bf16.mxu0 %v1471_v61  ;;  %2696 = vmatprep.subr.bf16.mxu1 %v1473_v63  ;;  %v1120_v61 = vld [vmem:[#allocation6 + $0x260] sm:$0xff]  ;;  %v1122_v63 = vld [vmem:[#allocation6 + $0x270] sm:$0xff] }
 0x3a7   : > { %v1578_v0 = vunpack.c.l.s8.bf16 %v1120_v61  ;;  %v1580_v1 = vunpack.c.l.s8.bf16 %v1122_v63  ;;  %v1590_v7 = vunpack.c.h.s8.bf16 %v1120_v61  ;;  %v1592_v8 = vunpack.c.h.s8.bf16 %v1122_v63 }
 0x3a9   : > { %2533 = vmatpush1.bf16.msra.mxu0 %v1470_v2  ;;  %2697 = vmatpush1.bf16.msra.mxu1 %v1472_v3  ;;  %v1591_v2 = vunpack.c.h.s8.bf16 %v1121_v55  ;;  %v1593_v3 = vunpack.c.h.s8.bf16 %v1123_v56 }
 0x3aa   : > { %2534 = vmatprep.subr.bf16.mxu0 %v1483_v4  ;;  %2698 = vmatprep.subr.bf16.mxu1 %v1485_v5  ;;  %v1133_v4 = vld [vmem:[#allocation6 + $0x2c8] sm:$0xff]  ;;  %v1135_v5 = vld [vmem:[#allocation6 + $0x2d8] sm:$0xff] }
 0x3ad   : > { %2535 = vmatpush1.bf16.msra.mxu0 %v1482_v9  ;;  %2699 = vmatpush1.bf16.msra.mxu1 %v1484_v10  ;;  %v1603_v9 = vunpack.c.l.s8.bf16 %v1133_v4  ;;  %v1605_v10 = vunpack.c.l.s8.bf16 %v1135_v5 }
 0x3ae   : > { %2536 = vmatprep.subr.bf16.mxu0 %v1495_v11  ;;  %2700 = vmatprep.subr.bf16.mxu1 %v1497_v12  ;;  %v1132_v11 = vld [vmem:[#allocation6 + $0x2c0] sm:$0xff]  ;;  %v1134_v12 = vld [vmem:[#allocation6 + $0x2d0] sm:$0xff] }
 0x3af   : > { %v1602_v13 = vunpack.c.l.s8.bf16 %v1132_v11  ;;  %v1604_v14 = vunpack.c.l.s8.bf16 %v1134_v12  ;;  %v1614_v20 = vunpack.c.h.s8.bf16 %v1132_v11  ;;  %v1616_v21 = vunpack.c.h.s8.bf16 %v1134_v12 }
 0x3b1   : > { %2537 = vmatpush1.bf16.msra.mxu0 %v1494_v15  ;;  %2701 = vmatpush1.bf16.msra.mxu1 %v1496_v16  ;;  %v1615_v15 = vunpack.c.h.s8.bf16 %v1133_v4  ;;  %v1617_v16 = vunpack.c.h.s8.bf16 %v1135_v5 }
 0x3b2   : > { %2538 = vmatprep.subr.bf16.mxu0 %v1507_v17  ;;  %2702 = vmatprep.subr.bf16.mxu1 %v1509_v19  ;;  %v1145_v17 = vld [vmem:[#allocation6 + $0x328] sm:$0xff]  ;;  %v1147_v19 = vld [vmem:[#allocation6 + $0x338] sm:$0xff] }
 0x3b5   : > { %2539 = vmatpush1.bf16.msra.mxu0 %v1506_v22  ;;  %2703 = vmatpush1.bf16.msra.mxu1 %v1508_v23  ;;  %v1627_v22 = vunpack.c.l.s8.bf16 %v1145_v17  ;;  %v1629_v23 = vunpack.c.l.s8.bf16 %v1147_v19 }
 0x3b6   : > { %2540 = vmatprep.subr.bf16.mxu0 %v1519_v24  ;;  %2704 = vmatprep.subr.bf16.mxu1 %v1521_v25  ;;  %v1144_v24 = vld [vmem:[#allocation6 + $0x320] sm:$0xff]  ;;  %v1146_v25 = vld [vmem:[#allocation6 + $0x330] sm:$0xff] }
 0x3b7   : > { %v1626_v27 = vunpack.c.l.s8.bf16 %v1144_v24  ;;  %v1628_v28 = vunpack.c.l.s8.bf16 %v1146_v25  ;;  %v1638_v33 = vunpack.c.h.s8.bf16 %v1144_v24  ;;  %v1640_v34 = vunpack.c.h.s8.bf16 %v1146_v25 }
 0x3b9   : > { %2541 = vmatpush1.bf16.msra.mxu0 %v1518_v29  ;;  %2705 = vmatpush1.bf16.msra.mxu1 %v1520_v30  ;;  %v1639_v29 = vunpack.c.h.s8.bf16 %v1145_v17  ;;  %v1641_v30 = vunpack.c.h.s8.bf16 %v1147_v19 }
 0x3ba   : > { %2542 = vmatprep.subr.bf16.mxu0 %v1531_v31  ;;  %2706 = vmatprep.subr.bf16.mxu1 %v1533_v32  ;;  %v1157_v31 = vld [vmem:[#allocation6 + $0x388] sm:$0xff]  ;;  %v1159_v32 = vld [vmem:[#allocation6 + $0x398] sm:$0xff] }
 0x3bd   : > { %2543 = vmatpush1.bf16.msra.mxu0 %v1530_v35  ;;  %2707 = vmatpush1.bf16.msra.mxu1 %v1532_v37  ;;  %v1651_v35 = vunpack.c.l.s8.bf16 %v1157_v31  ;;  %v1653_v37 = vunpack.c.l.s8.bf16 %v1159_v32 }
 0x3be   : > { %2544 = vmatprep.subr.bf16.mxu0 %v1543_v38  ;;  %2708 = vmatprep.subr.bf16.mxu1 %v1545_v39  ;;  %v1156_v38 = vld [vmem:[#allocation6 + $0x380] sm:$0xff]  ;;  %v1158_v39 = vld [vmem:[#allocation6 + $0x390] sm:$0xff] }
 0x3bf   : > { %v1650_v40 = vunpack.c.l.s8.bf16 %v1156_v38  ;;  %v1652_v41 = vunpack.c.l.s8.bf16 %v1158_v39  ;;  %v1662_v48 = vunpack.c.h.s8.bf16 %v1156_v38  ;;  %v1664_v49 = vunpack.c.h.s8.bf16 %v1158_v39 }
 0x3c1   : > { %2545 = vmatpush1.bf16.msra.mxu0 %v1542_v42  ;;  %2709 = vmatpush1.bf16.msra.mxu1 %v1544_v44  ;;  %v1663_v42 = vunpack.c.h.s8.bf16 %v1157_v31  ;;  %v1665_v44 = vunpack.c.h.s8.bf16 %v1159_v32 }
 0x3c2   : > { %2546 = vmatprep.subr.bf16.mxu0 %v1555_v46  ;;  %2710 = vmatprep.subr.bf16.mxu1 %v1557_v47  ;;  %v1169_v46 = vld [vmem:[#allocation6 + $0x3e8] sm:$0xff]  ;;  %v1171_v47 = vld [vmem:[#allocation6 + $0x3f8] sm:$0xff] }
 0x3c5   : > { %2547 = vmatpush1.bf16.msra.mxu0 %v1554_v50  ;;  %2711 = vmatpush1.bf16.msra.mxu1 %v1556_v52  ;;  %v1675_v50 = vunpack.c.l.s8.bf16 %v1169_v46  ;;  %v1677_v52 = vunpack.c.l.s8.bf16 %v1171_v47 }
 0x3c6   : > { %2548 = vmatprep.subr.bf16.mxu0 %v1567_v53  ;;  %2712 = vmatprep.subr.bf16.mxu1 %v1569_v54  ;;  %v1168_v53 = vld [vmem:[#allocation6 + $0x3e0] sm:$0xff]  ;;  %v1170_v54 = vld [vmem:[#allocation6 + $0x3f0] sm:$0xff] }
 0x3c7   : > { %v1674_v55 = vunpack.c.l.s8.bf16 %v1168_v53  ;;  %v1676_v56 = vunpack.c.l.s8.bf16 %v1170_v54  ;;  %v1686_v61 = vunpack.c.h.s8.bf16 %v1168_v53  ;;  %v1688_v63 = vunpack.c.h.s8.bf16 %v1170_v54 }
 0x3c9   : > { %2549 = vmatpush1.bf16.msra.mxu0 %v1566_v57  ;;  %2713 = vmatpush1.bf16.msra.mxu1 %v1568_v58  ;;  %v1687_v57 = vunpack.c.h.s8.bf16 %v1169_v46  ;;  %v1689_v58 = vunpack.c.h.s8.bf16 %v1171_v47 }
 0x3ca   : > { %2550 = vmatprep.subr.bf16.mxu0 %v1579_v59  ;;  %2714 = vmatprep.subr.bf16.mxu1 %v1581_v60  ;;  %v1181_v59 = vld [vmem:[#allocation6 + $0x448] sm:$0xff]  ;;  %v1183_v60 = vld [vmem:[#allocation6 + $0x458] sm:$0xff] }
 0x3cd   : > { %2551 = vmatpush1.bf16.msra.mxu0 %v1578_v0  ;;  %2715 = vmatpush1.bf16.msra.mxu1 %v1580_v1  ;;  %v1699_v0 = vunpack.c.l.s8.bf16 %v1181_v59  ;;  %v1701_v1 = vunpack.c.l.s8.bf16 %v1183_v60 }
 0x3ce   : > { %2552 = vmatprep.subr.bf16.mxu0 %v1591_v2  ;;  %2716 = vmatprep.subr.bf16.mxu1 %v1593_v3  ;;  %v1180_v2 = vld [vmem:[#allocation6 + $0x440] sm:$0xff]  ;;  %v1182_v3 = vld [vmem:[#allocation6 + $0x450] sm:$0xff] }
 0x3cf   : > { %v1698_v4 = vunpack.c.l.s8.bf16 %v1180_v2  ;;  %v1700_v5 = vunpack.c.l.s8.bf16 %v1182_v3  ;;  %v1710_v11 = vunpack.c.h.s8.bf16 %v1180_v2  ;;  %v1712_v12 = vunpack.c.h.s8.bf16 %v1182_v3 }
 0x3d1   : > { %2553 = vmatpush1.bf16.msra.mxu0 %v1590_v7  ;;  %2717 = vmatpush1.bf16.msra.mxu1 %v1592_v8  ;;  %v1711_v7 = vunpack.c.h.s8.bf16 %v1181_v59  ;;  %v1713_v8 = vunpack.c.h.s8.bf16 %v1183_v60 }
 0x3d2   : > { %2554 = vmatprep.subr.bf16.mxu0 %v1603_v9  ;;  %2718 = vmatprep.subr.bf16.mxu1 %v1605_v10  ;;  %v1193_v9 = vld [vmem:[#allocation6 + $0x4a8] sm:$0xff]  ;;  %v1195_v10 = vld [vmem:[#allocation6 + $0x4b8] sm:$0xff] }
 0x3d5   : > { %2555 = vmatpush1.bf16.msra.mxu0 %v1602_v13  ;;  %2719 = vmatpush1.bf16.msra.mxu1 %v1604_v14  ;;  %v1723_v13 = vunpack.c.l.s8.bf16 %v1193_v9  ;;  %v1725_v14 = vunpack.c.l.s8.bf16 %v1195_v10 }
 0x3d6   : > { %2556 = vmatprep.subr.bf16.mxu0 %v1615_v15  ;;  %2720 = vmatprep.subr.bf16.mxu1 %v1617_v16  ;;  %v1192_v15 = vld [vmem:[#allocation6 + $0x4a0] sm:$0xff]  ;;  %v1194_v16 = vld [vmem:[#allocation6 + $0x4b0] sm:$0xff] }
 0x3d7   : > { %v1722_v17 = vunpack.c.l.s8.bf16 %v1192_v15  ;;  %v1724_v19 = vunpack.c.l.s8.bf16 %v1194_v16  ;;  %v1734_v24 = vunpack.c.h.s8.bf16 %v1192_v15  ;;  %v1736_v25 = vunpack.c.h.s8.bf16 %v1194_v16 }
 0x3d9   : > { %2557 = vmatpush1.bf16.msra.mxu0 %v1614_v20  ;;  %2721 = vmatpush1.bf16.msra.mxu1 %v1616_v21  ;;  %v1735_v20 = vunpack.c.h.s8.bf16 %v1193_v9  ;;  %v1737_v21 = vunpack.c.h.s8.bf16 %v1195_v10 }
 0x3da   : > { %2567 = vmatprep.subr.bf16.mxu0 %v1627_v22  ;;  %2731 = vmatprep.subr.bf16.mxu1 %v1629_v23  ;;  %v1205_v22 = vld [vmem:[#allocation6 + $0x508] sm:$0xff]  ;;  %v1207_v23 = vld [vmem:[#allocation6 + $0x518] sm:$0xff] }
 0x3dc   : > { %2559 = vmatmul.mubr.bf16.vlgmr.msra.gmra.mrb[4].mxu0 %v11635_v43  ;;  %2723 = vmatmul.mubr.bf16.vlgmr.msra.gmra.mrb[4].mxu1 %v11635_v43 }
 0x3dd   : > { %2568 = vmatpush1.bf16.msra.mxu0 %v1626_v27  ;;  %2732 = vmatpush1.bf16.msra.mxu1 %v1628_v28  ;;  %v1747_v27 = vunpack.c.l.s8.bf16 %v1205_v22  ;;  %v1749_v28 = vunpack.c.l.s8.bf16 %v1207_v23 }
 0x3de   : > { %2569 = vmatprep.subr.bf16.mxu0 %v1639_v29  ;;  %2733 = vmatprep.subr.bf16.mxu1 %v1641_v30  ;;  %v1204_v29 = vld [vmem:[#allocation6 + $0x500] sm:$0xff]  ;;  %v1206_v30 = vld [vmem:[#allocation6 + $0x510] sm:$0xff] }
 0x3df   : > { %2599 = vmatprep.mubr.bf16.mxu0 %v11637_v51  ;;  %2763 = vmatprep.mubr.bf16.mxu1 %v11637_v51  ;;  %v1746_v31 = vunpack.c.l.s8.bf16 %v1204_v29  ;;  %v1748_v32 = vunpack.c.l.s8.bf16 %v1206_v30  ;;  %v1758_v38 = vunpack.c.h.s8.bf16 %v1204_v29  ;;  %v1760_v39 = vunpack.c.h.s8.bf16 %v1206_v30 }
 0x3e1   : > { %2570 = vmatpush1.bf16.msra.mxu0 %v1638_v33  ;;  %2734 = vmatpush1.bf16.msra.mxu1 %v1640_v34  ;;  %v1759_v33 = vunpack.c.h.s8.bf16 %v1205_v22  ;;  %v1761_v34 = vunpack.c.h.s8.bf16 %v1207_v23 }
 0x3e2   : > { %2571 = vmatprep.subr.bf16.mxu0 %v1651_v35  ;;  %2735 = vmatprep.subr.bf16.mxu1 %v1653_v37  ;;  %v1217_v35 = vld [vmem:[#allocation6 + $0x568] sm:$0xff]  ;;  %v1219_v37 = vld [vmem:[#allocation6 + $0x578] sm:$0xff] }
 0x3e5   : > { %2572 = vmatpush1.bf16.msra.mxu0 %v1650_v40  ;;  %2736 = vmatpush1.bf16.msra.mxu1 %v1652_v41  ;;  %v1771_v40 = vunpack.c.l.s8.bf16 %v1217_v35  ;;  %v1773_v41 = vunpack.c.l.s8.bf16 %v1219_v37 }
 0x3e6   : > { %2573 = vmatprep.subr.bf16.mxu0 %v1663_v42  ;;  %2737 = vmatprep.subr.bf16.mxu1 %v1665_v44  ;;  %v1216_v42 = vld [vmem:[#allocation6 + $0x560] sm:$0xff]  ;;  %v1218_v44 = vld [vmem:[#allocation6 + $0x570] sm:$0xff] }
 0x3e7   : > { %v1770_v46 = vunpack.c.l.s8.bf16 %v1216_v42  ;;  %v1772_v47 = vunpack.c.l.s8.bf16 %v1218_v44  ;;  %v1782_v53 = vunpack.c.h.s8.bf16 %v1216_v42  ;;  %v1784_v54 = vunpack.c.h.s8.bf16 %v1218_v44 }
 0x3e9   : > { %2574 = vmatpush1.bf16.msra.mxu0 %v1662_v48  ;;  %2738 = vmatpush1.bf16.msra.mxu1 %v1664_v49  ;;  %v1783_v48 = vunpack.c.h.s8.bf16 %v1217_v35  ;;  %v1785_v49 = vunpack.c.h.s8.bf16 %v1219_v37 }
 0x3ea   : > { %2575 = vmatprep.subr.bf16.mxu0 %v1675_v50  ;;  %2739 = vmatprep.subr.bf16.mxu1 %v1677_v52  ;;  %v1229_v50 = vld [vmem:[#allocation6 + $0x5c8] sm:$0xff]  ;;  %v1231_v52 = vld [vmem:[#allocation6 + $0x5d8] sm:$0xff] }
 0x3ed   : > { %2576 = vmatpush1.bf16.msra.mxu0 %v1674_v55  ;;  %2740 = vmatpush1.bf16.msra.mxu1 %v1676_v56  ;;  %v1795_v55 = vunpack.c.l.s8.bf16 %v1229_v50  ;;  %v1797_v56 = vunpack.c.l.s8.bf16 %v1231_v52 }
 0x3ee   : > { %2577 = vmatprep.subr.bf16.mxu0 %v1687_v57  ;;  %2741 = vmatprep.subr.bf16.mxu1 %v1689_v58  ;;  %v1228_v57 = vld [vmem:[#allocation6 + $0x5c0] sm:$0xff]  ;;  %v1230_v58 = vld [vmem:[#allocation6 + $0x5d0] sm:$0xff] }
 0x3ef   : > { %v1794_v59 = vunpack.c.l.s8.bf16 %v1228_v57  ;;  %v1796_v60 = vunpack.c.l.s8.bf16 %v1230_v58  ;;  %v1806_v2 = vunpack.c.h.s8.bf16 %v1228_v57  ;;  %v1808_v3 = vunpack.c.h.s8.bf16 %v1230_v58 }
 0x3f1   : > { %2578 = vmatpush1.bf16.msra.mxu0 %v1686_v61  ;;  %2742 = vmatpush1.bf16.msra.mxu1 %v1688_v63  ;;  %v1807_v61 = vunpack.c.h.s8.bf16 %v1229_v50  ;;  %v1809_v63 = vunpack.c.h.s8.bf16 %v1231_v52 }
 0x3f2   : > { %2579 = vmatprep.subr.bf16.mxu0 %v1699_v0  ;;  %2743 = vmatprep.subr.bf16.mxu1 %v1701_v1  ;;  %v1241_v0 = vld [vmem:[#allocation6 + $0x628] sm:$0xff]  ;;  %v1243_v1 = vld [vmem:[#allocation6 + $0x638] sm:$0xff] }
 0x3f5   : > { %2580 = vmatpush1.bf16.msra.mxu0 %v1698_v4  ;;  %2744 = vmatpush1.bf16.msra.mxu1 %v1700_v5  ;;  %v1819_v4 = vunpack.c.l.s8.bf16 %v1241_v0  ;;  %v1821_v5 = vunpack.c.l.s8.bf16 %v1243_v1 }
 0x3f6   : > { %2581 = vmatprep.subr.bf16.mxu0 %v1711_v7  ;;  %2745 = vmatprep.subr.bf16.mxu1 %v1713_v8  ;;  %v1240_v7 = vld [vmem:[#allocation6 + $0x620] sm:$0xff]  ;;  %v1242_v8 = vld [vmem:[#allocation6 + $0x630] sm:$0xff] }
 0x3f7   : > { %v1818_v9 = vunpack.c.l.s8.bf16 %v1240_v7  ;;  %v1820_v10 = vunpack.c.l.s8.bf16 %v1242_v8  ;;  %v1830_v15 = vunpack.c.h.s8.bf16 %v1240_v7  ;;  %v1832_v16 = vunpack.c.h.s8.bf16 %v1242_v8 }
 0x3f9   : > { %2582 = vmatpush1.bf16.msra.mxu0 %v1710_v11  ;;  %2746 = vmatpush1.bf16.msra.mxu1 %v1712_v12  ;;  %v1831_v11 = vunpack.c.h.s8.bf16 %v1241_v0  ;;  %v1833_v12 = vunpack.c.h.s8.bf16 %v1243_v1 }
 0x3fa   : > { %2583 = vmatprep.subr.bf16.mxu0 %v1723_v13  ;;  %2747 = vmatprep.subr.bf16.mxu1 %v1725_v14  ;;  %v1253_v13 = vld [vmem:[#allocation6 + $0x688] sm:$0xff]  ;;  %v1255_v14 = vld [vmem:[#allocation6 + $0x698] sm:$0xff] }
 0x3fd   : > { %2584 = vmatpush1.bf16.msra.mxu0 %v1722_v17  ;;  %2748 = vmatpush1.bf16.msra.mxu1 %v1724_v19  ;;  %v1843_v17 = vunpack.c.l.s8.bf16 %v1253_v13  ;;  %v1845_v19 = vunpack.c.l.s8.bf16 %v1255_v14 }
 0x3fe   : > { %2585 = vmatprep.subr.bf16.mxu0 %v1735_v20  ;;  %2749 = vmatprep.subr.bf16.mxu1 %v1737_v21  ;;  %v1252_v20 = vld [vmem:[#allocation6 + $0x680] sm:$0xff]  ;;  %v1254_v21 = vld [vmem:[#allocation6 + $0x690] sm:$0xff] }
 0x3ff   : > { %v1842_v22 = vunpack.c.l.s8.bf16 %v1252_v20  ;;  %v1844_v23 = vunpack.c.l.s8.bf16 %v1254_v21  ;;  %v1854_v29 = vunpack.c.h.s8.bf16 %v1252_v20  ;;  %v1856_v30 = vunpack.c.h.s8.bf16 %v1254_v21 }
 0x401   : > { %2586 = vmatpush1.bf16.msra.mxu0 %v1734_v24  ;;  %2750 = vmatpush1.bf16.msra.mxu1 %v1736_v25  ;;  %v1855_v24 = vunpack.c.h.s8.bf16 %v1253_v13  ;;  %v1857_v25 = vunpack.c.h.s8.bf16 %v1255_v14 }
 0x402   : > { %2587 = vmatprep.subr.bf16.mxu0 %v1747_v27  ;;  %2751 = vmatprep.subr.bf16.mxu1 %v1749_v28  ;;  %v1265_v27 = vld [vmem:[#allocation6 + $0x6e8] sm:$0xff]  ;;  %v1267_v28 = vld [vmem:[#allocation6 + $0x6f8] sm:$0xff] }
 0x405   : > { %2588 = vmatpush1.bf16.msra.mxu0 %v1746_v31  ;;  %2752 = vmatpush1.bf16.msra.mxu1 %v1748_v32  ;;  %v1867_v31 = vunpack.c.l.s8.bf16 %v1265_v27  ;;  %v1869_v32 = vunpack.c.l.s8.bf16 %v1267_v28 }
 0x406   : > { %2589 = vmatprep.subr.bf16.mxu0 %v1759_v33  ;;  %2753 = vmatprep.subr.bf16.mxu1 %v1761_v34  ;;  %v1264_v33 = vld [vmem:[#allocation6 + $0x6e0] sm:$0xff]  ;;  %v1266_v34 = vld [vmem:[#allocation6 + $0x6f0] sm:$0xff] }
 0x407   : > { %v1866_v35 = vunpack.c.l.s8.bf16 %v1264_v33  ;;  %v1868_v37 = vunpack.c.l.s8.bf16 %v1266_v34  ;;  %v1878_v42 = vunpack.c.h.s8.bf16 %v1264_v33  ;;  %v1880_v44 = vunpack.c.h.s8.bf16 %v1266_v34 }
 0x409   : > { %2590 = vmatpush1.bf16.msra.mxu0 %v1758_v38  ;;  %2754 = vmatpush1.bf16.msra.mxu1 %v1760_v39  ;;  %v1879_v38 = vunpack.c.h.s8.bf16 %v1265_v27  ;;  %v1881_v39 = vunpack.c.h.s8.bf16 %v1267_v28 }
 0x40a   : > { %2591 = vmatprep.subr.bf16.mxu0 %v1771_v40  ;;  %2755 = vmatprep.subr.bf16.mxu1 %v1773_v41  ;;  %v1277_v40 = vld [vmem:[#allocation6 + $0x748] sm:$0xff]  ;;  %v1279_v41 = vld [vmem:[#allocation6 + $0x758] sm:$0xff] }
 0x40d   : > { %2592 = vmatpush1.bf16.msra.mxu0 %v1770_v46  ;;  %2756 = vmatpush1.bf16.msra.mxu1 %v1772_v47  ;;  %v1891_v46 = vunpack.c.l.s8.bf16 %v1277_v40  ;;  %v1893_v47 = vunpack.c.l.s8.bf16 %v1279_v41 }
 0x40e   : > { %2593 = vmatprep.subr.bf16.mxu0 %v1783_v48  ;;  %2757 = vmatprep.subr.bf16.mxu1 %v1785_v49  ;;  %v1276_v48 = vld [vmem:[#allocation6 + $0x740] sm:$0xff]  ;;  %v1278_v49 = vld [vmem:[#allocation6 + $0x750] sm:$0xff] }
 0x40f   : > { %v1890_v50 = vunpack.c.l.s8.bf16 %v1276_v48  ;;  %v1892_v52 = vunpack.c.l.s8.bf16 %v1278_v49  ;;  %v1902_v57 = vunpack.c.h.s8.bf16 %v1276_v48  ;;  %v1904_v58 = vunpack.c.h.s8.bf16 %v1278_v49 }
 0x411   : > { %2594 = vmatpush1.bf16.msra.mxu0 %v1782_v53  ;;  %2758 = vmatpush1.bf16.msra.mxu1 %v1784_v54  ;;  %v1903_v53 = vunpack.c.h.s8.bf16 %v1277_v40  ;;  %v1905_v54 = vunpack.c.h.s8.bf16 %v1279_v41 }
 0x412   : > { %2595 = vmatprep.subr.bf16.mxu0 %v1795_v55  ;;  %2759 = vmatprep.subr.bf16.mxu1 %v1797_v56  ;;  %v1289_v55 = vld [vmem:[#allocation6 + $0x7a8] sm:$0xff]  ;;  %v1291_v56 = vld [vmem:[#allocation6 + $0x7b8] sm:$0xff] }
 0x415   : > { %2596 = vmatpush1.bf16.msra.mxu0 %v1794_v59  ;;  %2760 = vmatpush1.bf16.msra.mxu1 %v1796_v60  ;;  %v1915_v59 = vunpack.c.l.s8.bf16 %v1289_v55  ;;  %v1917_v60 = vunpack.c.l.s8.bf16 %v1291_v56 }
 0x416   : > { %2597 = vmatprep.subr.bf16.mxu0 %v1807_v61  ;;  %2761 = vmatprep.subr.bf16.mxu1 %v1809_v63  ;;  %v1288_v61 = vld [vmem:[#allocation6 + $0x7a0] sm:$0xff]  ;;  %v1290_v63 = vld [vmem:[#allocation6 + $0x7b0] sm:$0xff] }
 0x417   : > { %v1914_v0 = vunpack.c.l.s8.bf16 %v1288_v61  ;;  %v1916_v1 = vunpack.c.l.s8.bf16 %v1290_v63  ;;  %v1926_v7 = vunpack.c.h.s8.bf16 %v1288_v61  ;;  %v1928_v8 = vunpack.c.h.s8.bf16 %v1290_v63 }
 0x419   : > { %2598 = vmatpush1.bf16.msra.mxu0 %v1806_v2  ;;  %2762 = vmatpush1.bf16.msra.mxu1 %v1808_v3  ;;  %v1927_v2 = vunpack.c.h.s8.bf16 %v1289_v55  ;;  %v1929_v3 = vunpack.c.h.s8.bf16 %v1291_v56 }
 0x41a   : > { %2608 = vmatprep.subr.bf16.mxu0 %v1819_v4  ;;  %2772 = vmatprep.subr.bf16.mxu1 %v1821_v5  ;;  %v1301_v4 = vld [vmem:[#allocation6 + $0x808] sm:$0xff]  ;;  %v1303_v5 = vld [vmem:[#allocation6 + $0x818] sm:$0xff] }
 0x41c   : > { %2600 = vmatmul.mubr.bf16.vlgmr.msra.gmra.mrb[4].mxu0 %v11643_v18  ;;  %2764 = vmatmul.mubr.bf16.vlgmr.msra.gmra.mrb[4].mxu1 %v11643_v18 }
 0x41d   : > { %2609 = vmatpush1.bf16.msra.mxu0 %v1818_v9  ;;  %2773 = vmatpush1.bf16.msra.mxu1 %v1820_v10  ;;  %v1939_v9 = vunpack.c.l.s8.bf16 %v1301_v4  ;;  %v1941_v10 = vunpack.c.l.s8.bf16 %v1303_v5 }
 0x41e   : > { %2610 = vmatprep.subr.bf16.mxu0 %v1831_v11  ;;  %2774 = vmatprep.subr.bf16.mxu1 %v1833_v12  ;;  %v1300_v11 = vld [vmem:[#allocation6 + $0x800] sm:$0xff]  ;;  %v1302_v12 = vld [vmem:[#allocation6 + $0x810] sm:$0xff] }
 0x41f   : > { %2640 = vmatprep.mubr.bf16.mxu0 %v11645_v26  ;;  %2804 = vmatprep.mubr.bf16.mxu1 %v11645_v26  ;;  %v1938_v13 = vunpack.c.l.s8.bf16 %v1300_v11  ;;  %v1940_v14 = vunpack.c.l.s8.bf16 %v1302_v12  ;;  %v1950_v20 = vunpack.c.h.s8.bf16 %v1300_v11  ;;  %v1952_v21 = vunpack.c.h.s8.bf16 %v1302_v12 }
 0x421   : > { %2611 = vmatpush1.bf16.msra.mxu0 %v1830_v15  ;;  %2775 = vmatpush1.bf16.msra.mxu1 %v1832_v16  ;;  %v1951_v15 = vunpack.c.h.s8.bf16 %v1301_v4  ;;  %v1953_v16 = vunpack.c.h.s8.bf16 %v1303_v5 }
 0x422   : > { %2612 = vmatprep.subr.bf16.mxu0 %v1843_v17  ;;  %2776 = vmatprep.subr.bf16.mxu1 %v1845_v19  ;;  %v1313_v17 = vld [vmem:[#allocation6 + $0x868] sm:$0xff]  ;;  %v1315_v19 = vld [vmem:[#allocation6 + $0x878] sm:$0xff] }
 0x425   : > { %2613 = vmatpush1.bf16.msra.mxu0 %v1842_v22  ;;  %2777 = vmatpush1.bf16.msra.mxu1 %v1844_v23  ;;  %v1963_v22 = vunpack.c.l.s8.bf16 %v1313_v17  ;;  %v1965_v23 = vunpack.c.l.s8.bf16 %v1315_v19 }
 0x426   : > { %2614 = vmatprep.subr.bf16.mxu0 %v1855_v24  ;;  %2778 = vmatprep.subr.bf16.mxu1 %v1857_v25  ;;  %v1312_v24 = vld [vmem:[#allocation6 + $0x860] sm:$0xff]  ;;  %v1314_v25 = vld [vmem:[#allocation6 + $0x870] sm:$0xff] }
 0x427   : > { %v1962_v27 = vunpack.c.l.s8.bf16 %v1312_v24  ;;  %v1964_v28 = vunpack.c.l.s8.bf16 %v1314_v25  ;;  %v1974_v33 = vunpack.c.h.s8.bf16 %v1312_v24  ;;  %v1976_v34 = vunpack.c.h.s8.bf16 %v1314_v25 }
 0x429   : > { %2615 = vmatpush1.bf16.msra.mxu0 %v1854_v29  ;;  %2779 = vmatpush1.bf16.msra.mxu1 %v1856_v30  ;;  %v1975_v29 = vunpack.c.h.s8.bf16 %v1313_v17  ;;  %v1977_v30 = vunpack.c.h.s8.bf16 %v1315_v19 }
 0x42a   : > { %2616 = vmatprep.subr.bf16.mxu0 %v1867_v31  ;;  %2780 = vmatprep.subr.bf16.mxu1 %v1869_v32  ;;  %v1325_v31 = vld [vmem:[#allocation6 + $0x8c8] sm:$0xff]  ;;  %v1327_v32 = vld [vmem:[#allocation6 + $0x8d8] sm:$0xff] }
 0x42d   : > { %2617 = vmatpush1.bf16.msra.mxu0 %v1866_v35  ;;  %2781 = vmatpush1.bf16.msra.mxu1 %v1868_v37  ;;  %v1987_v35 = vunpack.c.l.s8.bf16 %v1325_v31  ;;  %v1989_v37 = vunpack.c.l.s8.bf16 %v1327_v32 }
 0x42e   : > { %2618 = vmatprep.subr.bf16.mxu0 %v1879_v38  ;;  %2782 = vmatprep.subr.bf16.mxu1 %v1881_v39  ;;  %v1324_v38 = vld [vmem:[#allocation6 + $0x8c0] sm:$0xff]  ;;  %v1326_v39 = vld [vmem:[#allocation6 + $0x8d0] sm:$0xff] }
 0x42f   : > { %v1986_v40 = vunpack.c.l.s8.bf16 %v1324_v38  ;;  %v1988_v41 = vunpack.c.l.s8.bf16 %v1326_v39  ;;  %v1998_v48 = vunpack.c.h.s8.bf16 %v1324_v38  ;;  %v2000_v49 = vunpack.c.h.s8.bf16 %v1326_v39 }
 0x431   : > { %2619 = vmatpush1.bf16.msra.mxu0 %v1878_v42  ;;  %2783 = vmatpush1.bf16.msra.mxu1 %v1880_v44  ;;  %v1999_v42 = vunpack.c.h.s8.bf16 %v1325_v31  ;;  %v2001_v44 = vunpack.c.h.s8.bf16 %v1327_v32 }
 0x432   : > { %2620 = vmatprep.subr.bf16.mxu0 %v1891_v46  ;;  %2784 = vmatprep.subr.bf16.mxu1 %v1893_v47  ;;  %v1337_v46 = vld [vmem:[#allocation6 + $0x928] sm:$0xff]  ;;  %v1339_v47 = vld [vmem:[#allocation6 + $0x938] sm:$0xff] }
 0x435   : > { %2621 = vmatpush1.bf16.msra.mxu0 %v1890_v50  ;;  %2785 = vmatpush1.bf16.msra.mxu1 %v1892_v52  ;;  %v2011_v50 = vunpack.c.l.s8.bf16 %v1337_v46  ;;  %v2013_v52 = vunpack.c.l.s8.bf16 %v1339_v47 }
 0x436   : > { %2622 = vmatprep.subr.bf16.mxu0 %v1903_v53  ;;  %2786 = vmatprep.subr.bf16.mxu1 %v1905_v54  ;;  %v1336_v53 = vld [vmem:[#allocation6 + $0x920] sm:$0xff]  ;;  %v1338_v54 = vld [vmem:[#allocation6 + $0x930] sm:$0xff] }
 0x437   : > { %v2010_v55 = vunpack.c.l.s8.bf16 %v1336_v53  ;;  %v2012_v56 = vunpack.c.l.s8.bf16 %v1338_v54  ;;  %v2022_v61 = vunpack.c.h.s8.bf16 %v1336_v53  ;;  %v2024_v63 = vunpack.c.h.s8.bf16 %v1338_v54  ;;  %v1384_v53 = vld [vmem:[#allocation6 + $0xaa0] sm:$0xff]  ;;  %v1386_v54 = vld [vmem:[#allocation6 + $0xab0] sm:$0xff] }
 0x439   : > { %2623 = vmatpush1.bf16.msra.mxu0 %v1902_v57  ;;  %2787 = vmatpush1.bf16.msra.mxu1 %v1904_v58  ;;  %v2023_v57 = vunpack.c.h.s8.bf16 %v1337_v46  ;;  %v2025_v58 = vunpack.c.h.s8.bf16 %v1339_v47  ;;  %v1385_v46 = vld [vmem:[#allocation6 + $0xaa8] sm:$0xff]  ;;  %v1387_v47 = vld [vmem:[#allocation6 + $0xab8] sm:$0xff] }
 0x43a   : > { %2624 = vmatprep.subr.bf16.mxu0 %v1915_v59  ;;  %2788 = vmatprep.subr.bf16.mxu1 %v1917_v60  ;;  %v1349_v59 = vld [vmem:[#allocation6 + $0x988] sm:$0xff]  ;;  %v1351_v60 = vld [vmem:[#allocation6 + $0x998] sm:$0xff] }
 0x43d   : > { %2625 = vmatpush1.bf16.msra.mxu0 %v1914_v0  ;;  %2789 = vmatpush1.bf16.msra.mxu1 %v1916_v1  ;;  %v2035_v0 = vunpack.c.l.s8.bf16 %v1349_v59  ;;  %v2037_v1 = vunpack.c.l.s8.bf16 %v1351_v60 }
 0x43e   : > { %2626 = vmatprep.subr.bf16.mxu0 %v1927_v2  ;;  %2790 = vmatprep.subr.bf16.mxu1 %v1929_v3  ;;  %v1348_v2 = vld [vmem:[#allocation6 + $0x980] sm:$0xff]  ;;  %v1350_v3 = vld [vmem:[#allocation6 + $0x990] sm:$0xff] }
 0x43f   : > { %v2034_v4 = vunpack.c.l.s8.bf16 %v1348_v2  ;;  %v2036_v5 = vunpack.c.l.s8.bf16 %v1350_v3  ;;  %v2046_v11 = vunpack.c.h.s8.bf16 %v1348_v2  ;;  %v2048_v12 = vunpack.c.h.s8.bf16 %v1350_v3  ;;  %v1396_v2 = vld [vmem:[#allocation6 + $0xb00] sm:$0xff]  ;;  %v1398_v3 = vld [vmem:[#allocation6 + $0xb10] sm:$0xff] }
 0x441   : > { %2627 = vmatpush1.bf16.msra.mxu0 %v1926_v7  ;;  %2791 = vmatpush1.bf16.msra.mxu1 %v1928_v8  ;;  %v2047_v7 = vunpack.c.h.s8.bf16 %v1349_v59  ;;  %v2049_v8 = vunpack.c.h.s8.bf16 %v1351_v60  ;;  %v1397_v59 = vld [vmem:[#allocation6 + $0xb08] sm:$0xff]  ;;  %v1399_v60 = vld [vmem:[#allocation6 + $0xb18] sm:$0xff] }
 0x442   : > { %2628 = vmatprep.subr.bf16.mxu0 %v1939_v9  ;;  %2792 = vmatprep.subr.bf16.mxu1 %v1941_v10  ;;  %v1361_v9 = vld [vmem:[#allocation6 + $0x9e8] sm:$0xff]  ;;  %v1363_v10 = vld [vmem:[#allocation6 + $0x9f8] sm:$0xff] }
 0x445   : > { %2629 = vmatpush1.bf16.msra.mxu0 %v1938_v13  ;;  %2793 = vmatpush1.bf16.msra.mxu1 %v1940_v14  ;;  %v2059_v13 = vunpack.c.l.s8.bf16 %v1361_v9  ;;  %v2061_v14 = vunpack.c.l.s8.bf16 %v1363_v10 }
 0x446   : > { %2630 = vmatprep.subr.bf16.mxu0 %v1951_v15  ;;  %2794 = vmatprep.subr.bf16.mxu1 %v1953_v16  ;;  %v1360_v15 = vld [vmem:[#allocation6 + $0x9e0] sm:$0xff]  ;;  %v1362_v16 = vld [vmem:[#allocation6 + $0x9f0] sm:$0xff] }
 0x447   : > { %v2058_v17 = vunpack.c.l.s8.bf16 %v1360_v15  ;;  %v2060_v19 = vunpack.c.l.s8.bf16 %v1362_v16  ;;  %v2070_v24 = vunpack.c.h.s8.bf16 %v1360_v15  ;;  %v2072_v25 = vunpack.c.h.s8.bf16 %v1362_v16  ;;  %v1408_v15 = vld [vmem:[#allocation6 + $0xb60] sm:$0xff]  ;;  %v1410_v16 = vld [vmem:[#allocation6 + $0xb70] sm:$0xff] }
 0x449   : > { %2631 = vmatpush1.bf16.msra.mxu0 %v1950_v20  ;;  %2795 = vmatpush1.bf16.msra.mxu1 %v1952_v21  ;;  %v2071_v20 = vunpack.c.h.s8.bf16 %v1361_v9  ;;  %v2073_v21 = vunpack.c.h.s8.bf16 %v1363_v10  ;;  %v1409_v9 = vld [vmem:[#allocation6 + $0xb68] sm:$0xff]  ;;  %v1411_v10 = vld [vmem:[#allocation6 + $0xb78] sm:$0xff] }
 0x44a   : > { %2632 = vmatprep.subr.bf16.mxu0 %v1963_v22  ;;  %2796 = vmatprep.subr.bf16.mxu1 %v1965_v23  ;;  %v1373_v22 = vld [vmem:[#allocation6 + $0xa48] sm:$0xff]  ;;  %v1375_v23 = vld [vmem:[#allocation6 + $0xa58] sm:$0xff] }
 0x44d   : > { %2633 = vmatpush1.bf16.msra.mxu0 %v1962_v27  ;;  %2797 = vmatpush1.bf16.msra.mxu1 %v1964_v28  ;;  %v2083_v27 = vunpack.c.l.s8.bf16 %v1373_v22  ;;  %v2085_v28 = vunpack.c.l.s8.bf16 %v1375_v23 }
 0x44e   : > { %2634 = vmatprep.subr.bf16.mxu0 %v1975_v29  ;;  %2798 = vmatprep.subr.bf16.mxu1 %v1977_v30  ;;  %v1372_v29 = vld [vmem:[#allocation6 + $0xa40] sm:$0xff]  ;;  %v1374_v30 = vld [vmem:[#allocation6 + $0xa50] sm:$0xff] }
 0x44f   : > { %v2082_v38 = vunpack.c.l.s8.bf16 %v1372_v29  ;;  %v2084_v39 = vunpack.c.l.s8.bf16 %v1374_v30 }
 0x451   : > { %2635 = vmatpush1.bf16.msra.mxu0 %v1974_v33  ;;  %2799 = vmatpush1.bf16.msra.mxu1 %v1976_v34 }
 0x452   : > { %2636 = vmatprep.subr.bf16.mxu0 %v1987_v35  ;;  %2800 = vmatprep.subr.bf16.mxu1 %v1989_v37 }
 0x455   : > { %2637 = vmatpush1.bf16.msra.mxu0 %v1986_v40  ;;  %2801 = vmatpush1.bf16.msra.mxu1 %v1988_v41 }
 0x456   : > { %2638 = vmatprep.subr.bf16.mxu0 %v1999_v42  ;;  %2802 = vmatprep.subr.bf16.mxu1 %v2001_v44  ;;  %v2095_v42 = vunpack.c.h.s8.bf16 %v1373_v22  ;;  %v2097_v44 = vunpack.c.h.s8.bf16 %v1375_v23  ;;  %v1421_v22 = vld [vmem:[#allocation6 + $0xbc8] sm:$0xff]  ;;  %v1423_v23 = vld [vmem:[#allocation6 + $0xbd8] sm:$0xff] }
 0x459   : > { %2639 = vmatpush1.bf16.msra.mxu0 %v1998_v48  ;;  %2803 = vmatpush1.bf16.msra.mxu1 %v2000_v49  ;;  %v2094_v48 = vunpack.c.h.s8.bf16 %v1372_v29  ;;  %v2096_v49 = vunpack.c.h.s8.bf16 %v1374_v30  ;;  %v1420_v29 = vld [vmem:[#allocation6 + $0xbc0] sm:$0xff]  ;;  %v1422_v30 = vld [vmem:[#allocation6 + $0xbd0] sm:$0xff] }
 0x45a   : > { %2649 = vmatprep.subr.bf16.mxu0 %v2011_v50  ;;  %2813 = vmatprep.subr.bf16.mxu1 %v2013_v52  ;;  %v2107_v50 = vunpack.c.l.s8.bf16 %v1385_v46  ;;  %v2109_v52 = vunpack.c.l.s8.bf16 %v1387_v47 }
 0x45c   : > { %2641 = vmatmul.mubr.bf16.vlgmr.msra.gmra.mrb[4].mxu0 %v11651_v62  ;;  %2805 = vmatmul.mubr.bf16.vlgmr.msra.gmra.mrb[4].mxu1 %v11651_v62 }
 0x45d   : > { %2650 = vmatpush1.bf16.msra.mxu0 %v2010_v55  ;;  %2814 = vmatpush1.bf16.msra.mxu1 %v2012_v56  ;;  %v2106_v55 = vunpack.c.l.s8.bf16 %v1384_v53  ;;  %v2108_v56 = vunpack.c.l.s8.bf16 %v1386_v54 }
 0x45e   : > { %2651 = vmatprep.subr.bf16.mxu0 %v2023_v57  ;;  %2815 = vmatprep.subr.bf16.mxu1 %v2025_v58  ;;  %v2119_v57 = vunpack.c.h.s8.bf16 %v1385_v46  ;;  %v2121_v58 = vunpack.c.h.s8.bf16 %v1387_v47 }
 0x45f   : > { %2681 = vmatprep.mubr.bf16.mxu0 %v11653_v6  ;;  %2845 = vmatprep.mubr.bf16.mxu1 %v11653_v6 }
 0x461   : > { %2652 = vmatpush1.bf16.msra.mxu0 %v2022_v61  ;;  %2816 = vmatpush1.bf16.msra.mxu1 %v2024_v63  ;;  %v2118_v61 = vunpack.c.h.s8.bf16 %v1384_v53  ;;  %v2120_v63 = vunpack.c.h.s8.bf16 %v1386_v54 }
 0x462   : > { %2653 = vmatprep.subr.bf16.mxu0 %v2035_v0  ;;  %2817 = vmatprep.subr.bf16.mxu1 %v2037_v1  ;;  %v2131_v0 = vunpack.c.l.s8.bf16 %v1397_v59  ;;  %v2133_v1 = vunpack.c.l.s8.bf16 %v1399_v60 }
 0x465   : > { %2654 = vmatpush1.bf16.msra.mxu0 %v2034_v4  ;;  %2818 = vmatpush1.bf16.msra.mxu1 %v2036_v5  ;;  %v2130_v4 = vunpack.c.l.s8.bf16 %v1396_v2  ;;  %v2132_v5 = vunpack.c.l.s8.bf16 %v1398_v3 }
 0x466   : > { %2655 = vmatprep.subr.bf16.mxu0 %v2047_v7  ;;  %2819 = vmatprep.subr.bf16.mxu1 %v2049_v8  ;;  %v2143_v7 = vunpack.c.h.s8.bf16 %v1397_v59  ;;  %v2145_v8 = vunpack.c.h.s8.bf16 %v1399_v60 }
 0x469   : > { %2656 = vmatpush1.bf16.msra.mxu0 %v2046_v11  ;;  %2820 = vmatpush1.bf16.msra.mxu1 %v2048_v12  ;;  %v2142_v11 = vunpack.c.h.s8.bf16 %v1396_v2  ;;  %v2144_v12 = vunpack.c.h.s8.bf16 %v1398_v3 }
 0x46a   : > { %2657 = vmatprep.subr.bf16.mxu0 %v2059_v13  ;;  %2821 = vmatprep.subr.bf16.mxu1 %v2061_v14  ;;  %v2155_v13 = vunpack.c.l.s8.bf16 %v1409_v9  ;;  %v2157_v14 = vunpack.c.l.s8.bf16 %v1411_v10 }
 0x46d   : > { %2658 = vmatpush1.bf16.msra.mxu0 %v2058_v17  ;;  %2822 = vmatpush1.bf16.msra.mxu1 %v2060_v19  ;;  %v2154_v17 = vunpack.c.l.s8.bf16 %v1408_v15  ;;  %v2156_v19 = vunpack.c.l.s8.bf16 %v1410_v16 }
 0x46e   : > { %2659 = vmatprep.subr.bf16.mxu0 %v2071_v20  ;;  %2823 = vmatprep.subr.bf16.mxu1 %v2073_v21  ;;  %v2167_v20 = vunpack.c.h.s8.bf16 %v1409_v9  ;;  %v2169_v21 = vunpack.c.h.s8.bf16 %v1411_v10 }
 0x46f   : > { %v11677_v31 = vpop.f32.mrb[0].mxu0  ;;  %v11679_v32 = vpop.f32.mrb[0].mxu1 }
 0x470   : > { %v11681_v33 = vpop.f32.mrb[1].mxu0  ;;  %v11683_v34 = vpop.f32.mrb[1].mxu1 }
 0x471   : > { %v2359_v35 = vpop.f32.mrb[2].mxu0  ;;  %v2523_v37 = vpop.f32.mrb[2].mxu1  ;;  %2660 = vmatpush1.bf16.msra.mxu0 %v2070_v24  ;;  %2824 = vmatpush1.bf16.msra.mxu1 %v2072_v25  ;;  %v2166_v24 = vunpack.c.h.s8.bf16 %v1408_v15  ;;  %v2168_v25 = vunpack.c.h.s8.bf16 %v1410_v16  ;;  %v1089_v16 = vld [vmem:[#allocation6 + $0x168] sm:$0xff] }
 0x472   : > { %v2360_v40 = vpop.f32.mrb[3].mxu0  ;;  %v2524_v41 = vpop.f32.mrb[3].mxu1  ;;  %2661 = vmatprep.subr.bf16.mxu0 %v2083_v27  ;;  %2825 = vmatprep.subr.bf16.mxu1 %v2085_v28  ;;  %v2179_v27 = vunpack.c.l.s8.bf16 %v1421_v22  ;;  %v2181_v28 = vunpack.c.l.s8.bf16 %v1423_v23  ;;  %v2178_v35 = vunpack.c.l.s8.bf16 %v1420_v29  ;;  %v2180_v37 = vunpack.c.l.s8.bf16 %v1422_v30 }
 0x473   : > { %v1053_v40 = vld [vmem:[#allocation6 + $0x48] sm:$0xff]  ;;  %v1055_v41 = vld [vmem:[#allocation6 + $0x58] sm:$0xff] }
 0x474   : > { %v1439_v46 = vunpack.c.l.s8.bf16 %v1053_v40  ;;  %v1441_v47 = vunpack.c.l.s8.bf16 %v1055_v41  ;;  %v1451_v53 = vunpack.c.h.s8.bf16 %v1053_v40  ;;  %v1453_v54 = vunpack.c.h.s8.bf16 %v1055_v41  ;;  %v1100_v41 = vld [vmem:[#allocation6 + $0x1c0] sm:$0xff] }
 0x475   : > { %2662 = vmatpush1.bf16.msra.mxu0 %v2082_v38  ;;  %2826 = vmatpush1.bf16.msra.mxu1 %v2084_v39  ;;  %v2191_v38 = vunpack.c.h.s8.bf16 %v1421_v22  ;;  %v2193_v39 = vunpack.c.h.s8.bf16 %v1423_v23  ;;  %v1088_v23 = vld [vmem:[#allocation6 + $0x160] sm:$0xff] }
 0x476   : > { %2663 = vmatprep.subr.bf16.mxu0 %v2095_v42  ;;  %2827 = vmatprep.subr.bf16.mxu1 %v2097_v44  ;;  %v2190_v42 = vunpack.c.h.s8.bf16 %v1420_v29  ;;  %v2192_v44 = vunpack.c.h.s8.bf16 %v1422_v30  ;;  %v1101_v30 = vld [vmem:[#allocation6 + $0x1c8] sm:$0xff] }
 0x479   : > { %2664 = vmatpush1.bf16.msra.mxu0 %v2094_v48  ;;  %2828 = vmatpush1.bf16.msra.mxu1 %v2096_v49  ;;  %v1052_v48 = vld [vmem:[#allocation6 + $0x40] sm:$0xff]  ;;  %v1054_v49 = vld [vmem:[#allocation6 + $0x50] sm:$0xff] }
 0x47a   : > { %2665 = vmatprep.subr.bf16.mxu0 %v2107_v50  ;;  %2829 = vmatprep.subr.bf16.mxu1 %v2109_v52  ;;  %v1438_v50 = vunpack.c.l.s8.bf16 %v1052_v48  ;;  %v1440_v52 = vunpack.c.l.s8.bf16 %v1054_v49 }
 0x47d   : > { %2666 = vmatpush1.bf16.msra.mxu0 %v2106_v55  ;;  %2830 = vmatpush1.bf16.msra.mxu1 %v2108_v56  ;;  %v1065_v55 = vld [vmem:[#allocation6 + $0xa8] sm:$0xff]  ;;  %v1067_v56 = vld [vmem:[#allocation6 + $0xb8] sm:$0xff] }
 0x47e   : > { %2667 = vmatprep.subr.bf16.mxu0 %v2119_v57  ;;  %2831 = vmatprep.subr.bf16.mxu1 %v2121_v58  ;;  %v1450_v57 = vunpack.c.h.s8.bf16 %v1052_v48  ;;  %v1452_v58 = vunpack.c.h.s8.bf16 %v1054_v49  ;;  %v1463_v59 = vunpack.c.l.s8.bf16 %v1065_v55  ;;  %v1465_v60 = vunpack.c.l.s8.bf16 %v1067_v56  ;;  %v1113_v49 = vld [vmem:[#allocation6 + $0x228] sm:$0xff] }
 0x47f   : > { %v1475_v2 = vunpack.c.h.s8.bf16 %v1065_v55  ;;  %v1477_v3 = vunpack.c.h.s8.bf16 %v1067_v56  ;;  %v1112_v56 = vld [vmem:[#allocation6 + $0x220] sm:$0xff] }
 0x481   : > { %2668 = vmatpush1.bf16.msra.mxu0 %v2118_v61  ;;  %2832 = vmatpush1.bf16.msra.mxu1 %v2120_v63  ;;  %v1064_v61 = vld [vmem:[#allocation6 + $0xa0] sm:$0xff]  ;;  %v1066_v63 = vld [vmem:[#allocation6 + $0xb0] sm:$0xff] }
 0x482   : > { %2669 = vmatprep.subr.bf16.mxu0 %v2131_v0  ;;  %2833 = vmatprep.subr.bf16.mxu1 %v2133_v1  ;;  %v1462_v0 = vunpack.c.l.s8.bf16 %v1064_v61  ;;  %v1464_v1 = vunpack.c.l.s8.bf16 %v1066_v63 }
 0x485   : > { %2670 = vmatpush1.bf16.msra.mxu0 %v2130_v4  ;;  %2834 = vmatpush1.bf16.msra.mxu1 %v2132_v5  ;;  %v1077_v4 = vld [vmem:[#allocation6 + $0x108] sm:$0xff]  ;;  %v1079_v5 = vld [vmem:[#allocation6 + $0x118] sm:$0xff] }
 0x486   : > { %2671 = vmatprep.subr.bf16.mxu0 %v2143_v7  ;;  %2835 = vmatprep.subr.bf16.mxu1 %v2145_v8  ;;  %v1474_v7 = vunpack.c.h.s8.bf16 %v1064_v61  ;;  %v1476_v8 = vunpack.c.h.s8.bf16 %v1066_v63  ;;  %v1487_v9 = vunpack.c.l.s8.bf16 %v1077_v4  ;;  %v1489_v10 = vunpack.c.l.s8.bf16 %v1079_v5  ;;  %v1125_v63 = vld [vmem:[#allocation6 + $0x288] sm:$0xff] }
 0x487   : > { %v1501_v15 = vunpack.c.h.s8.bf16 %v1079_v5  ;;  %v1124_v5 = vld [vmem:[#allocation6 + $0x280] sm:$0xff] }
 0x489   : > { %2672 = vmatpush1.bf16.msra.mxu0 %v2142_v11  ;;  %2836 = vmatpush1.bf16.msra.mxu1 %v2144_v12  ;;  %v1076_v11 = vld [vmem:[#allocation6 + $0x100] sm:$0xff] }
 0x48a   : > { %2673 = vmatprep.subr.bf16.mxu0 %v2155_v13  ;;  %2837 = vmatprep.subr.bf16.mxu1 %v2157_v14  ;;  %v1486_v12 = vunpack.c.l.s8.bf16 %v1076_v11  ;;  %v1499_v14 = vunpack.c.h.s8.bf16 %v1077_v4 }
 0x48d   : > { %2674 = vmatpush1.bf16.msra.mxu0 %v2154_v17  ;;  %2838 = vmatpush1.bf16.msra.mxu1 %v2156_v19  ;;  %v1091_v17 = vld [vmem:[#allocation6 + $0x178] sm:$0xff]  ;;  %v1498_v19 = vunpack.c.h.s8.bf16 %v1076_v11 }
 0x48e   : > { %2675 = vmatprep.subr.bf16.mxu0 %v2167_v20  ;;  %2839 = vmatprep.subr.bf16.mxu1 %v2169_v21  ;;  %v1511_v21 = vunpack.c.l.s8.bf16 %v1089_v16  ;;  %v1513_v22 = vunpack.c.l.s8.bf16 %v1091_v17  ;;  %v1525_v29 = vunpack.c.h.s8.bf16 %v1091_v17  ;;  %v1136_v17 = vld [vmem:[#allocation6 + $0x2e0] sm:$0xff] }
 0x491   : > { %2676 = vmatpush1.bf16.msra.mxu0 %v2166_v24  ;;  %2840 = vmatpush1.bf16.msra.mxu1 %v2168_v25  ;;  %v1090_v24 = vld [vmem:[#allocation6 + $0x170] sm:$0xff]  ;;  %v1510_v25 = vunpack.c.l.s8.bf16 %v1088_v23 }
 0x492   : > { %2677 = vmatprep.subr.bf16.mxu0 %v2179_v27  ;;  %2841 = vmatprep.subr.bf16.mxu1 %v2181_v28  ;;  %v1512_v27 = vunpack.c.l.s8.bf16 %v1090_v24  ;;  %v1523_v28 = vunpack.c.h.s8.bf16 %v1089_v16 }
 0x495   : > { %2678 = vmatpush1.bf16.msra.mxu0 %v2178_v35  ;;  %2842 = vmatpush1.bf16.msra.mxu1 %v2180_v37  ;;  %v1103_v35 = vld [vmem:[#allocation6 + $0x1d8] sm:$0xff]  ;;  %v1522_v37 = vunpack.c.h.s8.bf16 %v1088_v23 }
 0x496   : > { %2679 = vmatprep.subr.bf16.mxu0 %v2191_v38  ;;  %2843 = vmatprep.subr.bf16.mxu1 %v2193_v39  ;;  %v1524_v38 = vunpack.c.h.s8.bf16 %v1090_v24  ;;  %v1535_v39 = vunpack.c.l.s8.bf16 %v1101_v30  ;;  %v1537_v40 = vunpack.c.l.s8.bf16 %v1103_v35  ;;  %v1549_v48 = vunpack.c.h.s8.bf16 %v1103_v35  ;;  %v1149_v24 = vld [vmem:[#allocation6 + $0x348] sm:$0xff]  ;;  %v1148_v35 = vld [vmem:[#allocation6 + $0x340] sm:$0xff] }
 0x499   : > { %2680 = vmatpush1.bf16.msra.mxu0 %v2190_v42  ;;  %2844 = vmatpush1.bf16.msra.mxu1 %v2192_v44  ;;  %v1102_v42 = vld [vmem:[#allocation6 + $0x1d0] sm:$0xff]  ;;  %v1534_v44 = vunpack.c.l.s8.bf16 %v1100_v41 }
 0x49a   : > { %2854 = vmatprep.subr.bf16.mxu0 %v1439_v46  ;;  %3018 = vmatprep.subr.bf16.mxu1 %v1441_v47  ;;  %v1536_v46 = vunpack.c.l.s8.bf16 %v1102_v42  ;;  %v1547_v47 = vunpack.c.h.s8.bf16 %v1101_v30 }
 0x49c   : > { %2682 = vmatmul.mubr.bf16.vlgmr.msra.gmra.mrb[4].mxu0 %v11659_v45  ;;  %2846 = vmatmul.mubr.bf16.vlgmr.msra.gmra.mrb[4].mxu1 %v11659_v45 }
 0x49d   : > { %2855 = vmatpush1.bf16.msra.mxu0 %v1438_v50  ;;  %3019 = vmatpush1.bf16.msra.mxu1 %v1440_v52  ;;  %v1115_v50 = vld [vmem:[#allocation6 + $0x238] sm:$0xff]  ;;  %v1546_v52 = vunpack.c.h.s8.bf16 %v1100_v41 }
 0x49e   : > { %2856 = vmatprep.subr.bf16.mxu0 %v1451_v53  ;;  %3020 = vmatprep.subr.bf16.mxu1 %v1453_v54  ;;  %v1548_v53 = vunpack.c.h.s8.bf16 %v1102_v42  ;;  %v1559_v54 = vunpack.c.l.s8.bf16 %v1113_v49  ;;  %v1561_v55 = vunpack.c.l.s8.bf16 %v1115_v50  ;;  %v1573_v61 = vunpack.c.h.s8.bf16 %v1115_v50  ;;  %v1161_v42 = vld [vmem:[#allocation6 + $0x3a8] sm:$0xff]  ;;  %v1160_v50 = vld [vmem:[#allocation6 + $0x3a0] sm:$0xff] }
 0x49f   : > { %2886 = vmatprep.mubr.bf16.mxu0 %v11631_v36  ;;  %3050 = vmatprep.mubr.bf16.mxu1 %v11631_v36  ;;  %v1078_v36 = vld [vmem:[#allocation6 + $0x110] sm:$0xff] }
 0x4a0   : > { %v1488_v13 = vunpack.c.l.s8.bf16 %v1078_v36  ;;  %v1500_v20 = vunpack.c.h.s8.bf16 %v1078_v36  ;;  %v1137_v36 = vld [vmem:[#allocation6 + $0x2e8] sm:$0xff] }
 0x4a1   : > { %2857 = vmatpush1.bf16.msra.mxu0 %v1450_v57  ;;  %3021 = vmatpush1.bf16.msra.mxu1 %v1452_v58  ;;  %v1114_v57 = vld [vmem:[#allocation6 + $0x230] sm:$0xff]  ;;  %v1558_v58 = vunpack.c.l.s8.bf16 %v1112_v56 }
 0x4a2   : > { %2858 = vmatprep.subr.bf16.mxu0 %v1463_v59  ;;  %3022 = vmatprep.subr.bf16.mxu1 %v1465_v60  ;;  %v1560_v59 = vunpack.c.l.s8.bf16 %v1114_v57  ;;  %v1571_v60 = vunpack.c.h.s8.bf16 %v1113_v49 }
 0x4a5   : > { %2859 = vmatpush1.bf16.msra.mxu0 %v1462_v0  ;;  %3023 = vmatpush1.bf16.msra.mxu1 %v1464_v1  ;;  %v1127_v0 = vld [vmem:[#allocation6 + $0x298] sm:$0xff]  ;;  %v1570_v1 = vunpack.c.h.s8.bf16 %v1112_v56  ;;  %v1173_v56 = vld [vmem:[#allocation6 + $0x408] sm:$0xff] }
 0x4a6   : > { %2860 = vmatprep.subr.bf16.mxu0 %v1475_v2  ;;  %3024 = vmatprep.subr.bf16.mxu1 %v1477_v3  ;;  %v1572_v2 = vunpack.c.h.s8.bf16 %v1114_v57  ;;  %v1583_v3 = vunpack.c.l.s8.bf16 %v1125_v63  ;;  %v1585_v4 = vunpack.c.l.s8.bf16 %v1127_v0  ;;  %v1597_v11 = vunpack.c.h.s8.bf16 %v1127_v0  ;;  %v1175_v57 = vld [vmem:[#allocation6 + $0x418] sm:$0xff] }
 0x4a9   : > { %2861 = vmatpush1.bf16.msra.mxu0 %v1474_v7  ;;  %3025 = vmatpush1.bf16.msra.mxu1 %v1476_v8  ;;  %v1126_v7 = vld [vmem:[#allocation6 + $0x290] sm:$0xff]  ;;  %v1582_v8 = vunpack.c.l.s8.bf16 %v1124_v5 }
 0x4aa   : > { %2862 = vmatprep.subr.bf16.mxu0 %v1487_v9  ;;  %3026 = vmatprep.subr.bf16.mxu1 %v1489_v10  ;;  %v1584_v9 = vunpack.c.l.s8.bf16 %v1126_v7  ;;  %v1595_v10 = vunpack.c.h.s8.bf16 %v1125_v63  ;;  %v1172_v63 = vld [vmem:[#allocation6 + $0x400] sm:$0xff] }
 0x4ab   : > { %v1678_v0 = vunpack.c.l.s8.bf16 %v1172_v63 }
 0x4ad   : > { %2863 = vmatpush1.bf16.msra.mxu0 %v1486_v12  ;;  %3027 = vmatpush1.bf16.msra.mxu1 %v1488_v13  ;;  %v1139_v12 = vld [vmem:[#allocation6 + $0x2f8] sm:$0xff]  ;;  %v1594_v13 = vunpack.c.h.s8.bf16 %v1124_v5 }
 0x4ae   : > { %2864 = vmatprep.subr.bf16.mxu0 %v1499_v14  ;;  %3028 = vmatprep.subr.bf16.mxu1 %v1501_v15  ;;  %v1596_v14 = vunpack.c.h.s8.bf16 %v1126_v7  ;;  %v1607_v15 = vunpack.c.l.s8.bf16 %v1137_v36  ;;  %v1609_v16 = vunpack.c.l.s8.bf16 %v1139_v12  ;;  %v1621_v23 = vunpack.c.h.s8.bf16 %v1139_v12  ;;  %v1187_v5 = vld [vmem:[#allocation6 + $0x478] sm:$0xff] }
 0x4af   : > { %v1690_v7 = vunpack.c.h.s8.bf16 %v1172_v63  ;;  %v1235_v63 = vld [vmem:[#allocation6 + $0x5f8] sm:$0xff] }
 0x4b1   : > { %2865 = vmatpush1.bf16.msra.mxu0 %v1498_v19  ;;  %3029 = vmatpush1.bf16.msra.mxu1 %v1500_v20  ;;  %v1138_v19 = vld [vmem:[#allocation6 + $0x2f0] sm:$0xff]  ;;  %v1606_v20 = vunpack.c.l.s8.bf16 %v1136_v17 }
 0x4b2   : > { %2866 = vmatprep.subr.bf16.mxu0 %v1511_v21  ;;  %3030 = vmatprep.subr.bf16.mxu1 %v1513_v22  ;;  %v1608_v21 = vunpack.c.l.s8.bf16 %v1138_v19  ;;  %v1619_v22 = vunpack.c.h.s8.bf16 %v1137_v36  ;;  %v1186_v36 = vld [vmem:[#allocation6 + $0x470] sm:$0xff] }
 0x4b5   : > { %2867 = vmatpush1.bf16.msra.mxu0 %v1510_v25  ;;  %3031 = vmatpush1.bf16.msra.mxu1 %v1512_v27  ;;  %v1151_v25 = vld [vmem:[#allocation6 + $0x358] sm:$0xff]  ;;  %v1618_v27 = vunpack.c.h.s8.bf16 %v1136_v17 }
 0x4b6   : > { %2868 = vmatprep.subr.bf16.mxu0 %v1523_v28  ;;  %3032 = vmatprep.subr.bf16.mxu1 %v1525_v29  ;;  %v1620_v28 = vunpack.c.h.s8.bf16 %v1138_v19  ;;  %v1631_v29 = vunpack.c.l.s8.bf16 %v1149_v24  ;;  %v1633_v30 = vunpack.c.l.s8.bf16 %v1151_v25  ;;  %v1645_v41 = vunpack.c.h.s8.bf16 %v1151_v25  ;;  %v1199_v17 = vld [vmem:[#allocation6 + $0x4d8] sm:$0xff] }
 0x4b9   : > { %2869 = vmatpush1.bf16.msra.mxu0 %v1522_v37  ;;  %3033 = vmatpush1.bf16.msra.mxu1 %v1524_v38  ;;  %v1150_v37 = vld [vmem:[#allocation6 + $0x350] sm:$0xff]  ;;  %v1630_v38 = vunpack.c.l.s8.bf16 %v1148_v35 }
 0x4ba   : > { %2870 = vmatprep.subr.bf16.mxu0 %v1535_v39  ;;  %3034 = vmatprep.subr.bf16.mxu1 %v1537_v40  ;;  %v1632_v39 = vunpack.c.l.s8.bf16 %v1150_v37  ;;  %v1643_v40 = vunpack.c.h.s8.bf16 %v1149_v24  ;;  %v1198_v24 = vld [vmem:[#allocation6 + $0x4d0] sm:$0xff] }
 0x4bd   : > { %2871 = vmatpush1.bf16.msra.mxu0 %v1534_v44  ;;  %3035 = vmatpush1.bf16.msra.mxu1 %v1536_v46  ;;  %v1163_v44 = vld [vmem:[#allocation6 + $0x3b8] sm:$0xff]  ;;  %v1642_v46 = vunpack.c.h.s8.bf16 %v1148_v35 }
 0x4be   : > { %2872 = vmatprep.subr.bf16.mxu0 %v1547_v47  ;;  %3036 = vmatprep.subr.bf16.mxu1 %v1549_v48  ;;  %v1644_v47 = vunpack.c.h.s8.bf16 %v1150_v37  ;;  %v1655_v48 = vunpack.c.l.s8.bf16 %v1161_v42  ;;  %v1657_v49 = vunpack.c.l.s8.bf16 %v1163_v44  ;;  %v1211_v35 = vld [vmem:[#allocation6 + $0x538] sm:$0xff] }
 0x4c1   : > { %2873 = vmatpush1.bf16.msra.mxu0 %v1546_v52  ;;  %3037 = vmatpush1.bf16.msra.mxu1 %v1548_v53  ;;  %v1162_v52 = vld [vmem:[#allocation6 + $0x3b0] sm:$0xff]  ;;  %v1654_v53 = vunpack.c.l.s8.bf16 %v1160_v50 }
 0x4c2   : > { %2874 = vmatprep.subr.bf16.mxu0 %v1559_v54  ;;  %3038 = vmatprep.subr.bf16.mxu1 %v1561_v55  ;;  %v1656_v54 = vunpack.c.l.s8.bf16 %v1162_v52  ;;  %v1669_v55 = vunpack.c.h.s8.bf16 %v1163_v44 }
 0x4c5   : > { %2875 = vmatpush1.bf16.msra.mxu0 %v1558_v58  ;;  %3039 = vmatpush1.bf16.msra.mxu1 %v1560_v59  ;;  %v1666_v58 = vunpack.c.h.s8.bf16 %v1160_v50  ;;  %v1668_v59 = vunpack.c.h.s8.bf16 %v1162_v52  ;;  %v1223_v50 = vld [vmem:[#allocation6 + $0x598] sm:$0xff] }
 0x4c6   : > { %2876 = vmatprep.subr.bf16.mxu0 %v1571_v60  ;;  %3040 = vmatprep.subr.bf16.mxu1 %v1573_v61  ;;  %v1679_v60 = vunpack.c.l.s8.bf16 %v1173_v56  ;;  %v1681_v61 = vunpack.c.l.s8.bf16 %v1175_v57 }
 0x4c9   : > { %2877 = vmatpush1.bf16.msra.mxu0 %v1570_v1  ;;  %3041 = vmatpush1.bf16.msra.mxu1 %v1572_v2  ;;  %v1691_v2 = vunpack.c.h.s8.bf16 %v1173_v56  ;;  %v1222_v56 = vld [vmem:[#allocation6 + $0x590] sm:$0xff] }
 0x4ca   : > { %2878 = vmatprep.subr.bf16.mxu0 %v1583_v3  ;;  %3042 = vmatprep.subr.bf16.mxu1 %v1585_v4  ;;  %v1693_v3 = vunpack.c.h.s8.bf16 %v1175_v57  ;;  %v1185_v4 = vld [vmem:[#allocation6 + $0x468] sm:$0xff] }
 0x4cd   : > { %2879 = vmatpush1.bf16.msra.mxu0 %v1582_v8  ;;  %3043 = vmatpush1.bf16.msra.mxu1 %v1584_v9  ;;  %v1703_v9 = vunpack.c.l.s8.bf16 %v1185_v4 }
 0x4ce   : > { %2880 = vmatprep.subr.bf16.mxu0 %v1595_v10  ;;  %3044 = vmatprep.subr.bf16.mxu1 %v1597_v11  ;;  %v1705_v10 = vunpack.c.l.s8.bf16 %v1187_v5  ;;  %v1184_v11 = vld [vmem:[#allocation6 + $0x460] sm:$0xff] }
 0x4cf   : > { %v1702_v12 = vunpack.c.l.s8.bf16 %v1184_v11  ;;  %v1714_v19 = vunpack.c.h.s8.bf16 %v1184_v11  ;;  %v1247_v11 = vld [vmem:[#allocation6 + $0x658] sm:$0xff] }
 0x4d1   : > { %2881 = vmatpush1.bf16.msra.mxu0 %v1594_v13  ;;  %3045 = vmatpush1.bf16.msra.mxu1 %v1596_v14  ;;  %v1704_v13 = vunpack.c.l.s8.bf16 %v1186_v36  ;;  %v1715_v14 = vunpack.c.h.s8.bf16 %v1185_v4  ;;  %v1234_v4 = vld [vmem:[#allocation6 + $0x5f0] sm:$0xff] }
 0x4d2   : > { %2882 = vmatprep.subr.bf16.mxu0 %v1607_v15  ;;  %3046 = vmatprep.subr.bf16.mxu1 %v1609_v16  ;;  %v1717_v15 = vunpack.c.h.s8.bf16 %v1187_v5  ;;  %v1197_v16 = vld [vmem:[#allocation6 + $0x4c8] sm:$0xff] }
 0x4d5   : > { %2883 = vmatpush1.bf16.msra.mxu0 %v1606_v20  ;;  %3047 = vmatpush1.bf16.msra.mxu1 %v1608_v21  ;;  %v1716_v20 = vunpack.c.h.s8.bf16 %v1186_v36  ;;  %v1727_v21 = vunpack.c.l.s8.bf16 %v1197_v16 }
 0x4d6   : > { %2884 = vmatprep.subr.bf16.mxu0 %v1619_v22  ;;  %3048 = vmatprep.subr.bf16.mxu1 %v1621_v23  ;;  %v1729_v22 = vunpack.c.l.s8.bf16 %v1199_v17  ;;  %v1196_v23 = vld [vmem:[#allocation6 + $0x4c0] sm:$0xff] }
 0x4d7   : > { %v1726_v25 = vunpack.c.l.s8.bf16 %v1196_v23  ;;  %v1738_v37 = vunpack.c.h.s8.bf16 %v1196_v23  ;;  %v1259_v23 = vld [vmem:[#allocation6 + $0x6b8] sm:$0xff] }
 0x4d9   : > { %2885 = vmatpush1.bf16.msra.mxu0 %v1618_v27  ;;  %3049 = vmatpush1.bf16.msra.mxu1 %v1620_v28  ;;  %v1728_v27 = vunpack.c.l.s8.bf16 %v1198_v24  ;;  %v1739_v28 = vunpack.c.h.s8.bf16 %v1197_v16  ;;  %v1246_v16 = vld [vmem:[#allocation6 + $0x650] sm:$0xff] }
 0x4da   : > { %2895 = vmatprep.subr.bf16.mxu0 %v1631_v29  ;;  %3059 = vmatprep.subr.bf16.mxu1 %v1633_v30  ;;  %v1741_v29 = vunpack.c.h.s8.bf16 %v1199_v17  ;;  %v1209_v30 = vld [vmem:[#allocation6 + $0x528] sm:$0xff] }
 0x4dc   : > { %2887 = vmatmul.mubr.bf16.vlgmr.msra.gmra.mrb[8].mxu0 %v11635_v43  ;;  %3051 = vmatmul.mubr.bf16.vlgmr.msra.gmra.mrb[8].mxu1 %v11635_v43  ;;  %v1667_v43 = vunpack.c.h.s8.bf16 %v1161_v42  ;;  %v1210_v42 = vld [vmem:[#allocation6 + $0x530] sm:$0xff] }
 0x4dd   : > { %2896 = vmatpush1.bf16.msra.mxu0 %v1630_v38  ;;  %3060 = vmatpush1.bf16.msra.mxu1 %v1632_v39  ;;  %v1740_v38 = vunpack.c.h.s8.bf16 %v1198_v24  ;;  %v1751_v39 = vunpack.c.l.s8.bf16 %v1209_v30 }
 0x4de   : > { %2897 = vmatprep.subr.bf16.mxu0 %v1643_v40  ;;  %3061 = vmatprep.subr.bf16.mxu1 %v1645_v41  ;;  %v1753_v40 = vunpack.c.l.s8.bf16 %v1211_v35  ;;  %v1208_v41 = vld [vmem:[#allocation6 + $0x520] sm:$0xff] }
 0x4df   : > { %2927 = vmatprep.mubr.bf16.mxu0 %v11637_v51  ;;  %3091 = vmatprep.mubr.bf16.mxu1 %v11637_v51  ;;  %v1174_v51 = vld [vmem:[#allocation6 + $0x410] sm:$0xff]  ;;  %v1750_v44 = vunpack.c.l.s8.bf16 %v1208_v41  ;;  %v1762_v52 = vunpack.c.h.s8.bf16 %v1208_v41 }
 0x4e0   : > { %v1680_v1 = vunpack.c.l.s8.bf16 %v1174_v51  ;;  %v1692_v8 = vunpack.c.h.s8.bf16 %v1174_v51 }
 0x4e1   : > { %2898 = vmatpush1.bf16.msra.mxu0 %v1642_v46  ;;  %3062 = vmatpush1.bf16.msra.mxu1 %v1644_v47  ;;  %v1752_v46 = vunpack.c.l.s8.bf16 %v1210_v42  ;;  %v1763_v47 = vunpack.c.h.s8.bf16 %v1209_v30  ;;  %v1258_v30 = vld [vmem:[#allocation6 + $0x6b0] sm:$0xff] }
 0x4e2   : > { %2899 = vmatprep.subr.bf16.mxu0 %v1655_v48  ;;  %3063 = vmatprep.subr.bf16.mxu1 %v1657_v49  ;;  %v1765_v48 = vunpack.c.h.s8.bf16 %v1211_v35  ;;  %v1221_v49 = vld [vmem:[#allocation6 + $0x588] sm:$0xff] }
 0x4e5   : > { %2900 = vmatpush1.bf16.msra.mxu0 %v1654_v53  ;;  %3064 = vmatpush1.bf16.msra.mxu1 %v1656_v54  ;;  %v1764_v53 = vunpack.c.h.s8.bf16 %v1210_v42  ;;  %v1775_v54 = vunpack.c.l.s8.bf16 %v1221_v49  ;;  %v1860_v42 = vunpack.c.h.s8.bf16 %v1258_v30 }
 0x4e6   : > { %2901 = vmatprep.subr.bf16.mxu0 %v1667_v43  ;;  %3065 = vmatprep.subr.bf16.mxu1 %v1669_v55  ;;  %v1777_v43 = vunpack.c.l.s8.bf16 %v1223_v50  ;;  %v1220_v55 = vld [vmem:[#allocation6 + $0x580] sm:$0xff] }
 0x4e7   : > { %v1774_v57 = vunpack.c.l.s8.bf16 %v1220_v55  ;;  %v1786_v51 = vunpack.c.h.s8.bf16 %v1220_v55 }
 0x4e9   : > { %2902 = vmatpush1.bf16.msra.mxu0 %v1666_v58  ;;  %3066 = vmatpush1.bf16.msra.mxu1 %v1668_v59  ;;  %v1776_v58 = vunpack.c.l.s8.bf16 %v1222_v56  ;;  %v1787_v59 = vunpack.c.h.s8.bf16 %v1221_v49 }
 0x4ea   : > { %2903 = vmatprep.subr.bf16.mxu0 %v1679_v60  ;;  %3067 = vmatprep.subr.bf16.mxu1 %v1681_v61  ;;  %v1789_v60 = vunpack.c.h.s8.bf16 %v1223_v50  ;;  %v1233_v61 = vld [vmem:[#allocation6 + $0x5e8] sm:$0xff] }
 0x4ed   : > { %2904 = vmatpush1.bf16.msra.mxu0 %v1678_v0  ;;  %3068 = vmatpush1.bf16.msra.mxu1 %v1680_v1  ;;  %v1788_v0 = vunpack.c.h.s8.bf16 %v1222_v56  ;;  %v1799_v1 = vunpack.c.l.s8.bf16 %v1233_v61 }
 0x4ee   : > { %2905 = vmatprep.subr.bf16.mxu0 %v1691_v2  ;;  %3069 = vmatprep.subr.bf16.mxu1 %v1693_v3  ;;  %v1801_v2 = vunpack.c.l.s8.bf16 %v1235_v63  ;;  %v1232_v3 = vld [vmem:[#allocation6 + $0x5e0] sm:$0xff] }
 0x4ef   : > { %v1798_v5 = vunpack.c.l.s8.bf16 %v1232_v3  ;;  %v1810_v36 = vunpack.c.h.s8.bf16 %v1232_v3 }
 0x4f1   : > { %2906 = vmatpush1.bf16.msra.mxu0 %v1690_v7  ;;  %3070 = vmatpush1.bf16.msra.mxu1 %v1692_v8  ;;  %v1800_v7 = vunpack.c.l.s8.bf16 %v1234_v4  ;;  %v1811_v8 = vunpack.c.h.s8.bf16 %v1233_v61 }
 0x4f2   : > { %2907 = vmatprep.subr.bf16.mxu0 %v1703_v9  ;;  %3071 = vmatprep.subr.bf16.mxu1 %v1705_v10  ;;  %v1813_v9 = vunpack.c.h.s8.bf16 %v1235_v63  ;;  %v1245_v10 = vld [vmem:[#allocation6 + $0x648] sm:$0xff] }
 0x4f5   : > { %2908 = vmatpush1.bf16.msra.mxu0 %v1702_v12  ;;  %3072 = vmatpush1.bf16.msra.mxu1 %v1704_v13  ;;  %v1812_v12 = vunpack.c.h.s8.bf16 %v1234_v4  ;;  %v1823_v13 = vunpack.c.l.s8.bf16 %v1245_v10 }
 0x4f6   : > { %2909 = vmatprep.subr.bf16.mxu0 %v1715_v14  ;;  %3073 = vmatprep.subr.bf16.mxu1 %v1717_v15  ;;  %v1825_v14 = vunpack.c.l.s8.bf16 %v1247_v11  ;;  %v1244_v15 = vld [vmem:[#allocation6 + $0x640] sm:$0xff] }
 0x4f7   : > { %v1822_v17 = vunpack.c.l.s8.bf16 %v1244_v15  ;;  %v1834_v24 = vunpack.c.h.s8.bf16 %v1244_v15 }
 0x4f9   : > { %2910 = vmatpush1.bf16.msra.mxu0 %v1714_v19  ;;  %3074 = vmatpush1.bf16.msra.mxu1 %v1716_v20  ;;  %v1824_v19 = vunpack.c.l.s8.bf16 %v1246_v16  ;;  %v1835_v20 = vunpack.c.h.s8.bf16 %v1245_v10 }
 0x4fa   : > { %2911 = vmatprep.subr.bf16.mxu0 %v1727_v21  ;;  %3075 = vmatprep.subr.bf16.mxu1 %v1729_v22  ;;  %v1837_v21 = vunpack.c.h.s8.bf16 %v1247_v11  ;;  %v1257_v22 = vld [vmem:[#allocation6 + $0x6a8] sm:$0xff] }
 0x4fd   : > { %2912 = vmatpush1.bf16.msra.mxu0 %v1726_v25  ;;  %3076 = vmatpush1.bf16.msra.mxu1 %v1728_v27  ;;  %v1836_v25 = vunpack.c.h.s8.bf16 %v1246_v16  ;;  %v1847_v27 = vunpack.c.l.s8.bf16 %v1257_v22 }
 0x4fe   : > { %2913 = vmatprep.subr.bf16.mxu0 %v1739_v28  ;;  %3077 = vmatprep.subr.bf16.mxu1 %v1741_v29  ;;  %v1849_v28 = vunpack.c.l.s8.bf16 %v1259_v23  ;;  %v1256_v29 = vld [vmem:[#allocation6 + $0x6a0] sm:$0xff] }
 0x4ff   : > { %v1846_v35 = vunpack.c.l.s8.bf16 %v1256_v29  ;;  %v1858_v41 = vunpack.c.h.s8.bf16 %v1256_v29 }
 0x501   : > { %2914 = vmatpush1.bf16.msra.mxu0 %v1738_v37  ;;  %3078 = vmatpush1.bf16.msra.mxu1 %v1740_v38  ;;  %v1848_v37 = vunpack.c.l.s8.bf16 %v1258_v30  ;;  %v1861_v38 = vunpack.c.h.s8.bf16 %v1259_v23 }
 0x502   : > { %2915 = vmatprep.subr.bf16.mxu0 %v1751_v39  ;;  %3079 = vmatprep.subr.bf16.mxu1 %v1753_v40  ;;  %v1269_v39 = vld [vmem:[#allocation6 + $0x708] sm:$0xff]  ;;  %v1271_v40 = vld [vmem:[#allocation6 + $0x718] sm:$0xff] }
 0x503   : > { %v1883_v50 = vunpack.c.h.s8.bf16 %v1269_v39 }
 0x505   : > { %2916 = vmatpush1.bf16.msra.mxu0 %v1750_v44  ;;  %3080 = vmatpush1.bf16.msra.mxu1 %v1752_v46  ;;  %v1871_v44 = vunpack.c.l.s8.bf16 %v1269_v39  ;;  %v1873_v46 = vunpack.c.l.s8.bf16 %v1271_v40 }
 0x506   : > { %2917 = vmatprep.subr.bf16.mxu0 %v1763_v47  ;;  %3081 = vmatprep.subr.bf16.mxu1 %v1765_v48  ;;  %v1268_v47 = vld [vmem:[#allocation6 + $0x700] sm:$0xff] }
 0x507   : > { %v1870_v48 = vunpack.c.l.s8.bf16 %v1268_v47 }
 0x509   : > { %2918 = vmatpush1.bf16.msra.mxu0 %v1762_v52  ;;  %3082 = vmatpush1.bf16.msra.mxu1 %v1764_v53  ;;  %v1885_v52 = vunpack.c.h.s8.bf16 %v1271_v40  ;;  %v1281_v53 = vld [vmem:[#allocation6 + $0x768] sm:$0xff] }
 0x50a   : > { %2919 = vmatprep.subr.bf16.mxu0 %v1775_v54  ;;  %3083 = vmatprep.subr.bf16.mxu1 %v1777_v43  ;;  %v1283_v54 = vld [vmem:[#allocation6 + $0x778] sm:$0xff]  ;;  %v1882_v43 = vunpack.c.h.s8.bf16 %v1268_v47  ;;  %v1895_v56 = vunpack.c.l.s8.bf16 %v1281_v53  ;;  %v1907_v63 = vunpack.c.h.s8.bf16 %v1281_v53 }
 0x50d   : > { %2920 = vmatpush1.bf16.msra.mxu0 %v1774_v57  ;;  %3084 = vmatpush1.bf16.msra.mxu1 %v1776_v58  ;;  %v1897_v57 = vunpack.c.l.s8.bf16 %v1283_v54  ;;  %v1280_v58 = vld [vmem:[#allocation6 + $0x760] sm:$0xff] }
 0x50e   : > { %2921 = vmatprep.subr.bf16.mxu0 %v1787_v59  ;;  %3085 = vmatprep.subr.bf16.mxu1 %v1789_v60  ;;  %v1282_v59 = vld [vmem:[#allocation6 + $0x770] sm:$0xff]  ;;  %v1894_v60 = vunpack.c.l.s8.bf16 %v1280_v58 }
 0x50f   : > { %v1896_v61 = vunpack.c.l.s8.bf16 %v1282_v59  ;;  %v1908_v3 = vunpack.c.h.s8.bf16 %v1282_v59 }
 0x511   : > { %2922 = vmatpush1.bf16.msra.mxu0 %v1786_v51  ;;  %3086 = vmatpush1.bf16.msra.mxu1 %v1788_v0  ;;  %v1909_v51 = vunpack.c.h.s8.bf16 %v1283_v54  ;;  %v1293_v0 = vld [vmem:[#allocation6 + $0x7c8] sm:$0xff] }
 0x512   : > { %2923 = vmatprep.subr.bf16.mxu0 %v1799_v1  ;;  %3087 = vmatprep.subr.bf16.mxu1 %v1801_v2  ;;  %v1295_v1 = vld [vmem:[#allocation6 + $0x7d8] sm:$0xff]  ;;  %v1906_v2 = vunpack.c.h.s8.bf16 %v1280_v58  ;;  %v1919_v4 = vunpack.c.l.s8.bf16 %v1293_v0  ;;  %v1931_v11 = vunpack.c.h.s8.bf16 %v1293_v0 }
 0x515   : > { %2924 = vmatpush1.bf16.msra.mxu0 %v1798_v5  ;;  %3088 = vmatpush1.bf16.msra.mxu1 %v1800_v7  ;;  %v1921_v5 = vunpack.c.l.s8.bf16 %v1295_v1  ;;  %v1292_v7 = vld [vmem:[#allocation6 + $0x7c0] sm:$0xff] }
 0x516   : > { %2925 = vmatprep.subr.bf16.mxu0 %v1811_v8  ;;  %3089 = vmatprep.subr.bf16.mxu1 %v1813_v9  ;;  %v1294_v8 = vld [vmem:[#allocation6 + $0x7d0] sm:$0xff]  ;;  %v1918_v9 = vunpack.c.l.s8.bf16 %v1292_v7 }
 0x517   : > { %v1920_v10 = vunpack.c.l.s8.bf16 %v1294_v8  ;;  %v1932_v15 = vunpack.c.h.s8.bf16 %v1294_v8 }
 0x519   : > { %2926 = vmatpush1.bf16.msra.mxu0 %v1810_v36  ;;  %3090 = vmatpush1.bf16.msra.mxu1 %v1812_v12  ;;  %v1933_v36 = vunpack.c.h.s8.bf16 %v1295_v1  ;;  %v1305_v12 = vld [vmem:[#allocation6 + $0x828] sm:$0xff] }
 0x51a   : > { %2936 = vmatprep.subr.bf16.mxu0 %v1823_v13  ;;  %3100 = vmatprep.subr.bf16.mxu1 %v1825_v14  ;;  %v1307_v13 = vld [vmem:[#allocation6 + $0x838] sm:$0xff]  ;;  %v1930_v14 = vunpack.c.h.s8.bf16 %v1292_v7  ;;  %v1943_v16 = vunpack.c.l.s8.bf16 %v1305_v12  ;;  %v1955_v23 = vunpack.c.h.s8.bf16 %v1305_v12 }
 0x51c   : > { %2928 = vmatmul.mubr.bf16.vlgmr.msra.gmra.mrb[8].mxu0 %v11643_v18  ;;  %3092 = vmatmul.mubr.bf16.vlgmr.msra.gmra.mrb[8].mxu1 %v11643_v18  ;;  %v1859_v18 = vunpack.c.h.s8.bf16 %v1257_v22 }
 0x51d   : > { %2937 = vmatpush1.bf16.msra.mxu0 %v1822_v17  ;;  %3101 = vmatpush1.bf16.msra.mxu1 %v1824_v19  ;;  %v1945_v17 = vunpack.c.l.s8.bf16 %v1307_v13  ;;  %v1304_v19 = vld [vmem:[#allocation6 + $0x820] sm:$0xff] }
 0x51e   : > { %2938 = vmatprep.subr.bf16.mxu0 %v1835_v20  ;;  %3102 = vmatprep.subr.bf16.mxu1 %v1837_v21  ;;  %v1306_v20 = vld [vmem:[#allocation6 + $0x830] sm:$0xff]  ;;  %v1942_v21 = vunpack.c.l.s8.bf16 %v1304_v19 }
 0x51f   : > { %2968 = vmatprep.mubr.bf16.mxu0 %v11645_v26  ;;  %3132 = vmatprep.mubr.bf16.mxu1 %v11645_v26  ;;  %v1270_v26 = vld [vmem:[#allocation6 + $0x710] sm:$0xff]  ;;  %v1944_v22 = vunpack.c.l.s8.bf16 %v1306_v20  ;;  %v1956_v29 = vunpack.c.h.s8.bf16 %v1306_v20 }
 0x520   : > { %v1872_v49 = vunpack.c.l.s8.bf16 %v1270_v26  ;;  %v1884_v55 = vunpack.c.h.s8.bf16 %v1270_v26 }
 0x521   : > { %2939 = vmatpush1.bf16.msra.mxu0 %v1834_v24  ;;  %3103 = vmatpush1.bf16.msra.mxu1 %v1836_v25  ;;  %v1957_v24 = vunpack.c.h.s8.bf16 %v1307_v13  ;;  %v1317_v25 = vld [vmem:[#allocation6 + $0x888] sm:$0xff] }
 0x522   : > { %2940 = vmatprep.subr.bf16.mxu0 %v1847_v27  ;;  %3104 = vmatprep.subr.bf16.mxu1 %v1849_v28  ;;  %v1319_v27 = vld [vmem:[#allocation6 + $0x898] sm:$0xff]  ;;  %v1954_v28 = vunpack.c.h.s8.bf16 %v1304_v19  ;;  %v1967_v30 = vunpack.c.l.s8.bf16 %v1317_v25  ;;  %v1979_v40 = vunpack.c.h.s8.bf16 %v1317_v25 }
 0x525   : > { %2941 = vmatpush1.bf16.msra.mxu0 %v1846_v35  ;;  %3105 = vmatpush1.bf16.msra.mxu1 %v1848_v37  ;;  %v1969_v35 = vunpack.c.l.s8.bf16 %v1319_v27  ;;  %v1316_v37 = vld [vmem:[#allocation6 + $0x880] sm:$0xff] }
 0x526   : > { %2942 = vmatprep.subr.bf16.mxu0 %v1859_v18  ;;  %3106 = vmatprep.subr.bf16.mxu1 %v1861_v38  ;;  %v1318_v18 = vld [vmem:[#allocation6 + $0x890] sm:$0xff]  ;;  %v1966_v38 = vunpack.c.l.s8.bf16 %v1316_v37 }
 0x527   : > { %v1968_v39 = vunpack.c.l.s8.bf16 %v1318_v18  ;;  %v1980_v47 = vunpack.c.h.s8.bf16 %v1318_v18  ;;  %v1376_v18 = vld [vmem:[#allocation6 + $0xa60] sm:$0xff] }
 0x529   : > { %2943 = vmatpush1.bf16.msra.mxu0 %v1858_v41  ;;  %3107 = vmatpush1.bf16.msra.mxu1 %v1860_v42  ;;  %v1981_v41 = vunpack.c.h.s8.bf16 %v1319_v27  ;;  %v1329_v42 = vld [vmem:[#allocation6 + $0x8e8] sm:$0xff] }
 0x52a   : > { %2944 = vmatprep.subr.bf16.mxu0 %v1871_v44  ;;  %3108 = vmatprep.subr.bf16.mxu1 %v1873_v46  ;;  %v1331_v44 = vld [vmem:[#allocation6 + $0x8f8] sm:$0xff]  ;;  %v1978_v46 = vunpack.c.h.s8.bf16 %v1316_v37  ;;  %v1991_v26 = vunpack.c.l.s8.bf16 %v1329_v42  ;;  %v2003_v54 = vunpack.c.h.s8.bf16 %v1329_v42  ;;  %v1377_v27 = vld [vmem:[#allocation6 + $0xa68] sm:$0xff] }
 0x52d   : > { %2945 = vmatpush1.bf16.msra.mxu0 %v1870_v48  ;;  %3109 = vmatpush1.bf16.msra.mxu1 %v1872_v49  ;;  %v1993_v48 = vunpack.c.l.s8.bf16 %v1331_v44  ;;  %v1328_v49 = vld [vmem:[#allocation6 + $0x8e0] sm:$0xff] }
 0x52e   : > { %2946 = vmatprep.subr.bf16.mxu0 %v1883_v50  ;;  %3110 = vmatprep.subr.bf16.mxu1 %v1885_v52  ;;  %v1330_v50 = vld [vmem:[#allocation6 + $0x8f0] sm:$0xff]  ;;  %v1990_v52 = vunpack.c.l.s8.bf16 %v1328_v49 }
 0x52f   : > { %v1992_v53 = vunpack.c.l.s8.bf16 %v1330_v50  ;;  %v2004_v58 = vunpack.c.h.s8.bf16 %v1330_v50  ;;  %v2099_v50 = vunpack.c.h.s8.bf16 %v1377_v27 }
 0x531   : > { %2947 = vmatpush1.bf16.msra.mxu0 %v1882_v43  ;;  %3111 = vmatpush1.bf16.msra.mxu1 %v1884_v55  ;;  %v2005_v43 = vunpack.c.h.s8.bf16 %v1331_v44  ;;  %v1341_v55 = vld [vmem:[#allocation6 + $0x948] sm:$0xff] }
 0x532   : > { %2948 = vmatprep.subr.bf16.mxu0 %v1895_v56  ;;  %3112 = vmatprep.subr.bf16.mxu1 %v1897_v57  ;;  %v1343_v56 = vld [vmem:[#allocation6 + $0x958] sm:$0xff]  ;;  %v2002_v57 = vunpack.c.h.s8.bf16 %v1328_v49  ;;  %v2015_v59 = vunpack.c.l.s8.bf16 %v1341_v55  ;;  %v2027_v1 = vunpack.c.h.s8.bf16 %v1341_v55 }
 0x535   : > { %2949 = vmatpush1.bf16.msra.mxu0 %v1894_v60  ;;  %3113 = vmatpush1.bf16.msra.mxu1 %v1896_v61  ;;  %v2017_v60 = vunpack.c.l.s8.bf16 %v1343_v56  ;;  %v1340_v61 = vld [vmem:[#allocation6 + $0x940] sm:$0xff] }
 0x536   : > { %2950 = vmatprep.subr.bf16.mxu0 %v1907_v63  ;;  %3114 = vmatprep.subr.bf16.mxu1 %v1909_v51  ;;  %v1342_v63 = vld [vmem:[#allocation6 + $0x950] sm:$0xff]  ;;  %v2014_v51 = vunpack.c.l.s8.bf16 %v1340_v61 }
 0x537   : > { %v2016_v0 = vunpack.c.l.s8.bf16 %v1342_v63  ;;  %v2028_v7 = vunpack.c.h.s8.bf16 %v1342_v63 }
 0x539   : > { %2951 = vmatpush1.bf16.msra.mxu0 %v1906_v2  ;;  %3115 = vmatpush1.bf16.msra.mxu1 %v1908_v3  ;;  %v2029_v2 = vunpack.c.h.s8.bf16 %v1343_v56  ;;  %v1353_v3 = vld [vmem:[#allocation6 + $0x9a8] sm:$0xff] }
 0x53a   : > { %2952 = vmatprep.subr.bf16.mxu0 %v1919_v4  ;;  %3116 = vmatprep.subr.bf16.mxu1 %v1921_v5  ;;  %v1355_v4 = vld [vmem:[#allocation6 + $0x9b8] sm:$0xff]  ;;  %v2026_v5 = vunpack.c.h.s8.bf16 %v1340_v61  ;;  %v2039_v8 = vunpack.c.l.s8.bf16 %v1353_v3 }
 0x53b   : > { %v2053_v13 = vunpack.c.h.s8.bf16 %v1355_v4 }
 0x53d   : > { %2953 = vmatpush1.bf16.msra.mxu0 %v1918_v9  ;;  %3117 = vmatpush1.bf16.msra.mxu1 %v1920_v10  ;;  %v2041_v9 = vunpack.c.l.s8.bf16 %v1355_v4  ;;  %v1352_v10 = vld [vmem:[#allocation6 + $0x9a0] sm:$0xff] }
 0x53e   : > { %2954 = vmatprep.subr.bf16.mxu0 %v1931_v11  ;;  %3118 = vmatprep.subr.bf16.mxu1 %v1933_v36  ;;  %v1354_v11 = vld [vmem:[#allocation6 + $0x9b0] sm:$0xff]  ;;  %v2038_v36 = vunpack.c.l.s8.bf16 %v1352_v10 }
 0x53f   : > { %v2040_v12 = vunpack.c.l.s8.bf16 %v1354_v11 }
 0x541   : > { %2955 = vmatpush1.bf16.msra.mxu0 %v1930_v14  ;;  %3119 = vmatpush1.bf16.msra.mxu1 %v1932_v15  ;;  %v1365_v14 = vld [vmem:[#allocation6 + $0xa08] sm:$0xff]  ;;  %v1367_v15 = vld [vmem:[#allocation6 + $0xa18] sm:$0xff] }
 0x542   : > { %2956 = vmatprep.subr.bf16.mxu0 %v1943_v16  ;;  %3120 = vmatprep.subr.bf16.mxu1 %v1945_v17  ;;  %v2050_v16 = vunpack.c.h.s8.bf16 %v1352_v10  ;;  %v2052_v17 = vunpack.c.h.s8.bf16 %v1354_v11  ;;  %v2063_v19 = vunpack.c.l.s8.bf16 %v1365_v14  ;;  %v2065_v20 = vunpack.c.l.s8.bf16 %v1367_v15 }
 0x543   : > { %v2077_v25 = vunpack.c.h.s8.bf16 %v1367_v15 }
 0x545   : > { %2957 = vmatpush1.bf16.msra.mxu0 %v1942_v21  ;;  %3121 = vmatpush1.bf16.msra.mxu1 %v1944_v22  ;;  %v1364_v21 = vld [vmem:[#allocation6 + $0xa00] sm:$0xff] }
 0x546   : > { %2958 = vmatprep.subr.bf16.mxu0 %v1955_v23  ;;  %3122 = vmatprep.subr.bf16.mxu1 %v1957_v24  ;;  %v2062_v22 = vunpack.c.l.s8.bf16 %v1364_v21  ;;  %v2075_v24 = vunpack.c.h.s8.bf16 %v1365_v14 }
 0x549   : > { %2959 = vmatpush1.bf16.msra.mxu0 %v1954_v28  ;;  %3123 = vmatpush1.bf16.msra.mxu1 %v1956_v29  ;;  %v1379_v28 = vld [vmem:[#allocation6 + $0xa78] sm:$0xff]  ;;  %v2074_v29 = vunpack.c.h.s8.bf16 %v1364_v21 }
 0x54a   : > { %2960 = vmatprep.subr.bf16.mxu0 %v1967_v30  ;;  %3124 = vmatprep.subr.bf16.mxu1 %v1969_v35  ;;  %v2087_v35 = vunpack.c.l.s8.bf16 %v1377_v27  ;;  %v2089_v37 = vunpack.c.l.s8.bf16 %v1379_v28 }
 0x54d   : > { %2961 = vmatpush1.bf16.msra.mxu0 %v1966_v38  ;;  %3125 = vmatpush1.bf16.msra.mxu1 %v1968_v39  ;;  %v1378_v38 = vld [vmem:[#allocation6 + $0xa70] sm:$0xff] }
 0x54e   : > { %2962 = vmatprep.subr.bf16.mxu0 %v1979_v40  ;;  %3126 = vmatprep.subr.bf16.mxu1 %v1981_v41  ;;  %v2100_v55 = vunpack.c.h.s8.bf16 %v1378_v38 }
 0x551   : > { %2963 = vmatpush1.bf16.msra.mxu0 %v1978_v46  ;;  %3127 = vmatpush1.bf16.msra.mxu1 %v1980_v47  ;;  %v2086_v47 = vunpack.c.l.s8.bf16 %v1376_v18 }
 0x552   : > { %2964 = vmatprep.subr.bf16.mxu0 %v1991_v26  ;;  %3128 = vmatprep.subr.bf16.mxu1 %v1993_v48  ;;  %v2088_v26 = vunpack.c.l.s8.bf16 %v1378_v38 }
 0x555   : > { %2965 = vmatpush1.bf16.msra.mxu0 %v1990_v52  ;;  %3129 = vmatpush1.bf16.msra.mxu1 %v1992_v53  ;;  %v2101_v52 = vunpack.c.h.s8.bf16 %v1379_v28  ;;  %v1389_v53 = vld [vmem:[#allocation6 + $0xac8] sm:$0xff] }
 0x556   : > { %2966 = vmatprep.subr.bf16.mxu0 %v2003_v54  ;;  %3130 = vmatprep.subr.bf16.mxu1 %v2005_v43  ;;  %v1391_v54 = vld [vmem:[#allocation6 + $0xad8] sm:$0xff]  ;;  %v2098_v43 = vunpack.c.h.s8.bf16 %v1376_v18  ;;  %v2111_v56 = vunpack.c.l.s8.bf16 %v1389_v53  ;;  %v2123_v63 = vunpack.c.h.s8.bf16 %v1389_v53 }
 0x559   : > { %2967 = vmatpush1.bf16.msra.mxu0 %v2002_v57  ;;  %3131 = vmatpush1.bf16.msra.mxu1 %v2004_v58  ;;  %v2113_v57 = vunpack.c.l.s8.bf16 %v1391_v54  ;;  %v1388_v58 = vld [vmem:[#allocation6 + $0xac0] sm:$0xff] }
 0x55a   : > { %2977 = vmatprep.subr.bf16.mxu0 %v2015_v59  ;;  %3141 = vmatprep.subr.bf16.mxu1 %v2017_v60  ;;  %v1390_v59 = vld [vmem:[#allocation6 + $0xad0] sm:$0xff]  ;;  %v2110_v60 = vunpack.c.l.s8.bf16 %v1388_v58 }
 0x55b   : > { %v2112_v61 = vunpack.c.l.s8.bf16 %v1390_v59 }
 0x55c   : > { %2969 = vmatmul.mubr.bf16.vlgmr.msra.gmra.mrb[8].mxu0 %v11651_v62  ;;  %3133 = vmatmul.mubr.bf16.vlgmr.msra.gmra.mrb[8].mxu1 %v11651_v62  ;;  %v2051_v62 = vunpack.c.h.s8.bf16 %v1353_v3  ;;  %v2124_v3 = vunpack.c.h.s8.bf16 %v1390_v59 }
 0x55d   : > { %2978 = vmatpush1.bf16.msra.mxu0 %v2014_v51  ;;  %3142 = vmatpush1.bf16.msra.mxu1 %v2016_v0  ;;  %v2125_v51 = vunpack.c.h.s8.bf16 %v1391_v54  ;;  %v1401_v0 = vld [vmem:[#allocation6 + $0xb28] sm:$0xff] }
 0x55e   : > { %2979 = vmatprep.subr.bf16.mxu0 %v2027_v1  ;;  %3143 = vmatprep.subr.bf16.mxu1 %v2029_v2  ;;  %v1403_v1 = vld [vmem:[#allocation6 + $0xb38] sm:$0xff]  ;;  %v2122_v2 = vunpack.c.h.s8.bf16 %v1388_v58  ;;  %v2135_v4 = vunpack.c.l.s8.bf16 %v1401_v0  ;;  %v2147_v11 = vunpack.c.h.s8.bf16 %v1401_v0  ;;  %v3256_v54 = vld [vmem:[%s11593_s16] sm:$0xff] }
 0x55f   : > { %3009 = vmatprep.mubr.bf16.mxu0 %v11653_v6  ;;  %3173 = vmatprep.mubr.bf16.mxu1 %v11653_v6  ;;  %v1366_v6 = vld [vmem:[#allocation6 + $0xa10] sm:$0xff] }
 0x560   : > { %v2064_v23 = vunpack.c.l.s8.bf16 %v1366_v6  ;;  %v2076_v30 = vunpack.c.h.s8.bf16 %v1366_v6 }
 0x561   : > { %2980 = vmatpush1.bf16.msra.mxu0 %v2026_v5  ;;  %3144 = vmatpush1.bf16.msra.mxu1 %v2028_v7  ;;  %v2137_v5 = vunpack.c.l.s8.bf16 %v1403_v1  ;;  %v1400_v7 = vld [vmem:[#allocation6 + $0xb20] sm:$0xff] }
 0x562   : > { %2981 = vmatprep.subr.bf16.mxu0 %v2039_v8  ;;  %3145 = vmatprep.subr.bf16.mxu1 %v2041_v9  ;;  %v1402_v8 = vld [vmem:[#allocation6 + $0xb30] sm:$0xff]  ;;  %v2134_v9 = vunpack.c.l.s8.bf16 %v1400_v7 }
 0x563   : > { %v2136_v10 = vunpack.c.l.s8.bf16 %v1402_v8  ;;  %v2148_v14 = vunpack.c.h.s8.bf16 %v1402_v8 }
 0x565   : > { %2982 = vmatpush1.bf16.msra.mxu0 %v2038_v36  ;;  %3146 = vmatpush1.bf16.msra.mxu1 %v2040_v12  ;;  %v2149_v36 = vunpack.c.h.s8.bf16 %v1403_v1  ;;  %v1413_v12 = vld [vmem:[#allocation6 + $0xb88] sm:$0xff] }
 0x566   : > { %2983 = vmatprep.subr.bf16.mxu0 %v2051_v62  ;;  %3147 = vmatprep.subr.bf16.mxu1 %v2053_v13  ;;  %v1415_v62 = vld [vmem:[#allocation6 + $0xb98] sm:$0xff]  ;;  %v2146_v13 = vunpack.c.h.s8.bf16 %v1400_v7  ;;  %v2159_v15 = vunpack.c.l.s8.bf16 %v1413_v12  ;;  %v2171_v6 = vunpack.c.h.s8.bf16 %v1413_v12 }
 0x569   : > { %2984 = vmatpush1.bf16.msra.mxu0 %v2050_v16  ;;  %3148 = vmatpush1.bf16.msra.mxu1 %v2052_v17  ;;  %v2161_v16 = vunpack.c.l.s8.bf16 %v1415_v62  ;;  %v1412_v17 = vld [vmem:[#allocation6 + $0xb80] sm:$0xff] }
 0x56a   : > { %2985 = vmatprep.subr.bf16.mxu0 %v2063_v19  ;;  %3149 = vmatprep.subr.bf16.mxu1 %v2065_v20  ;;  %v1414_v19 = vld [vmem:[#allocation6 + $0xb90] sm:$0xff]  ;;  %v2158_v20 = vunpack.c.l.s8.bf16 %v1412_v17 }
 0x56b   : > { %v2160_v21 = vunpack.c.l.s8.bf16 %v1414_v19  ;;  %v2172_v27 = vunpack.c.h.s8.bf16 %v1414_v19 }
 0x56d   : > { %2986 = vmatpush1.bf16.msra.mxu0 %v2062_v22  ;;  %3150 = vmatpush1.bf16.msra.mxu1 %v2064_v23  ;;  %v2173_v22 = vunpack.c.h.s8.bf16 %v1415_v62  ;;  %v1425_v23 = vld [vmem:[#allocation6 + $0xbe8] sm:$0xff] }
 0x56e   : > { %2987 = vmatprep.subr.bf16.mxu0 %v2075_v24  ;;  %3151 = vmatprep.subr.bf16.mxu1 %v2077_v25  ;;  %v1427_v24 = vld [vmem:[#allocation6 + $0xbf8] sm:$0xff]  ;;  %v2170_v25 = vunpack.c.h.s8.bf16 %v1412_v17  ;;  %v2183_v28 = vunpack.c.l.s8.bf16 %v1425_v23  ;;  %v2195_v38 = vunpack.c.h.s8.bf16 %v1425_v23 }
 0x56f   : > { %v11701_v39 = vpop.f32.mrb[4].mxu0  ;;  %v11703_v40 = vpop.f32.mrb[4].mxu1 }
 0x570   : > { %v11705_v41 = vpop.f32.mrb[5].mxu0  ;;  %v11707_v42 = vpop.f32.mrb[5].mxu1 }
 0x571   : > { %v2687_v44 = vpop.f32.mrb[6].mxu0  ;;  %v2851_v46 = vpop.f32.mrb[6].mxu1  ;;  %2988 = vmatpush1.bf16.msra.mxu0 %v2074_v29  ;;  %3152 = vmatpush1.bf16.msra.mxu1 %v2076_v30  ;;  %v2185_v29 = vunpack.c.l.s8.bf16 %v1427_v24  ;;  %v1424_v30 = vld [vmem:[#allocation6 + $0xbe0] sm:$0xff] }
 0x572   : > { %v2688_v48 = vpop.f32.mrb[7].mxu0  ;;  %v2852_v49 = vpop.f32.mrb[7].mxu1  ;;  %2989 = vmatprep.subr.bf16.mxu0 %v2087_v35  ;;  %3153 = vmatprep.subr.bf16.mxu1 %v2089_v37  ;;  %v1426_v35 = vld [vmem:[#allocation6 + $0xbf0] sm:$0xff]  ;;  %v2182_v37 = vunpack.c.l.s8.bf16 %v1424_v30  ;;  %v2197_v44 = vunpack.c.h.s8.bf16 %v1427_v24  ;;  %v2194_v46 = vunpack.c.h.s8.bf16 %v1424_v30 }
 0x573   : > { %v2184_v18 = vunpack.c.l.s8.bf16 %v1426_v35 }
 0x575   : > { %2990 = vmatpush1.bf16.msra.mxu0 %v2086_v47  ;;  %3154 = vmatpush1.bf16.msra.mxu1 %v2088_v26  ;;  %v2196_v47 = vunpack.c.h.s8.bf16 %v1426_v35  ;;  %v3184_v26 = vlaneseq }
 0x576   : > { %2991 = vmatprep.subr.bf16.mxu0 %v2099_v50  ;;  %3155 = vmatprep.subr.bf16.mxu1 %v2101_v52  ;;  %v1428_v50 = vld [vmem:[#allocation8] sm:$0xff] }
 0x577   : > { %v3185_v48 = vshrl.u32 %v3184_v26, 7 }
 0x579   : > { %2992 = vmatpush1.bf16.msra.mxu0 %v2098_v43  ;;  %3156 = vmatpush1.bf16.msra.mxu1 %v2100_v55  ;;  %v11711_v49 = vsub.s32 0, %v3185_v48  ;;  %v11713_v52 = vsub.s32 2, %v3185_v48  ;;  %v11718_v55 = vsub.s32 1, %v3185_v48  ;;  %v3202_v7 = vsub.s32 4, %v3185_v48 }
 0x57a   : > { %2993 = vmatprep.subr.bf16.mxu0 %v2111_v56  ;;  %3157 = vmatprep.subr.bf16.mxu1 %v2113_v57  ;;  %v11720_v56 = vsub.s32 3, %v3185_v48  ;;  %v3210_v8 = vsub.s32 6, %v3185_v48 }
 0x57b   : > { %v3187_v53 = vrot.slane %v1428_v50, %v11711_v49  ;;  %v3195_v43 = vrot.slane %v1428_v50, %v11713_v52  ;;  %v3271_v59 = vrot.slane %v3256_v54, %v11713_v52  ;;  %v3267_v1 = vrot.slane %v3256_v54, %v11718_v55 }
 0x57c   : > { %v3203_v12 = vrot.slane %v1428_v50, %v3202_v7 }
 0x57d   : > { %2994 = vmatpush1.bf16.msra.mxu0 %v2110_v60  ;;  %3158 = vmatpush1.bf16.msra.mxu1 %v2112_v61  ;;  %v3244_v57 = vmul.f32 %v3187_v53, %v11677_v31  ;;  %v3246_v58 = vmul.f32 %v3195_v43, %v11679_v32  ;;  %v3191_v60 = vrot.slane %v1428_v50, %v11718_v55 }
 0x57e   : > { %2995 = vmatprep.subr.bf16.mxu0 %v2123_v63  ;;  %3159 = vmatprep.subr.bf16.mxu1 %v2125_v51  ;;  %v3199_v61 = vrot.slane %v1428_v50, %v11720_v56  ;;  %v3275_v31 = vrot.slane %v3256_v54, %v11720_v56 }
 0x57f   : > { %v3322_v51 = vadd.f32 %v3271_v59, %v3246_v58  ;;  %v3245_v0 = vmul.f32 %v3191_v60, %v11681_v33  ;;  %v3211_v33 = vrot.slane %v1428_v50, %v3210_v8 }
 0x581   : > { %2996 = vmatpush1.bf16.msra.mxu0 %v2122_v2  ;;  %3160 = vmatpush1.bf16.msra.mxu1 %v2124_v3  ;;  %v3247_v2 = vmul.f32 %v3199_v61, %v11683_v34  ;;  %v3248_v34 = vmul.f32 %v3203_v12, %v11701_v39 }
 0x582   : > { %2997 = vmatprep.subr.bf16.mxu0 %v2135_v4  ;;  %3161 = vmatprep.subr.bf16.mxu1 %v2137_v5  ;;  %v8775_v4 = vmul.f32 -1.442695, %v3322_v51  ;;  %v3321_v5 = vadd.f32 %v3267_v1, %v3245_v0 }
 0x583   : > { %v3323_v32 = vadd.f32 %v3275_v31, %v3247_v2 }
 0x585   : > { %2998 = vmatpush1.bf16.msra.mxu0 %v2134_v9  ;;  %3162 = vmatpush1.bf16.msra.mxu1 %v2136_v10  ;;  %v3206_v9 = vsub.s32 5, %v3185_v48  ;;  %v8774_v10 = vmul.f32 -1.442695, %v3321_v5 }
 0x586   : > { %2999 = vmatprep.subr.bf16.mxu0 %v2147_v11  ;;  %3163 = vmatprep.subr.bf16.mxu1 %v2149_v36  ;;  %v3214_v11 = vsub.s32 7, %v3185_v48  ;;  %v8776_v36 = vmul.f32 -1.442695, %v3323_v32  ;;  %v3257_v48 = vld [vmem:[%s11593_s16 + $0x8] sm:$0xf] }
 0x587   : > { %v3207_v62 = vrot.slane %v1428_v50, %v3206_v9  ;;  %v3283_v19 = vrot.slane %v3256_v54, %v3206_v9  ;;  %v3303_v51 = vrot.slane %v3257_v48, %v11713_v52  ;;  %v3307_v5 = vrot.slane %v3257_v48, %v11720_v56 }
 0x589   : > { %3000 = vmatpush1.bf16.msra.mxu0 %v2146_v13  ;;  %3164 = vmatpush1.bf16.msra.mxu1 %v2148_v14  ;;  %v3215_v13 = vrot.slane %v1428_v50, %v3214_v11  ;;  %v3279_v14 = vrot.slane %v3256_v54, %v3202_v7  ;;  %v3249_v17 = vmul.f32 %v3207_v62, %v11705_v41 }
 0x58a   : > { %3001 = vmatprep.subr.bf16.mxu0 %v2159_v15  ;;  %3165 = vmatprep.subr.bf16.mxu1 %v2161_v16  ;;  %v3250_v15 = vmul.f32 %v3211_v33, %v11703_v40  ;;  %v3287_v16 = vrot.slane %v3256_v54, %v3210_v8 }
 0x58b   : > { %v3324_v23 = vadd.f32 %v3279_v14, %v3248_v34 }
 0x58c   : > { %v3326_v24 = vadd.f32 %v3287_v16, %v3250_v15 }
 0x58d   : > { %3002 = vmatpush1.bf16.msra.mxu0 %v2158_v20  ;;  %3166 = vmatpush1.bf16.msra.mxu1 %v2160_v21  ;;  %v3251_v21 = vmul.f32 %v3215_v13, %v11707_v42  ;;  %v8777_v30 = vmul.f32 -1.442695, %v3324_v23 }
 0x58e   : > { %3003 = vmatprep.subr.bf16.mxu0 %v2171_v6  ;;  %3167 = vmatprep.subr.bf16.mxu1 %v2173_v22  ;;  %v3291_v6 = vrot.slane %v3256_v54, %v3214_v11  ;;  %v8779_v35 = vmul.f32 -1.442695, %v3326_v24 }
 0x591   : > { %3004 = vmatpush1.bf16.msra.mxu0 %v2170_v25  ;;  %3168 = vmatpush1.bf16.msra.mxu1 %v2172_v27  ;;  %v3325_v27 = vadd.f32 %v3283_v19, %v3249_v17 }
 0x592   : > { %3005 = vmatprep.subr.bf16.mxu0 %v2183_v28  ;;  %3169 = vmatprep.subr.bf16.mxu1 %v2185_v29  ;;  %v3327_v29 = vadd.f32 %v3291_v6, %v3251_v21 }
 0x594   : > { %v8780_v41 = vmul.f32 -1.442695, %v3327_v29 }
 0x595   : > { %3006 = vmatpush1.bf16.msra.mxu0 %v2182_v37  ;;  %3170 = vmatpush1.bf16.msra.mxu1 %v2184_v18  ;;  %v8778_v37 = vmul.f32 -1.442695, %v3325_v27 }
 0x596   : > { %3007 = vmatprep.subr.bf16.mxu0 %v2195_v38  ;;  %3171 = vmatprep.subr.bf16.mxu1 %v2197_v44  ;;  %v1429_v44 = vld [vmem:[#allocation8 + $0x8] sm:$0xf] }
 0x597   : > { %v3219_v53 = vrot.slane %v1429_v44, %v11711_v49  ;;  %v3227_v43 = vrot.slane %v1429_v44, %v11713_v52  ;;  %v3223_v58 = vrot.slane %v1429_v44, %v11718_v55  ;;  %v3231_v59 = vrot.slane %v1429_v44, %v11720_v56 }
 0x599   : > { %3008 = vmatpush1.bf16.msra.mxu0 %v2194_v46  ;;  %3172 = vmatpush1.bf16.msra.mxu1 %v2196_v47  ;;  %v3380_v46 = vld [vmem:[%s11599_s27] sm:$0xf] }
 0x59a   : > { %v3389_v0 = vrot.slane %v3380_v46, %v11718_v55  ;;  %v3397_v32 = vrot.slane %v3380_v46, %v11720_v56 }
 0x59c   : > { %3010 = vmatmul.mubr.bf16.vlgmr.msra.gmra.mrb[8].mxu0 %v11659_v45  ;;  %3174 = vmatmul.mubr.bf16.vlgmr.msra.gmra.mrb[8].mxu1 %v11659_v45  ;;  %v3263_v45 = vrot.slane %v3256_v54, %v11711_v49  ;;  %v3385_v54 = vrot.slane %v3380_v46, %v11711_v49 }
 0x59e   : > { %v3320_v63 = vadd.f32 %v3263_v45, %v3244_v57  ;;  %v3393_v45 = vrot.slane %v3380_v46, %v11713_v52 }
 0x5a0   : > { %v8773_v3 = vmul.f32 -1.442695, %v3320_v63  ;;  %v3295_v63 = vrot.slane %v3257_v48, %v11711_v49 }
 0x5a2   : > { %9618 = vpow2.f32 %v8773_v3 }
 0x5a3   : > { %9620 = vpow2.f32 %v8775_v4  ;;  %v3299_v4 = vrot.slane %v3257_v48, %v11718_v55 }
 0x5a4   : > { %9622 = vpow2.f32 %v8774_v10 }
 0x5a5   : > { %9624 = vpow2.f32 %v8776_v36 }
 0x5ac   : > { %v9619_v20 = vpop.eup %9618 }
 0x5ad   : > { %v9621_v22 = vpop.eup %9620  ;;  %v3344_v25 = vadd.f32 1.0, %v9619_v20 }
 0x5ae   : > { %v3346_v28 = vadd.f32 1.0, %v9621_v22  ;;  %v9623_v39 = vpop.eup %9622 }
 0x5af   : > { %v9625_v40 = vpop.eup %9624  ;;  %9626 = vrcp.f32 %v3344_v25  ;;  %v3345_v18 = vadd.f32 1.0, %v9623_v39 }
 0x5b0   : > { %9628 = vrcp.f32 %v3346_v28  ;;  %v3347_v42 = vadd.f32 1.0, %v9625_v40 }
 0x5b1   : > { %9630 = vpow2.f32 %v8777_v30 }
 0x5b2   : > { %9632 = vpow2.f32 %v8779_v35 }
 0x5b3   : > { %9634 = vpow2.f32 %v8778_v37 }
 0x5b4   : > { %9636 = vpow2.f32 %v8780_v41 }
 0x5b5   : > { %9638 = vrcp.f32 %v3345_v18 }
 0x5b6   : > { %9640 = vrcp.f32 %v3347_v42 }
 0x5b9   : > { %v9627_v38 = vpop.eup %9626 }
 0x5ba   : > { %v9629_v47 = vpop.eup %9628  ;;  %v3402_v10 = vmul.f32 %v9627_v38, %v3385_v54 }
 0x5bb   : > { %v9631_v26 = vpop.eup %9630  ;;  %v3404_v12 = vmul.f32 %v9629_v47, %v3393_v45 }
 0x5bc   : > { %v9633_v50 = vpop.eup %9632  ;;  %v3368_v61 = vadd.f32 1.0, %v9631_v26 }
 0x5bd   : > { %v9635_v57 = vpop.eup %9634  ;;  %v3370_v2 = vadd.f32 1.0, %v9633_v50 }
 0x5be   : > { %v9637_v60 = vpop.eup %9636  ;;  %v3369_v8 = vadd.f32 1.0, %v9635_v57  ;;  %9642 = vrcp.f32 %v3368_v61 }
 0x5bf   : > { %v9639_v1 = vpop.eup %9638  ;;  %v3371_v52 = vadd.f32 1.0, %v9637_v60  ;;  %9644 = vrcp.f32 %v3370_v2 }
 0x5c0   : > { %v9641_v7 = vpop.eup %9640  ;;  %v3403_v15 = vmul.f32 %v9639_v1, %v3389_v0  ;;  %9646 = vrcp.f32 %v3369_v8 }
 0x5c1   : > { %v3405_v20 = vmul.f32 %v9641_v7, %v3397_v32  ;;  %9648 = vrcp.f32 %v3371_v52 }
 0x5c8   : > { %v9643_v24 = vpop.eup %9642 }
 0x5c9   : > { %v9645_v25 = vpop.eup %9644  ;;  %v3414_v29 = vsub.f32 1.0, %v9643_v24 }
 0x5ca   : > { %v9647_v27 = vpop.eup %9646  ;;  %v3416_v39 = vsub.f32 1.0, %v9645_v25 }
 0x5cb   : > { %v9649_v28 = vpop.eup %9648  ;;  %v3415_v40 = vsub.f32 1.0, %v9647_v27 }
 0x5cc   : > { %v3417_v18 = vsub.f32 1.0, %v9649_v28 }
 0x66f   : > { %v3011_v31 = vpop.f32.mrb[8].mxu0  ;;  %v3175_v3 = vpop.f32.mrb[8].mxu1 }
 0x670   : > { %v3252_v9 = vmul.f32 %v3219_v53, %v3011_v31  ;;  %v3254_v11 = vmul.f32 %v3227_v43, %v3175_v3  ;;  %v3013_v49 = vpop.f32.mrb[9].mxu0  ;;  %v3177_v36 = vpop.f32.mrb[9].mxu1 }
 0x671   : > { %v3253_v33 = vmul.f32 %v3223_v58, %v3013_v49  ;;  %v3255_v62 = vmul.f32 %v3231_v59, %v3177_v36  ;;  %v3015_v13 = vpop.f32.mrb[10].mxu0  ;;  %v3179_v34 = vpop.f32.mrb[10].mxu1 }
 0x672   : > { %v3328_v14 = vadd.f32 %v3295_v63, %v3252_v9  ;;  %v3330_v55 = vadd.f32 %v3303_v51, %v3254_v11  ;;  %v3016_v16 = vpop.f32.mrb[11].mxu0  ;;  %v3180_v17 = vpop.f32.mrb[11].mxu1 }
 0x673   : > { %v3329_v56 = vadd.f32 %v3299_v4, %v3253_v33  ;;  %v3331_v19 = vadd.f32 %v3307_v5, %v3255_v62 }
 0x674   : > { %v3406_v21 = vadd.f32 %v3402_v10, %v3328_v14  ;;  %v3408_v6 = vadd.f32 %v3404_v12, %v3330_v55 }
 0x675   : > { %v3407_v22 = vadd.f32 %v3403_v15, %v3329_v56  ;;  %v3409_v23 = vadd.f32 %v3405_v20, %v3331_v19 }
 0x676   : > { %9650 = vtanh.f32 %v3406_v21 }
 0x677   : > { %9652 = vtanh.f32 %v3408_v6 }
 0x678   : > { %9654 = vtanh.f32 %v3407_v22 }
 0x679   : > { %9656 = vtanh.f32 %v3409_v23 }
 0x680   : > { %v9651_v30 = vpop.eup %9650 }
 0x681   : > { %v9653_v35 = vpop.eup %9652  ;;  %v3418_v37 = vmul.f32 %v9651_v30, %v3414_v29 }
 0x682   : > { %v9655_v41 = vpop.eup %9654  ;;  %v3420_v42 = vmul.f32 %v9653_v35, %v3416_v39 }
 0x683   : > { %v9657_v38 = vpop.eup %9656  ;;  %v3419_v44 = vmul.f32 %v9655_v41, %v3415_v40 }
 0x684   : > { %v3421_v46 = vmul.f32 %v9657_v38, %v3417_v18 }
 0x685   : > { %v9160_v47 = vpack.c.bf16 %v3419_v44, %v3418_v37 }
 0x686   : > { %v9161_v26 = vpack.c.bf16 %v3421_v46, %v3420_v42 }
 0x687   : > { %3438 = vst [vmem:[#allocation2] sm:$0xff] %v9160_v47 }
 0x688   : > { %3439 = vst [vmem:[#allocation2 + $0x8] sm:$0xff] %v9161_v26 }
 0x689 PF: > { %p8783_p10 = scmp.le.s32.totalorder %s11027_s28, 0 }
 0x68a   : > { %v3447_v48 = vld [vmem:[%s11583_s8 + $0x8] sm:$0xff] (!%p8783_p10)  ;;  %v3449_v50 = vld [vmem:[%s11583_s8 + $0x18] sm:$0xff] (!%p8783_p10)  ;;  %v3446_v53 = vld [vmem:[%s11583_s8] sm:$0xff] (!%p8783_p10) }
 0x68b   : > { %3443 = sbr.rel (%p8783_p10) target bundleno = 2298 (0x8fa), region = 184  ;;  %v3641_v54 = vunpack.c.l.s8.bf16 (!%p8783_p10), %v3447_v48  ;;  %v3653_v43 = vunpack.c.h.s8.bf16 (!%p8783_p10), %v3447_v48  ;;  %v3643_v57 = vunpack.c.l.s8.bf16 (!%p8783_p10), %v3449_v50  ;;  %v3655_v45 = vunpack.c.h.s8.bf16 (!%p8783_p10), %v3449_v50  ;;  %v3448_v58 = vld [vmem:[%s11583_s8 + $0x10] sm:$0xff] (!%p8783_p10)  ;;  %v3459_v61 = vld [vmem:[%s11583_s8 + $0x68] sm:$0xff] (!%p8783_p10)  ;;  %v3461_v63 = vld [vmem:[%s11583_s8 + $0x78] sm:$0xff] (!%p8783_p10) }
 0x68c   : > { %v3640_v59 = vunpack.c.l.s8.bf16 (!%p8783_p10), %v3446_v53  ;;  %v3642_v60 = vunpack.c.l.s8.bf16 (!%p8783_p10), %v3448_v58  ;;  %v3652_v51 = vunpack.c.h.s8.bf16 (!%p8783_p10), %v3446_v53  ;;  %v3654_v0 = vunpack.c.h.s8.bf16 (!%p8783_p10), %v3448_v58  ;;  %v3458_v31 = vld [vmem:[%s11583_s8 + $0x60] sm:$0xff] (!%p8783_p10)  ;;  %v3460_v3 = vld [vmem:[%s11583_s8 + $0x70] sm:$0xff] (!%p8783_p10)  ;;  %v3471_v8 = vld [vmem:[%s11583_s8 + $0xc8] sm:$0xff] (!%p8783_p10) }
 0x68d   : > { %4038 = vmatprep.subr.bf16.mxu0 (!%p8783_p10), %v3641_v54  ;;  %4120 = vmatprep.subr.bf16.mxu1 (!%p8783_p10), %v3643_v57  ;;  %v3665_v1 = vunpack.c.l.s8.bf16 (!%p8783_p10), %v3459_v61  ;;  %v3667_v2 = vunpack.c.l.s8.bf16 (!%p8783_p10), %v3461_v63  ;;  %v3664_v4 = vunpack.c.l.s8.bf16 (!%p8783_p10), %v3458_v31  ;;  %v3666_v5 = vunpack.c.l.s8.bf16 (!%p8783_p10), %v3460_v3  ;;  %v3473_v9 = vld [vmem:[%s11583_s8 + $0xd8] sm:$0xff] (!%p8783_p10)  ;;  %v3470_v52 = vld [vmem:[%s11583_s8 + $0xc0] sm:$0xff] (!%p8783_p10)  ;;  %v3472_v12 = vld [vmem:[%s11583_s8 + $0xd0] sm:$0xff] (!%p8783_p10) }
 0x68e   : > { %4039 = vmatpush1.bf16.msra.mxu0 (!%p8783_p10), %v3640_v59  ;;  %4121 = vmatpush1.bf16.msra.mxu1 (!%p8783_p10), %v3642_v60  ;;  %v3677_v32 = vunpack.c.h.s8.bf16 (!%p8783_p10), %v3459_v61  ;;  %v3679_v7 = vunpack.c.h.s8.bf16 (!%p8783_p10), %v3461_v63  ;;  %v3676_v10 = vunpack.c.h.s8.bf16 (!%p8783_p10), %v3458_v31  ;;  %v3678_v11 = vunpack.c.h.s8.bf16 (!%p8783_p10), %v3460_v3  ;;  %v11763_v33 = vld [vmem:[#allocation2] sm:$0xff] (!%p8783_p10)  ;;  %v3485_v16 = vld [vmem:[%s11583_s8 + $0x138] sm:$0xff] (!%p8783_p10)  ;;  %v3484_v6 = vld [vmem:[%s11583_s8 + $0x130] sm:$0xff] (!%p8783_p10) }
 0x68f   : > { %4040 = vmatprep.subr.bf16.mxu0 (!%p8783_p10), %v3653_v43  ;;  %4122 = vmatprep.subr.bf16.mxu1 (!%p8783_p10), %v3655_v45  ;;  %v3689_v49 = vunpack.c.l.s8.bf16 (!%p8783_p10), %v3471_v8  ;;  %v3691_v36 = vunpack.c.l.s8.bf16 (!%p8783_p10), %v3473_v9  ;;  %v3688_v62 = vunpack.c.l.s8.bf16 (!%p8783_p10), %v3470_v52  ;;  %v3690_v13 = vunpack.c.l.s8.bf16 (!%p8783_p10), %v3472_v12  ;;  %v3483_v15 = vld [vmem:[%s11583_s8 + $0x128] sm:$0xff] (!%p8783_p10)  ;;  %v3482_v21 = vld [vmem:[%s11583_s8 + $0x120] sm:$0xff] (!%p8783_p10)  ;;  %v3497_v28 = vld [vmem:[%s11583_s8 + $0x198] sm:$0xff] (!%p8783_p10) }
 0x690   : > { %v3701_v34 = vunpack.c.h.s8.bf16 (!%p8783_p10), %v3471_v8  ;;  %v3703_v14 = vunpack.c.h.s8.bf16 (!%p8783_p10), %v3473_v9  ;;  %v11767_v55 = vcombine.high (!%p8783_p10), %v11763_v33, %v11763_v33  ;;  %v3700_v17 = vunpack.c.h.s8.bf16 (!%p8783_p10), %v3470_v52  ;;  %v3495_v27 = vld [vmem:[%s11583_s8 + $0x188] sm:$0xff] (!%p8783_p10)  ;;  %v3494_v40 = vld [vmem:[%s11583_s8 + $0x180] sm:$0xff] (!%p8783_p10)  ;;  %v3496_v37 = vld [vmem:[%s11583_s8 + $0x190] sm:$0xff] (!%p8783_p10) }
 0x691   : > { %v3702_v56 = vunpack.c.h.s8.bf16 (!%p8783_p10), %v3472_v12  ;;  %v3713_v19 = vunpack.c.l.s8.bf16 (!%p8783_p10), %v3483_v15  ;;  %v3715_v20 = vunpack.c.l.s8.bf16 (!%p8783_p10), %v3485_v16  ;;  %v3712_v22 = vunpack.c.l.s8.bf16 (!%p8783_p10), %v3482_v21  ;;  %v3507_v44 = vld [vmem:[%s11583_s8 + $0x1e8] sm:$0xff] (!%p8783_p10)  ;;  %v3509_v46 = vld [vmem:[%s11583_s8 + $0x1f8] sm:$0xff] (!%p8783_p10)  ;;  %v3506_v53 = vld [vmem:[%s11583_s8 + $0x1e0] sm:$0xff] (!%p8783_p10) }
 0x692   : > { %4041 = vmatpush1.bf16.msra.mxu0 %v3652_v51  ;;  %4123 = vmatpush1.bf16.msra.mxu1 %v3654_v0  ;;  %v3714_v23 = vunpack.c.l.s8.bf16 %v3484_v6  ;;  %v3725_v24 = vunpack.c.h.s8.bf16 %v3483_v15  ;;  %v3727_v25 = vunpack.c.h.s8.bf16 %v3485_v16  ;;  %v3724_v29 = vunpack.c.h.s8.bf16 %v3482_v21  ;;  %v3508_v54 = vld [vmem:[%s11583_s8 + $0x1f0] sm:$0xff]  ;;  %v3519_v59 = vld [vmem:[%s11583_s8 + $0x248] sm:$0xff]  ;;  %v3521_v60 = vld [vmem:[%s11583_s8 + $0x258] sm:$0xff] }
 0x693   : > { %4042 = vmatprep.subr.bf16.mxu0 %v3665_v1  ;;  %4124 = vmatprep.subr.bf16.mxu1 %v3667_v2  ;;  %v3726_v30 = vunpack.c.h.s8.bf16 %v3484_v6  ;;  %v3737_v39 = vunpack.c.l.s8.bf16 %v3495_v27  ;;  %v3739_v35 = vunpack.c.l.s8.bf16 %v3497_v28  ;;  %v3736_v41 = vunpack.c.l.s8.bf16 %v3494_v40  ;;  %v3518_v1 = vld [vmem:[%s11583_s8 + $0x240] sm:$0xff]  ;;  %v3520_v2 = vld [vmem:[%s11583_s8 + $0x250] sm:$0xff] }
 0x694   : > { %4070 = vmatprep.mubr.bf16.mxu0 %v11767_v55  ;;  %4152 = vmatprep.mubr.bf16.mxu1 %v11767_v55  ;;  %v3738_v18 = vunpack.c.l.s8.bf16 %v3496_v37  ;;  %v3749_v42 = vunpack.c.h.s8.bf16 %v3495_v27  ;;  %v3751_v38 = vunpack.c.h.s8.bf16 %v3497_v28  ;;  %v3748_v47 = vunpack.c.h.s8.bf16 %v3494_v40  ;;  %v11799_v6 = vld [vmem:[#allocation2 + $0x8] sm:$0xff]  ;;  %v3557_v28 = vld [vmem:[%s11583_s8 + $0x378] sm:$0xff]  ;;  %v3554_v40 = vld [vmem:[%s11583_s8 + $0x360] sm:$0xff] }
 0x695   : > { %v3750_v26 = vunpack.c.h.s8.bf16 %v3496_v37  ;;  %v3761_v48 = vunpack.c.l.s8.bf16 %v3507_v44  ;;  %v3763_v50 = vunpack.c.l.s8.bf16 %v3509_v46  ;;  %v3760_v43 = vunpack.c.l.s8.bf16 %v3506_v53  ;;  %v3555_v27 = vld [vmem:[%s11583_s8 + $0x368] sm:$0xff]  ;;  %v3556_v37 = vld [vmem:[%s11583_s8 + $0x370] sm:$0xff] }
 0x696   : > { %4043 = vmatpush1.bf16.msra.mxu0 %v3664_v4  ;;  %4125 = vmatpush1.bf16.msra.mxu1 %v3666_v5  ;;  %v3762_v57 = vunpack.c.l.s8.bf16 %v3508_v54  ;;  %v3773_v45 = vunpack.c.h.s8.bf16 %v3507_v44  ;;  %v3775_v58 = vunpack.c.h.s8.bf16 %v3509_v46  ;;  %v3772_v61 = vunpack.c.h.s8.bf16 %v3506_v53  ;;  %v3567_v44 = vld [vmem:[%s11583_s8 + $0x3c8] sm:$0xff]  ;;  %v3569_v46 = vld [vmem:[%s11583_s8 + $0x3d8] sm:$0xff]  ;;  %v3566_v53 = vld [vmem:[%s11583_s8 + $0x3c0] sm:$0xff] }
 0x697   : > { %4044 = vmatprep.subr.bf16.mxu0 %v3677_v32  ;;  %4126 = vmatprep.subr.bf16.mxu1 %v3679_v7  ;;  %v3774_v63 = vunpack.c.h.s8.bf16 %v3508_v54  ;;  %v3785_v51 = vunpack.c.l.s8.bf16 %v3519_v59  ;;  %v3787_v0 = vunpack.c.l.s8.bf16 %v3521_v60  ;;  %v3784_v31 = vunpack.c.l.s8.bf16 %v3518_v1  ;;  %v3531_v32 = vld [vmem:[%s11583_s8 + $0x2a8] sm:$0xff]  ;;  %v3533_v7 = vld [vmem:[%s11583_s8 + $0x2b8] sm:$0xff]  ;;  %v3568_v54 = vld [vmem:[%s11583_s8 + $0x3d0] sm:$0xff] }
 0x698   : > { %v3786_v3 = vunpack.c.l.s8.bf16 %v3520_v2  ;;  %v3797_v4 = vunpack.c.h.s8.bf16 %v3519_v59  ;;  %v3799_v5 = vunpack.c.h.s8.bf16 %v3521_v60  ;;  %v3796_v8 = vunpack.c.h.s8.bf16 %v3518_v1  ;;  %v3579_v59 = vld [vmem:[%s11583_s8 + $0x428] sm:$0xff]  ;;  %v3581_v60 = vld [vmem:[%s11583_s8 + $0x438] sm:$0xff]  ;;  %v3578_v1 = vld [vmem:[%s11583_s8 + $0x420] sm:$0xff] }
 0x699   : > { %v3798_v9 = vunpack.c.h.s8.bf16 %v3520_v2  ;;  %v11797_v21 = vcombine.low %v11763_v33, %v11763_v33  ;;  %v3580_v2 = vld [vmem:[%s11583_s8 + $0x430] sm:$0xff] }
 0x69a   : > { %4045 = vmatpush1.bf16.msra.mxu0 %v3676_v10  ;;  %4127 = vmatpush1.bf16.msra.mxu1 %v3678_v11  ;;  %v3809_v10 = vunpack.c.l.s8.bf16 %v3531_v32  ;;  %v3811_v11 = vunpack.c.l.s8.bf16 %v3533_v7 }
 0x69b   : > { %4046 = vmatprep.subr.bf16.mxu0 %v3689_v49  ;;  %4128 = vmatprep.subr.bf16.mxu1 %v3691_v36  ;;  %v3530_v49 = vld [vmem:[%s11583_s8 + $0x2a0] sm:$0xff]  ;;  %v3532_v36 = vld [vmem:[%s11583_s8 + $0x2b0] sm:$0xff] }
 0x69c   : > { %v3808_v52 = vunpack.c.l.s8.bf16 %v3530_v49  ;;  %v3810_v12 = vunpack.c.l.s8.bf16 %v3532_v36  ;;  %v3820_v15 = vunpack.c.h.s8.bf16 %v3530_v49  ;;  %v3822_v16 = vunpack.c.h.s8.bf16 %v3532_v36  ;;  %v3590_v49 = vld [vmem:[%s11583_s8 + $0x480] sm:$0xff]  ;;  %v3592_v36 = vld [vmem:[%s11583_s8 + $0x490] sm:$0xff] }
 0x69e   : > { %4047 = vmatpush1.bf16.msra.mxu0 %v3688_v62  ;;  %4129 = vmatpush1.bf16.msra.mxu1 %v3690_v13  ;;  %v3821_v62 = vunpack.c.h.s8.bf16 %v3531_v32  ;;  %v3823_v13 = vunpack.c.h.s8.bf16 %v3533_v7  ;;  %v3591_v32 = vld [vmem:[%s11583_s8 + $0x488] sm:$0xff]  ;;  %v3593_v7 = vld [vmem:[%s11583_s8 + $0x498] sm:$0xff] }
 0x69f   : > { %4048 = vmatprep.subr.bf16.mxu0 %v3701_v34  ;;  %4130 = vmatprep.subr.bf16.mxu1 %v3703_v14  ;;  %v3543_v34 = vld [vmem:[%s11583_s8 + $0x308] sm:$0xff]  ;;  %v3545_v14 = vld [vmem:[%s11583_s8 + $0x318] sm:$0xff] }
 0x6a2   : > { %4049 = vmatpush1.bf16.msra.mxu0 %v3700_v17  ;;  %4131 = vmatpush1.bf16.msra.mxu1 %v3702_v56  ;;  %v3833_v17 = vunpack.c.l.s8.bf16 %v3543_v34  ;;  %v3835_v56 = vunpack.c.l.s8.bf16 %v3545_v14 }
 0x6a3   : > { %4050 = vmatprep.subr.bf16.mxu0 %v3713_v19  ;;  %4132 = vmatprep.subr.bf16.mxu1 %v3715_v20  ;;  %v3542_v19 = vld [vmem:[%s11583_s8 + $0x300] sm:$0xff]  ;;  %v3544_v20 = vld [vmem:[%s11583_s8 + $0x310] sm:$0xff] }
 0x6a4   : > { %v3844_v33 = vunpack.c.h.s8.bf16 %v3542_v19 }
 0x6a6   : > { %4051 = vmatpush1.bf16.msra.mxu0 %v3712_v22  ;;  %4133 = vmatpush1.bf16.msra.mxu1 %v3714_v23  ;;  %v3832_v22 = vunpack.c.l.s8.bf16 %v3542_v19  ;;  %v3834_v23 = vunpack.c.l.s8.bf16 %v3544_v20  ;;  %v3602_v19 = vld [vmem:[%s11583_s8 + $0x4e0] sm:$0xff] }
 0x6a7   : > { %4052 = vmatprep.subr.bf16.mxu0 %v3725_v24  ;;  %4134 = vmatprep.subr.bf16.mxu1 %v3727_v25  ;;  %v3845_v24 = vunpack.c.h.s8.bf16 %v3543_v34  ;;  %v3847_v25 = vunpack.c.h.s8.bf16 %v3545_v14  ;;  %v3603_v34 = vld [vmem:[%s11583_s8 + $0x4e8] sm:$0xff]  ;;  %v3605_v14 = vld [vmem:[%s11583_s8 + $0x4f8] sm:$0xff] }
 0x6aa   : > { %4053 = vmatpush1.bf16.msra.mxu0 %v3724_v29  ;;  %4135 = vmatpush1.bf16.msra.mxu1 %v3726_v30  ;;  %v11805_v29 = vcombine.high %v11799_v6, %v11799_v6  ;;  %v3846_v30 = vunpack.c.h.s8.bf16 %v3544_v20  ;;  %v3604_v20 = vld [vmem:[%s11583_s8 + $0x4f0] sm:$0xff] }
 0x6ab   : > { %4054 = vmatprep.subr.bf16.mxu0 %v3737_v39  ;;  %4136 = vmatprep.subr.bf16.mxu1 %v3739_v35  ;;  %v3857_v39 = vunpack.c.l.s8.bf16 %v3555_v27  ;;  %v3859_v35 = vunpack.c.l.s8.bf16 %v3557_v28 }
 0x6ae   : > { %4055 = vmatpush1.bf16.msra.mxu0 %v3736_v41  ;;  %4137 = vmatpush1.bf16.msra.mxu1 %v3738_v18  ;;  %v3856_v41 = vunpack.c.l.s8.bf16 %v3554_v40  ;;  %v3858_v18 = vunpack.c.l.s8.bf16 %v3556_v37 }
 0x6af   : > { %4056 = vmatprep.subr.bf16.mxu0 %v3749_v42  ;;  %4138 = vmatprep.subr.bf16.mxu1 %v3751_v38  ;;  %v3869_v42 = vunpack.c.h.s8.bf16 %v3555_v27  ;;  %v3871_v38 = vunpack.c.h.s8.bf16 %v3557_v28  ;;  %v3615_v27 = vld [vmem:[%s11583_s8 + $0x548] sm:$0xff]  ;;  %v3617_v28 = vld [vmem:[%s11583_s8 + $0x558] sm:$0xff] }
 0x6b2   : > { %4057 = vmatpush1.bf16.msra.mxu0 %v3748_v47  ;;  %4139 = vmatpush1.bf16.msra.mxu1 %v3750_v26  ;;  %v3868_v47 = vunpack.c.h.s8.bf16 %v3554_v40  ;;  %v3870_v26 = vunpack.c.h.s8.bf16 %v3556_v37  ;;  %v3614_v40 = vld [vmem:[%s11583_s8 + $0x540] sm:$0xff]  ;;  %v3616_v37 = vld [vmem:[%s11583_s8 + $0x550] sm:$0xff] }
 0x6b3   : > { %4058 = vmatprep.subr.bf16.mxu0 %v3761_v48  ;;  %4140 = vmatprep.subr.bf16.mxu1 %v3763_v50  ;;  %v3881_v48 = vunpack.c.l.s8.bf16 %v3567_v44  ;;  %v3883_v50 = vunpack.c.l.s8.bf16 %v3569_v46 }
 0x6b6   : > { %4059 = vmatpush1.bf16.msra.mxu0 %v3760_v43  ;;  %4141 = vmatpush1.bf16.msra.mxu1 %v3762_v57  ;;  %v3880_v43 = vunpack.c.l.s8.bf16 %v3566_v53  ;;  %v3882_v57 = vunpack.c.l.s8.bf16 %v3568_v54 }
 0x6b7   : > { %4060 = vmatprep.subr.bf16.mxu0 %v3773_v45  ;;  %4142 = vmatprep.subr.bf16.mxu1 %v3775_v58  ;;  %v3893_v45 = vunpack.c.h.s8.bf16 %v3567_v44  ;;  %v3895_v58 = vunpack.c.h.s8.bf16 %v3569_v46  ;;  %v3627_v44 = vld [vmem:[%s11583_s8 + $0x5a8] sm:$0xff]  ;;  %v3629_v46 = vld [vmem:[%s11583_s8 + $0x5b8] sm:$0xff] }
 0x6ba   : > { %4061 = vmatpush1.bf16.msra.mxu0 %v3772_v61  ;;  %4143 = vmatpush1.bf16.msra.mxu1 %v3774_v63  ;;  %v3892_v61 = vunpack.c.h.s8.bf16 %v3566_v53  ;;  %v3894_v63 = vunpack.c.h.s8.bf16 %v3568_v54  ;;  %v3626_v53 = vld [vmem:[%s11583_s8 + $0x5a0] sm:$0xff]  ;;  %v3628_v54 = vld [vmem:[%s11583_s8 + $0x5b0] sm:$0xff] }
 0x6bb   : > { %4062 = vmatprep.subr.bf16.mxu0 %v3785_v51  ;;  %4144 = vmatprep.subr.bf16.mxu1 %v3787_v0  ;;  %v3905_v51 = vunpack.c.l.s8.bf16 %v3579_v59  ;;  %v3907_v0 = vunpack.c.l.s8.bf16 %v3581_v60 }
 0x6be   : > { %4063 = vmatpush1.bf16.msra.mxu0 %v3784_v31  ;;  %4145 = vmatpush1.bf16.msra.mxu1 %v3786_v3  ;;  %v3904_v31 = vunpack.c.l.s8.bf16 %v3578_v1  ;;  %v3906_v3 = vunpack.c.l.s8.bf16 %v3580_v2 }
 0x6bf   : > { %4064 = vmatprep.subr.bf16.mxu0 %v3797_v4  ;;  %4146 = vmatprep.subr.bf16.mxu1 %v3799_v5  ;;  %v3917_v4 = vunpack.c.h.s8.bf16 %v3579_v59  ;;  %v3919_v5 = vunpack.c.h.s8.bf16 %v3581_v60  ;;  %v3451_v59 = vld [vmem:[%s11583_s8 + $0x28] sm:$0xff]  ;;  %v3453_v60 = vld [vmem:[%s11583_s8 + $0x38] sm:$0xff] }
 0x6c2   : > { %4065 = vmatpush1.bf16.msra.mxu0 %v3796_v8  ;;  %4147 = vmatpush1.bf16.msra.mxu1 %v3798_v9  ;;  %v3916_v8 = vunpack.c.h.s8.bf16 %v3578_v1  ;;  %v3918_v9 = vunpack.c.h.s8.bf16 %v3580_v2  ;;  %v3450_v1 = vld [vmem:[%s11583_s8 + $0x20] sm:$0xff]  ;;  %v3452_v2 = vld [vmem:[%s11583_s8 + $0x30] sm:$0xff] }
 0x6c3   : > { %4066 = vmatprep.subr.bf16.mxu0 %v3809_v10  ;;  %4148 = vmatprep.subr.bf16.mxu1 %v3811_v11  ;;  %v3929_v10 = vunpack.c.l.s8.bf16 %v3591_v32  ;;  %v3931_v11 = vunpack.c.l.s8.bf16 %v3593_v7 }
 0x6c6   : > { %4067 = vmatpush1.bf16.msra.mxu0 %v3808_v52  ;;  %4149 = vmatpush1.bf16.msra.mxu1 %v3810_v12  ;;  %v3928_v52 = vunpack.c.l.s8.bf16 %v3590_v49  ;;  %v3930_v12 = vunpack.c.l.s8.bf16 %v3592_v36 }
 0x6c7   : > { %4068 = vmatprep.subr.bf16.mxu0 %v3821_v62  ;;  %4150 = vmatprep.subr.bf16.mxu1 %v3823_v13  ;;  %v3941_v62 = vunpack.c.h.s8.bf16 %v3591_v32  ;;  %v3943_v13 = vunpack.c.h.s8.bf16 %v3593_v7  ;;  %v3659_v32 = vunpack.c.h.s8.bf16 %v3453_v60  ;;  %v3463_v7 = vld [vmem:[%s11583_s8 + $0x88] sm:$0xff] }
 0x6ca   : > { %4069 = vmatpush1.bf16.msra.mxu0 %v3820_v15  ;;  %4151 = vmatpush1.bf16.msra.mxu1 %v3822_v16  ;;  %v3940_v15 = vunpack.c.h.s8.bf16 %v3590_v49  ;;  %v3942_v16 = vunpack.c.h.s8.bf16 %v3592_v36  ;;  %v3462_v49 = vld [vmem:[%s11583_s8 + $0x80] sm:$0xff]  ;;  %v3464_v36 = vld [vmem:[%s11583_s8 + $0x90] sm:$0xff] }
 0x6cb   : > { %4079 = vmatprep.subr.bf16.mxu0 %v3833_v17  ;;  %4161 = vmatprep.subr.bf16.mxu1 %v3835_v56  ;;  %v3953_v17 = vunpack.c.l.s8.bf16 %v3603_v34  ;;  %v3955_v56 = vunpack.c.l.s8.bf16 %v3605_v14 }
 0x6cd   : > { %4071 = vmatmul.mubr.bf16.vlgmr.msra.gmra.mrb[0].mxu0 %v11797_v21  ;;  %4153 = vmatmul.mubr.bf16.vlgmr.msra.gmra.mrb[0].mxu1 %v11797_v21 }
 0x6ce   : > { %4080 = vmatpush1.bf16.msra.mxu0 %v3832_v22  ;;  %4162 = vmatpush1.bf16.msra.mxu1 %v3834_v23  ;;  %v3952_v22 = vunpack.c.l.s8.bf16 %v3602_v19  ;;  %v3954_v23 = vunpack.c.l.s8.bf16 %v3604_v20 }
 0x6cf   : > { %4081 = vmatprep.subr.bf16.mxu0 %v3845_v24  ;;  %4163 = vmatprep.subr.bf16.mxu1 %v3847_v25  ;;  %v3965_v24 = vunpack.c.h.s8.bf16 %v3603_v34  ;;  %v3967_v25 = vunpack.c.h.s8.bf16 %v3605_v14  ;;  %v3475_v34 = vld [vmem:[%s11583_s8 + $0xe8] sm:$0xff]  ;;  %v3477_v14 = vld [vmem:[%s11583_s8 + $0xf8] sm:$0xff] }
 0x6d0   : > { %4111 = vmatprep.mubr.bf16.mxu0 %v11805_v29  ;;  %4193 = vmatprep.mubr.bf16.mxu1 %v11805_v29 }
 0x6d2   : > { %4082 = vmatpush1.bf16.msra.mxu0 %v3844_v33  ;;  %4164 = vmatpush1.bf16.msra.mxu1 %v3846_v30  ;;  %v3964_v33 = vunpack.c.h.s8.bf16 %v3602_v19  ;;  %v3966_v30 = vunpack.c.h.s8.bf16 %v3604_v20  ;;  %v3474_v19 = vld [vmem:[%s11583_s8 + $0xe0] sm:$0xff]  ;;  %v3476_v20 = vld [vmem:[%s11583_s8 + $0xf0] sm:$0xff] }
 0x6d3   : > { %4083 = vmatprep.subr.bf16.mxu0 %v3857_v39  ;;  %4165 = vmatprep.subr.bf16.mxu1 %v3859_v35  ;;  %v3977_v39 = vunpack.c.l.s8.bf16 %v3615_v27  ;;  %v3979_v35 = vunpack.c.l.s8.bf16 %v3617_v28 }
 0x6d6   : > { %4084 = vmatpush1.bf16.msra.mxu0 %v3856_v41  ;;  %4166 = vmatpush1.bf16.msra.mxu1 %v3858_v18  ;;  %v3976_v41 = vunpack.c.l.s8.bf16 %v3614_v40  ;;  %v3978_v18 = vunpack.c.l.s8.bf16 %v3616_v37 }
 0x6d7   : > { %4085 = vmatprep.subr.bf16.mxu0 %v3869_v42  ;;  %4167 = vmatprep.subr.bf16.mxu1 %v3871_v38  ;;  %v3989_v42 = vunpack.c.h.s8.bf16 %v3615_v27  ;;  %v3991_v38 = vunpack.c.h.s8.bf16 %v3617_v28  ;;  %v3487_v27 = vld [vmem:[%s11583_s8 + $0x148] sm:$0xff]  ;;  %v3489_v28 = vld [vmem:[%s11583_s8 + $0x158] sm:$0xff] }
 0x6da   : > { %4086 = vmatpush1.bf16.msra.mxu0 %v3868_v47  ;;  %4168 = vmatpush1.bf16.msra.mxu1 %v3870_v26  ;;  %v3988_v47 = vunpack.c.h.s8.bf16 %v3614_v40  ;;  %v3990_v26 = vunpack.c.h.s8.bf16 %v3616_v37  ;;  %v3486_v40 = vld [vmem:[%s11583_s8 + $0x140] sm:$0xff]  ;;  %v3488_v37 = vld [vmem:[%s11583_s8 + $0x150] sm:$0xff] }
 0x6db   : > { %4087 = vmatprep.subr.bf16.mxu0 %v3881_v48  ;;  %4169 = vmatprep.subr.bf16.mxu1 %v3883_v50  ;;  %v4001_v48 = vunpack.c.l.s8.bf16 %v3627_v44  ;;  %v4003_v50 = vunpack.c.l.s8.bf16 %v3629_v46 }
 0x6de   : > { %4088 = vmatpush1.bf16.msra.mxu0 %v3880_v43  ;;  %4170 = vmatpush1.bf16.msra.mxu1 %v3882_v57  ;;  %v4000_v43 = vunpack.c.l.s8.bf16 %v3626_v53  ;;  %v4002_v57 = vunpack.c.l.s8.bf16 %v3628_v54 }
 0x6df   : > { %4089 = vmatprep.subr.bf16.mxu0 %v3893_v45  ;;  %4171 = vmatprep.subr.bf16.mxu1 %v3895_v58  ;;  %v4013_v45 = vunpack.c.h.s8.bf16 %v3627_v44  ;;  %v4015_v58 = vunpack.c.h.s8.bf16 %v3629_v46  ;;  %v3499_v44 = vld [vmem:[%s11583_s8 + $0x1a8] sm:$0xff]  ;;  %v3501_v46 = vld [vmem:[%s11583_s8 + $0x1b8] sm:$0xff] }
 0x6e2   : > { %4090 = vmatpush1.bf16.msra.mxu0 %v3892_v61  ;;  %4172 = vmatpush1.bf16.msra.mxu1 %v3894_v63  ;;  %v4012_v61 = vunpack.c.h.s8.bf16 %v3626_v53  ;;  %v4014_v63 = vunpack.c.h.s8.bf16 %v3628_v54  ;;  %v3498_v53 = vld [vmem:[%s11583_s8 + $0x1a0] sm:$0xff]  ;;  %v3500_v54 = vld [vmem:[%s11583_s8 + $0x1b0] sm:$0xff] }
 0x6e3   : > { %4091 = vmatprep.subr.bf16.mxu0 %v3905_v51  ;;  %4173 = vmatprep.subr.bf16.mxu1 %v3907_v0  ;;  %v3645_v51 = vunpack.c.l.s8.bf16 %v3451_v59  ;;  %v3647_v0 = vunpack.c.l.s8.bf16 %v3453_v60  ;;  %v3513_v60 = vld [vmem:[%s11583_s8 + $0x218] sm:$0xff] }
 0x6e6   : > { %4092 = vmatpush1.bf16.msra.mxu0 %v3904_v31  ;;  %4174 = vmatpush1.bf16.msra.mxu1 %v3906_v3  ;;  %v11843_v31 = vcombine.low %v11799_v6, %v11799_v6  ;;  %v3644_v3 = vunpack.c.l.s8.bf16 %v3450_v1  ;;  %v3656_v6 = vunpack.c.h.s8.bf16 %v3450_v1  ;;  %v3510_v1 = vld [vmem:[%s11583_s8 + $0x200] sm:$0xff] }
 0x6e7   : > { %4093 = vmatprep.subr.bf16.mxu0 %v3917_v4  ;;  %4175 = vmatprep.subr.bf16.mxu1 %v3919_v5  ;;  %v3646_v4 = vunpack.c.l.s8.bf16 %v3452_v2  ;;  %v3657_v5 = vunpack.c.h.s8.bf16 %v3451_v59  ;;  %v3511_v59 = vld [vmem:[%s11583_s8 + $0x208] sm:$0xff] }
 0x6ea   : > { %4094 = vmatpush1.bf16.msra.mxu0 %v3916_v8  ;;  %4176 = vmatpush1.bf16.msra.mxu1 %v3918_v9  ;;  %v3465_v8 = vld [vmem:[%s11583_s8 + $0x98] sm:$0xff]  ;;  %v3658_v9 = vunpack.c.h.s8.bf16 %v3452_v2  ;;  %v3512_v2 = vld [vmem:[%s11583_s8 + $0x210] sm:$0xff] }
 0x6eb   : > { %4095 = vmatprep.subr.bf16.mxu0 %v3929_v10  ;;  %4177 = vmatprep.subr.bf16.mxu1 %v3931_v11  ;;  %v3669_v10 = vunpack.c.l.s8.bf16 %v3463_v7  ;;  %v3671_v11 = vunpack.c.l.s8.bf16 %v3465_v8 }
 0x6ee   : > { %4096 = vmatpush1.bf16.msra.mxu0 %v3928_v52  ;;  %4178 = vmatpush1.bf16.msra.mxu1 %v3930_v12  ;;  %v3668_v52 = vunpack.c.l.s8.bf16 %v3462_v49  ;;  %v3670_v12 = vunpack.c.l.s8.bf16 %v3464_v36 }
 0x6ef   : > { %4097 = vmatprep.subr.bf16.mxu0 %v3941_v62  ;;  %4179 = vmatprep.subr.bf16.mxu1 %v3943_v13  ;;  %v3681_v62 = vunpack.c.h.s8.bf16 %v3463_v7  ;;  %v3683_v13 = vunpack.c.h.s8.bf16 %v3465_v8  ;;  %v3523_v7 = vld [vmem:[%s11583_s8 + $0x268] sm:$0xff]  ;;  %v3525_v8 = vld [vmem:[%s11583_s8 + $0x278] sm:$0xff] }
 0x6f2   : > { %4098 = vmatpush1.bf16.msra.mxu0 %v3940_v15  ;;  %4180 = vmatpush1.bf16.msra.mxu1 %v3942_v16  ;;  %v3680_v15 = vunpack.c.h.s8.bf16 %v3462_v49  ;;  %v3682_v16 = vunpack.c.h.s8.bf16 %v3464_v36  ;;  %v3522_v49 = vld [vmem:[%s11583_s8 + $0x260] sm:$0xff]  ;;  %v3524_v36 = vld [vmem:[%s11583_s8 + $0x270] sm:$0xff] }
 0x6f3   : > { %4099 = vmatprep.subr.bf16.mxu0 %v3953_v17  ;;  %4181 = vmatprep.subr.bf16.mxu1 %v3955_v56  ;;  %v3693_v17 = vunpack.c.l.s8.bf16 %v3475_v34  ;;  %v3695_v56 = vunpack.c.l.s8.bf16 %v3477_v14 }
 0x6f6   : > { %4100 = vmatpush1.bf16.msra.mxu0 %v3952_v22  ;;  %4182 = vmatpush1.bf16.msra.mxu1 %v3954_v23  ;;  %v3692_v22 = vunpack.c.l.s8.bf16 %v3474_v19  ;;  %v3694_v23 = vunpack.c.l.s8.bf16 %v3476_v20 }
 0x6f7   : > { %4101 = vmatprep.subr.bf16.mxu0 %v3965_v24  ;;  %4183 = vmatprep.subr.bf16.mxu1 %v3967_v25  ;;  %v3705_v24 = vunpack.c.h.s8.bf16 %v3475_v34  ;;  %v3707_v25 = vunpack.c.h.s8.bf16 %v3477_v14  ;;  %v3535_v34 = vld [vmem:[%s11583_s8 + $0x2c8] sm:$0xff]  ;;  %v3537_v14 = vld [vmem:[%s11583_s8 + $0x2d8] sm:$0xff] }
 0x6fa   : > { %4102 = vmatpush1.bf16.msra.mxu0 %v3964_v33  ;;  %4184 = vmatpush1.bf16.msra.mxu1 %v3966_v30  ;;  %v3704_v33 = vunpack.c.h.s8.bf16 %v3474_v19  ;;  %v3706_v30 = vunpack.c.h.s8.bf16 %v3476_v20  ;;  %v3534_v19 = vld [vmem:[%s11583_s8 + $0x2c0] sm:$0xff]  ;;  %v3536_v20 = vld [vmem:[%s11583_s8 + $0x2d0] sm:$0xff] }
 0x6fb   : > { %4103 = vmatprep.subr.bf16.mxu0 %v3977_v39  ;;  %4185 = vmatprep.subr.bf16.mxu1 %v3979_v35  ;;  %v3717_v39 = vunpack.c.l.s8.bf16 %v3487_v27  ;;  %v3719_v35 = vunpack.c.l.s8.bf16 %v3489_v28 }
 0x6fe   : > { %4104 = vmatpush1.bf16.msra.mxu0 %v3976_v41  ;;  %4186 = vmatpush1.bf16.msra.mxu1 %v3978_v18  ;;  %v3716_v41 = vunpack.c.l.s8.bf16 %v3486_v40  ;;  %v3718_v18 = vunpack.c.l.s8.bf16 %v3488_v37 }
 0x6ff   : > { %4105 = vmatprep.subr.bf16.mxu0 %v3989_v42  ;;  %4187 = vmatprep.subr.bf16.mxu1 %v3991_v38  ;;  %v3729_v42 = vunpack.c.h.s8.bf16 %v3487_v27  ;;  %v3731_v38 = vunpack.c.h.s8.bf16 %v3489_v28  ;;  %v3547_v27 = vld [vmem:[%s11583_s8 + $0x328] sm:$0xff]  ;;  %v3549_v28 = vld [vmem:[%s11583_s8 + $0x338] sm:$0xff] }
 0x702   : > { %4106 = vmatpush1.bf16.msra.mxu0 %v3988_v47  ;;  %4188 = vmatpush1.bf16.msra.mxu1 %v3990_v26  ;;  %v3728_v47 = vunpack.c.h.s8.bf16 %v3486_v40  ;;  %v3730_v26 = vunpack.c.h.s8.bf16 %v3488_v37  ;;  %v3546_v40 = vld [vmem:[%s11583_s8 + $0x320] sm:$0xff]  ;;  %v3548_v37 = vld [vmem:[%s11583_s8 + $0x330] sm:$0xff] }
 0x703   : > { %4107 = vmatprep.subr.bf16.mxu0 %v4001_v48  ;;  %4189 = vmatprep.subr.bf16.mxu1 %v4003_v50  ;;  %v3741_v48 = vunpack.c.l.s8.bf16 %v3499_v44  ;;  %v3743_v50 = vunpack.c.l.s8.bf16 %v3501_v46 }
 0x706   : > { %4108 = vmatpush1.bf16.msra.mxu0 %v4000_v43  ;;  %4190 = vmatpush1.bf16.msra.mxu1 %v4002_v57  ;;  %v3740_v43 = vunpack.c.l.s8.bf16 %v3498_v53  ;;  %v3742_v57 = vunpack.c.l.s8.bf16 %v3500_v54 }
 0x707   : > { %4109 = vmatprep.subr.bf16.mxu0 %v4013_v45  ;;  %4191 = vmatprep.subr.bf16.mxu1 %v4015_v58  ;;  %v3753_v45 = vunpack.c.h.s8.bf16 %v3499_v44  ;;  %v3755_v58 = vunpack.c.h.s8.bf16 %v3501_v46  ;;  %v3559_v44 = vld [vmem:[%s11583_s8 + $0x388] sm:$0xff]  ;;  %v3561_v46 = vld [vmem:[%s11583_s8 + $0x398] sm:$0xff] }
 0x70a   : > { %4110 = vmatpush1.bf16.msra.mxu0 %v4012_v61  ;;  %4192 = vmatpush1.bf16.msra.mxu1 %v4014_v63  ;;  %v3752_v61 = vunpack.c.h.s8.bf16 %v3498_v53  ;;  %v3754_v63 = vunpack.c.h.s8.bf16 %v3500_v54  ;;  %v3558_v53 = vld [vmem:[%s11583_s8 + $0x380] sm:$0xff]  ;;  %v3560_v54 = vld [vmem:[%s11583_s8 + $0x390] sm:$0xff] }
 0x70b   : > { %4202 = vmatprep.subr.bf16.mxu0 %v3645_v51  ;;  %4284 = vmatprep.subr.bf16.mxu1 %v3647_v0  ;;  %v3765_v51 = vunpack.c.l.s8.bf16 %v3511_v59  ;;  %v3767_v0 = vunpack.c.l.s8.bf16 %v3513_v60 }
 0x70d   : > { %4112 = vmatmul.mubr.bf16.vlgmr.msra.gmra.mrb[0].mxu0 %v11843_v31  ;;  %4194 = vmatmul.mubr.bf16.vlgmr.msra.gmra.mrb[0].mxu1 %v11843_v31 }
 0x70e   : > { %4203 = vmatpush1.bf16.msra.mxu0 %v3644_v3  ;;  %4285 = vmatpush1.bf16.msra.mxu1 %v3646_v4  ;;  %v3764_v3 = vunpack.c.l.s8.bf16 %v3510_v1  ;;  %v3766_v4 = vunpack.c.l.s8.bf16 %v3512_v2 }
 0x70f   : > { %4204 = vmatprep.subr.bf16.mxu0 %v3657_v5  ;;  %4286 = vmatprep.subr.bf16.mxu1 %v3659_v32  ;;  %v3777_v5 = vunpack.c.h.s8.bf16 %v3511_v59  ;;  %v3779_v32 = vunpack.c.h.s8.bf16 %v3513_v60  ;;  %v3571_v59 = vld [vmem:[%s11583_s8 + $0x3e8] sm:$0xff]  ;;  %v3573_v60 = vld [vmem:[%s11583_s8 + $0x3f8] sm:$0xff] }
 0x710   : > { %4234 = vmatprep.mubr.bf16.mxu0 %v11767_v55  ;;  %4316 = vmatprep.mubr.bf16.mxu1 %v11767_v55 }
 0x712   : > { %4205 = vmatpush1.bf16.msra.mxu0 %v3656_v6  ;;  %4287 = vmatpush1.bf16.msra.mxu1 %v3658_v9  ;;  %v3776_v6 = vunpack.c.h.s8.bf16 %v3510_v1  ;;  %v3778_v9 = vunpack.c.h.s8.bf16 %v3512_v2  ;;  %v3570_v1 = vld [vmem:[%s11583_s8 + $0x3e0] sm:$0xff]  ;;  %v3572_v2 = vld [vmem:[%s11583_s8 + $0x3f0] sm:$0xff] }
 0x713   : > { %4206 = vmatprep.subr.bf16.mxu0 %v3669_v10  ;;  %4288 = vmatprep.subr.bf16.mxu1 %v3671_v11  ;;  %v3789_v10 = vunpack.c.l.s8.bf16 %v3523_v7  ;;  %v3791_v11 = vunpack.c.l.s8.bf16 %v3525_v8 }
 0x716   : > { %4207 = vmatpush1.bf16.msra.mxu0 %v3668_v52  ;;  %4289 = vmatpush1.bf16.msra.mxu1 %v3670_v12  ;;  %v3788_v52 = vunpack.c.l.s8.bf16 %v3522_v49  ;;  %v3790_v12 = vunpack.c.l.s8.bf16 %v3524_v36 }
 0x717   : > { %4208 = vmatprep.subr.bf16.mxu0 %v3681_v62  ;;  %4290 = vmatprep.subr.bf16.mxu1 %v3683_v13  ;;  %v3801_v62 = vunpack.c.h.s8.bf16 %v3523_v7  ;;  %v3803_v13 = vunpack.c.h.s8.bf16 %v3525_v8  ;;  %v3583_v7 = vld [vmem:[%s11583_s8 + $0x448] sm:$0xff]  ;;  %v3585_v8 = vld [vmem:[%s11583_s8 + $0x458] sm:$0xff] }
 0x71a   : > { %4209 = vmatpush1.bf16.msra.mxu0 %v3680_v15  ;;  %4291 = vmatpush1.bf16.msra.mxu1 %v3682_v16  ;;  %v3800_v15 = vunpack.c.h.s8.bf16 %v3522_v49  ;;  %v3802_v16 = vunpack.c.h.s8.bf16 %v3524_v36  ;;  %v3582_v49 = vld [vmem:[%s11583_s8 + $0x440] sm:$0xff]  ;;  %v3584_v36 = vld [vmem:[%s11583_s8 + $0x450] sm:$0xff] }
 0x71b   : > { %4210 = vmatprep.subr.bf16.mxu0 %v3693_v17  ;;  %4292 = vmatprep.subr.bf16.mxu1 %v3695_v56  ;;  %v3813_v17 = vunpack.c.l.s8.bf16 %v3535_v34  ;;  %v3815_v56 = vunpack.c.l.s8.bf16 %v3537_v14 }
 0x71e   : > { %4211 = vmatpush1.bf16.msra.mxu0 %v3692_v22  ;;  %4293 = vmatpush1.bf16.msra.mxu1 %v3694_v23  ;;  %v3812_v22 = vunpack.c.l.s8.bf16 %v3534_v19  ;;  %v3814_v23 = vunpack.c.l.s8.bf16 %v3536_v20 }
 0x71f   : > { %4212 = vmatprep.subr.bf16.mxu0 %v3705_v24  ;;  %4294 = vmatprep.subr.bf16.mxu1 %v3707_v25  ;;  %v3825_v24 = vunpack.c.h.s8.bf16 %v3535_v34  ;;  %v3827_v25 = vunpack.c.h.s8.bf16 %v3537_v14  ;;  %v3595_v34 = vld [vmem:[%s11583_s8 + $0x4a8] sm:$0xff]  ;;  %v3597_v14 = vld [vmem:[%s11583_s8 + $0x4b8] sm:$0xff] }
 0x722   : > { %4213 = vmatpush1.bf16.msra.mxu0 %v3704_v33  ;;  %4295 = vmatpush1.bf16.msra.mxu1 %v3706_v30  ;;  %v3824_v33 = vunpack.c.h.s8.bf16 %v3534_v19  ;;  %v3826_v30 = vunpack.c.h.s8.bf16 %v3536_v20  ;;  %v3594_v19 = vld [vmem:[%s11583_s8 + $0x4a0] sm:$0xff]  ;;  %v3596_v20 = vld [vmem:[%s11583_s8 + $0x4b0] sm:$0xff] }
 0x723   : > { %4214 = vmatprep.subr.bf16.mxu0 %v3717_v39  ;;  %4296 = vmatprep.subr.bf16.mxu1 %v3719_v35  ;;  %v3837_v39 = vunpack.c.l.s8.bf16 %v3547_v27  ;;  %v3839_v35 = vunpack.c.l.s8.bf16 %v3549_v28 }
 0x726   : > { %4215 = vmatpush1.bf16.msra.mxu0 %v3716_v41  ;;  %4297 = vmatpush1.bf16.msra.mxu1 %v3718_v18  ;;  %v3836_v41 = vunpack.c.l.s8.bf16 %v3546_v40  ;;  %v3838_v18 = vunpack.c.l.s8.bf16 %v3548_v37 }
 0x727   : > { %4216 = vmatprep.subr.bf16.mxu0 %v3729_v42  ;;  %4298 = vmatprep.subr.bf16.mxu1 %v3731_v38  ;;  %v3849_v42 = vunpack.c.h.s8.bf16 %v3547_v27  ;;  %v3851_v38 = vunpack.c.h.s8.bf16 %v3549_v28  ;;  %v3607_v27 = vld [vmem:[%s11583_s8 + $0x508] sm:$0xff]  ;;  %v3609_v28 = vld [vmem:[%s11583_s8 + $0x518] sm:$0xff] }
 0x72a   : > { %4217 = vmatpush1.bf16.msra.mxu0 %v3728_v47  ;;  %4299 = vmatpush1.bf16.msra.mxu1 %v3730_v26  ;;  %v3848_v47 = vunpack.c.h.s8.bf16 %v3546_v40  ;;  %v3850_v26 = vunpack.c.h.s8.bf16 %v3548_v37  ;;  %v3606_v40 = vld [vmem:[%s11583_s8 + $0x500] sm:$0xff]  ;;  %v3608_v37 = vld [vmem:[%s11583_s8 + $0x510] sm:$0xff] }
 0x72b   : > { %4218 = vmatprep.subr.bf16.mxu0 %v3741_v48  ;;  %4300 = vmatprep.subr.bf16.mxu1 %v3743_v50  ;;  %v3861_v48 = vunpack.c.l.s8.bf16 %v3559_v44  ;;  %v3863_v50 = vunpack.c.l.s8.bf16 %v3561_v46 }
 0x72e   : > { %4219 = vmatpush1.bf16.msra.mxu0 %v3740_v43  ;;  %4301 = vmatpush1.bf16.msra.mxu1 %v3742_v57  ;;  %v3860_v43 = vunpack.c.l.s8.bf16 %v3558_v53  ;;  %v3862_v57 = vunpack.c.l.s8.bf16 %v3560_v54 }
 0x72f   : > { %4220 = vmatprep.subr.bf16.mxu0 %v3753_v45  ;;  %4302 = vmatprep.subr.bf16.mxu1 %v3755_v58  ;;  %v3873_v45 = vunpack.c.h.s8.bf16 %v3559_v44  ;;  %v3875_v58 = vunpack.c.h.s8.bf16 %v3561_v46  ;;  %v3619_v44 = vld [vmem:[%s11583_s8 + $0x568] sm:$0xff]  ;;  %v3621_v46 = vld [vmem:[%s11583_s8 + $0x578] sm:$0xff] }
 0x732   : > { %4221 = vmatpush1.bf16.msra.mxu0 %v3752_v61  ;;  %4303 = vmatpush1.bf16.msra.mxu1 %v3754_v63  ;;  %v3872_v61 = vunpack.c.h.s8.bf16 %v3558_v53  ;;  %v3874_v63 = vunpack.c.h.s8.bf16 %v3560_v54  ;;  %v3618_v53 = vld [vmem:[%s11583_s8 + $0x560] sm:$0xff]  ;;  %v3620_v54 = vld [vmem:[%s11583_s8 + $0x570] sm:$0xff] }
 0x733   : > { %4222 = vmatprep.subr.bf16.mxu0 %v3765_v51  ;;  %4304 = vmatprep.subr.bf16.mxu1 %v3767_v0  ;;  %v3885_v51 = vunpack.c.l.s8.bf16 %v3571_v59  ;;  %v3887_v0 = vunpack.c.l.s8.bf16 %v3573_v60 }
 0x736   : > { %4223 = vmatpush1.bf16.msra.mxu0 %v3764_v3  ;;  %4305 = vmatpush1.bf16.msra.mxu1 %v3766_v4  ;;  %v3884_v3 = vunpack.c.l.s8.bf16 %v3570_v1  ;;  %v3886_v4 = vunpack.c.l.s8.bf16 %v3572_v2 }
 0x737   : > { %4224 = vmatprep.subr.bf16.mxu0 %v3777_v5  ;;  %4306 = vmatprep.subr.bf16.mxu1 %v3779_v32  ;;  %v3897_v5 = vunpack.c.h.s8.bf16 %v3571_v59  ;;  %v3899_v32 = vunpack.c.h.s8.bf16 %v3573_v60  ;;  %v3631_v59 = vld [vmem:[%s11583_s8 + $0x5c8] sm:$0xff]  ;;  %v3633_v60 = vld [vmem:[%s11583_s8 + $0x5d8] sm:$0xff] }
 0x73a   : > { %4225 = vmatpush1.bf16.msra.mxu0 %v3776_v6  ;;  %4307 = vmatpush1.bf16.msra.mxu1 %v3778_v9  ;;  %v3896_v6 = vunpack.c.h.s8.bf16 %v3570_v1  ;;  %v3898_v9 = vunpack.c.h.s8.bf16 %v3572_v2  ;;  %v3630_v1 = vld [vmem:[%s11583_s8 + $0x5c0] sm:$0xff]  ;;  %v3632_v2 = vld [vmem:[%s11583_s8 + $0x5d0] sm:$0xff] }
 0x73b   : > { %4226 = vmatprep.subr.bf16.mxu0 %v3789_v10  ;;  %4308 = vmatprep.subr.bf16.mxu1 %v3791_v11  ;;  %v3909_v10 = vunpack.c.l.s8.bf16 %v3583_v7  ;;  %v3911_v11 = vunpack.c.l.s8.bf16 %v3585_v8 }
 0x73e   : > { %4227 = vmatpush1.bf16.msra.mxu0 %v3788_v52  ;;  %4309 = vmatpush1.bf16.msra.mxu1 %v3790_v12  ;;  %v3908_v52 = vunpack.c.l.s8.bf16 %v3582_v49  ;;  %v3910_v12 = vunpack.c.l.s8.bf16 %v3584_v36 }
 0x73f   : > { %4228 = vmatprep.subr.bf16.mxu0 %v3801_v62  ;;  %4310 = vmatprep.subr.bf16.mxu1 %v3803_v13  ;;  %v3921_v62 = vunpack.c.h.s8.bf16 %v3583_v7  ;;  %v3923_v13 = vunpack.c.h.s8.bf16 %v3585_v8  ;;  %v3455_v7 = vld [vmem:[%s11583_s8 + $0x48] sm:$0xff]  ;;  %v3457_v8 = vld [vmem:[%s11583_s8 + $0x58] sm:$0xff] }
 0x742   : > { %4229 = vmatpush1.bf16.msra.mxu0 %v3800_v15  ;;  %4311 = vmatpush1.bf16.msra.mxu1 %v3802_v16  ;;  %v3920_v15 = vunpack.c.h.s8.bf16 %v3582_v49  ;;  %v3922_v16 = vunpack.c.h.s8.bf16 %v3584_v36  ;;  %v3454_v49 = vld [vmem:[%s11583_s8 + $0x40] sm:$0xff]  ;;  %v3456_v36 = vld [vmem:[%s11583_s8 + $0x50] sm:$0xff] }
 0x743   : > { %4230 = vmatprep.subr.bf16.mxu0 %v3813_v17  ;;  %4312 = vmatprep.subr.bf16.mxu1 %v3815_v56  ;;  %v3933_v17 = vunpack.c.l.s8.bf16 %v3595_v34  ;;  %v3935_v56 = vunpack.c.l.s8.bf16 %v3597_v14 }
 0x746   : > { %4231 = vmatpush1.bf16.msra.mxu0 %v3812_v22  ;;  %4313 = vmatpush1.bf16.msra.mxu1 %v3814_v23  ;;  %v3932_v22 = vunpack.c.l.s8.bf16 %v3594_v19  ;;  %v3934_v23 = vunpack.c.l.s8.bf16 %v3596_v20 }
 0x747   : > { %4232 = vmatprep.subr.bf16.mxu0 %v3825_v24  ;;  %4314 = vmatprep.subr.bf16.mxu1 %v3827_v25  ;;  %v3945_v24 = vunpack.c.h.s8.bf16 %v3595_v34  ;;  %v3947_v25 = vunpack.c.h.s8.bf16 %v3597_v14  ;;  %v3467_v34 = vld [vmem:[%s11583_s8 + $0xa8] sm:$0xff]  ;;  %v3469_v14 = vld [vmem:[%s11583_s8 + $0xb8] sm:$0xff] }
 0x74a   : > { %4233 = vmatpush1.bf16.msra.mxu0 %v3824_v33  ;;  %4315 = vmatpush1.bf16.msra.mxu1 %v3826_v30  ;;  %v3944_v33 = vunpack.c.h.s8.bf16 %v3594_v19  ;;  %v3946_v30 = vunpack.c.h.s8.bf16 %v3596_v20  ;;  %v3466_v19 = vld [vmem:[%s11583_s8 + $0xa0] sm:$0xff]  ;;  %v3468_v20 = vld [vmem:[%s11583_s8 + $0xb0] sm:$0xff] }
 0x74b   : > { %4243 = vmatprep.subr.bf16.mxu0 %v3837_v39  ;;  %4325 = vmatprep.subr.bf16.mxu1 %v3839_v35  ;;  %v3957_v39 = vunpack.c.l.s8.bf16 %v3607_v27  ;;  %v3959_v35 = vunpack.c.l.s8.bf16 %v3609_v28 }
 0x74d   : > { %4235 = vmatmul.mubr.bf16.vlgmr.msra.gmra.mrb[4].mxu0 %v11797_v21  ;;  %4317 = vmatmul.mubr.bf16.vlgmr.msra.gmra.mrb[4].mxu1 %v11797_v21 }
 0x74e   : > { %4244 = vmatpush1.bf16.msra.mxu0 %v3836_v41  ;;  %4326 = vmatpush1.bf16.msra.mxu1 %v3838_v18  ;;  %v3956_v41 = vunpack.c.l.s8.bf16 %v3606_v40  ;;  %v3958_v18 = vunpack.c.l.s8.bf16 %v3608_v37 }
 0x74f   : > { %4245 = vmatprep.subr.bf16.mxu0 %v3849_v42  ;;  %4327 = vmatprep.subr.bf16.mxu1 %v3851_v38  ;;  %v3969_v42 = vunpack.c.h.s8.bf16 %v3607_v27  ;;  %v3971_v38 = vunpack.c.h.s8.bf16 %v3609_v28  ;;  %v3479_v27 = vld [vmem:[%s11583_s8 + $0x108] sm:$0xff]  ;;  %v3481_v28 = vld [vmem:[%s11583_s8 + $0x118] sm:$0xff] }
 0x750   : > { %4275 = vmatprep.mubr.bf16.mxu0 %v11805_v29  ;;  %4357 = vmatprep.mubr.bf16.mxu1 %v11805_v29 }
 0x752   : > { %4246 = vmatpush1.bf16.msra.mxu0 %v3848_v47  ;;  %4328 = vmatpush1.bf16.msra.mxu1 %v3850_v26  ;;  %v3968_v47 = vunpack.c.h.s8.bf16 %v3606_v40  ;;  %v3970_v26 = vunpack.c.h.s8.bf16 %v3608_v37  ;;  %v3480_v40 = vld [vmem:[%s11583_s8 + $0x110] sm:$0xff] }
 0x753   : > { %4247 = vmatprep.subr.bf16.mxu0 %v3861_v48  ;;  %4329 = vmatprep.subr.bf16.mxu1 %v3863_v50  ;;  %v3981_v48 = vunpack.c.l.s8.bf16 %v3619_v44  ;;  %v3983_v50 = vunpack.c.l.s8.bf16 %v3621_v46 }
 0x756   : > { %4248 = vmatpush1.bf16.msra.mxu0 %v3860_v43  ;;  %4330 = vmatpush1.bf16.msra.mxu1 %v3862_v57  ;;  %v3980_v43 = vunpack.c.l.s8.bf16 %v3618_v53  ;;  %v3982_v57 = vunpack.c.l.s8.bf16 %v3620_v54 }
 0x757   : > { %4249 = vmatprep.subr.bf16.mxu0 %v3873_v45  ;;  %4331 = vmatprep.subr.bf16.mxu1 %v3875_v58  ;;  %v3993_v45 = vunpack.c.h.s8.bf16 %v3619_v44  ;;  %v3995_v58 = vunpack.c.h.s8.bf16 %v3621_v46  ;;  %v3493_v44 = vld [vmem:[%s11583_s8 + $0x178] sm:$0xff] }
 0x75a   : > { %4250 = vmatpush1.bf16.msra.mxu0 %v3872_v61  ;;  %4332 = vmatpush1.bf16.msra.mxu1 %v3874_v63  ;;  %v3992_v61 = vunpack.c.h.s8.bf16 %v3618_v53  ;;  %v3994_v63 = vunpack.c.h.s8.bf16 %v3620_v54  ;;  %v3492_v53 = vld [vmem:[%s11583_s8 + $0x170] sm:$0xff] }
 0x75b   : > { %4251 = vmatprep.subr.bf16.mxu0 %v3885_v51  ;;  %4333 = vmatprep.subr.bf16.mxu1 %v3887_v0  ;;  %v4005_v51 = vunpack.c.l.s8.bf16 %v3631_v59  ;;  %v4007_v0 = vunpack.c.l.s8.bf16 %v3633_v60 }
 0x75e   : > { %4252 = vmatpush1.bf16.msra.mxu0 %v3884_v3  ;;  %4334 = vmatpush1.bf16.msra.mxu1 %v3886_v4  ;;  %v4004_v3 = vunpack.c.l.s8.bf16 %v3630_v1  ;;  %v4006_v4 = vunpack.c.l.s8.bf16 %v3632_v2 }
 0x75f   : > { %4253 = vmatprep.subr.bf16.mxu0 %v3897_v5  ;;  %4335 = vmatprep.subr.bf16.mxu1 %v3899_v32  ;;  %v4017_v5 = vunpack.c.h.s8.bf16 %v3631_v59  ;;  %v4019_v32 = vunpack.c.h.s8.bf16 %v3633_v60  ;;  %v3505_v59 = vld [vmem:[%s11583_s8 + $0x1d8] sm:$0xff] }
 0x762   : > { %4254 = vmatpush1.bf16.msra.mxu0 %v3896_v6  ;;  %4336 = vmatpush1.bf16.msra.mxu1 %v3898_v9  ;;  %v4016_v6 = vunpack.c.h.s8.bf16 %v3630_v1  ;;  %v4018_v9 = vunpack.c.h.s8.bf16 %v3632_v2  ;;  %v3504_v1 = vld [vmem:[%s11583_s8 + $0x1d0] sm:$0xff] }
 0x763   : > { %4255 = vmatprep.subr.bf16.mxu0 %v3909_v10  ;;  %4337 = vmatprep.subr.bf16.mxu1 %v3911_v11  ;;  %v3649_v10 = vunpack.c.l.s8.bf16 %v3455_v7  ;;  %v3651_v11 = vunpack.c.l.s8.bf16 %v3457_v8 }
 0x766   : > { %4256 = vmatpush1.bf16.msra.mxu0 %v3908_v52  ;;  %4338 = vmatpush1.bf16.msra.mxu1 %v3910_v12  ;;  %v3648_v52 = vunpack.c.l.s8.bf16 %v3454_v49  ;;  %v3650_v12 = vunpack.c.l.s8.bf16 %v3456_v36 }
 0x767   : > { %4257 = vmatprep.subr.bf16.mxu0 %v3921_v62  ;;  %4339 = vmatprep.subr.bf16.mxu1 %v3923_v13  ;;  %v3661_v62 = vunpack.c.h.s8.bf16 %v3455_v7  ;;  %v3663_v13 = vunpack.c.h.s8.bf16 %v3457_v8  ;;  %v3517_v7 = vld [vmem:[%s11583_s8 + $0x238] sm:$0xff] }
 0x76a   : > { %4258 = vmatpush1.bf16.msra.mxu0 %v3920_v15  ;;  %4340 = vmatpush1.bf16.msra.mxu1 %v3922_v16  ;;  %v3660_v15 = vunpack.c.h.s8.bf16 %v3454_v49  ;;  %v3662_v16 = vunpack.c.h.s8.bf16 %v3456_v36  ;;  %v3516_v49 = vld [vmem:[%s11583_s8 + $0x230] sm:$0xff] }
 0x76b   : > { %4259 = vmatprep.subr.bf16.mxu0 %v3933_v17  ;;  %4341 = vmatprep.subr.bf16.mxu1 %v3935_v56  ;;  %v3673_v17 = vunpack.c.l.s8.bf16 %v3467_v34  ;;  %v3675_v56 = vunpack.c.l.s8.bf16 %v3469_v14 }
 0x76e   : > { %4260 = vmatpush1.bf16.msra.mxu0 %v3932_v22  ;;  %4342 = vmatpush1.bf16.msra.mxu1 %v3934_v23  ;;  %v3672_v22 = vunpack.c.l.s8.bf16 %v3466_v19  ;;  %v3674_v23 = vunpack.c.l.s8.bf16 %v3468_v20 }
 0x76f   : > { %4261 = vmatprep.subr.bf16.mxu0 %v3945_v24  ;;  %4343 = vmatprep.subr.bf16.mxu1 %v3947_v25  ;;  %v3685_v24 = vunpack.c.h.s8.bf16 %v3467_v34  ;;  %v3687_v25 = vunpack.c.h.s8.bf16 %v3469_v14  ;;  %v3529_v34 = vld [vmem:[%s11583_s8 + $0x298] sm:$0xff] }
 0x772   : > { %4262 = vmatpush1.bf16.msra.mxu0 %v3944_v33  ;;  %4344 = vmatpush1.bf16.msra.mxu1 %v3946_v30  ;;  %v3684_v33 = vunpack.c.h.s8.bf16 %v3466_v19  ;;  %v3686_v30 = vunpack.c.h.s8.bf16 %v3468_v20  ;;  %v3528_v19 = vld [vmem:[%s11583_s8 + $0x290] sm:$0xff] }
 0x773   : > { %4263 = vmatprep.subr.bf16.mxu0 %v3957_v39  ;;  %4345 = vmatprep.subr.bf16.mxu1 %v3959_v35  ;;  %v3699_v39 = vunpack.c.l.s8.bf16 %v3481_v28  ;;  %v3478_v35 = vld [vmem:[%s11583_s8 + $0x100] sm:$0xff] }
 0x774   : > { %v3696_v37 = vunpack.c.l.s8.bf16 %v3478_v35  ;;  %v3708_v46 = vunpack.c.h.s8.bf16 %v3478_v35  ;;  %v3540_v35 = vld [vmem:[%s11583_s8 + $0x2f0] sm:$0xff] }
 0x776   : > { %4264 = vmatpush1.bf16.msra.mxu0 %v3956_v41  ;;  %4346 = vmatpush1.bf16.msra.mxu1 %v3958_v18  ;;  %v3698_v41 = vunpack.c.l.s8.bf16 %v3480_v40  ;;  %v3709_v18 = vunpack.c.h.s8.bf16 %v3479_v27 }
 0x777   : > { %4265 = vmatprep.subr.bf16.mxu0 %v3969_v42  ;;  %4347 = vmatprep.subr.bf16.mxu1 %v3971_v38  ;;  %v3711_v42 = vunpack.c.h.s8.bf16 %v3481_v28  ;;  %v3491_v38 = vld [vmem:[%s11583_s8 + $0x168] sm:$0xff] }
 0x77a   : > { %4266 = vmatpush1.bf16.msra.mxu0 %v3968_v47  ;;  %4348 = vmatpush1.bf16.msra.mxu1 %v3970_v26  ;;  %v3710_v47 = vunpack.c.h.s8.bf16 %v3480_v40  ;;  %v3721_v26 = vunpack.c.l.s8.bf16 %v3491_v38 }
 0x77b   : > { %4267 = vmatprep.subr.bf16.mxu0 %v3981_v48  ;;  %4349 = vmatprep.subr.bf16.mxu1 %v3983_v50  ;;  %v3723_v48 = vunpack.c.l.s8.bf16 %v3493_v44  ;;  %v3490_v50 = vld [vmem:[%s11583_s8 + $0x160] sm:$0xff] }
 0x77c   : > { %v3720_v54 = vunpack.c.l.s8.bf16 %v3490_v50  ;;  %v3732_v60 = vunpack.c.h.s8.bf16 %v3490_v50  ;;  %v3552_v50 = vld [vmem:[%s11583_s8 + $0x350] sm:$0xff] }
 0x77e   : > { %4268 = vmatpush1.bf16.msra.mxu0 %v3980_v43  ;;  %4350 = vmatpush1.bf16.msra.mxu1 %v3982_v57  ;;  %v3722_v43 = vunpack.c.l.s8.bf16 %v3492_v53  ;;  %v3733_v57 = vunpack.c.h.s8.bf16 %v3491_v38  ;;  %v3553_v38 = vld [vmem:[%s11583_s8 + $0x358] sm:$0xff] }
 0x77f   : > { %4269 = vmatprep.subr.bf16.mxu0 %v3993_v45  ;;  %4351 = vmatprep.subr.bf16.mxu1 %v3995_v58  ;;  %v3735_v45 = vunpack.c.h.s8.bf16 %v3493_v44  ;;  %v3503_v58 = vld [vmem:[%s11583_s8 + $0x1c8] sm:$0xff] }
 0x782   : > { %4270 = vmatpush1.bf16.msra.mxu0 %v3992_v61  ;;  %4352 = vmatpush1.bf16.msra.mxu1 %v3994_v63  ;;  %v3734_v61 = vunpack.c.h.s8.bf16 %v3492_v53  ;;  %v3745_v63 = vunpack.c.l.s8.bf16 %v3503_v58 }
 0x783   : > { %4271 = vmatprep.subr.bf16.mxu0 %v4005_v51  ;;  %4353 = vmatprep.subr.bf16.mxu1 %v4007_v0  ;;  %v3747_v51 = vunpack.c.l.s8.bf16 %v3505_v59  ;;  %v3502_v0 = vld [vmem:[%s11583_s8 + $0x1c0] sm:$0xff] }
 0x784   : > { %v3744_v2 = vunpack.c.l.s8.bf16 %v3502_v0  ;;  %v3756_v8 = vunpack.c.h.s8.bf16 %v3502_v0  ;;  %v3564_v0 = vld [vmem:[%s11583_s8 + $0x3b0] sm:$0xff] }
 0x786   : > { %4272 = vmatpush1.bf16.msra.mxu0 %v4004_v3  ;;  %4354 = vmatpush1.bf16.msra.mxu1 %v4006_v4  ;;  %v3746_v3 = vunpack.c.l.s8.bf16 %v3504_v1  ;;  %v3757_v4 = vunpack.c.h.s8.bf16 %v3503_v58  ;;  %v3565_v58 = vld [vmem:[%s11583_s8 + $0x3b8] sm:$0xff] }
 0x787   : > { %4273 = vmatprep.subr.bf16.mxu0 %v4017_v5  ;;  %4355 = vmatprep.subr.bf16.mxu1 %v4019_v32  ;;  %v3759_v5 = vunpack.c.h.s8.bf16 %v3505_v59  ;;  %v3515_v32 = vld [vmem:[%s11583_s8 + $0x228] sm:$0xff] }
 0x78a   : > { %4274 = vmatpush1.bf16.msra.mxu0 %v4016_v6  ;;  %4356 = vmatpush1.bf16.msra.mxu1 %v4018_v9  ;;  %v3758_v6 = vunpack.c.h.s8.bf16 %v3504_v1  ;;  %v3769_v9 = vunpack.c.l.s8.bf16 %v3515_v32 }
 0x78b   : > { %4366 = vmatprep.subr.bf16.mxu0 %v3649_v10  ;;  %4448 = vmatprep.subr.bf16.mxu1 %v3651_v11  ;;  %v3771_v10 = vunpack.c.l.s8.bf16 %v3517_v7  ;;  %v3514_v11 = vld [vmem:[%s11583_s8 + $0x220] sm:$0xff] }
 0x78c   : > { %v3768_v36 = vunpack.c.l.s8.bf16 %v3514_v11  ;;  %v3780_v14 = vunpack.c.h.s8.bf16 %v3514_v11 }
 0x78d   : > { %4276 = vmatmul.mubr.bf16.vlgmr.msra.gmra.mrb[4].mxu0 %v11843_v31  ;;  %4358 = vmatmul.mubr.bf16.vlgmr.msra.gmra.mrb[4].mxu1 %v11843_v31 }
 0x78e   : > { %4367 = vmatpush1.bf16.msra.mxu0 %v3648_v52  ;;  %4449 = vmatpush1.bf16.msra.mxu1 %v3650_v12  ;;  %v3770_v52 = vunpack.c.l.s8.bf16 %v3516_v49  ;;  %v3781_v12 = vunpack.c.h.s8.bf16 %v3515_v32 }
 0x78f   : > { %4368 = vmatprep.subr.bf16.mxu0 %v3661_v62  ;;  %4450 = vmatprep.subr.bf16.mxu1 %v3663_v13  ;;  %v3783_v62 = vunpack.c.h.s8.bf16 %v3517_v7  ;;  %v3527_v13 = vld [vmem:[%s11583_s8 + $0x288] sm:$0xff]  ;;  %v3878_v7 = vunpack.c.h.s8.bf16 %v3564_v0 }
 0x790   : > { %4398 = vmatprep.mubr.bf16.mxu0 %v11767_v55  ;;  %4480 = vmatprep.mubr.bf16.mxu1 %v11767_v55  ;;  %v3697_v55 = vunpack.c.l.s8.bf16 %v3479_v27  ;;  %v3541_v27 = vld [vmem:[%s11583_s8 + $0x2f8] sm:$0xff] }
 0x792   : > { %4369 = vmatpush1.bf16.msra.mxu0 %v3660_v15  ;;  %4451 = vmatpush1.bf16.msra.mxu1 %v3662_v16  ;;  %v3782_v15 = vunpack.c.h.s8.bf16 %v3516_v49  ;;  %v3793_v16 = vunpack.c.l.s8.bf16 %v3527_v13 }
 0x793   : > { %4370 = vmatprep.subr.bf16.mxu0 %v3673_v17  ;;  %4452 = vmatprep.subr.bf16.mxu1 %v3675_v56  ;;  %v3795_v17 = vunpack.c.l.s8.bf16 %v3529_v34  ;;  %v3526_v56 = vld [vmem:[%s11583_s8 + $0x280] sm:$0xff] }
 0x794   : > { %v3792_v20 = vunpack.c.l.s8.bf16 %v3526_v56  ;;  %v3804_v28 = vunpack.c.h.s8.bf16 %v3526_v56 }
 0x796   : > { %4371 = vmatpush1.bf16.msra.mxu0 %v3672_v22  ;;  %4453 = vmatpush1.bf16.msra.mxu1 %v3674_v23  ;;  %v3794_v22 = vunpack.c.l.s8.bf16 %v3528_v19  ;;  %v3805_v23 = vunpack.c.h.s8.bf16 %v3527_v13 }
 0x797   : > { %4372 = vmatprep.subr.bf16.mxu0 %v3685_v24  ;;  %4454 = vmatprep.subr.bf16.mxu1 %v3687_v25  ;;  %v3807_v24 = vunpack.c.h.s8.bf16 %v3529_v34  ;;  %v3539_v25 = vld [vmem:[%s11583_s8 + $0x2e8] sm:$0xff] }
 0x79a   : > { %4373 = vmatpush1.bf16.msra.mxu0 %v3684_v33  ;;  %4455 = vmatpush1.bf16.msra.mxu1 %v3686_v30  ;;  %v3806_v33 = vunpack.c.h.s8.bf16 %v3528_v19  ;;  %v3817_v30 = vunpack.c.l.s8.bf16 %v3539_v25 }
 0x79b   : > { %4374 = vmatprep.subr.bf16.mxu0 %v3697_v55  ;;  %4456 = vmatprep.subr.bf16.mxu1 %v3699_v39  ;;  %v3819_v55 = vunpack.c.l.s8.bf16 %v3541_v27  ;;  %v3538_v39 = vld [vmem:[%s11583_s8 + $0x2e0] sm:$0xff] }
 0x79c   : > { %v3816_v40 = vunpack.c.l.s8.bf16 %v3538_v39  ;;  %v3828_v44 = vunpack.c.h.s8.bf16 %v3538_v39  ;;  %v3601_v39 = vld [vmem:[%s11583_s8 + $0x4d8] sm:$0xff] }
 0x79e   : > { %4375 = vmatpush1.bf16.msra.mxu0 %v3696_v37  ;;  %4457 = vmatpush1.bf16.msra.mxu1 %v3698_v41  ;;  %v3818_v37 = vunpack.c.l.s8.bf16 %v3540_v35  ;;  %v3829_v41 = vunpack.c.h.s8.bf16 %v3539_v25 }
 0x79f   : > { %4376 = vmatprep.subr.bf16.mxu0 %v3709_v18  ;;  %4458 = vmatprep.subr.bf16.mxu1 %v3711_v42  ;;  %v3831_v18 = vunpack.c.h.s8.bf16 %v3541_v27  ;;  %v3551_v42 = vld [vmem:[%s11583_s8 + $0x348] sm:$0xff] }
 0x7a2   : > { %4377 = vmatpush1.bf16.msra.mxu0 %v3708_v46  ;;  %4459 = vmatpush1.bf16.msra.mxu1 %v3710_v47  ;;  %v3830_v46 = vunpack.c.h.s8.bf16 %v3540_v35  ;;  %v3841_v47 = vunpack.c.l.s8.bf16 %v3551_v42 }
 0x7a3   : > { %4378 = vmatprep.subr.bf16.mxu0 %v3721_v26  ;;  %4460 = vmatprep.subr.bf16.mxu1 %v3723_v48  ;;  %v3843_v26 = vunpack.c.l.s8.bf16 %v3553_v38  ;;  %v3550_v48 = vld [vmem:[%s11583_s8 + $0x340] sm:$0xff] }
 0x7a4   : > { %v3840_v53 = vunpack.c.l.s8.bf16 %v3550_v48  ;;  %v3852_v59 = vunpack.c.h.s8.bf16 %v3550_v48  ;;  %v3613_v48 = vld [vmem:[%s11583_s8 + $0x538] sm:$0xff] }
 0x7a6   : > { %4379 = vmatpush1.bf16.msra.mxu0 %v3720_v54  ;;  %4461 = vmatpush1.bf16.msra.mxu1 %v3722_v43  ;;  %v3842_v54 = vunpack.c.l.s8.bf16 %v3552_v50  ;;  %v3853_v43 = vunpack.c.h.s8.bf16 %v3551_v42  ;;  %v3600_v42 = vld [vmem:[%s11583_s8 + $0x4d0] sm:$0xff] }
 0x7a7   : > { %4380 = vmatprep.subr.bf16.mxu0 %v3733_v57  ;;  %4462 = vmatprep.subr.bf16.mxu1 %v3735_v45  ;;  %v3855_v57 = vunpack.c.h.s8.bf16 %v3553_v38  ;;  %v3563_v45 = vld [vmem:[%s11583_s8 + $0x3a8] sm:$0xff] }
 0x7aa   : > { %4381 = vmatpush1.bf16.msra.mxu0 %v3732_v60  ;;  %4463 = vmatpush1.bf16.msra.mxu1 %v3734_v61  ;;  %v3854_v60 = vunpack.c.h.s8.bf16 %v3552_v50  ;;  %v3865_v61 = vunpack.c.l.s8.bf16 %v3563_v45 }
 0x7ab   : > { %4382 = vmatprep.subr.bf16.mxu0 %v3745_v63  ;;  %4464 = vmatprep.subr.bf16.mxu1 %v3747_v51  ;;  %v3867_v63 = vunpack.c.l.s8.bf16 %v3565_v58  ;;  %v3562_v51 = vld [vmem:[%s11583_s8 + $0x3a0] sm:$0xff] }
 0x7ac   : > { %v3864_v1 = vunpack.c.l.s8.bf16 %v3562_v51  ;;  %v3876_v32 = vunpack.c.h.s8.bf16 %v3562_v51  ;;  %v3625_v51 = vld [vmem:[%s11583_s8 + $0x598] sm:$0xff] }
 0x7ae   : > { %4383 = vmatpush1.bf16.msra.mxu0 %v3744_v2  ;;  %4465 = vmatpush1.bf16.msra.mxu1 %v3746_v3  ;;  %v3877_v2 = vunpack.c.h.s8.bf16 %v3563_v45  ;;  %v3879_v3 = vunpack.c.h.s8.bf16 %v3565_v58  ;;  %v3612_v45 = vld [vmem:[%s11583_s8 + $0x530] sm:$0xff] }
 0x7af   : > { %4384 = vmatprep.subr.bf16.mxu0 %v3757_v4  ;;  %4466 = vmatprep.subr.bf16.mxu1 %v3759_v5  ;;  %v3575_v4 = vld [vmem:[%s11583_s8 + $0x408] sm:$0xff]  ;;  %v3577_v5 = vld [vmem:[%s11583_s8 + $0x418] sm:$0xff] }
 0x7b0   : > { %v3901_v49 = vunpack.c.h.s8.bf16 %v3575_v4 }
 0x7b2   : > { %4385 = vmatpush1.bf16.msra.mxu0 %v3756_v8  ;;  %4467 = vmatpush1.bf16.msra.mxu1 %v3758_v6  ;;  %v3891_v8 = vunpack.c.l.s8.bf16 %v3577_v5  ;;  %v3574_v6 = vld [vmem:[%s11583_s8 + $0x400] sm:$0xff] }
 0x7b3   : > { %4386 = vmatprep.subr.bf16.mxu0 %v3769_v9  ;;  %4468 = vmatprep.subr.bf16.mxu1 %v3771_v10  ;;  %v3576_v9 = vld [vmem:[%s11583_s8 + $0x410] sm:$0xff]  ;;  %v3888_v10 = vunpack.c.l.s8.bf16 %v3574_v6 }
 0x7b4   : > { %v3890_v11 = vunpack.c.l.s8.bf16 %v3576_v9  ;;  %v3902_v13 = vunpack.c.h.s8.bf16 %v3576_v9 }
 0x7b6   : > { %4387 = vmatpush1.bf16.msra.mxu0 %v3768_v36  ;;  %4469 = vmatpush1.bf16.msra.mxu1 %v3770_v52  ;;  %v3903_v36 = vunpack.c.h.s8.bf16 %v3577_v5  ;;  %v3587_v52 = vld [vmem:[%s11583_s8 + $0x468] sm:$0xff] }
 0x7b7   : > { %4388 = vmatprep.subr.bf16.mxu0 %v3781_v12  ;;  %4470 = vmatprep.subr.bf16.mxu1 %v3783_v62  ;;  %v3589_v12 = vld [vmem:[%s11583_s8 + $0x478] sm:$0xff]  ;;  %v3900_v62 = vunpack.c.h.s8.bf16 %v3574_v6  ;;  %v3913_v34 = vunpack.c.l.s8.bf16 %v3587_v52 }
 0x7b8   : > { %v3637_v6 = vld [vmem:[%s11583_s8 + $0x5f8] sm:$0xff] }
 0x7ba   : > { %4389 = vmatpush1.bf16.msra.mxu0 %v3780_v14  ;;  %4471 = vmatpush1.bf16.msra.mxu1 %v3782_v15  ;;  %v3915_v14 = vunpack.c.l.s8.bf16 %v3589_v12  ;;  %v3586_v15 = vld [vmem:[%s11583_s8 + $0x460] sm:$0xff] }
 0x7bb   : > { %4390 = vmatprep.subr.bf16.mxu0 %v3793_v16  ;;  %4472 = vmatprep.subr.bf16.mxu1 %v3795_v17  ;;  %v3588_v16 = vld [vmem:[%s11583_s8 + $0x470] sm:$0xff]  ;;  %v3924_v35 = vunpack.c.h.s8.bf16 %v3586_v15 }
 0x7bc   : > { %v3914_v25 = vunpack.c.l.s8.bf16 %v3588_v16 }
 0x7be   : > { %4391 = vmatpush1.bf16.msra.mxu0 %v3792_v20  ;;  %4473 = vmatpush1.bf16.msra.mxu1 %v3794_v22 }
 0x7bf   : > { %4392 = vmatprep.subr.bf16.mxu0 %v3805_v23  ;;  %4474 = vmatprep.subr.bf16.mxu1 %v3807_v24  ;;  %v3912_v24 = vunpack.c.l.s8.bf16 %v3586_v15 }
 0x7c2   : > { %4393 = vmatpush1.bf16.msra.mxu0 %v3804_v28  ;;  %4475 = vmatpush1.bf16.msra.mxu1 %v3806_v33  ;;  %v3925_v33 = vunpack.c.h.s8.bf16 %v3587_v52  ;;  %v3636_v52 = vld [vmem:[%s11583_s8 + $0x5f0] sm:$0xff] }
 0x7c3   : > { %4394 = vmatprep.subr.bf16.mxu0 %v3817_v30  ;;  %4476 = vmatprep.subr.bf16.mxu1 %v3819_v55  ;;  %v3927_v30 = vunpack.c.h.s8.bf16 %v3589_v12  ;;  %v3599_v55 = vld [vmem:[%s11583_s8 + $0x4c8] sm:$0xff]  ;;  %v4022_v15 = vunpack.c.h.s8.bf16 %v3636_v52 }
 0x7c6   : > { %4395 = vmatpush1.bf16.msra.mxu0 %v3816_v40  ;;  %4477 = vmatpush1.bf16.msra.mxu1 %v3818_v37  ;;  %v3926_v40 = vunpack.c.h.s8.bf16 %v3588_v16  ;;  %v3937_v37 = vunpack.c.l.s8.bf16 %v3599_v55 }
 0x7c7   : > { %4396 = vmatprep.subr.bf16.mxu0 %v3829_v41  ;;  %4478 = vmatprep.subr.bf16.mxu1 %v3831_v18  ;;  %v3939_v41 = vunpack.c.l.s8.bf16 %v3601_v39  ;;  %v3598_v18 = vld [vmem:[%s11583_s8 + $0x4c0] sm:$0xff] }
 0x7c8   : > { %v3936_v38 = vunpack.c.l.s8.bf16 %v3598_v18  ;;  %v3948_v50 = vunpack.c.h.s8.bf16 %v3598_v18 }
 0x7ca   : > { %4397 = vmatpush1.bf16.msra.mxu0 %v3828_v44  ;;  %4479 = vmatpush1.bf16.msra.mxu1 %v3830_v46  ;;  %v3938_v44 = vunpack.c.l.s8.bf16 %v3600_v42  ;;  %v3949_v46 = vunpack.c.h.s8.bf16 %v3599_v55 }
 0x7cb   : > { %4407 = vmatprep.subr.bf16.mxu0 %v3841_v47  ;;  %4489 = vmatprep.subr.bf16.mxu1 %v3843_v26  ;;  %v3951_v47 = vunpack.c.h.s8.bf16 %v3601_v39  ;;  %v3611_v26 = vld [vmem:[%s11583_s8 + $0x528] sm:$0xff] }
 0x7cd   : > { %4399 = vmatmul.mubr.bf16.vlgmr.msra.gmra.mrb[8].mxu0 %v11797_v21  ;;  %4481 = vmatmul.mubr.bf16.vlgmr.msra.gmra.mrb[8].mxu1 %v11797_v21  ;;  %v3866_v21 = vunpack.c.l.s8.bf16 %v3564_v0 }
 0x7ce   : > { %4408 = vmatpush1.bf16.msra.mxu0 %v3840_v53  ;;  %4490 = vmatpush1.bf16.msra.mxu1 %v3842_v54  ;;  %v3950_v53 = vunpack.c.h.s8.bf16 %v3600_v42  ;;  %v3961_v54 = vunpack.c.l.s8.bf16 %v3611_v26 }
 0x7cf   : > { %4409 = vmatprep.subr.bf16.mxu0 %v3853_v43  ;;  %4491 = vmatprep.subr.bf16.mxu1 %v3855_v57  ;;  %v3963_v43 = vunpack.c.l.s8.bf16 %v3613_v48  ;;  %v3610_v57 = vld [vmem:[%s11583_s8 + $0x520] sm:$0xff] }
 0x7d0   : > { %4439 = vmatprep.mubr.bf16.mxu0 %v11805_v29  ;;  %4521 = vmatprep.mubr.bf16.mxu1 %v11805_v29  ;;  %v3889_v29 = vunpack.c.l.s8.bf16 %v3575_v4  ;;  %v3960_v58 = vunpack.c.l.s8.bf16 %v3610_v57  ;;  %v3972_v0 = vunpack.c.h.s8.bf16 %v3610_v57  ;;  %v3624_v4 = vld [vmem:[%s11583_s8 + $0x590] sm:$0xff] }
 0x7d2   : > { %4410 = vmatpush1.bf16.msra.mxu0 %v3852_v59  ;;  %4492 = vmatpush1.bf16.msra.mxu1 %v3854_v60  ;;  %v3962_v59 = vunpack.c.l.s8.bf16 %v3612_v45  ;;  %v3973_v60 = vunpack.c.h.s8.bf16 %v3611_v26 }
 0x7d3   : > { %4411 = vmatprep.subr.bf16.mxu0 %v3865_v61  ;;  %4493 = vmatprep.subr.bf16.mxu1 %v3867_v63  ;;  %v3975_v61 = vunpack.c.h.s8.bf16 %v3613_v48  ;;  %v3623_v63 = vld [vmem:[%s11583_s8 + $0x588] sm:$0xff] }
 0x7d6   : > { %4412 = vmatpush1.bf16.msra.mxu0 %v3864_v1  ;;  %4494 = vmatpush1.bf16.msra.mxu1 %v3866_v21  ;;  %v3974_v1 = vunpack.c.h.s8.bf16 %v3612_v45  ;;  %v3985_v21 = vunpack.c.l.s8.bf16 %v3623_v63 }
 0x7d7   : > { %4413 = vmatprep.subr.bf16.mxu0 %v3877_v2  ;;  %4495 = vmatprep.subr.bf16.mxu1 %v3879_v3  ;;  %v3987_v2 = vunpack.c.l.s8.bf16 %v3625_v51  ;;  %v3622_v3 = vld [vmem:[%s11583_s8 + $0x580] sm:$0xff] }
 0x7d8   : > { %v3984_v5 = vunpack.c.l.s8.bf16 %v3622_v3  ;;  %v3996_v9 = vunpack.c.h.s8.bf16 %v3622_v3 }
 0x7da   : > { %4414 = vmatpush1.bf16.msra.mxu0 %v3876_v32  ;;  %4496 = vmatpush1.bf16.msra.mxu1 %v3878_v7  ;;  %v3986_v32 = vunpack.c.l.s8.bf16 %v3624_v4  ;;  %v3997_v7 = vunpack.c.h.s8.bf16 %v3623_v63 }
 0x7db   : > { %4415 = vmatprep.subr.bf16.mxu0 %v3889_v29  ;;  %4497 = vmatprep.subr.bf16.mxu1 %v3891_v8  ;;  %v3999_v29 = vunpack.c.h.s8.bf16 %v3625_v51  ;;  %v3635_v8 = vld [vmem:[%s11583_s8 + $0x5e8] sm:$0xff] }
 0x7de   : > { %4416 = vmatpush1.bf16.msra.mxu0 %v3888_v10  ;;  %4498 = vmatpush1.bf16.msra.mxu1 %v3890_v11  ;;  %v3998_v10 = vunpack.c.h.s8.bf16 %v3624_v4  ;;  %v4009_v11 = vunpack.c.l.s8.bf16 %v3635_v8 }
 0x7df   : > { %4417 = vmatprep.subr.bf16.mxu0 %v3901_v49  ;;  %4499 = vmatprep.subr.bf16.mxu1 %v3903_v36  ;;  %v4011_v49 = vunpack.c.l.s8.bf16 %v3637_v6  ;;  %v3634_v36 = vld [vmem:[%s11583_s8 + $0x5e0] sm:$0xff] }
 0x7e0   : > { %v11969_v17 = vpop.f32.mrb[0].mxu0  ;;  %v11971_v56 = vpop.f32.mrb[0].mxu1  ;;  %v4008_v12 = vunpack.c.l.s8.bf16 %v3634_v36 }
 0x7e1   : > { %v11973_v19 = vpop.f32.mrb[1].mxu0  ;;  %v11975_v20 = vpop.f32.mrb[1].mxu1 }
 0x7e2   : > { %v4117_v22 = vpop.f32.mrb[2].mxu0  ;;  %v4199_v23 = vpop.f32.mrb[2].mxu1  ;;  %4418 = vmatpush1.bf16.msra.mxu0 %v3900_v62  ;;  %4500 = vmatpush1.bf16.msra.mxu1 %v3902_v13  ;;  %v4010_v62 = vunpack.c.l.s8.bf16 %v3636_v52  ;;  %v4021_v13 = vunpack.c.h.s8.bf16 %v3635_v8 }
 0x7e3   : > { %v4118_v27 = vpop.f32.mrb[3].mxu0  ;;  %v4200_v28 = vpop.f32.mrb[3].mxu1  ;;  %4419 = vmatprep.subr.bf16.mxu0 %v3913_v34  ;;  %4501 = vmatprep.subr.bf16.mxu1 %v3915_v14  ;;  %v4023_v34 = vunpack.c.h.s8.bf16 %v3637_v6  ;;  %v4020_v14 = vunpack.c.h.s8.bf16 %v3634_v36 }
 0x7e6   : > { %4420 = vmatpush1.bf16.msra.mxu0 %v3912_v24  ;;  %4502 = vmatpush1.bf16.msra.mxu1 %v3914_v25 }
 0x7e7   : > { %4421 = vmatprep.subr.bf16.mxu0 %v3925_v33  ;;  %4503 = vmatprep.subr.bf16.mxu1 %v3927_v30  ;;  %v4532_v30 = vlaneseq }
 0x7e9   : > { %v4533_v55 = vshrl.u32 %v4532_v30, 7 }
 0x7ea   : > { %4422 = vmatpush1.bf16.msra.mxu0 %v3924_v35  ;;  %4504 = vmatpush1.bf16.msra.mxu1 %v3926_v40  ;;  %v3638_v35 = vld [vmem:[%s856_s26] sm:$0xff] }
 0x7eb   : > { %4423 = vmatprep.subr.bf16.mxu0 %v3937_v37  ;;  %4505 = vmatprep.subr.bf16.mxu1 %v3939_v41  ;;  %v11995_v39 = vsub.s32 0, %v4533_v55  ;;  %v11999_v40 = vsub.s32 2, %v4533_v55  ;;  %v4604_v41 = vld [vmem:[%s11593_s16] sm:$0xff]  ;;  %v12004_v18 = vsub.s32 1, %v4533_v55  ;;  %v12006_v42 = vsub.s32 3, %v4533_v55 }
 0x7ec   : > { %v4554_v63 = vsub.s32 5, %v4533_v55 }
 0x7ed   : > { %v4535_v37 = vrot.slane %v3638_v35, %v11995_v39  ;;  %v4539_v26 = vrot.slane %v3638_v35, %v12004_v18  ;;  %v4547_v48 = vrot.slane %v3638_v35, %v12006_v42 }
 0x7ee   : > { %4424 = vmatpush1.bf16.msra.mxu0 %v3936_v38  ;;  %4506 = vmatpush1.bf16.msra.mxu1 %v3938_v44  ;;  %v4611_v44 = vrot.slane %v4604_v41, %v11995_v39 }
 0x7ef   : > { %4425 = vmatprep.subr.bf16.mxu0 %v3949_v46  ;;  %4507 = vmatprep.subr.bf16.mxu1 %v3951_v47  ;;  %v4592_v38 = vmul.f32 %v4535_v37, %v11969_v17  ;;  %v4619_v47 = vrot.slane %v4604_v41, %v11999_v40  ;;  %v4595_v57 = vmul.f32 %v4547_v48, %v11975_v20 }
 0x7f0   : > { %v4623_v17 = vrot.slane %v4604_v41, %v12006_v42 }
 0x7f2   : > { %4426 = vmatpush1.bf16.msra.mxu0 %v3948_v50  ;;  %4508 = vmatpush1.bf16.msra.mxu1 %v3950_v53  ;;  %v4668_v50 = vadd.f32 %v4611_v44, %v4592_v38 }
 0x7f3   : > { %4427 = vmatprep.subr.bf16.mxu0 %v3961_v54  ;;  %4509 = vmatprep.subr.bf16.mxu1 %v3963_v43  ;;  %v4593_v54 = vmul.f32 %v4539_v26, %v11973_v19  ;;  %v4615_v43 = vrot.slane %v4604_v41, %v12004_v18 }
 0x7f4   : > { %v8788_v45 = vmul.f32 -1.442695, %v4668_v50 }
 0x7f6   : > { %4428 = vmatpush1.bf16.msra.mxu0 %v3960_v58  ;;  %4510 = vmatpush1.bf16.msra.mxu1 %v3962_v59  ;;  %v4669_v59 = vadd.f32 %v4615_v43, %v4593_v54  ;;  %9662 = vpow2.f32 %v8788_v45 }
 0x7f7   : > { %4429 = vmatprep.subr.bf16.mxu0 %v3973_v60  ;;  %4511 = vmatprep.subr.bf16.mxu1 %v3975_v61  ;;  %v4550_v60 = vsub.s32 4, %v4533_v55  ;;  %v4558_v61 = vsub.s32 6, %v4533_v55 }
 0x7f8   : > { %v8789_v51 = vmul.f32 -1.442695, %v4669_v59 }
 0x7f9   : > { %v4559_v19 = vrot.slane %v3638_v35, %v4558_v61  ;;  %v4627_v4 = vrot.slane %v4604_v41, %v4550_v60 }
 0x7fa   : > { %4430 = vmatpush1.bf16.msra.mxu0 %v3972_v0  ;;  %4512 = vmatpush1.bf16.msra.mxu1 %v3974_v1  ;;  %v4562_v0 = vsub.s32 7, %v4533_v55  ;;  %v4605_v55 = vld [vmem:[%s11593_s16 + $0x8] sm:$0xf] }
 0x7fb   : > { %4431 = vmatprep.subr.bf16.mxu0 %v3985_v21  ;;  %4513 = vmatprep.subr.bf16.mxu1 %v3987_v2  ;;  %v4551_v21 = vrot.slane %v3638_v35, %v4550_v60  ;;  %v4555_v2 = vrot.slane %v3638_v35, %v4554_v63  ;;  %v4643_v50 = vrot.slane %v4605_v55, %v11995_v39 }
 0x7fc   : > { %v4563_v3 = vrot.slane %v3638_v35, %v4562_v0  ;;  %v4655_v59 = vrot.slane %v4605_v55, %v12006_v42 }
 0x7fe   : > { %4432 = vmatpush1.bf16.msra.mxu0 %v3984_v5  ;;  %4514 = vmatpush1.bf16.msra.mxu1 %v3986_v32  ;;  %v4635_v32 = vrot.slane %v4604_v41, %v4558_v61 }
 0x7ff   : > { %4433 = vmatprep.subr.bf16.mxu0 %v3997_v7  ;;  %4515 = vmatprep.subr.bf16.mxu1 %v3999_v29  ;;  %v4631_v29 = vrot.slane %v4604_v41, %v4554_v63 }
 0x800   : > { %v9663_v8 = vpop.eup %9662 }
 0x801   : > { %v4692_v36 = vadd.f32 1.0, %v9663_v8 }
 0x802   : > { %4434 = vmatpush1.bf16.msra.mxu0 %v3996_v9  ;;  %4516 = vmatpush1.bf16.msra.mxu1 %v3998_v10  ;;  %v4639_v9 = vrot.slane %v4604_v41, %v4562_v0 }
 0x803   : > { %4435 = vmatprep.subr.bf16.mxu0 %v4009_v11  ;;  %4517 = vmatprep.subr.bf16.mxu1 %v4011_v49 }
 0x806   : > { %4436 = vmatpush1.bf16.msra.mxu0 %v4008_v12  ;;  %4518 = vmatpush1.bf16.msra.mxu1 %v4010_v62 }
 0x807   : > { %4437 = vmatprep.subr.bf16.mxu0 %v4021_v13  ;;  %4519 = vmatprep.subr.bf16.mxu1 %v4023_v34 }
 0x80a   : > { %4438 = vmatpush1.bf16.msra.mxu0 %v4020_v14  ;;  %4520 = vmatpush1.bf16.msra.mxu1 %v4022_v15 }
 0x80d   : > { %4440 = vmatmul.mubr.bf16.vlgmr.msra.gmra.mrb[8].mxu0 %v11843_v31  ;;  %4522 = vmatmul.mubr.bf16.vlgmr.msra.gmra.mrb[8].mxu1 %v11843_v31  ;;  %v4543_v31 = vrot.slane %v3638_v35, %v11999_v40 }
 0x80f   : > { %v4594_v46 = vmul.f32 %v4543_v31, %v11971_v56  ;;  %v4671_v56 = vadd.f32 %v4623_v17, %v4595_v57 }
 0x811   : > { %v4670_v53 = vadd.f32 %v4619_v47, %v4594_v46  ;;  %v8791_v1 = vmul.f32 -1.442695, %v4671_v56 }
 0x813   : > { %v8790_v58 = vmul.f32 -1.442695, %v4670_v53  ;;  %v4651_v53 = vrot.slane %v4605_v55, %v11999_v40 }
 0x815   : > { %9664 = vpow2.f32 %v8790_v58  ;;  %v4647_v58 = vrot.slane %v4605_v55, %v12004_v18 }
 0x816   : > { %9666 = vpow2.f32 %v8789_v51 }
 0x817   : > { %9668 = vpow2.f32 %v8791_v1 }
 0x818   : > { %9670 = vrcp.f32 %v4692_v36 }
 0x81f   : > { %v9665_v10 = vpop.eup %9664 }
 0x820   : > { %v4694_v12 = vadd.f32 1.0, %v9665_v10  ;;  %v9667_v34 = vpop.eup %9666 }
 0x821   : > { %v9669_v15 = vpop.eup %9668 }
 0x822   : > { %9672 = vrcp.f32 %v4694_v12 }
 0x860   : > { %v4277_v16 = vpop.f32.mrb[4].mxu0  ;;  %v4359_v22 = vpop.f32.mrb[4].mxu1 }
 0x861   : > { %v4279_v23 = vpop.f32.mrb[5].mxu0  ;;  %v4361_v24 = vpop.f32.mrb[5].mxu1  ;;  %v4596_v20 = vmul.f32 %v4551_v21, %v4277_v16  ;;  %v4598_v5 = vmul.f32 %v4559_v19, %v4359_v22 }
 0x862   : > { %v4281_v25 = vpop.f32.mrb[6].mxu0  ;;  %v4363_v27 = vpop.f32.mrb[6].mxu1  ;;  %v4597_v7 = vmul.f32 %v4555_v2, %v4279_v23  ;;  %v4599_v6 = vmul.f32 %v4563_v3, %v4361_v24  ;;  %v4693_v23 = vadd.f32 1.0, %v9667_v34  ;;  %v4695_v24 = vadd.f32 1.0, %v9669_v15 }
 0x863   : > { %v4282_v28 = vpop.f32.mrb[7].mxu0  ;;  %v4364_v33 = vpop.f32.mrb[7].mxu1  ;;  %v4672_v11 = vadd.f32 %v4627_v4, %v4596_v20  ;;  %v4674_v49 = vadd.f32 %v4635_v32, %v4598_v5  ;;  %v3639_v27 = vld [vmem:[%s856_s26 + $0x8] sm:$0xf] }
 0x864   : > { %v4673_v52 = vadd.f32 %v4631_v29, %v4597_v7  ;;  %v4675_v62 = vadd.f32 %v4639_v9, %v4599_v6  ;;  %v9671_v25 = vpop.eup %9670  ;;  %v4728_v28 = vld [vmem:[%s11599_s27] sm:$0xf]  ;;  %v4567_v37 = vrot.slane %v3639_v27, %v11995_v39  ;;  %v4575_v31 = vrot.slane %v3639_v27, %v11999_v40 }
 0x865   : > { %v8792_v13 = vmul.f32 -1.442695, %v4672_v11  ;;  %v8794_v14 = vmul.f32 -1.442695, %v4674_v49  ;;  %v9673_v33 = vpop.eup %9672  ;;  %v4733_v41 = vrot.slane %v4728_v28, %v11995_v39  ;;  %v4741_v44 = vrot.slane %v4728_v28, %v11999_v40 }
 0x866   : > { %v8793_v16 = vmul.f32 -1.442695, %v4673_v52  ;;  %v8795_v22 = vmul.f32 -1.442695, %v4675_v62  ;;  %v4571_v46 = vrot.slane %v3639_v27, %v12004_v18  ;;  %v4579_v47 = vrot.slane %v3639_v27, %v12006_v42 }
 0x867   : > { %9674 = vpow2.f32 %v8792_v13  ;;  %v4737_v54 = vrot.slane %v4728_v28, %v12004_v18  ;;  %v4745_v56 = vrot.slane %v4728_v28, %v12006_v42  ;;  %v4750_v51 = vmul.f32 %v9671_v25, %v4733_v41 }
 0x868   : > { %9676 = vpow2.f32 %v8794_v14  ;;  %v4752_v21 = vmul.f32 %v9673_v33, %v4741_v44 }
 0x869   : > { %9678 = vpow2.f32 %v8793_v16 }
 0x86a   : > { %9680 = vpow2.f32 %v8795_v22 }
 0x86b   : > { %9682 = vrcp.f32 %v4693_v23 }
 0x86c   : > { %9684 = vrcp.f32 %v4695_v24 }
 0x871   : > { %v9675_v30 = vpop.eup %9674 }
 0x872   : > { %v9677_v35 = vpop.eup %9676  ;;  %v4716_v48 = vadd.f32 1.0, %v9675_v30 }
 0x873   : > { %v9679_v38 = vpop.eup %9678  ;;  %v4718_v57 = vadd.f32 1.0, %v9677_v35 }
 0x874   : > { %v9681_v26 = vpop.eup %9680  ;;  %v4717_v61 = vadd.f32 1.0, %v9679_v38  ;;  %9686 = vrcp.f32 %v4716_v48 }
 0x875   : > { %v9683_v43 = vpop.eup %9682  ;;  %v4719_v40 = vadd.f32 1.0, %v9681_v26  ;;  %9688 = vrcp.f32 %v4718_v57 }
 0x876   : > { %v9685_v60 = vpop.eup %9684  ;;  %v4751_v5 = vmul.f32 %v9683_v43, %v4737_v54  ;;  %9690 = vrcp.f32 %v4717_v61 }
 0x877   : > { %v4753_v8 = vmul.f32 %v9685_v60, %v4745_v56  ;;  %9692 = vrcp.f32 %v4719_v40 }
 0x87e   : > { %v9687_v49 = vpop.eup %9686 }
 0x87f   : > { %v9689_v36 = vpop.eup %9688  ;;  %v4762_v62 = vsub.f32 1.0, %v9687_v49 }
 0x880   : > { %v9691_v52 = vpop.eup %9690  ;;  %v4764_v34 = vsub.f32 1.0, %v9689_v36 }
 0x881   : > { %v9693_v12 = vpop.eup %9692  ;;  %v4763_v15 = vsub.f32 1.0, %v9691_v52 }
 0x882   : > { %v4765_v23 = vsub.f32 1.0, %v9693_v12 }
 0x8e0   : > { %v4441_v17 = vpop.f32.mrb[8].mxu0  ;;  %v4523_v45 = vpop.f32.mrb[8].mxu1 }
 0x8e1   : > { %v4600_v63 = vmul.f32 %v4567_v37, %v4441_v17  ;;  %v4602_v0 = vmul.f32 %v4575_v31, %v4523_v45  ;;  %v4443_v39 = vpop.f32.mrb[9].mxu0  ;;  %v4525_v1 = vpop.f32.mrb[9].mxu1 }
 0x8e2   : > { %v4601_v19 = vmul.f32 %v4571_v46, %v4443_v39  ;;  %v4603_v2 = vmul.f32 %v4579_v47, %v4525_v1  ;;  %v4445_v3 = vpop.f32.mrb[10].mxu0  ;;  %v4527_v20 = vpop.f32.mrb[10].mxu1 }
 0x8e3   : > { %v4676_v4 = vadd.f32 %v4643_v50, %v4600_v63  ;;  %v4678_v18 = vadd.f32 %v4651_v53, %v4602_v0  ;;  %v4446_v32 = vpop.f32.mrb[11].mxu0  ;;  %v4528_v7 = vpop.f32.mrb[11].mxu1 }
 0x8e4   : > { %v4677_v42 = vadd.f32 %v4647_v58, %v4601_v19  ;;  %v4679_v29 = vadd.f32 %v4655_v59, %v4603_v2 }
 0x8e5   : > { %v4754_v6 = vadd.f32 %v4750_v51, %v4676_v4  ;;  %v4756_v9 = vadd.f32 %v4752_v21, %v4678_v18 }
 0x8e6   : > { %v4755_v10 = vadd.f32 %v4751_v5, %v4677_v42  ;;  %v4757_v11 = vadd.f32 %v4753_v8, %v4679_v29 }
 0x8e7   : > { %9694 = vtanh.f32 %v4754_v6 }
 0x8e8   : > { %9696 = vtanh.f32 %v4756_v9 }
 0x8e9   : > { %9698 = vtanh.f32 %v4755_v10 }
 0x8ea   : > { %9700 = vtanh.f32 %v4757_v11 }
 0x8f1   : > { %v9695_v13 = vpop.eup %9694 }
 0x8f2   : > { %v9697_v14 = vpop.eup %9696  ;;  %v4766_v16 = vmul.f32 %v9695_v13, %v4762_v62 }
 0x8f3   : > { %v9699_v22 = vpop.eup %9698  ;;  %v4768_v24 = vmul.f32 %v9697_v14, %v4764_v34 }
 0x8f4   : > { %v9701_v25 = vpop.eup %9700  ;;  %v4767_v27 = vmul.f32 %v9699_v22, %v4763_v15 }
 0x8f5   : > { %v4769_v28 = vmul.f32 %v9701_v25, %v4765_v23 }
 0x8f6   : > { %v9162_v33 = vpack.c.bf16 %v4767_v27, %v4766_v16 }
 0x8f7   : > { %v9163_v30 = vpack.c.bf16 %v4769_v28, %v4768_v24 }
 0x8f8   : > { %4786 = vst [vmem:[#allocation2] sm:$0xff] %v9162_v33 }
 0x8f9   : > { %4787 = vst [vmem:[#allocation2 + $0x8] sm:$0xff] %v9163_v30 }
 0x8fa PF: > { %v4799_v55 = vld [vmem:[%s11601_s7 + $0x8] sm:$0xff]  ;;  %v4801_v35 = vld [vmem:[%s11601_s7 + $0x18] sm:$0xff]  ;;  %v4798_v37 = vld [vmem:[%s11601_s7] sm:$0xff]  ;;  %p8802_p2 = scmp.ne.s32.totalorder %s11027_s28, 5 }
 0x8fb   : > { %v4927_v41 = vunpack.c.l.s8.bf16 %v4799_v55  ;;  %v4935_v31 = vunpack.c.h.s8.bf16 %v4799_v55  ;;  %v4929_v38 = vunpack.c.l.s8.bf16 %v4801_v35  ;;  %v4937_v44 = vunpack.c.h.s8.bf16 %v4801_v35  ;;  %v4800_v46 = vld [vmem:[%s11601_s7 + $0x10] sm:$0xff]  ;;  %v4807_v48 = vld [vmem:[%s11601_s7 + $0x48] sm:$0xff]  ;;  %v4809_v50 = vld [vmem:[%s11601_s7 + $0x58] sm:$0xff]  ;;  %s12510_s30 = sld [smem:[#allocation67_spill]] (!%p8802_p2) }
 0x8fc   : > { %v4926_v47 = vunpack.c.l.s8.bf16 %v4798_v37  ;;  %v4928_v26 = vunpack.c.l.s8.bf16 %v4800_v46  ;;  %v4934_v53 = vunpack.c.h.s8.bf16 %v4798_v37  ;;  %v4936_v54 = vunpack.c.h.s8.bf16 %v4800_v46  ;;  %v4806_v17 = vld [vmem:[%s11601_s7 + $0x40] sm:$0xff]  ;;  %v4808_v45 = vld [vmem:[%s11601_s7 + $0x50] sm:$0xff]  ;;  %v4815_v61 = vld [vmem:[%s11601_s7 + $0x88] sm:$0xff] }
 0x8fd   : > { %5196 = vmatprep.subr.bf16.mxu0 %v4927_v41  ;;  %5278 = vmatprep.subr.bf16.mxu1 %v4929_v38  ;;  %v4943_v43 = vunpack.c.l.s8.bf16 %v4807_v48  ;;  %v4945_v57 = vunpack.c.l.s8.bf16 %v4809_v50  ;;  %v4942_v58 = vunpack.c.l.s8.bf16 %v4806_v17  ;;  %v4944_v59 = vunpack.c.l.s8.bf16 %v4808_v45  ;;  %v4817_v63 = vld [vmem:[%s11601_s7 + $0x98] sm:$0xff]  ;;  %v4814_v40 = vld [vmem:[%s11601_s7 + $0x80] sm:$0xff]  ;;  %v4816_v21 = vld [vmem:[%s11601_s7 + $0x90] sm:$0xff] }
 0x8fe   : > { %5197 = vmatpush1.bf16.msra.mxu0 %v4926_v47  ;;  %5279 = vmatpush1.bf16.msra.mxu1 %v4928_v26  ;;  %v4951_v56 = vunpack.c.h.s8.bf16 %v4807_v48  ;;  %v4953_v60 = vunpack.c.h.s8.bf16 %v4809_v50  ;;  %v4950_v51 = vunpack.c.h.s8.bf16 %v4806_v17  ;;  %v4952_v0 = vunpack.c.h.s8.bf16 %v4808_v45  ;;  %v4823_v5 = vld [vmem:[%s11601_s7 + $0xc8] sm:$0xff]  ;;  %v4825_v32 = vld [vmem:[%s11601_s7 + $0xd8] sm:$0xff]  ;;  %v4822_v6 = vld [vmem:[%s11601_s7 + $0xc0] sm:$0xff] }
 0x8ff   : > { %5198 = vmatprep.subr.bf16.mxu0 %v4935_v31  ;;  %5280 = vmatprep.subr.bf16.mxu1 %v4937_v44  ;;  %v4959_v39 = vunpack.c.l.s8.bf16 %v4815_v61  ;;  %v4961_v1 = vunpack.c.l.s8.bf16 %v4817_v63  ;;  %v12046_v19 = vld [vmem:[#allocation2] sm:$0xff]  ;;  %v4958_v2 = vunpack.c.l.s8.bf16 %v4814_v40  ;;  %v4960_v3 = vunpack.c.l.s8.bf16 %v4816_v21  ;;  %v4833_v12 = vld [vmem:[%s11601_s7 + $0x118] sm:$0xff]  ;;  %v4830_v15 = vld [vmem:[%s11601_s7 + $0x100] sm:$0xff] }
 0x900   : > { %v4967_v20 = vunpack.c.h.s8.bf16 %v4815_v61  ;;  %v4969_v4 = vunpack.c.h.s8.bf16 %v4817_v63  ;;  %v12050_v18 = vcombine.high %v12046_v19, %v12046_v19  ;;  %v4966_v7 = vunpack.c.h.s8.bf16 %v4814_v40  ;;  %v4824_v9 = vld [vmem:[%s11601_s7 + $0xd0] sm:$0xff]  ;;  %v4831_v52 = vld [vmem:[%s11601_s7 + $0x108] sm:$0xff]  ;;  %v4841_v28 = vld [vmem:[%s11601_s7 + $0x158] sm:$0xff] }
 0x901   : > { %v4968_v42 = vunpack.c.h.s8.bf16 %v4816_v21  ;;  %v4975_v29 = vunpack.c.l.s8.bf16 %v4823_v5  ;;  %v4977_v8 = vunpack.c.l.s8.bf16 %v4825_v32  ;;  %v4974_v10 = vunpack.c.l.s8.bf16 %v4822_v6  ;;  %v4832_v16 = vld [vmem:[%s11601_s7 + $0x110] sm:$0xff]  ;;  %v4839_v27 = vld [vmem:[%s11601_s7 + $0x148] sm:$0xff]  ;;  %v4838_v37 = vld [vmem:[%s11601_s7 + $0x140] sm:$0xff] }
 0x902   : > { %5199 = vmatpush1.bf16.msra.mxu0 %v4934_v53  ;;  %5281 = vmatpush1.bf16.msra.mxu1 %v4936_v54  ;;  %v4976_v11 = vunpack.c.l.s8.bf16 %v4824_v9  ;;  %v4983_v49 = vunpack.c.h.s8.bf16 %v4823_v5  ;;  %v4985_v36 = vunpack.c.h.s8.bf16 %v4825_v32  ;;  %v4982_v62 = vunpack.c.h.s8.bf16 %v4822_v6  ;;  %v4840_v41 = vld [vmem:[%s11601_s7 + $0x150] sm:$0xff]  ;;  %v4847_v47 = vld [vmem:[%s11601_s7 + $0x188] sm:$0xff]  ;;  %v4849_v26 = vld [vmem:[%s11601_s7 + $0x198] sm:$0xff] }
 0x903   : > { %5200 = vmatprep.subr.bf16.mxu0 %v4943_v43  ;;  %5282 = vmatprep.subr.bf16.mxu1 %v4945_v57  ;;  %v4984_v13 = vunpack.c.h.s8.bf16 %v4824_v9  ;;  %v4991_v34 = vunpack.c.l.s8.bf16 %v4831_v52  ;;  %v4993_v14 = vunpack.c.l.s8.bf16 %v4833_v12  ;;  %v4990_v22 = vunpack.c.l.s8.bf16 %v4830_v15  ;;  %v4846_v43 = vld [vmem:[%s11601_s7 + $0x180] sm:$0xff]  ;;  %v4848_v57 = vld [vmem:[%s11601_s7 + $0x190] sm:$0xff] }
 0x904   : > { %5228 = vmatprep.mubr.bf16.mxu0 %v12050_v18  ;;  %5310 = vmatprep.mubr.bf16.mxu1 %v12050_v18  ;;  %v4992_v23 = vunpack.c.l.s8.bf16 %v4832_v16  ;;  %v4999_v24 = vunpack.c.h.s8.bf16 %v4831_v52  ;;  %v5001_v25 = vunpack.c.h.s8.bf16 %v4833_v12  ;;  %v4998_v33 = vunpack.c.h.s8.bf16 %v4830_v15  ;;  %v12082_v9 = vld [vmem:[#allocation2 + $0x8] sm:$0xff]  ;;  %v4871_v52 = vld [vmem:[%s11601_s7 + $0x248] sm:$0xff]  ;;  %v4870_v15 = vld [vmem:[%s11601_s7 + $0x240] sm:$0xff] }
 0x905   : > { %v5000_v30 = vunpack.c.h.s8.bf16 %v4832_v16  ;;  %v5007_v55 = vunpack.c.l.s8.bf16 %v4839_v27  ;;  %v5009_v35 = vunpack.c.l.s8.bf16 %v4841_v28  ;;  %v5006_v31 = vunpack.c.l.s8.bf16 %v4838_v37  ;;  %v4873_v12 = vld [vmem:[%s11601_s7 + $0x258] sm:$0xff]  ;;  %v4872_v16 = vld [vmem:[%s11601_s7 + $0x250] sm:$0xff] }
 0x906   : > { %5201 = vmatpush1.bf16.msra.mxu0 %v4942_v58  ;;  %5283 = vmatpush1.bf16.msra.mxu1 %v4944_v59  ;;  %v5008_v38 = vunpack.c.l.s8.bf16 %v4840_v41  ;;  %v5015_v44 = vunpack.c.h.s8.bf16 %v4839_v27  ;;  %v5017_v46 = vunpack.c.h.s8.bf16 %v4841_v28  ;;  %v5014_v48 = vunpack.c.h.s8.bf16 %v4838_v37  ;;  %v4879_v27 = vld [vmem:[%s11601_s7 + $0x288] sm:$0xff]  ;;  %v4881_v28 = vld [vmem:[%s11601_s7 + $0x298] sm:$0xff]  ;;  %v4878_v37 = vld [vmem:[%s11601_s7 + $0x280] sm:$0xff] }
 0x907   : > { %5202 = vmatprep.subr.bf16.mxu0 %v4951_v56  ;;  %5284 = vmatprep.subr.bf16.mxu1 %v4953_v60  ;;  %v5016_v50 = vunpack.c.h.s8.bf16 %v4840_v41  ;;  %v5023_v53 = vunpack.c.l.s8.bf16 %v4847_v47  ;;  %v5025_v54 = vunpack.c.l.s8.bf16 %v4849_v26  ;;  %v5022_v17 = vunpack.c.l.s8.bf16 %v4846_v43  ;;  %v4855_v56 = vld [vmem:[%s11601_s7 + $0x1c8] sm:$0xff]  ;;  %v4857_v60 = vld [vmem:[%s11601_s7 + $0x1d8] sm:$0xff]  ;;  %v4880_v41 = vld [vmem:[%s11601_s7 + $0x290] sm:$0xff] }
 0x908   : > { %v5024_v45 = vunpack.c.l.s8.bf16 %v4848_v57  ;;  %v5031_v58 = vunpack.c.h.s8.bf16 %v4847_v47  ;;  %v5033_v59 = vunpack.c.h.s8.bf16 %v4849_v26  ;;  %v5030_v61 = vunpack.c.h.s8.bf16 %v4846_v43  ;;  %v4887_v47 = vld [vmem:[%s11601_s7 + $0x2c8] sm:$0xff]  ;;  %v4889_v26 = vld [vmem:[%s11601_s7 + $0x2d8] sm:$0xff]  ;;  %v4886_v43 = vld [vmem:[%s11601_s7 + $0x2c0] sm:$0xff] }
 0x909   : > { %v5032_v63 = vunpack.c.h.s8.bf16 %v4848_v57  ;;  %v12080_v6 = vcombine.low %v12046_v19, %v12046_v19  ;;  %v4888_v57 = vld [vmem:[%s11601_s7 + $0x2d0] sm:$0xff]  ;;  %vm10885_vm14 = vmmov (!%p8802_p2), 0  }
 0x90a   : > { %5203 = vmatpush1.bf16.msra.mxu0 %v4950_v51  ;;  %5285 = vmatpush1.bf16.msra.mxu1 %v4952_v0  ;;  %v5039_v51 = vunpack.c.l.s8.bf16 %v4855_v56  ;;  %v5041_v0 = vunpack.c.l.s8.bf16 %v4857_v60 }
 0x90b   : > { %5204 = vmatprep.subr.bf16.mxu0 %v4959_v39  ;;  %5286 = vmatprep.subr.bf16.mxu1 %v4961_v1  ;;  %v4854_v39 = vld [vmem:[%s11601_s7 + $0x1c0] sm:$0xff]  ;;  %v4856_v1 = vld [vmem:[%s11601_s7 + $0x1d0] sm:$0xff] }
 0x90c   : > { %v5038_v40 = vunpack.c.l.s8.bf16 %v4854_v39  ;;  %v5040_v21 = vunpack.c.l.s8.bf16 %v4856_v1  ;;  %v5046_v5 = vunpack.c.h.s8.bf16 %v4854_v39  ;;  %v5048_v32 = vunpack.c.h.s8.bf16 %v4856_v1  ;;  %v4894_v39 = vld [vmem:[%s11601_s7 + $0x300] sm:$0xff]  ;;  %v4896_v1 = vld [vmem:[%s11601_s7 + $0x310] sm:$0xff] }
 0x90e   : > { %5205 = vmatpush1.bf16.msra.mxu0 %v4958_v2  ;;  %5287 = vmatpush1.bf16.msra.mxu1 %v4960_v3  ;;  %v5047_v2 = vunpack.c.h.s8.bf16 %v4855_v56  ;;  %v5049_v3 = vunpack.c.h.s8.bf16 %v4857_v60  ;;  %v4895_v56 = vld [vmem:[%s11601_s7 + $0x308] sm:$0xff]  ;;  %v4897_v60 = vld [vmem:[%s11601_s7 + $0x318] sm:$0xff] }
 0x90f   : > { %5206 = vmatprep.subr.bf16.mxu0 %v4967_v20  ;;  %5288 = vmatprep.subr.bf16.mxu1 %v4969_v4  ;;  %v4863_v20 = vld [vmem:[%s11601_s7 + $0x208] sm:$0xff]  ;;  %v4865_v4 = vld [vmem:[%s11601_s7 + $0x218] sm:$0xff] }
 0x912   : > { %5207 = vmatpush1.bf16.msra.mxu0 %v4966_v7  ;;  %5289 = vmatpush1.bf16.msra.mxu1 %v4968_v42  ;;  %v5055_v7 = vunpack.c.l.s8.bf16 %v4863_v20  ;;  %v5057_v42 = vunpack.c.l.s8.bf16 %v4865_v4 }
 0x913   : > { %5208 = vmatprep.subr.bf16.mxu0 %v4975_v29  ;;  %5290 = vmatprep.subr.bf16.mxu1 %v4977_v8  ;;  %v4862_v29 = vld [vmem:[%s11601_s7 + $0x200] sm:$0xff]  ;;  %v4864_v8 = vld [vmem:[%s11601_s7 + $0x210] sm:$0xff] }
 0x914   : > { %v5062_v19 = vunpack.c.h.s8.bf16 %v4862_v29 }
 0x916   : > { %5209 = vmatpush1.bf16.msra.mxu0 %v4974_v10  ;;  %5291 = vmatpush1.bf16.msra.mxu1 %v4976_v11  ;;  %v5054_v10 = vunpack.c.l.s8.bf16 %v4862_v29  ;;  %v5056_v11 = vunpack.c.l.s8.bf16 %v4864_v8  ;;  %v4902_v29 = vld [vmem:[%s11601_s7 + $0x340] sm:$0xff] }
 0x917   : > { %5210 = vmatprep.subr.bf16.mxu0 %v4983_v49  ;;  %5292 = vmatprep.subr.bf16.mxu1 %v4985_v36  ;;  %v5063_v49 = vunpack.c.h.s8.bf16 %v4863_v20  ;;  %v5065_v36 = vunpack.c.h.s8.bf16 %v4865_v4  ;;  %v4903_v20 = vld [vmem:[%s11601_s7 + $0x348] sm:$0xff]  ;;  %v4905_v4 = vld [vmem:[%s11601_s7 + $0x358] sm:$0xff] }
 0x91a   : > { %5211 = vmatpush1.bf16.msra.mxu0 %v4982_v62  ;;  %5293 = vmatpush1.bf16.msra.mxu1 %v4984_v13  ;;  %v12088_v62 = vcombine.high %v12082_v9, %v12082_v9  ;;  %v5064_v13 = vunpack.c.h.s8.bf16 %v4864_v8  ;;  %v4904_v8 = vld [vmem:[%s11601_s7 + $0x350] sm:$0xff] }
 0x91b   : > { %5212 = vmatprep.subr.bf16.mxu0 %v4991_v34  ;;  %5294 = vmatprep.subr.bf16.mxu1 %v4993_v14  ;;  %v5071_v34 = vunpack.c.l.s8.bf16 %v4871_v52  ;;  %v5073_v14 = vunpack.c.l.s8.bf16 %v4873_v12 }
 0x91e   : > { %5213 = vmatpush1.bf16.msra.mxu0 %v4990_v22  ;;  %5295 = vmatpush1.bf16.msra.mxu1 %v4992_v23  ;;  %v5070_v22 = vunpack.c.l.s8.bf16 %v4870_v15  ;;  %v5072_v23 = vunpack.c.l.s8.bf16 %v4872_v16 }
 0x91f   : > { %5214 = vmatprep.subr.bf16.mxu0 %v4999_v24  ;;  %5296 = vmatprep.subr.bf16.mxu1 %v5001_v25  ;;  %v5079_v24 = vunpack.c.h.s8.bf16 %v4871_v52  ;;  %v5081_v25 = vunpack.c.h.s8.bf16 %v4873_v12  ;;  %v4911_v52 = vld [vmem:[%s11601_s7 + $0x388] sm:$0xff]  ;;  %v4913_v12 = vld [vmem:[%s11601_s7 + $0x398] sm:$0xff] }
 0x922   : > { %5215 = vmatpush1.bf16.msra.mxu0 %v4998_v33  ;;  %5297 = vmatpush1.bf16.msra.mxu1 %v5000_v30  ;;  %v5078_v33 = vunpack.c.h.s8.bf16 %v4870_v15  ;;  %v5080_v30 = vunpack.c.h.s8.bf16 %v4872_v16  ;;  %v4910_v15 = vld [vmem:[%s11601_s7 + $0x380] sm:$0xff]  ;;  %v4912_v16 = vld [vmem:[%s11601_s7 + $0x390] sm:$0xff] }
 0x923   : > { %5216 = vmatprep.subr.bf16.mxu0 %v5007_v55  ;;  %5298 = vmatprep.subr.bf16.mxu1 %v5009_v35  ;;  %v5087_v55 = vunpack.c.l.s8.bf16 %v4879_v27  ;;  %v5089_v35 = vunpack.c.l.s8.bf16 %v4881_v28 }
 0x926   : > { %5217 = vmatpush1.bf16.msra.mxu0 %v5006_v31  ;;  %5299 = vmatpush1.bf16.msra.mxu1 %v5008_v38  ;;  %v5086_v31 = vunpack.c.l.s8.bf16 %v4878_v37  ;;  %v5088_v38 = vunpack.c.l.s8.bf16 %v4880_v41 }
 0x927   : > { %5218 = vmatprep.subr.bf16.mxu0 %v5015_v44  ;;  %5300 = vmatprep.subr.bf16.mxu1 %v5017_v46  ;;  %v5095_v44 = vunpack.c.h.s8.bf16 %v4879_v27  ;;  %v5097_v46 = vunpack.c.h.s8.bf16 %v4881_v28  ;;  %v4919_v27 = vld [vmem:[%s11601_s7 + $0x3c8] sm:$0xff]  ;;  %v4921_v28 = vld [vmem:[%s11601_s7 + $0x3d8] sm:$0xff] }
 0x92a   : > { %5219 = vmatpush1.bf16.msra.mxu0 %v5014_v48  ;;  %5301 = vmatpush1.bf16.msra.mxu1 %v5016_v50  ;;  %v5094_v48 = vunpack.c.h.s8.bf16 %v4878_v37  ;;  %v5096_v50 = vunpack.c.h.s8.bf16 %v4880_v41  ;;  %v4918_v37 = vld [vmem:[%s11601_s7 + $0x3c0] sm:$0xff]  ;;  %v4920_v41 = vld [vmem:[%s11601_s7 + $0x3d0] sm:$0xff] }
 0x92b   : > { %5220 = vmatprep.subr.bf16.mxu0 %v5023_v53  ;;  %5302 = vmatprep.subr.bf16.mxu1 %v5025_v54  ;;  %v5103_v53 = vunpack.c.l.s8.bf16 %v4887_v47  ;;  %v5105_v54 = vunpack.c.l.s8.bf16 %v4889_v26 }
 0x92e   : > { %5221 = vmatpush1.bf16.msra.mxu0 %v5022_v17  ;;  %5303 = vmatpush1.bf16.msra.mxu1 %v5024_v45  ;;  %v5102_v17 = vunpack.c.l.s8.bf16 %v4886_v43  ;;  %v5104_v45 = vunpack.c.l.s8.bf16 %v4888_v57 }
 0x92f   : > { %5222 = vmatprep.subr.bf16.mxu0 %v5031_v58  ;;  %5304 = vmatprep.subr.bf16.mxu1 %v5033_v59  ;;  %v5111_v58 = vunpack.c.h.s8.bf16 %v4887_v47  ;;  %v5113_v59 = vunpack.c.h.s8.bf16 %v4889_v26  ;;  %v4803_v47 = vld [vmem:[%s11601_s7 + $0x28] sm:$0xff]  ;;  %v4805_v26 = vld [vmem:[%s11601_s7 + $0x38] sm:$0xff] }
 0x932   : > { %5223 = vmatpush1.bf16.msra.mxu0 %v5030_v61  ;;  %5305 = vmatpush1.bf16.msra.mxu1 %v5032_v63  ;;  %v5110_v61 = vunpack.c.h.s8.bf16 %v4886_v43  ;;  %v5112_v63 = vunpack.c.h.s8.bf16 %v4888_v57  ;;  %v4802_v43 = vld [vmem:[%s11601_s7 + $0x20] sm:$0xff]  ;;  %v4804_v57 = vld [vmem:[%s11601_s7 + $0x30] sm:$0xff] }
 0x933   : > { %5224 = vmatprep.subr.bf16.mxu0 %v5039_v51  ;;  %5306 = vmatprep.subr.bf16.mxu1 %v5041_v0  ;;  %v5119_v51 = vunpack.c.l.s8.bf16 %v4895_v56  ;;  %v5121_v0 = vunpack.c.l.s8.bf16 %v4897_v60 }
 0x936   : > { %5225 = vmatpush1.bf16.msra.mxu0 %v5038_v40  ;;  %5307 = vmatpush1.bf16.msra.mxu1 %v5040_v21  ;;  %v5118_v40 = vunpack.c.l.s8.bf16 %v4894_v39  ;;  %v5120_v21 = vunpack.c.l.s8.bf16 %v4896_v1 }
 0x937   : > { %5226 = vmatprep.subr.bf16.mxu0 %v5047_v2  ;;  %5308 = vmatprep.subr.bf16.mxu1 %v5049_v3  ;;  %v5127_v2 = vunpack.c.h.s8.bf16 %v4895_v56  ;;  %v5129_v3 = vunpack.c.h.s8.bf16 %v4897_v60  ;;  %v4941_v56 = vunpack.c.h.s8.bf16 %v4805_v26  ;;  %v4811_v60 = vld [vmem:[%s11601_s7 + $0x68] sm:$0xff] }
 0x93a   : > { %5227 = vmatpush1.bf16.msra.mxu0 %v5046_v5  ;;  %5309 = vmatpush1.bf16.msra.mxu1 %v5048_v32  ;;  %v5126_v5 = vunpack.c.h.s8.bf16 %v4894_v39  ;;  %v5128_v32 = vunpack.c.h.s8.bf16 %v4896_v1  ;;  %v4810_v39 = vld [vmem:[%s11601_s7 + $0x60] sm:$0xff]  ;;  %v4812_v1 = vld [vmem:[%s11601_s7 + $0x70] sm:$0xff] }
 0x93b   : > { %5237 = vmatprep.subr.bf16.mxu0 %v5055_v7  ;;  %5319 = vmatprep.subr.bf16.mxu1 %v5057_v42  ;;  %v5135_v7 = vunpack.c.l.s8.bf16 %v4903_v20  ;;  %v5137_v42 = vunpack.c.l.s8.bf16 %v4905_v4 }
 0x93d   : > { %5229 = vmatmul.mubr.bf16.vlgmr.msra.gmra.mrb[0].mxu0 %v12080_v6  ;;  %5311 = vmatmul.mubr.bf16.vlgmr.msra.gmra.mrb[0].mxu1 %v12080_v6 }
 0x93e   : > { %5238 = vmatpush1.bf16.msra.mxu0 %v5054_v10  ;;  %5320 = vmatpush1.bf16.msra.mxu1 %v5056_v11  ;;  %v5134_v10 = vunpack.c.l.s8.bf16 %v4902_v29  ;;  %v5136_v11 = vunpack.c.l.s8.bf16 %v4904_v8 }
 0x93f   : > { %5239 = vmatprep.subr.bf16.mxu0 %v5063_v49  ;;  %5321 = vmatprep.subr.bf16.mxu1 %v5065_v36  ;;  %v5143_v49 = vunpack.c.h.s8.bf16 %v4903_v20  ;;  %v5145_v36 = vunpack.c.h.s8.bf16 %v4905_v4  ;;  %v4819_v20 = vld [vmem:[%s11601_s7 + $0xa8] sm:$0xff]  ;;  %v4821_v4 = vld [vmem:[%s11601_s7 + $0xb8] sm:$0xff] }
 0x940   : > { %5269 = vmatprep.mubr.bf16.mxu0 %v12088_v62  ;;  %5351 = vmatprep.mubr.bf16.mxu1 %v12088_v62 }
 0x942   : > { %5240 = vmatpush1.bf16.msra.mxu0 %v5062_v19  ;;  %5322 = vmatpush1.bf16.msra.mxu1 %v5064_v13  ;;  %v5142_v19 = vunpack.c.h.s8.bf16 %v4902_v29  ;;  %v5144_v13 = vunpack.c.h.s8.bf16 %v4904_v8  ;;  %v4820_v29 = vld [vmem:[%s11601_s7 + $0xb0] sm:$0xff] }
 0x943   : > { %5241 = vmatprep.subr.bf16.mxu0 %v5071_v34  ;;  %5323 = vmatprep.subr.bf16.mxu1 %v5073_v14  ;;  %v5151_v34 = vunpack.c.l.s8.bf16 %v4911_v52  ;;  %v5153_v14 = vunpack.c.l.s8.bf16 %v4913_v12 }
 0x946   : > { %5242 = vmatpush1.bf16.msra.mxu0 %v5070_v22  ;;  %5324 = vmatpush1.bf16.msra.mxu1 %v5072_v23  ;;  %v5150_v22 = vunpack.c.l.s8.bf16 %v4910_v15  ;;  %v5152_v23 = vunpack.c.l.s8.bf16 %v4912_v16 }
 0x947   : > { %5243 = vmatprep.subr.bf16.mxu0 %v5079_v24  ;;  %5325 = vmatprep.subr.bf16.mxu1 %v5081_v25  ;;  %v5159_v24 = vunpack.c.h.s8.bf16 %v4911_v52  ;;  %v5161_v25 = vunpack.c.h.s8.bf16 %v4913_v12  ;;  %v4829_v52 = vld [vmem:[%s11601_s7 + $0xf8] sm:$0xff] }
 0x94a   : > { %5244 = vmatpush1.bf16.msra.mxu0 %v5078_v33  ;;  %5326 = vmatpush1.bf16.msra.mxu1 %v5080_v30  ;;  %v5158_v33 = vunpack.c.h.s8.bf16 %v4910_v15  ;;  %v5160_v30 = vunpack.c.h.s8.bf16 %v4912_v16  ;;  %v4828_v15 = vld [vmem:[%s11601_s7 + $0xf0] sm:$0xff] }
 0x94b   : > { %5245 = vmatprep.subr.bf16.mxu0 %v5087_v55  ;;  %5327 = vmatprep.subr.bf16.mxu1 %v5089_v35  ;;  %v5167_v55 = vunpack.c.l.s8.bf16 %v4919_v27  ;;  %v5169_v35 = vunpack.c.l.s8.bf16 %v4921_v28 }
 0x94e   : > { %5246 = vmatpush1.bf16.msra.mxu0 %v5086_v31  ;;  %5328 = vmatpush1.bf16.msra.mxu1 %v5088_v38  ;;  %v5166_v31 = vunpack.c.l.s8.bf16 %v4918_v37  ;;  %v5168_v38 = vunpack.c.l.s8.bf16 %v4920_v41 }
 0x94f   : > { %5247 = vmatprep.subr.bf16.mxu0 %v5095_v44  ;;  %5329 = vmatprep.subr.bf16.mxu1 %v5097_v46  ;;  %v5175_v44 = vunpack.c.h.s8.bf16 %v4919_v27  ;;  %v5177_v46 = vunpack.c.h.s8.bf16 %v4921_v28  ;;  %v4837_v27 = vld [vmem:[%s11601_s7 + $0x138] sm:$0xff] }
 0x952   : > { %5248 = vmatpush1.bf16.msra.mxu0 %v5094_v48  ;;  %5330 = vmatpush1.bf16.msra.mxu1 %v5096_v50  ;;  %v5174_v48 = vunpack.c.h.s8.bf16 %v4918_v37  ;;  %v5176_v50 = vunpack.c.h.s8.bf16 %v4920_v41  ;;  %v4836_v37 = vld [vmem:[%s11601_s7 + $0x130] sm:$0xff] }
 0x953   : > { %5249 = vmatprep.subr.bf16.mxu0 %v5103_v53  ;;  %5331 = vmatprep.subr.bf16.mxu1 %v5105_v54  ;;  %v4931_v53 = vunpack.c.l.s8.bf16 %v4803_v47  ;;  %v4933_v54 = vunpack.c.l.s8.bf16 %v4805_v26 }
 0x956   : > { %5250 = vmatpush1.bf16.msra.mxu0 %v5102_v17  ;;  %5332 = vmatpush1.bf16.msra.mxu1 %v5104_v45  ;;  %v12126_v17 = vcombine.low %v12082_v9, %v12082_v9  ;;  %v4930_v45 = vunpack.c.l.s8.bf16 %v4802_v43  ;;  %v4938_v9 = vunpack.c.h.s8.bf16 %v4802_v43  ;;  %v4844_v43 = vld [vmem:[%s11601_s7 + $0x170] sm:$0xff] }
 0x957   : > { %5251 = vmatprep.subr.bf16.mxu0 %v5111_v58  ;;  %5333 = vmatprep.subr.bf16.mxu1 %v5113_v59  ;;  %v4932_v58 = vunpack.c.l.s8.bf16 %v4804_v57  ;;  %v4939_v59 = vunpack.c.h.s8.bf16 %v4803_v47  ;;  %v4845_v47 = vld [vmem:[%s11601_s7 + $0x178] sm:$0xff] }
 0x95a   : > { %5252 = vmatpush1.bf16.msra.mxu0 %v5110_v61  ;;  %5334 = vmatpush1.bf16.msra.mxu1 %v5112_v63  ;;  %v4813_v61 = vld [vmem:[%s11601_s7 + $0x78] sm:$0xff]  ;;  %v4940_v63 = vunpack.c.h.s8.bf16 %v4804_v57 }
 0x95b   : > { %5253 = vmatprep.subr.bf16.mxu0 %v5119_v51  ;;  %5335 = vmatprep.subr.bf16.mxu1 %v5121_v0  ;;  %v4947_v51 = vunpack.c.l.s8.bf16 %v4811_v60  ;;  %v4949_v0 = vunpack.c.l.s8.bf16 %v4813_v61 }
 0x95e   : > { %5254 = vmatpush1.bf16.msra.mxu0 %v5118_v40  ;;  %5336 = vmatpush1.bf16.msra.mxu1 %v5120_v21  ;;  %v4946_v40 = vunpack.c.l.s8.bf16 %v4810_v39  ;;  %v4948_v21 = vunpack.c.l.s8.bf16 %v4812_v1 }
 0x95f   : > { %5255 = vmatprep.subr.bf16.mxu0 %v5127_v2  ;;  %5337 = vmatprep.subr.bf16.mxu1 %v5129_v3  ;;  %v4955_v2 = vunpack.c.h.s8.bf16 %v4811_v60  ;;  %v4957_v3 = vunpack.c.h.s8.bf16 %v4813_v61  ;;  %v4853_v60 = vld [vmem:[%s11601_s7 + $0x1b8] sm:$0xff] }
 0x962   : > { %5256 = vmatpush1.bf16.msra.mxu0 %v5126_v5  ;;  %5338 = vmatpush1.bf16.msra.mxu1 %v5128_v32  ;;  %v4954_v5 = vunpack.c.h.s8.bf16 %v4810_v39  ;;  %v4956_v32 = vunpack.c.h.s8.bf16 %v4812_v1  ;;  %v4852_v39 = vld [vmem:[%s11601_s7 + $0x1b0] sm:$0xff] }
 0x963   : > { %5257 = vmatprep.subr.bf16.mxu0 %v5135_v7  ;;  %5339 = vmatprep.subr.bf16.mxu1 %v5137_v42  ;;  %v4965_v7 = vunpack.c.l.s8.bf16 %v4821_v4  ;;  %v4818_v42 = vld [vmem:[%s11601_s7 + $0xa0] sm:$0xff] }
 0x964   : > { %v4962_v8 = vunpack.c.l.s8.bf16 %v4818_v42  ;;  %v4970_v12 = vunpack.c.h.s8.bf16 %v4818_v42  ;;  %v4860_v42 = vld [vmem:[%s11601_s7 + $0x1f0] sm:$0xff] }
 0x966   : > { %5258 = vmatpush1.bf16.msra.mxu0 %v5134_v10  ;;  %5340 = vmatpush1.bf16.msra.mxu1 %v5136_v11  ;;  %v4964_v10 = vunpack.c.l.s8.bf16 %v4820_v29  ;;  %v4971_v11 = vunpack.c.h.s8.bf16 %v4819_v20 }
 0x967   : > { %5259 = vmatprep.subr.bf16.mxu0 %v5143_v49  ;;  %5341 = vmatprep.subr.bf16.mxu1 %v5145_v36  ;;  %v4973_v49 = vunpack.c.h.s8.bf16 %v4821_v4  ;;  %v4827_v36 = vld [vmem:[%s11601_s7 + $0xe8] sm:$0xff] }
 0x96a   : > { %5260 = vmatpush1.bf16.msra.mxu0 %v5142_v19  ;;  %5342 = vmatpush1.bf16.msra.mxu1 %v5144_v13  ;;  %v4972_v19 = vunpack.c.h.s8.bf16 %v4820_v29  ;;  %v4979_v13 = vunpack.c.l.s8.bf16 %v4827_v36 }
 0x96b   : > { %5261 = vmatprep.subr.bf16.mxu0 %v5151_v34  ;;  %5343 = vmatprep.subr.bf16.mxu1 %v5153_v14  ;;  %v4981_v34 = vunpack.c.l.s8.bf16 %v4829_v52  ;;  %v4826_v14 = vld [vmem:[%s11601_s7 + $0xe0] sm:$0xff] }
 0x96c   : > { %v4978_v16 = vunpack.c.l.s8.bf16 %v4826_v14  ;;  %v4986_v28 = vunpack.c.h.s8.bf16 %v4826_v14  ;;  %v4868_v14 = vld [vmem:[%s11601_s7 + $0x230] sm:$0xff] }
 0x96e   : > { %5262 = vmatpush1.bf16.msra.mxu0 %v5150_v22  ;;  %5344 = vmatpush1.bf16.msra.mxu1 %v5152_v23  ;;  %v4980_v22 = vunpack.c.l.s8.bf16 %v4828_v15  ;;  %v4987_v23 = vunpack.c.h.s8.bf16 %v4827_v36  ;;  %v4869_v36 = vld [vmem:[%s11601_s7 + $0x238] sm:$0xff] }
 0x96f   : > { %5263 = vmatprep.subr.bf16.mxu0 %v5159_v24  ;;  %5345 = vmatprep.subr.bf16.mxu1 %v5161_v25  ;;  %v4989_v24 = vunpack.c.h.s8.bf16 %v4829_v52  ;;  %v4835_v25 = vld [vmem:[%s11601_s7 + $0x128] sm:$0xff] }
 0x972   : > { %5264 = vmatpush1.bf16.msra.mxu0 %v5158_v33  ;;  %5346 = vmatpush1.bf16.msra.mxu1 %v5160_v30  ;;  %v4988_v33 = vunpack.c.h.s8.bf16 %v4828_v15  ;;  %v4995_v30 = vunpack.c.l.s8.bf16 %v4835_v25 }
 0x973   : > { %5265 = vmatprep.subr.bf16.mxu0 %v5167_v55  ;;  %5347 = vmatprep.subr.bf16.mxu1 %v5169_v35  ;;  %v4997_v55 = vunpack.c.l.s8.bf16 %v4837_v27  ;;  %v4834_v35 = vld [vmem:[%s11601_s7 + $0x120] sm:$0xff] }
 0x974   : > { %v4994_v41 = vunpack.c.l.s8.bf16 %v4834_v35  ;;  %v5002_v26 = vunpack.c.h.s8.bf16 %v4834_v35  ;;  %v4876_v35 = vld [vmem:[%s11601_s7 + $0x270] sm:$0xff] }
 0x976   : > { %5266 = vmatpush1.bf16.msra.mxu0 %v5166_v31  ;;  %5348 = vmatpush1.bf16.msra.mxu1 %v5168_v38  ;;  %v4996_v31 = vunpack.c.l.s8.bf16 %v4836_v37  ;;  %v5003_v38 = vunpack.c.h.s8.bf16 %v4835_v25  ;;  %v4877_v25 = vld [vmem:[%s11601_s7 + $0x278] sm:$0xff] }
 0x977   : > { %5267 = vmatprep.subr.bf16.mxu0 %v5175_v44  ;;  %5349 = vmatprep.subr.bf16.mxu1 %v5177_v46  ;;  %v5005_v44 = vunpack.c.h.s8.bf16 %v4837_v27  ;;  %v4843_v46 = vld [vmem:[%s11601_s7 + $0x168] sm:$0xff] }
 0x97a   : > { %5268 = vmatpush1.bf16.msra.mxu0 %v5174_v48  ;;  %5350 = vmatpush1.bf16.msra.mxu1 %v5176_v50  ;;  %v5004_v48 = vunpack.c.h.s8.bf16 %v4836_v37  ;;  %v5011_v50 = vunpack.c.l.s8.bf16 %v4843_v46 }
 0x97b   : > { %5360 = vmatprep.subr.bf16.mxu0 %v4931_v53  ;;  %5442 = vmatprep.subr.bf16.mxu1 %v4933_v54  ;;  %v5013_v53 = vunpack.c.l.s8.bf16 %v4845_v47  ;;  %v4842_v54 = vld [vmem:[%s11601_s7 + $0x160] sm:$0xff] }
 0x97c   : > { %v5010_v57 = vunpack.c.l.s8.bf16 %v4842_v54  ;;  %v5018_v61 = vunpack.c.h.s8.bf16 %v4842_v54 }
 0x97d   : > { %5270 = vmatmul.mubr.bf16.vlgmr.msra.gmra.mrb[0].mxu0 %v12126_v17  ;;  %5352 = vmatmul.mubr.bf16.vlgmr.msra.gmra.mrb[0].mxu1 %v12126_v17 }
 0x97e   : > { %5361 = vmatpush1.bf16.msra.mxu0 %v4930_v45  ;;  %5443 = vmatpush1.bf16.msra.mxu1 %v4932_v58  ;;  %v5012_v45 = vunpack.c.l.s8.bf16 %v4844_v43  ;;  %v5019_v58 = vunpack.c.h.s8.bf16 %v4843_v46 }
 0x97f   : > { %5362 = vmatprep.subr.bf16.mxu0 %v4939_v59  ;;  %5444 = vmatprep.subr.bf16.mxu1 %v4941_v56  ;;  %v5021_v59 = vunpack.c.h.s8.bf16 %v4845_v47  ;;  %v4851_v56 = vld [vmem:[%s11601_s7 + $0x1a8] sm:$0xff]  ;;  %v5084_v47 = vunpack.c.h.s8.bf16 %v4876_v35 }
 0x980   : > { %5392 = vmatprep.mubr.bf16.mxu0 %v12050_v18  ;;  %5474 = vmatprep.mubr.bf16.mxu1 %v12050_v18  ;;  %v4963_v18 = vunpack.c.l.s8.bf16 %v4819_v20  ;;  %v4861_v20 = vld [vmem:[%s11601_s7 + $0x1f8] sm:$0xff] }
 0x982   : > { %5363 = vmatpush1.bf16.msra.mxu0 %v4938_v9  ;;  %5445 = vmatpush1.bf16.msra.mxu1 %v4940_v63  ;;  %v5020_v9 = vunpack.c.h.s8.bf16 %v4844_v43  ;;  %v5027_v63 = vunpack.c.l.s8.bf16 %v4851_v56 }
 0x983   : > { %5364 = vmatprep.subr.bf16.mxu0 %v4947_v51  ;;  %5446 = vmatprep.subr.bf16.mxu1 %v4949_v0  ;;  %v5029_v51 = vunpack.c.l.s8.bf16 %v4853_v60  ;;  %v4850_v0 = vld [vmem:[%s11601_s7 + $0x1a0] sm:$0xff] }
 0x984   : > { %v5026_v1 = vunpack.c.l.s8.bf16 %v4850_v0  ;;  %v5034_v4 = vunpack.c.h.s8.bf16 %v4850_v0 }
 0x986   : > { %5365 = vmatpush1.bf16.msra.mxu0 %v4946_v40  ;;  %5447 = vmatpush1.bf16.msra.mxu1 %v4948_v21  ;;  %v5028_v40 = vunpack.c.l.s8.bf16 %v4852_v39  ;;  %v5035_v21 = vunpack.c.h.s8.bf16 %v4851_v56 }
 0x987   : > { %5366 = vmatprep.subr.bf16.mxu0 %v4955_v2  ;;  %5448 = vmatprep.subr.bf16.mxu1 %v4957_v3  ;;  %v5037_v2 = vunpack.c.h.s8.bf16 %v4853_v60  ;;  %v4859_v3 = vld [vmem:[%s11601_s7 + $0x1e8] sm:$0xff] }
 0x98a   : > { %5367 = vmatpush1.bf16.msra.mxu0 %v4954_v5  ;;  %5449 = vmatpush1.bf16.msra.mxu1 %v4956_v32  ;;  %v5036_v5 = vunpack.c.h.s8.bf16 %v4852_v39  ;;  %v5043_v32 = vunpack.c.l.s8.bf16 %v4859_v3 }
 0x98b   : > { %5368 = vmatprep.subr.bf16.mxu0 %v4963_v18  ;;  %5450 = vmatprep.subr.bf16.mxu1 %v4965_v7  ;;  %v5045_v18 = vunpack.c.l.s8.bf16 %v4861_v20  ;;  %v4858_v7 = vld [vmem:[%s11601_s7 + $0x1e0] sm:$0xff] }
 0x98c   : > { %v5042_v29 = vunpack.c.l.s8.bf16 %v4858_v7  ;;  %v5050_v52 = vunpack.c.h.s8.bf16 %v4858_v7 }
 0x98e   : > { %5369 = vmatpush1.bf16.msra.mxu0 %v4962_v8  ;;  %5451 = vmatpush1.bf16.msra.mxu1 %v4964_v10  ;;  %v5044_v8 = vunpack.c.l.s8.bf16 %v4860_v42  ;;  %v5051_v10 = vunpack.c.h.s8.bf16 %v4859_v3 }
 0x98f   : > { %5370 = vmatprep.subr.bf16.mxu0 %v4971_v11  ;;  %5452 = vmatprep.subr.bf16.mxu1 %v4973_v49  ;;  %v5053_v11 = vunpack.c.h.s8.bf16 %v4861_v20  ;;  %v4867_v49 = vld [vmem:[%s11601_s7 + $0x228] sm:$0xff] }
 0x992   : > { %5371 = vmatpush1.bf16.msra.mxu0 %v4970_v12  ;;  %5453 = vmatpush1.bf16.msra.mxu1 %v4972_v19  ;;  %v5052_v12 = vunpack.c.h.s8.bf16 %v4860_v42  ;;  %v5059_v19 = vunpack.c.l.s8.bf16 %v4867_v49 }
 0x993   : > { %5372 = vmatprep.subr.bf16.mxu0 %v4979_v13  ;;  %5454 = vmatprep.subr.bf16.mxu1 %v4981_v34  ;;  %v5061_v13 = vunpack.c.l.s8.bf16 %v4869_v36  ;;  %v4866_v34 = vld [vmem:[%s11601_s7 + $0x220] sm:$0xff] }
 0x994   : > { %v5058_v15 = vunpack.c.l.s8.bf16 %v4866_v34  ;;  %v5066_v27 = vunpack.c.h.s8.bf16 %v4866_v34 }
 0x996   : > { %5373 = vmatpush1.bf16.msra.mxu0 %v4978_v16  ;;  %5455 = vmatpush1.bf16.msra.mxu1 %v4980_v22  ;;  %v5060_v16 = vunpack.c.l.s8.bf16 %v4868_v14  ;;  %v5067_v22 = vunpack.c.h.s8.bf16 %v4867_v49 }
 0x997   : > { %5374 = vmatprep.subr.bf16.mxu0 %v4987_v23  ;;  %5456 = vmatprep.subr.bf16.mxu1 %v4989_v24  ;;  %v5069_v23 = vunpack.c.h.s8.bf16 %v4869_v36  ;;  %v4875_v24 = vld [vmem:[%s11601_s7 + $0x268] sm:$0xff] }
 0x99a   : > { %5375 = vmatpush1.bf16.msra.mxu0 %v4986_v28  ;;  %5457 = vmatpush1.bf16.msra.mxu1 %v4988_v33  ;;  %v5068_v28 = vunpack.c.h.s8.bf16 %v4868_v14  ;;  %v5075_v33 = vunpack.c.l.s8.bf16 %v4875_v24 }
 0x99b   : > { %5376 = vmatprep.subr.bf16.mxu0 %v4995_v30  ;;  %5458 = vmatprep.subr.bf16.mxu1 %v4997_v55  ;;  %v5077_v30 = vunpack.c.l.s8.bf16 %v4877_v25  ;;  %v4874_v55 = vld [vmem:[%s11601_s7 + $0x260] sm:$0xff] }
 0x99c   : > { %v5074_v37 = vunpack.c.l.s8.bf16 %v4874_v55  ;;  %v5082_v46 = vunpack.c.h.s8.bf16 %v4874_v55 }
 0x99e   : > { %5377 = vmatpush1.bf16.msra.mxu0 %v4994_v41  ;;  %5459 = vmatpush1.bf16.msra.mxu1 %v4996_v31  ;;  %v5083_v41 = vunpack.c.h.s8.bf16 %v4875_v24  ;;  %v5085_v31 = vunpack.c.h.s8.bf16 %v4877_v25 }
 0x99f   : > { %5378 = vmatprep.subr.bf16.mxu0 %v5003_v38  ;;  %5460 = vmatprep.subr.bf16.mxu1 %v5005_v44  ;;  %v4883_v38 = vld [vmem:[%s11601_s7 + $0x2a8] sm:$0xff]  ;;  %v4885_v44 = vld [vmem:[%s11601_s7 + $0x2b8] sm:$0xff] }
 0x9a0   : > { %v5099_v43 = vunpack.c.h.s8.bf16 %v4883_v38 }
 0x9a2   : > { %5379 = vmatpush1.bf16.msra.mxu0 %v5002_v26  ;;  %5461 = vmatpush1.bf16.msra.mxu1 %v5004_v48  ;;  %v5093_v26 = vunpack.c.l.s8.bf16 %v4885_v44  ;;  %v4882_v48 = vld [vmem:[%s11601_s7 + $0x2a0] sm:$0xff] }
 0x9a3   : > { %5380 = vmatprep.subr.bf16.mxu0 %v5011_v50  ;;  %5462 = vmatprep.subr.bf16.mxu1 %v5013_v53  ;;  %v4884_v50 = vld [vmem:[%s11601_s7 + $0x2b0] sm:$0xff]  ;;  %v5090_v53 = vunpack.c.l.s8.bf16 %v4882_v48 }
 0x9a4   : > { %v5092_v54 = vunpack.c.l.s8.bf16 %v4884_v50  ;;  %v5100_v56 = vunpack.c.h.s8.bf16 %v4884_v50 }
 0x9a6   : > { %5381 = vmatpush1.bf16.msra.mxu0 %v5010_v57  ;;  %5463 = vmatpush1.bf16.msra.mxu1 %v5012_v45  ;;  %v5101_v57 = vunpack.c.h.s8.bf16 %v4885_v44  ;;  %v4891_v45 = vld [vmem:[%s11601_s7 + $0x2e8] sm:$0xff] }
 0x9a7   : > { %5382 = vmatprep.subr.bf16.mxu0 %v5019_v58  ;;  %5464 = vmatprep.subr.bf16.mxu1 %v5021_v59  ;;  %v4893_v58 = vld [vmem:[%s11601_s7 + $0x2f8] sm:$0xff]  ;;  %v5098_v59 = vunpack.c.h.s8.bf16 %v4882_v48  ;;  %v5107_v60 = vunpack.c.l.s8.bf16 %v4891_v45  ;;  %v5115_v39 = vunpack.c.h.s8.bf16 %v4891_v45 }
 0x9aa   : > { %5383 = vmatpush1.bf16.msra.mxu0 %v5018_v61  ;;  %5465 = vmatpush1.bf16.msra.mxu1 %v5020_v9  ;;  %v5109_v61 = vunpack.c.l.s8.bf16 %v4893_v58  ;;  %v4890_v9 = vld [vmem:[%s11601_s7 + $0x2e0] sm:$0xff] }
 0x9ab   : > { %5384 = vmatprep.subr.bf16.mxu0 %v5027_v63  ;;  %5466 = vmatprep.subr.bf16.mxu1 %v5029_v51  ;;  %v4892_v63 = vld [vmem:[%s11601_s7 + $0x2f0] sm:$0xff]  ;;  %v5106_v51 = vunpack.c.l.s8.bf16 %v4890_v9 }
 0x9ac   : > { %v5108_v0 = vunpack.c.l.s8.bf16 %v4892_v63  ;;  %v5116_v3 = vunpack.c.h.s8.bf16 %v4892_v63 }
 0x9ae   : > { %5385 = vmatpush1.bf16.msra.mxu0 %v5026_v1  ;;  %5467 = vmatpush1.bf16.msra.mxu1 %v5028_v40  ;;  %v5117_v1 = vunpack.c.h.s8.bf16 %v4893_v58  ;;  %v4899_v40 = vld [vmem:[%s11601_s7 + $0x328] sm:$0xff] }
 0x9af   : > { %5386 = vmatprep.subr.bf16.mxu0 %v5035_v21  ;;  %5468 = vmatprep.subr.bf16.mxu1 %v5037_v2  ;;  %v4901_v21 = vld [vmem:[%s11601_s7 + $0x338] sm:$0xff]  ;;  %v5114_v2 = vunpack.c.h.s8.bf16 %v4890_v9  ;;  %v5123_v20 = vunpack.c.l.s8.bf16 %v4899_v40  ;;  %v5131_v42 = vunpack.c.h.s8.bf16 %v4899_v40 }
 0x9b2   : > { %5387 = vmatpush1.bf16.msra.mxu0 %v5034_v4  ;;  %5469 = vmatpush1.bf16.msra.mxu1 %v5036_v5  ;;  %v5125_v4 = vunpack.c.l.s8.bf16 %v4901_v21  ;;  %v4898_v5 = vld [vmem:[%s11601_s7 + $0x320] sm:$0xff] }
 0x9b3   : > { %5388 = vmatprep.subr.bf16.mxu0 %v5043_v32  ;;  %5470 = vmatprep.subr.bf16.mxu1 %v5045_v18  ;;  %v4900_v32 = vld [vmem:[%s11601_s7 + $0x330] sm:$0xff]  ;;  %v5122_v18 = vunpack.c.l.s8.bf16 %v4898_v5 }
 0x9b4   : > { %v5124_v7 = vunpack.c.l.s8.bf16 %v4900_v32  ;;  %v5132_v49 = vunpack.c.h.s8.bf16 %v4900_v32 }
 0x9b6   : > { %5389 = vmatpush1.bf16.msra.mxu0 %v5042_v29  ;;  %5471 = vmatpush1.bf16.msra.mxu1 %v5044_v8  ;;  %v5133_v29 = vunpack.c.h.s8.bf16 %v4901_v21  ;;  %v4907_v8 = vld [vmem:[%s11601_s7 + $0x368] sm:$0xff] }
 0x9b7   : > { %5390 = vmatprep.subr.bf16.mxu0 %v5051_v10  ;;  %5472 = vmatprep.subr.bf16.mxu1 %v5053_v11  ;;  %v4909_v10 = vld [vmem:[%s11601_s7 + $0x378] sm:$0xff]  ;;  %v5130_v11 = vunpack.c.h.s8.bf16 %v4898_v5  ;;  %v5139_v36 = vunpack.c.l.s8.bf16 %v4907_v8  ;;  %v5147_v14 = vunpack.c.h.s8.bf16 %v4907_v8 }
 0x9ba   : > { %5391 = vmatpush1.bf16.msra.mxu0 %v5050_v52  ;;  %5473 = vmatpush1.bf16.msra.mxu1 %v5052_v12  ;;  %v5141_v52 = vunpack.c.l.s8.bf16 %v4909_v10  ;;  %v4906_v12 = vld [vmem:[%s11601_s7 + $0x360] sm:$0xff] }
 0x9bb   : > { %5401 = vmatprep.subr.bf16.mxu0 %v5059_v19  ;;  %5483 = vmatprep.subr.bf16.mxu1 %v5061_v13  ;;  %v4908_v19 = vld [vmem:[%s11601_s7 + $0x370] sm:$0xff]  ;;  %v5138_v13 = vunpack.c.l.s8.bf16 %v4906_v12 }
 0x9bc   : > { %v5140_v34 = vunpack.c.l.s8.bf16 %v4908_v19  ;;  %v5148_v24 = vunpack.c.h.s8.bf16 %v4908_v19 }
 0x9bd   : > { %5393 = vmatmul.mubr.bf16.vlgmr.msra.gmra.mrb[4].mxu0 %v12080_v6  ;;  %5475 = vmatmul.mubr.bf16.vlgmr.msra.gmra.mrb[4].mxu1 %v12080_v6  ;;  %v5076_v6 = vunpack.c.l.s8.bf16 %v4876_v35 }
 0x9be   : > { %5402 = vmatpush1.bf16.msra.mxu0 %v5058_v15  ;;  %5484 = vmatpush1.bf16.msra.mxu1 %v5060_v16  ;;  %v5149_v15 = vunpack.c.h.s8.bf16 %v4909_v10  ;;  %v4915_v16 = vld [vmem:[%s11601_s7 + $0x3a8] sm:$0xff] }
 0x9bf   : > { %5403 = vmatprep.subr.bf16.mxu0 %v5067_v22  ;;  %5485 = vmatprep.subr.bf16.mxu1 %v5069_v23  ;;  %v4917_v22 = vld [vmem:[%s11601_s7 + $0x3b8] sm:$0xff]  ;;  %v5146_v23 = vunpack.c.h.s8.bf16 %v4906_v12  ;;  %v5155_v25 = vunpack.c.l.s8.bf16 %v4915_v16  ;;  %v5163_v35 = vunpack.c.h.s8.bf16 %v4915_v16 }
 0x9c0   : > { %5433 = vmatprep.mubr.bf16.mxu0 %v12088_v62  ;;  %5515 = vmatprep.mubr.bf16.mxu1 %v12088_v62  ;;  %v5091_v62 = vunpack.c.l.s8.bf16 %v4883_v38 }
 0x9c2   : > { %5404 = vmatpush1.bf16.msra.mxu0 %v5066_v27  ;;  %5486 = vmatpush1.bf16.msra.mxu1 %v5068_v28  ;;  %v5157_v27 = vunpack.c.l.s8.bf16 %v4917_v22  ;;  %v4914_v28 = vld [vmem:[%s11601_s7 + $0x3a0] sm:$0xff] }
 0x9c3   : > { %5405 = vmatprep.subr.bf16.mxu0 %v5075_v33  ;;  %5487 = vmatprep.subr.bf16.mxu1 %v5077_v30  ;;  %v4916_v33 = vld [vmem:[%s11601_s7 + $0x3b0] sm:$0xff]  ;;  %v5154_v30 = vunpack.c.l.s8.bf16 %v4914_v28 }
 0x9c4   : > { %v5156_v55 = vunpack.c.l.s8.bf16 %v4916_v33  ;;  %v5164_v38 = vunpack.c.h.s8.bf16 %v4916_v33  ;;  %v4793_v33 = vld [vmem:[#allocation3 + $0x28] sm:$0xff] }
 0x9c6   : > { %5406 = vmatpush1.bf16.msra.mxu0 %v5074_v37  ;;  %5488 = vmatpush1.bf16.msra.mxu1 %v5076_v6  ;;  %v5165_v37 = vunpack.c.h.s8.bf16 %v4917_v22  ;;  %v4923_v6 = vld [vmem:[%s11601_s7 + $0x3e8] sm:$0xff]  ;;  %v4792_v22 = vld [vmem:[#allocation3 + $0x20] sm:$0xff] }
 0x9c7   : > { %5407 = vmatprep.subr.bf16.mxu0 %v5083_v41  ;;  %5489 = vmatprep.subr.bf16.mxu1 %v5085_v31  ;;  %v4925_v41 = vld [vmem:[%s11601_s7 + $0x3f8] sm:$0xff]  ;;  %v5162_v31 = vunpack.c.h.s8.bf16 %v4914_v28  ;;  %v5171_v44 = vunpack.c.l.s8.bf16 %v4923_v6  ;;  %v5179_v50 = vunpack.c.h.s8.bf16 %v4923_v6 }
 0x9ca   : > { %5408 = vmatpush1.bf16.msra.mxu0 %v5082_v46  ;;  %5490 = vmatpush1.bf16.msra.mxu1 %v5084_v47  ;;  %v5173_v46 = vunpack.c.l.s8.bf16 %v4925_v41  ;;  %v4922_v47 = vld [vmem:[%s11601_s7 + $0x3e0] sm:$0xff] }
 0x9cb   : > { %5409 = vmatprep.subr.bf16.mxu0 %v5091_v62  ;;  %5491 = vmatprep.subr.bf16.mxu1 %v5093_v26  ;;  %v4924_v62 = vld [vmem:[%s11601_s7 + $0x3f0] sm:$0xff]  ;;  %v5170_v26 = vunpack.c.l.s8.bf16 %v4922_v47  ;;  %s12511_s7 = sld [smem:[#allocation71_spill]] (!%p8802_p2) }
 0x9cc   : > { %v5172_v48 = vunpack.c.l.s8.bf16 %v4924_v62 }
 0x9ce   : > { %5410 = vmatpush1.bf16.msra.mxu0 %v5090_v53  ;;  %5492 = vmatpush1.bf16.msra.mxu1 %v5092_v54  ;;  %v5181_v53 = vunpack.c.h.s8.bf16 %v4925_v41  ;;  %v5178_v54 = vunpack.c.h.s8.bf16 %v4922_v47 }
 0x9cf   : > { %5411 = vmatprep.subr.bf16.mxu0 %v5099_v43  ;;  %5493 = vmatprep.subr.bf16.mxu1 %v5101_v57  ;;  %v5180_v43 = vunpack.c.h.s8.bf16 %v4924_v62  ;;  %v5526_v57 = vlaneseq }
 0x9d1   : > { %v12198_v45 = vshrl.u32 %v5526_v57, 7  ;;  %v9714_v57 = vld [vmem:[#allocation20 + $0x2c] ss:$16 sps:$4 sm:$0xff] (!%p8802_p2)  }
 0x9d2   : > { %5412 = vmatpush1.bf16.msra.mxu0 %v5098_v59  ;;  %5494 = vmatpush1.bf16.msra.mxu1 %v5100_v56  ;;  %v5524_v56 = vld [vmem:[%s11607_s22] sm:$0xff] }
 0x9d3   : > { %5413 = vmatprep.subr.bf16.mxu0 %v5107_v60  ;;  %5495 = vmatprep.subr.bf16.mxu1 %v5109_v61  ;;  %v12201_v58 = vsub.s32 0, %v12198_v45  ;;  %v12204_v59 = vsub.s32 2, %v12198_v45  ;;  %v12208_v60 = vsub.s32 1, %v12198_v45  ;;  %v12211_v61 = vsub.s32 3, %v12198_v45 }
 0x9d4   : > { %v5552_v12 = vsub.s32 6, %v12198_v45  ;;  %v5548_v19 = vsub.s32 5, %v12198_v45 }
 0x9d5   : > { %v5529_v9 = vrot.slane %v5524_v56, %v12201_v58  ;;  %v5533_v63 = vrot.slane %v5524_v56, %v12208_v60 }
 0x9d6   : > { %5414 = vmatpush1.bf16.msra.mxu0 %v5106_v51  ;;  %5496 = vmatpush1.bf16.msra.mxu1 %v5108_v0  ;;  %v5541_v51 = vrot.slane %v5524_v56, %v12211_v61  ;;  %v4788_v0 = vld [vmem:[#allocation3] sm:$0xff] }
 0x9d7   : > { %5415 = vmatprep.subr.bf16.mxu0 %v5115_v39  ;;  %5497 = vmatprep.subr.bf16.mxu1 %v5117_v1  ;;  %v4790_v1 = vld [vmem:[#allocation3 + $0x10] sm:$0xff] }
 0x9da   : > { %5416 = vmatpush1.bf16.msra.mxu0 %v5114_v2  ;;  %5498 = vmatpush1.bf16.msra.mxu1 %v5116_v3  ;;  %v4789_v3 = vld [vmem:[#allocation3 + $0x8] sm:$0xff] }
 0x9db   : > { %5417 = vmatprep.subr.bf16.mxu0 %v5123_v20  ;;  %5499 = vmatprep.subr.bf16.mxu1 %v5125_v4  ;;  %v4791_v4 = vld [vmem:[#allocation3 + $0x18] sm:$0xff] }
 0x9de   : > { %5418 = vmatpush1.bf16.msra.mxu0 %v5122_v18  ;;  %5500 = vmatpush1.bf16.msra.mxu1 %v5124_v7 }
 0x9df   : > { %5419 = vmatprep.subr.bf16.mxu0 %v5131_v42  ;;  %5501 = vmatprep.subr.bf16.mxu1 %v5133_v29 }
 0x9e2   : > { %5420 = vmatpush1.bf16.msra.mxu0 %v5130_v11  ;;  %5502 = vmatpush1.bf16.msra.mxu1 %v5132_v49 }
 0x9e3   : > { %5421 = vmatprep.subr.bf16.mxu0 %v5139_v36  ;;  %5503 = vmatprep.subr.bf16.mxu1 %v5141_v52  ;;  %v5544_v52 = vsub.s32 4, %v12198_v45 }
 0x9e6   : > { %5422 = vmatpush1.bf16.msra.mxu0 %v5138_v13  ;;  %5504 = vmatpush1.bf16.msra.mxu1 %v5140_v34  ;;  %v5556_v13 = vsub.s32 7, %v12198_v45  ;;  %v5545_v34 = vrot.slane %v5524_v56, %v5544_v52  ;;  %v10081_v45 = vld [vmem:[#allocation20 + $0x7c8] ss:$16 sps:$4 sm:$0xff] (!%p8802_p2)  }
 0x9e7   : > { %5423 = vmatprep.subr.bf16.mxu0 %v5147_v14  ;;  %5505 = vmatprep.subr.bf16.mxu1 %v5149_v15  ;;  %v5553_v14 = vrot.slane %v5524_v56, %v5552_v12  ;;  %v5549_v15 = vrot.slane %v5524_v56, %v5548_v19 }
 0x9e8   : > { %v5557_v16 = vrot.slane %v5524_v56, %v5556_v13 }
 0x9ea   : > { %5424 = vmatpush1.bf16.msra.mxu0 %v5146_v23  ;;  %5506 = vmatpush1.bf16.msra.mxu1 %v5148_v24  ;;  %v4794_v24 = vld [vmem:[#allocation3 + $0x30] sm:$0xff] }
 0x9eb   : > { %5425 = vmatprep.subr.bf16.mxu0 %v5155_v25  ;;  %5507 = vmatprep.subr.bf16.mxu1 %v5157_v27 }
 0x9ee   : > { %5426 = vmatpush1.bf16.msra.mxu0 %v5154_v30  ;;  %5508 = vmatpush1.bf16.msra.mxu1 %v5156_v55  ;;  %v4795_v55 = vld [vmem:[#allocation3 + $0x38] sm:$0xff] }
 0x9ef   : > { %5427 = vmatprep.subr.bf16.mxu0 %v5163_v35  ;;  %5509 = vmatprep.subr.bf16.mxu1 %v5165_v37 }
 0x9f2   : > { %5428 = vmatpush1.bf16.msra.mxu0 %v5162_v31  ;;  %5510 = vmatpush1.bf16.msra.mxu1 %v5164_v38 }
 0x9f3   : > { %5429 = vmatprep.subr.bf16.mxu0 %v5171_v44  ;;  %5511 = vmatprep.subr.bf16.mxu1 %v5173_v46 }
 0x9f6   : > { %5430 = vmatpush1.bf16.msra.mxu0 %v5170_v26  ;;  %5512 = vmatpush1.bf16.msra.mxu1 %v5172_v48  ;;  %v9706_v48 = vld [vmem:[#allocation20 + $0x4] ss:$16 sps:$4 sm:$0xff] (!%p8802_p2)  }
 0x9f7   : > { %5431 = vmatprep.subr.bf16.mxu0 %v5179_v50  ;;  %5513 = vmatprep.subr.bf16.mxu1 %v5181_v53  ;;  %v9708_v50 = vld [vmem:[#allocation20 + $0xc] ss:$16 sps:$4 sm:$0xff] (!%p8802_p2)   ;;  %v9710_v53 = vld [vmem:[#allocation20] ss:$16 sps:$4 sm:$0xff] (!%p8802_p2)  }
 0x9fa   : > { %5432 = vmatpush1.bf16.msra.mxu0 %v5178_v54  ;;  %5514 = vmatpush1.bf16.msra.mxu1 %v5180_v43  ;;  %v9711_v54 = vld [vmem:[#allocation20 + $0x8] ss:$16 sps:$4 sm:$0xff] (!%p8802_p2)   ;;  %v9712_v43 = vld [vmem:[#allocation20 + $0x24] ss:$16 sps:$4 sm:$0xff] (!%p8802_p2)  }
 0x9fb   : > { %7242 = vmatprep.subr.bf16.mxu0 (!%p8802_p2), %v9706_v48  ;;  %7406 = vmatprep.subr.bf16.mxu1 (!%p8802_p2), %v9708_v50  ;;  %v9783_v48 = vld [vmem:[#allocation20 + $0x188] ss:$16 sps:$4 sm:$0xff] (!%p8802_p2)   ;;  %v9784_v50 = vld [vmem:[#allocation20 + $0x1a4] ss:$16 sps:$4 sm:$0xff] (!%p8802_p2)  }
 0x9fd   : > { %5434 = vmatmul.mubr.bf16.vlgmr.msra.gmra.mrb[4].mxu0 %v12126_v17  ;;  %5516 = vmatmul.mubr.bf16.vlgmr.msra.gmra.mrb[4].mxu1 %v12126_v17  ;;  %v5537_v17 = vrot.slane %v5524_v56, %v12204_v59  ;;  %v9716_v56 = vld [vmem:[#allocation20 + $0x20] ss:$16 sps:$4 sm:$0xff] (!%p8802_p2)  }
 0x9fe   : > { %7243 = vmatpush1.bf16.msra.mxu0 (!%p8802_p2), %v9710_v53  ;;  %7407 = vmatpush1.bf16.msra.mxu1 (!%p8802_p2), %v9711_v54 }
 0x9ff   : > { %7244 = vmatprep.subr.bf16.mxu0 (!%p8802_p2), %v9712_v43  ;;  %7408 = vmatprep.subr.bf16.mxu1 (!%p8802_p2), %v9714_v57  ;;  %v9786_v43 = vld [vmem:[#allocation20 + $0x1ac] ss:$16 sps:$4 sm:$0xff] (!%p8802_p2)  }
 0xa02   : > { %7245 = vmatpush1.bf16.msra.mxu0 (!%p8802_p2), %v9716_v56 }
 0xa50   : > { %v5271_v39 = vpop.f32.mrb[0].mxu0  ;;  %v5353_v40 = vpop.f32.mrb[0].mxu1 }
 0xa51   : > { %v5566_v21 = vmul.f32 %v5529_v9, %v5271_v39  ;;  %v5568_v2 = vmul.f32 %v5537_v17, %v5353_v40  ;;  %v5273_v20 = vpop.f32.mrb[1].mxu0  ;;  %v5355_v5 = vpop.f32.mrb[1].mxu1  ;;  %v9717_v9 = vld [vmem:[#allocation20 + $0x28] ss:$16 sps:$4 sm:$0xff] (!%p8802_p2)   ;;  %v9718_v17 = vld [vmem:[#allocation20 + $0x44] ss:$16 sps:$4 sm:$0xff] (!%p8802_p2)  }
 0xa52   : > { %v5567_v32 = vmul.f32 %v5533_v63, %v5273_v20  ;;  %v5569_v18 = vmul.f32 %v5541_v51, %v5355_v5  ;;  %v5275_v7 = vpop.f32.mrb[2].mxu0  ;;  %v5357_v42 = vpop.f32.mrb[2].mxu1  ;;  %v9720_v63 = vld [vmem:[#allocation20 + $0x4c] ss:$16 sps:$4 sm:$0xff] (!%p8802_p2)   ;;  %v9722_v51 = vld [vmem:[#allocation20 + $0x40] ss:$16 sps:$4 sm:$0xff] (!%p8802_p2)   ;;  %7409 = vmatpush1.bf16.msra.mxu1 (!%p8802_p2), %v9717_v9  ;;  %7246 = vmatprep.subr.bf16.mxu0 (!%p8802_p2), %v9718_v17 }
 0xa53   : > { %v5574_v29 = vadd.f32 %v5566_v21, %v4788_v0  ;;  %v5576_v8 = vadd.f32 %v5568_v2, %v4790_v1  ;;  %v5276_v10 = vpop.f32.mrb[3].mxu0  ;;  %v5358_v11 = vpop.f32.mrb[3].mxu1  ;;  %v9723_v0 = vld [vmem:[#allocation20 + $0x48] ss:$16 sps:$4 sm:$0xff] (!%p8802_p2)   ;;  %v9724_v39 = vld [vmem:[#allocation20 + $0x64] ss:$16 sps:$4 sm:$0xff] (!%p8802_p2)   ;;  %7410 = vmatprep.subr.bf16.mxu1 (!%p8802_p2), %v9720_v63  ;;  %7247 = vmatpush1.bf16.msra.mxu0 (!%p8802_p2), %v9722_v51 }
 0xa54   : > { %v5575_v49 = vadd.f32 %v5567_v32, %v4789_v3  ;;  %v5577_v36 = vadd.f32 %v5569_v18, %v4791_v4  ;;  %v9726_v1 = vld [vmem:[#allocation20 + $0x6c] ss:$16 sps:$4 sm:$0xff] (!%p8802_p2)   ;;  %v9728_v40 = vld [vmem:[#allocation20 + $0x60] ss:$16 sps:$4 sm:$0xff] (!%p8802_p2)   ;;  %v9729_v21 = vld [vmem:[#allocation20 + $0x68] ss:$16 sps:$4 sm:$0xff] (!%p8802_p2)   ;;  %7248 = vmatprep.subr.bf16.mxu0 (!%p8802_p2), %v9724_v39 }
 0xa55   : > { %5582 = vst [vmem:[#allocation3] sm:$0xff] %v5574_v29  ;;  %5584 = vst [vmem:[#allocation3 + $0x10] sm:$0xff] %v5576_v8  ;;  %v9730_v2 = vld [vmem:[#allocation20 + $0x84] ss:$16 sps:$4 sm:$0xff] (!%p8802_p2)   ;;  %v9732_v3 = vld [vmem:[#allocation20 + $0x8c] ss:$16 sps:$4 sm:$0xff] (!%p8802_p2)  }
 0xa56   : > { %5583 = vst [vmem:[#allocation3 + $0x8] sm:$0xff] %v5575_v49  ;;  %5585 = vst [vmem:[#allocation3 + $0x18] sm:$0xff] %v5577_v36  ;;  %7411 = vmatpush1.bf16.msra.mxu1 (!%p8802_p2), %v9723_v0  ;;  %v9734_v20 = vld [vmem:[#allocation20 + $0x80] ss:$16 sps:$4 sm:$0xff] (!%p8802_p2)   ;;  %v9735_v4 = vld [vmem:[#allocation20 + $0x88] ss:$16 sps:$4 sm:$0xff] (!%p8802_p2)  }
 0xa57   : > { %7412 = vmatprep.subr.bf16.mxu1 (!%p8802_p2), %v9726_v1  ;;  %7249 = vmatpush1.bf16.msra.mxu0 (!%p8802_p2), %v9728_v40  ;;  %v9736_v5 = vld [vmem:[#allocation20 + $0xa4] ss:$16 sps:$4 sm:$0xff] (!%p8802_p2)   ;;  %v9738_v32 = vld [vmem:[#allocation20 + $0xac] ss:$16 sps:$4 sm:$0xff] (!%p8802_p2)   ;;  %v9740_v18 = vld [vmem:[#allocation20 + $0xa0] ss:$16 sps:$4 sm:$0xff] (!%p8802_p2)  }
 0xa58   : > { %7250 = vmatprep.subr.bf16.mxu0 (!%p8802_p2), %v9730_v2  ;;  %v9741_v7 = vld [vmem:[#allocation20 + $0xa8] ss:$16 sps:$4 sm:$0xff] (!%p8802_p2)   ;;  %v9742_v42 = vld [vmem:[#allocation20 + $0xc4] ss:$16 sps:$4 sm:$0xff] (!%p8802_p2)   ;;  %v9744_v29 = vld [vmem:[#allocation20 + $0xcc] ss:$16 sps:$4 sm:$0xff] (!%p8802_p2)  }
 0xa59   : > { %v9746_v8 = vld [vmem:[#allocation20 + $0xc0] ss:$16 sps:$4 sm:$0xff] (!%p8802_p2)   ;;  %v9747_v10 = vld [vmem:[#allocation20 + $0xc8] ss:$16 sps:$4 sm:$0xff] (!%p8802_p2)   ;;  %v9748_v11 = vld [vmem:[#allocation20 + $0xe4] ss:$16 sps:$4 sm:$0xff] (!%p8802_p2)  }
 0xa5a   : > { %7413 = vmatpush1.bf16.msra.mxu1 (!%p8802_p2), %v9729_v21  ;;  %v9750_v49 = vld [vmem:[#allocation20 + $0xec] ss:$16 sps:$4 sm:$0xff] (!%p8802_p2)   ;;  %v9752_v36 = vld [vmem:[#allocation20 + $0xe0] ss:$16 sps:$4 sm:$0xff] (!%p8802_p2)   ;;  %v9789_v63 = vld [vmem:[#allocation20 + $0x1a8] ss:$16 sps:$4 sm:$0xff] (!%p8802_p2)  }
 0xa5b   : > { %7414 = vmatprep.subr.bf16.mxu1 (!%p8802_p2), %v9732_v3  ;;  %7251 = vmatpush1.bf16.msra.mxu0 (!%p8802_p2), %v9734_v20  ;;  %v9788_v9 = vld [vmem:[#allocation20 + $0x1a0] ss:$16 sps:$4 sm:$0xff] (!%p8802_p2)   ;;  %v9790_v0 = vld [vmem:[#allocation20 + $0x1c4] ss:$16 sps:$4 sm:$0xff] (!%p8802_p2)   ;;  %v9792_v39 = vld [vmem:[#allocation20 + $0x1cc] ss:$16 sps:$4 sm:$0xff] (!%p8802_p2)  }
 0xa5c   : > { %7252 = vmatprep.subr.bf16.mxu0 (!%p8802_p2), %v9736_v5  ;;  %v5594_v57 = vld [vmem:[#allocation3] sm:$0xff] (!%p8802_p2)  ;;  %v9794_v1 = vld [vmem:[#allocation20 + $0x1c0] ss:$16 sps:$4 sm:$0xff] (!%p8802_p2)   ;;  %v9798_v3 = vld [vmem:[#allocation20 + $0x1ec] ss:$16 sps:$4 sm:$0xff] (!%p8802_p2)  }
 0xa5d   : > { %v9795_v40 = vld [vmem:[#allocation20 + $0x1c8] ss:$16 sps:$4 sm:$0xff] (!%p8802_p2)   ;;  %v9796_v2 = vld [vmem:[#allocation20 + $0x1e4] ss:$16 sps:$4 sm:$0xff] (!%p8802_p2)   ;;  %v9800_v20 = vld [vmem:[#allocation20 + $0x1e0] ss:$16 sps:$4 sm:$0xff] (!%p8802_p2)  }
 0xa5e   : > { %7415 = vmatpush1.bf16.msra.mxu1 (!%p8802_p2), %v9735_v4  ;;  %v9801_v4 = vld [vmem:[#allocation20 + $0x1e8] ss:$16 sps:$4 sm:$0xff] (!%p8802_p2)  }
 0xa5f   : > { %7416 = vmatprep.subr.bf16.mxu1 (!%p8802_p2), %v9738_v32  ;;  %7253 = vmatpush1.bf16.msra.mxu0 (!%p8802_p2), %v9740_v18  ;;  %v9804_v32 = vld [vmem:[#allocation20 + $0x204] ss:$16 sps:$4 sm:$0xff] (!%p8802_p2)   ;;  %v9807_v18 = vld [vmem:[#allocation20 + $0x20c] ss:$16 sps:$4 sm:$0xff] (!%p8802_p2)  }
 0xa60   : > { %7254 = vmatprep.subr.bf16.mxu0 (!%p8802_p2), %v9742_v42 }
 0xa62   : > { %7417 = vmatpush1.bf16.msra.mxu1 (!%p8802_p2), %v9741_v7  ;;  %v9802_v7 = vld [vmem:[#allocation20 + $0x200] ss:$16 sps:$4 sm:$0xff] (!%p8802_p2)  }
 0xa63   : > { %7418 = vmatprep.subr.bf16.mxu1 (!%p8802_p2), %v9744_v29  ;;  %7255 = vmatpush1.bf16.msra.mxu0 (!%p8802_p2), %v9746_v8  ;;  %v9805_v29 = vld [vmem:[#allocation20 + $0x208] ss:$16 sps:$4 sm:$0xff] (!%p8802_p2)   ;;  %v9810_v8 = vld [vmem:[#allocation20 + $0x224] ss:$16 sps:$4 sm:$0xff] (!%p8802_p2)  }
 0xa64   : > { %7256 = vmatprep.subr.bf16.mxu0 (!%p8802_p2), %v9748_v11  ;;  %v9808_v11 = vld [vmem:[#allocation20 + $0x220] ss:$16 sps:$4 sm:$0xff] (!%p8802_p2)  }
 0xa66   : > { %7419 = vmatpush1.bf16.msra.mxu1 (!%p8802_p2), %v9747_v10  ;;  %v9813_v10 = vld [vmem:[#allocation20 + $0x22c] ss:$16 sps:$4 sm:$0xff] (!%p8802_p2)  }
 0xa67   : > { %7420 = vmatprep.subr.bf16.mxu1 (!%p8802_p2), %v9750_v49  ;;  %7257 = vmatpush1.bf16.msra.mxu0 (!%p8802_p2), %v9752_v36  ;;  %v9811_v49 = vld [vmem:[#allocation20 + $0x228] ss:$16 sps:$4 sm:$0xff] (!%p8802_p2)   ;;  %v9816_v36 = vld [vmem:[#allocation20 + $0x244] ss:$16 sps:$4 sm:$0xff] (!%p8802_p2)  }
 0xad0   : > { %v5435_v23 = vpop.f32.mrb[4].mxu0  ;;  %v5517_v25 = vpop.f32.mrb[4].mxu1  ;;  %5593 = sbr.rel (%p8802_p2) target bundleno = 4156 (0x103c), region = 188 }
 0xad1   : > { %v5570_v27 = vmul.f32 %v5545_v34, %v5435_v23  ;;  %v5572_v28 = vmul.f32 %v5553_v14, %v5517_v25  ;;  %v5437_v30 = vpop.f32.mrb[5].mxu0  ;;  %v5519_v35 = vpop.f32.mrb[5].mxu1  ;;  %v9753_v34 = vld [vmem:[#allocation20 + $0xe8] ss:$16 sps:$4 sm:$0xff] (!%p8802_p2)   ;;  %v9754_v14 = vld [vmem:[#allocation20 + $0x104] ss:$16 sps:$4 sm:$0xff] (!%p8802_p2)  }
 0xad2   : > { %v5571_v37 = vmul.f32 %v5549_v15, %v5437_v30  ;;  %v5573_v6 = vmul.f32 %v5557_v16, %v5519_v35  ;;  %v5439_v41 = vpop.f32.mrb[6].mxu0  ;;  %v5521_v31 = vpop.f32.mrb[6].mxu1  ;;  %v9756_v15 = vld [vmem:[#allocation20 + $0x10c] ss:$16 sps:$4 sm:$0xff] (!%p8802_p2)   ;;  %v9758_v16 = vld [vmem:[#allocation20 + $0x100] ss:$16 sps:$4 sm:$0xff] (!%p8802_p2)   ;;  %7421 = vmatpush1.bf16.msra.mxu1 (!%p8802_p2), %v9753_v34  ;;  %7258 = vmatprep.subr.bf16.mxu0 (!%p8802_p2), %v9754_v14 }
 0xad3   : > { %v5578_v38 = vadd.f32 %v5570_v27, %v4792_v22  ;;  %v5580_v44 = vadd.f32 %v5572_v28, %v4794_v24  ;;  %v5440_v46 = vpop.f32.mrb[7].mxu0  ;;  %v5522_v47 = vpop.f32.mrb[7].mxu1  ;;  %v9759_v22 = vld [vmem:[#allocation20 + $0x108] ss:$16 sps:$4 sm:$0xff] (!%p8802_p2)   ;;  %v9760_v23 = vld [vmem:[#allocation20 + $0x124] ss:$16 sps:$4 sm:$0xff] (!%p8802_p2)   ;;  %7422 = vmatprep.subr.bf16.mxu1 (!%p8802_p2), %v9756_v15  ;;  %7259 = vmatpush1.bf16.msra.mxu0 (!%p8802_p2), %v9758_v16 }
 0xad4   : > { %v5579_v62 = vadd.f32 %v5571_v37, %v4793_v33  ;;  %v5581_v26 = vadd.f32 %v5573_v6, %v4795_v55  ;;  %v9762_v24 = vld [vmem:[#allocation20 + $0x12c] ss:$16 sps:$4 sm:$0xff] (!%p8802_p2)   ;;  %v9764_v25 = vld [vmem:[#allocation20 + $0x120] ss:$16 sps:$4 sm:$0xff] (!%p8802_p2)   ;;  %v9765_v27 = vld [vmem:[#allocation20 + $0x128] ss:$16 sps:$4 sm:$0xff] (!%p8802_p2)   ;;  %7260 = vmatprep.subr.bf16.mxu0 (!%p8802_p2), %v9760_v23 }
 0xad5   : > { %5586 = vst [vmem:[#allocation3 + $0x20] sm:$0xff] %v5578_v38  ;;  %5588 = vst [vmem:[#allocation3 + $0x30] sm:$0xff] %v5580_v44  ;;  %v9766_v28 = vld [vmem:[#allocation20 + $0x144] ss:$16 sps:$4 sm:$0xff] (!%p8802_p2)   ;;  %v9768_v33 = vld [vmem:[#allocation20 + $0x14c] ss:$16 sps:$4 sm:$0xff] (!%p8802_p2)  }
 0xad6   : > { %5587 = vst [vmem:[#allocation3 + $0x28] sm:$0xff] %v5579_v62  ;;  %5589 = vst [vmem:[#allocation3 + $0x38] sm:$0xff] %v5581_v26  ;;  %7423 = vmatpush1.bf16.msra.mxu1 (!%p8802_p2), %v9759_v22  ;;  %v9770_v30 = vld [vmem:[#allocation20 + $0x140] ss:$16 sps:$4 sm:$0xff] (!%p8802_p2)   ;;  %v9771_v55 = vld [vmem:[#allocation20 + $0x148] ss:$16 sps:$4 sm:$0xff] (!%p8802_p2)  }
 0xad7   : > { %7424 = vmatprep.subr.bf16.mxu1 %v9762_v24  ;;  %7261 = vmatpush1.bf16.msra.mxu0 %v9764_v25  ;;  %v9772_v35 = vld [vmem:[#allocation20 + $0x164] ss:$16 sps:$4 sm:$0xff]   ;;  %v9774_v37 = vld [vmem:[#allocation20 + $0x16c] ss:$16 sps:$4 sm:$0xff]   ;;  %v9776_v31 = vld [vmem:[#allocation20 + $0x160] ss:$16 sps:$4 sm:$0xff]  }
 0xad8   : > { %7262 = vmatprep.subr.bf16.mxu0 %v9766_v28  ;;  %v5595_v6 = vld [vmem:[#allocation3 + $0x8] sm:$0xff]  ;;  %v12230_v41 = vld [vmem:[#allocation18] sm:$0xff]  ;;  %v9778_v46 = vld [vmem:[#allocation20 + $0x184] ss:$16 sps:$4 sm:$0xff]  }
 0xad9   : > { %v9777_v38 = vld [vmem:[#allocation20 + $0x168] ss:$16 sps:$4 sm:$0xff]   ;;  %v5611_v44 = vrot.slane %v12230_v41, %v12208_v60  ;;  %v9780_v47 = vld [vmem:[#allocation20 + $0x18c] ss:$16 sps:$4 sm:$0xff]   ;;  %v9782_v26 = vld [vmem:[#allocation20 + $0x180] ss:$16 sps:$4 sm:$0xff]   ;;  %v5607_v54 = vrot.slane %v12230_v41, %v12201_v58 }
 0xada   : > { %7425 = vmatpush1.bf16.msra.mxu1 %v9765_v27  ;;  %v9819_v34 = vld [vmem:[#allocation20 + $0x24c] ss:$16 sps:$4 sm:$0xff]   ;;  %v9814_v14 = vld [vmem:[#allocation20 + $0x240] ss:$16 sps:$4 sm:$0xff]   ;;  %v9817_v15 = vld [vmem:[#allocation20 + $0x248] ss:$16 sps:$4 sm:$0xff]  }
 0xadb   : > { %7426 = vmatprep.subr.bf16.mxu1 %v9768_v33  ;;  %7263 = vmatpush1.bf16.msra.mxu0 %v9770_v30  ;;  %v5645_v62 = vadd.f32 %v5611_v44, %v5595_v6  ;;  %v5644_v51 = vadd.f32 %v5607_v54, %v5594_v57  ;;  %v9822_v16 = vld [vmem:[#allocation20 + $0x264] ss:$16 sps:$4 sm:$0xff]   ;;  %v9825_v22 = vld [vmem:[#allocation20 + $0x26c] ss:$16 sps:$4 sm:$0xff]   ;;  %v9820_v23 = vld [vmem:[#allocation20 + $0x260] ss:$16 sps:$4 sm:$0xff]   ;;  %v5619_v6 = vrot.slane %v12230_v41, %v12211_v61 }
 0xadc   : > { %7264 = vmatprep.subr.bf16.mxu0 %v9772_v35  ;;  %v9823_v24 = vld [vmem:[#allocation20 + $0x268] ss:$16 sps:$4 sm:$0xff]   ;;  %v9828_v25 = vld [vmem:[#allocation20 + $0x284] ss:$16 sps:$4 sm:$0xff]   ;;  %v9831_v27 = vld [vmem:[#allocation20 + $0x28c] ss:$16 sps:$4 sm:$0xff]  }
 0xadd   : > { %vm5653_vm0 = vcmp.ge.f32.partialorder %v5645_v62, 0.0  ;;  %v5661_v53 = vmul.f32 0.01, %v5645_v62  ;;  %v5660_v21 = vmul.f32 0.01, %v5644_v51  ;;  %vm5652_vm1 = vcmp.ge.f32.partialorder %v5644_v51, 0.0 }
 0xade   : > { %7427 = vmatpush1.bf16.msra.mxu1 %v9771_v55  ;;  %v9826_v28 = vld [vmem:[#allocation20 + $0x280] ss:$16 sps:$4 sm:$0xff]   ;;  %v9829_v33 = vld [vmem:[#allocation20 + $0x288] ss:$16 sps:$4 sm:$0xff]   ;;  %v9834_v30 = vld [vmem:[#allocation20 + $0x2a4] ss:$16 sps:$4 sm:$0xff]  }
 0xadf   : > { %7428 = vmatprep.subr.bf16.mxu1 %v9774_v37  ;;  %7265 = vmatpush1.bf16.msra.mxu0 %v9776_v31  ;;  %v5669_v56 = vsel %vm5653_vm0, %v5645_v62, %v5661_v53  ;;  %v5668_v5 = vsel %vm5652_vm1, %v5644_v51, %v5660_v21  ;;  %v9837_v55 = vld [vmem:[#allocation20 + $0x2ac] ss:$16 sps:$4 sm:$0xff]   ;;  %v9832_v35 = vld [vmem:[#allocation20 + $0x2a0] ss:$16 sps:$4 sm:$0xff]   ;;  %v9835_v37 = vld [vmem:[#allocation20 + $0x2a8] ss:$16 sps:$4 sm:$0xff]  }
 0xae0   : > { %7266 = vmatprep.subr.bf16.mxu0 %v9778_v46  ;;  %v5677_v17 = vpack.c.bf16 %v5669_v56, %v5669_v56  ;;  %v5676_v42 = vpack.c.bf16 %v5668_v5, %v5668_v5  ;;  %v9840_v31 = vld [vmem:[#allocation20 + $0x2c4] ss:$16 sps:$4 sm:$0xff]   ;;  %v5597_v44 = vld [vmem:[#allocation3 + $0x18] sm:$0xff]  ;;  %v9847_v54 = vld [vmem:[#allocation20 + $0x2e8] ss:$16 sps:$4 sm:$0xff]   ;;  %vm8405_vm1 = vcmask 523264  }
 0xae1   : > { %v9838_v46 = vld [vmem:[#allocation20 + $0x2c0] ss:$16 sps:$4 sm:$0xff]   ;;  %v5647_v62 = vadd.f32 %v5619_v6, %v5597_v44  ;;  %v9855_v57 = vld [vmem:[#allocation20 + $0x30c] ss:$16 sps:$4 sm:$0xff]   ;;  %v9858_v51 = vld [vmem:[#allocation20 + $0x324] ss:$16 sps:$4 sm:$0xff]  }
 0xae2   : > { %7429 = vmatpush1.bf16.msra.mxu1 %v9777_v38  ;;  %7274 = vmatprep.mubr.bf16.mxu0 %v5677_v17  ;;  %v9843_v38 = vld [vmem:[#allocation20 + $0x2cc] ss:$16 sps:$4 sm:$0xff]   ;;  %v9844_v53 = vld [vmem:[#allocation20 + $0x2e0] ss:$16 sps:$4 sm:$0xff]   ;;  %v9906_v44 = vld [vmem:[#allocation20 + $0x424] ss:$16 sps:$4 sm:$0xff]  }
 0xae3   : > { %7430 = vmatprep.subr.bf16.mxu1 %v9780_v47  ;;  %7267 = vmatpush1.bf16.msra.mxu0 %v9782_v26  ;;  %v9841_v47 = vld [vmem:[#allocation20 + $0x2c8] ss:$16 sps:$4 sm:$0xff]   ;;  %v9846_v26 = vld [vmem:[#allocation20 + $0x2e4] ss:$16 sps:$4 sm:$0xff]   ;;  %vm5655_vm2 = vcmp.ge.f32.partialorder %v5647_v62, 0.0 }
 0xae4   : > { %7268 = vmatprep.subr.bf16.mxu0 %v9784_v50  ;;  %7438 = vmatprep.mubr.bf16.mxu1 %v5677_v17  ;;  %v5663_v50 = vmul.f32 0.01, %v5647_v62  ;;  %v9850_v17 = vld [vmem:[#allocation20 + $0x300] ss:$16 sps:$4 sm:$0xff]   ;;  %v9867_v21 = vld [vmem:[#allocation20 + $0x34c] ss:$16 sps:$4 sm:$0xff]  }
 0xae5   : > { %v9868_v5 = vld [vmem:[#allocation20 + $0x360] ss:$16 sps:$4 sm:$0xff]  }
 0xae6   : > { %7431 = vmatpush1.bf16.msra.mxu1 %v9783_v48  ;;  %v9849_v48 = vld [vmem:[#allocation20 + $0x2ec] ss:$16 sps:$4 sm:$0xff]   ;;  %v5671_v56 = vsel %vm5655_vm2, %v5647_v62, %v5663_v50  ;;  %v9904_v62 = vld [vmem:[#allocation20 + $0x420] ss:$16 sps:$4 sm:$0xff]   ;;  %v9912_v50 = vld [vmem:[#allocation20 + $0x444] ss:$16 sps:$4 sm:$0xff]  }
 0xae7   : > { %7432 = vmatprep.subr.bf16.mxu1 %v9786_v43  ;;  %7269 = vmatpush1.bf16.msra.mxu0 %v9788_v9  ;;  %v9852_v43 = vld [vmem:[#allocation20 + $0x304] ss:$16 sps:$4 sm:$0xff]   ;;  %v5679_v9 = vpack.c.bf16 %v5671_v56, %v5671_v56 }
 0xae8   : > { %7270 = vmatprep.subr.bf16.mxu0 %v9790_v0  ;;  %v9861_v0 = vld [vmem:[#allocation20 + $0x32c] ss:$16 sps:$4 sm:$0xff]  }
 0xaea   : > { %7433 = vmatpush1.bf16.msra.mxu1 %v9789_v63  ;;  %v9853_v63 = vld [vmem:[#allocation20 + $0x308] ss:$16 sps:$4 sm:$0xff]  }
 0xaeb   : > { %7434 = vmatprep.subr.bf16.mxu1 %v9792_v39  ;;  %7271 = vmatpush1.bf16.msra.mxu0 %v9794_v1  ;;  %v9856_v39 = vld [vmem:[#allocation20 + $0x320] ss:$16 sps:$4 sm:$0xff]   ;;  %v9859_v1 = vld [vmem:[#allocation20 + $0x328] ss:$16 sps:$4 sm:$0xff]  }
 0xaec   : > { %7272 = vmatprep.subr.bf16.mxu0 %v9796_v2  ;;  %v9862_v2 = vld [vmem:[#allocation20 + $0x340] ss:$16 sps:$4 sm:$0xff]  }
 0xaee   : > { %7435 = vmatpush1.bf16.msra.mxu1 %v9795_v40  ;;  %v9864_v40 = vld [vmem:[#allocation20 + $0x344] ss:$16 sps:$4 sm:$0xff]  }
 0xaef   : > { %7436 = vmatprep.subr.bf16.mxu1 %v9798_v3  ;;  %7273 = vmatpush1.bf16.msra.mxu0 %v9800_v20  ;;  %v9865_v3 = vld [vmem:[#allocation20 + $0x348] ss:$16 sps:$4 sm:$0xff]   ;;  %v9870_v20 = vld [vmem:[#allocation20 + $0x364] ss:$16 sps:$4 sm:$0xff]  }
 0xaf0   : > { %7283 = vmatprep.subr.bf16.mxu0 %v9804_v32  ;;  %v9871_v32 = vld [vmem:[#allocation20 + $0x368] ss:$16 sps:$4 sm:$0xff]  }
 0xaf2   : > { %7437 = vmatpush1.bf16.msra.mxu1 %v9801_v4  ;;  %7275 = vmatmul.mubr.bf16.vlgmr.msra.gmra.mrb[0].mxu0 %v5676_v42  ;;  %v9873_v4 = vld [vmem:[#allocation20 + $0x36c] ss:$16 sps:$4 sm:$0xff]  }
 0xaf3   : > { %7447 = vmatprep.subr.bf16.mxu1 %v9807_v18  ;;  %7284 = vmatpush1.bf16.msra.mxu0 %v9802_v7  ;;  %v9876_v18 = vld [vmem:[#allocation20 + $0x384] ss:$16 sps:$4 sm:$0xff]   ;;  %v9879_v7 = vld [vmem:[#allocation20 + $0x38c] ss:$16 sps:$4 sm:$0xff]  }
 0xaf4   : > { %7285 = vmatprep.subr.bf16.mxu0 %v9810_v8  ;;  %7315 = vmatprep.mubr.bf16.mxu0 %v5679_v9  ;;  %v9882_v8 = vld [vmem:[#allocation20 + $0x3a4] ss:$16 sps:$4 sm:$0xff]  }
 0xaf5   : > { %7439 = vmatmul.mubr.bf16.vlgmr.msra.gmra.mrb[0].mxu1 %v5676_v42  ;;  %v9874_v42 = vld [vmem:[#allocation20 + $0x380] ss:$16 sps:$4 sm:$0xff]  }
 0xaf6   : > { %7448 = vmatpush1.bf16.msra.mxu1 %v9805_v29  ;;  %7479 = vmatprep.mubr.bf16.mxu1 %v5679_v9  ;;  %v9877_v29 = vld [vmem:[#allocation20 + $0x388] ss:$16 sps:$4 sm:$0xff]   ;;  %v9918_v9 = vld [vmem:[#allocation20 + $0x464] ss:$16 sps:$4 sm:$0xff]  }
 0xaf7   : > { %7449 = vmatprep.subr.bf16.mxu1 %v9813_v10  ;;  %7286 = vmatpush1.bf16.msra.mxu0 %v9808_v11  ;;  %v9885_v10 = vld [vmem:[#allocation20 + $0x3ac] ss:$16 sps:$4 sm:$0xff]   ;;  %v5615_v11 = vrot.slane %v12230_v41, %v12204_v59 }
 0xaf8   : > { %7287 = vmatprep.subr.bf16.mxu0 %v9816_v36  ;;  %v9880_v36 = vld [vmem:[#allocation20 + $0x3a0] ss:$16 sps:$4 sm:$0xff]  }
 0xafa   : > { %7450 = vmatpush1.bf16.msra.mxu1 %v9811_v49  ;;  %v5596_v49 = vld [vmem:[#allocation3 + $0x10] sm:$0xff] }
 0xafb   : > { %7451 = vmatprep.subr.bf16.mxu1 %v9819_v34  ;;  %7288 = vmatpush1.bf16.msra.mxu0 %v9814_v14  ;;  %v9883_v34 = vld [vmem:[#allocation20 + $0x3a8] ss:$16 sps:$4 sm:$0xff]   ;;  %v9888_v14 = vld [vmem:[#allocation20 + $0x3c4] ss:$16 sps:$4 sm:$0xff]  }
 0xafc   : > { %7289 = vmatprep.subr.bf16.mxu0 %v9822_v16  ;;  %v9891_v16 = vld [vmem:[#allocation20 + $0x3cc] ss:$16 sps:$4 sm:$0xff]  }
 0xafe   : > { %7452 = vmatpush1.bf16.msra.mxu1 %v9817_v15  ;;  %v5646_v15 = vadd.f32 %v5615_v11, %v5596_v49  ;;  %v9951_v11 = vld [vmem:[#allocation20 + $0x50c] ss:$16 sps:$4 sm:$0xff]   ;;  %v9946_v49 = vld [vmem:[#allocation20 + $0x500] ss:$16 sps:$4 sm:$0xff]  }
 0xaff   : > { %7453 = vmatprep.subr.bf16.mxu1 %v9825_v22  ;;  %7290 = vmatpush1.bf16.msra.mxu0 %v9820_v23  ;;  %v9886_v22 = vld [vmem:[#allocation20 + $0x3c0] ss:$16 sps:$4 sm:$0xff]   ;;  %v9889_v23 = vld [vmem:[#allocation20 + $0x3c8] ss:$16 sps:$4 sm:$0xff]  }
 0xb00   : > { %7291 = vmatprep.subr.bf16.mxu0 %v9828_v25  ;;  %v5662_v25 = vmul.f32 0.01, %v5646_v15  ;;  %vm5654_vm3 = vcmp.ge.f32.partialorder %v5646_v15, 0.0 }
 0xb02   : > { %7454 = vmatpush1.bf16.msra.mxu1 %v9823_v24  ;;  %v9894_v24 = vld [vmem:[#allocation20 + $0x3e4] ss:$16 sps:$4 sm:$0xff]  }
 0xb03   : > { %7455 = vmatprep.subr.bf16.mxu1 %v9831_v27  ;;  %7292 = vmatpush1.bf16.msra.mxu0 %v9826_v28  ;;  %v9897_v27 = vld [vmem:[#allocation20 + $0x3ec] ss:$16 sps:$4 sm:$0xff]   ;;  %v9892_v28 = vld [vmem:[#allocation20 + $0x3e0] ss:$16 sps:$4 sm:$0xff]  }
 0xb04   : > { %7293 = vmatprep.subr.bf16.mxu0 %v9834_v30  ;;  %v9900_v30 = vld [vmem:[#allocation20 + $0x404] ss:$16 sps:$4 sm:$0xff]  }
 0xb06   : > { %7456 = vmatpush1.bf16.msra.mxu1 %v9829_v33  ;;  %v9895_v33 = vld [vmem:[#allocation20 + $0x3e8] ss:$16 sps:$4 sm:$0xff]  }
 0xb07   : > { %7457 = vmatprep.subr.bf16.mxu1 %v9837_v55  ;;  %7294 = vmatpush1.bf16.msra.mxu0 %v9832_v35  ;;  %v5670_v55 = vsel %vm5654_vm3, %v5646_v15, %v5662_v25  ;;  %v9903_v35 = vld [vmem:[#allocation20 + $0x40c] ss:$16 sps:$4 sm:$0xff]   ;;  %v9952_v15 = vld [vmem:[#allocation20 + $0x520] ss:$16 sps:$4 sm:$0xff]   ;;  %v9961_v25 = vld [vmem:[#allocation20 + $0x548] ss:$16 sps:$4 sm:$0xff]  }
 0xb08   : > { %7295 = vmatprep.subr.bf16.mxu0 %v9840_v31  ;;  %v5678_v6 = vpack.c.bf16 %v5670_v55, %v5670_v55  ;;  %v5627_v31 = vrot.slane %v12230_v41, %v5548_v19  ;;  %v9972_v55 = vld [vmem:[#allocation20 + $0x584] ss:$16 sps:$4 sm:$0xff]  }
 0xb0a   : > { %7458 = vmatpush1.bf16.msra.mxu1 %v9835_v37  ;;  %v9898_v37 = vld [vmem:[#allocation20 + $0x400] ss:$16 sps:$4 sm:$0xff]  }
 0xb0b   : > { %7459 = vmatprep.subr.bf16.mxu1 %v9843_v38  ;;  %7296 = vmatpush1.bf16.msra.mxu0 %v9838_v46  ;;  %v9901_v38 = vld [vmem:[#allocation20 + $0x408] ss:$16 sps:$4 sm:$0xff]   ;;  %v9909_v46 = vld [vmem:[#allocation20 + $0x42c] ss:$16 sps:$4 sm:$0xff]  }
 0xb0c   : > { %7297 = vmatprep.subr.bf16.mxu0 %v9846_v26  ;;  %v9907_v26 = vld [vmem:[#allocation20 + $0x428] ss:$16 sps:$4 sm:$0xff]  }
 0xb0e   : > { %7460 = vmatpush1.bf16.msra.mxu1 %v9841_v47  ;;  %v5599_v47 = vld [vmem:[#allocation3 + $0x28] sm:$0xff] }
 0xb0f   : > { %7461 = vmatprep.subr.bf16.mxu1 %v9849_v48  ;;  %7298 = vmatpush1.bf16.msra.mxu0 %v9844_v53  ;;  %v5649_v48 = vadd.f32 %v5627_v31, %v5599_v47  ;;  %v9915_v53 = vld [vmem:[#allocation20 + $0x44c] ss:$16 sps:$4 sm:$0xff]   ;;  %v5623_v31 = vrot.slane %v12230_v41, %v5544_v52  ;;  %v9976_v47 = vld [vmem:[#allocation20 + $0x5a0] ss:$16 sps:$4 sm:$0xff]  }
 0xb10   : > { %7299 = vmatprep.subr.bf16.mxu0 %v9852_v43  ;;  %v9910_v43 = vld [vmem:[#allocation20 + $0x440] ss:$16 sps:$4 sm:$0xff]   ;;  %v9987_v52 = vld [vmem:[#allocation20 + $0x5cc] ss:$16 sps:$4 sm:$0xff]  }
 0xb11   : > { %vm5657_vm4 = vcmp.ge.f32.partialorder %v5649_v48, 0.0  ;;  %v5665_v19 = vmul.f32 0.01, %v5649_v48  ;;  %v9982_v41 = vld [vmem:[#allocation20 + $0x5c0] ss:$16 sps:$4 sm:$0xff]  }
 0xb12   : > { %7462 = vmatpush1.bf16.msra.mxu1 %v9847_v54 }
 0xb13   : > { %7463 = vmatprep.subr.bf16.mxu1 %v9855_v57  ;;  %7300 = vmatpush1.bf16.msra.mxu0 %v9850_v17  ;;  %v5673_v54 = vsel %vm5657_vm4, %v5649_v48, %v5665_v19  ;;  %v9913_v57 = vld [vmem:[#allocation20 + $0x448] ss:$16 sps:$4 sm:$0xff]   ;;  %v9921_v17 = vld [vmem:[#allocation20 + $0x46c] ss:$16 sps:$4 sm:$0xff]  }
 0xb14   : > { %7301 = vmatprep.subr.bf16.mxu0 %v9858_v51  ;;  %v5681_v56 = vpack.c.bf16 %v5673_v54, %v5673_v54  ;;  %v9919_v51 = vld [vmem:[#allocation20 + $0x468] ss:$16 sps:$4 sm:$0xff]   ;;  %v5601_v19 = vld [vmem:[#allocation3 + $0x38] sm:$0xff] }
 0xb15   : > { %v12246_v48 = vld [vmem:[#allocation18] sm:$0xff] }
 0xb16   : > { %7464 = vmatpush1.bf16.msra.mxu1 %v9853_v63  ;;  %v9916_v63 = vld [vmem:[#allocation20 + $0x460] ss:$16 sps:$4 sm:$0xff]   ;;  %v9985_v54 = vld [vmem:[#allocation20 + $0x5c8] ss:$16 sps:$4 sm:$0xff]  }
 0xb17   : > { %7465 = vmatprep.subr.bf16.mxu1 %v9861_v0  ;;  %7302 = vmatpush1.bf16.msra.mxu0 %v9856_v39  ;;  %v9924_v0 = vld [vmem:[#allocation20 + $0x484] ss:$16 sps:$4 sm:$0xff]   ;;  %v9927_v39 = vld [vmem:[#allocation20 + $0x48c] ss:$16 sps:$4 sm:$0xff]  }
 0xb18   : > { %7303 = vmatprep.subr.bf16.mxu0 %v9864_v40  ;;  %v9925_v40 = vld [vmem:[#allocation20 + $0x488] ss:$16 sps:$4 sm:$0xff]  }
 0xb1a   : > { %7466 = vmatpush1.bf16.msra.mxu1 %v9859_v1  ;;  %v9922_v1 = vld [vmem:[#allocation20 + $0x480] ss:$16 sps:$4 sm:$0xff]  }
 0xb1b   : > { %7467 = vmatprep.subr.bf16.mxu1 %v9867_v21  ;;  %7304 = vmatpush1.bf16.msra.mxu0 %v9862_v2  ;;  %v9930_v21 = vld [vmem:[#allocation20 + $0x4a4] ss:$16 sps:$4 sm:$0xff]   ;;  %v9933_v2 = vld [vmem:[#allocation20 + $0x4ac] ss:$16 sps:$4 sm:$0xff]  }
 0xb1c   : > { %7305 = vmatprep.subr.bf16.mxu0 %v9870_v20  ;;  %v9931_v20 = vld [vmem:[#allocation20 + $0x4a8] ss:$16 sps:$4 sm:$0xff]  }
 0xb1e   : > { %7468 = vmatpush1.bf16.msra.mxu1 %v9865_v3  ;;  %v9928_v3 = vld [vmem:[#allocation20 + $0x4a0] ss:$16 sps:$4 sm:$0xff]  }
 0xb1f   : > { %7469 = vmatprep.subr.bf16.mxu1 %v9873_v4  ;;  %7306 = vmatpush1.bf16.msra.mxu0 %v9868_v5  ;;  %v9936_v4 = vld [vmem:[#allocation20 + $0x4c4] ss:$16 sps:$4 sm:$0xff]   ;;  %v9939_v5 = vld [vmem:[#allocation20 + $0x4cc] ss:$16 sps:$4 sm:$0xff]  }
 0xb20   : > { %7307 = vmatprep.subr.bf16.mxu0 %v9876_v18  ;;  %v9937_v18 = vld [vmem:[#allocation20 + $0x4c8] ss:$16 sps:$4 sm:$0xff]  }
 0xb22   : > { %7470 = vmatpush1.bf16.msra.mxu1 %v9871_v32  ;;  %v9934_v32 = vld [vmem:[#allocation20 + $0x4c0] ss:$16 sps:$4 sm:$0xff]  }
 0xb23   : > { %7471 = vmatprep.subr.bf16.mxu1 %v9879_v7  ;;  %7308 = vmatpush1.bf16.msra.mxu0 %v9874_v42  ;;  %v9942_v7 = vld [vmem:[#allocation20 + $0x4e4] ss:$16 sps:$4 sm:$0xff]   ;;  %v9945_v42 = vld [vmem:[#allocation20 + $0x4ec] ss:$16 sps:$4 sm:$0xff]  }
 0xb24   : > { %7309 = vmatprep.subr.bf16.mxu0 %v9882_v8  ;;  %v9943_v8 = vld [vmem:[#allocation20 + $0x4e8] ss:$16 sps:$4 sm:$0xff]  }
 0xb26   : > { %7472 = vmatpush1.bf16.msra.mxu1 %v9877_v29  ;;  %v9940_v29 = vld [vmem:[#allocation20 + $0x4e0] ss:$16 sps:$4 sm:$0xff]  }
 0xb27   : > { %7473 = vmatprep.subr.bf16.mxu1 %v9885_v10  ;;  %7310 = vmatpush1.bf16.msra.mxu0 %v9880_v36  ;;  %v9948_v10 = vld [vmem:[#allocation20 + $0x504] ss:$16 sps:$4 sm:$0xff]   ;;  %v9949_v36 = vld [vmem:[#allocation20 + $0x508] ss:$16 sps:$4 sm:$0xff]  }
 0xb28   : > { %7311 = vmatprep.subr.bf16.mxu0 %v9888_v14  ;;  %v9957_v14 = vld [vmem:[#allocation20 + $0x52c] ss:$16 sps:$4 sm:$0xff]  }
 0xb2a   : > { %7474 = vmatpush1.bf16.msra.mxu1 %v9883_v34  ;;  %v9954_v34 = vld [vmem:[#allocation20 + $0x524] ss:$16 sps:$4 sm:$0xff]  }
 0xb2b   : > { %7475 = vmatprep.subr.bf16.mxu1 %v9891_v16  ;;  %7312 = vmatpush1.bf16.msra.mxu0 %v9886_v22  ;;  %v9955_v16 = vld [vmem:[#allocation20 + $0x528] ss:$16 sps:$4 sm:$0xff]   ;;  %v9960_v22 = vld [vmem:[#allocation20 + $0x544] ss:$16 sps:$4 sm:$0xff]  }
 0xb2c   : > { %7313 = vmatprep.subr.bf16.mxu0 %v9894_v24  ;;  %v9958_v24 = vld [vmem:[#allocation20 + $0x540] ss:$16 sps:$4 sm:$0xff]  }
 0xb2e   : > { %7476 = vmatpush1.bf16.msra.mxu1 %v9889_v23  ;;  %v9963_v23 = vld [vmem:[#allocation20 + $0x54c] ss:$16 sps:$4 sm:$0xff]  }
 0xb2f   : > { %7477 = vmatprep.subr.bf16.mxu1 %v9897_v27  ;;  %7314 = vmatpush1.bf16.msra.mxu0 %v9892_v28  ;;  %v9966_v27 = vld [vmem:[#allocation20 + $0x564] ss:$16 sps:$4 sm:$0xff]   ;;  %v9969_v28 = vld [vmem:[#allocation20 + $0x56c] ss:$16 sps:$4 sm:$0xff]  }
 0xb30   : > { %7324 = vmatprep.subr.bf16.mxu0 %v9900_v30  ;;  %v9967_v30 = vld [vmem:[#allocation20 + $0x568] ss:$16 sps:$4 sm:$0xff]  }
 0xb32   : > { %7478 = vmatpush1.bf16.msra.mxu1 %v9895_v33  ;;  %7316 = vmatmul.mubr.bf16.vlgmr.msra.gmra.mrb[0].mxu0 %v5678_v6  ;;  %v9964_v33 = vld [vmem:[#allocation20 + $0x560] ss:$16 sps:$4 sm:$0xff]  }
 0xb33   : > { %7488 = vmatprep.subr.bf16.mxu1 %v9903_v35  ;;  %7325 = vmatpush1.bf16.msra.mxu0 %v9898_v37  ;;  %v9975_v35 = vld [vmem:[#allocation20 + $0x58c] ss:$16 sps:$4 sm:$0xff]   ;;  %v9970_v37 = vld [vmem:[#allocation20 + $0x580] ss:$16 sps:$4 sm:$0xff]  }
 0xb34   : > { %7326 = vmatprep.subr.bf16.mxu0 %v9906_v44  ;;  %7356 = vmatprep.mubr.bf16.mxu0 %v5681_v56  ;;  %v9981_v44 = vld [vmem:[#allocation20 + $0x5ac] ss:$16 sps:$4 sm:$0xff]  }
 0xb35   : > { %7480 = vmatmul.mubr.bf16.vlgmr.msra.gmra.mrb[0].mxu1 %v5678_v6  ;;  %v9973_v6 = vld [vmem:[#allocation20 + $0x588] ss:$16 sps:$4 sm:$0xff]  }
 0xb36   : > { %7489 = vmatpush1.bf16.msra.mxu1 %v9901_v38  ;;  %7520 = vmatprep.mubr.bf16.mxu1 %v5681_v56  ;;  %v9978_v38 = vld [vmem:[#allocation20 + $0x5a4] ss:$16 sps:$4 sm:$0xff]  }
 0xb37   : > { %7490 = vmatprep.subr.bf16.mxu1 %v9909_v46  ;;  %7327 = vmatpush1.bf16.msra.mxu0 %v9904_v62  ;;  %v5598_v46 = vld [vmem:[#allocation3 + $0x20] sm:$0xff] }
 0xb38   : > { %7328 = vmatprep.subr.bf16.mxu0 %v9912_v50  ;;  %v9979_v62 = vld [vmem:[#allocation20 + $0x5a8] ss:$16 sps:$4 sm:$0xff]   ;;  %v5635_v50 = vrot.slane %v12246_v48, %v5556_v13 }
 0xb39   : > { %v9991_v13 = vld [vmem:[#allocation20 + $0x5e8] ss:$16 sps:$4 sm:$0xff]  }
 0xb3a   : > { %7491 = vmatpush1.bf16.msra.mxu1 %v9907_v26  ;;  %v9984_v26 = vld [vmem:[#allocation20 + $0x5c4] ss:$16 sps:$4 sm:$0xff]  }
 0xb3b   : > { %7492 = vmatprep.subr.bf16.mxu1 %v9915_v53  ;;  %7329 = vmatpush1.bf16.msra.mxu0 %v9910_v43  ;;  %v5648_v53 = vadd.f32 %v5623_v31, %v5598_v46  ;;  %v5651_v43 = vadd.f32 %v5635_v50, %v5601_v19  ;;  %v10047_v31 = vld [vmem:[#allocation20 + $0x70c] ss:$16 sps:$4 sm:$0xff]   ;;  %v10050_v46 = vld [vmem:[#allocation20 + $0x724] ss:$16 sps:$4 sm:$0xff]   ;;  %v10054_v19 = vld [vmem:[#allocation20 + $0x740] ss:$16 sps:$4 sm:$0xff]  }
 0xb3c   : > { %7330 = vmatprep.subr.bf16.mxu0 %v9918_v9  ;;  %v9993_v9 = vld [vmem:[#allocation20 + $0x5ec] ss:$16 sps:$4 sm:$0xff]   ;;  %v10056_v50 = vld [vmem:[#allocation20 + $0x744] ss:$16 sps:$4 sm:$0xff]  }
 0xb3d   : > { %v5664_v56 = vmul.f32 0.01, %v5648_v53  ;;  %vm5656_vm5 = vcmp.ge.f32.partialorder %v5648_v53, 0.0  ;;  %vm5659_vm6 = vcmp.ge.f32.partialorder %v5651_v43, 0.0 }
 0xb3e   : > { %7493 = vmatpush1.bf16.msra.mxu1 %v9913_v57  ;;  %v9990_v57 = vld [vmem:[#allocation20 + $0x5e4] ss:$16 sps:$4 sm:$0xff]  }
 0xb3f   : > { %7494 = vmatprep.subr.bf16.mxu1 %v9921_v17  ;;  %7331 = vmatpush1.bf16.msra.mxu0 %v9916_v63  ;;  %v9988_v17 = vld [vmem:[#allocation20 + $0x5e0] ss:$16 sps:$4 sm:$0xff]   ;;  %v5667_v63 = vmul.f32 0.01, %v5651_v43 }
 0xb40   : > { %7332 = vmatprep.subr.bf16.mxu0 %v9924_v0  ;;  %v5672_v0 = vsel %vm5656_vm5, %v5648_v53, %v5664_v56  ;;  %v10059_v53 = vld [vmem:[#allocation20 + $0x74c] ss:$16 sps:$4 sm:$0xff]   ;;  %v10068_v56 = vld [vmem:[#allocation20 + $0x784] ss:$16 sps:$4 sm:$0xff]  }
 0xb42   : > { %7495 = vmatpush1.bf16.msra.mxu1 %v9919_v51  ;;  %v9996_v51 = vld [vmem:[#allocation20 + $0x604] ss:$16 sps:$4 sm:$0xff]  }
 0xb43   : > { %7496 = vmatprep.subr.bf16.mxu1 %v9927_v39  ;;  %7333 = vmatpush1.bf16.msra.mxu0 %v9922_v1  ;;  %v9999_v39 = vld [vmem:[#allocation20 + $0x60c] ss:$16 sps:$4 sm:$0xff]   ;;  %v9994_v1 = vld [vmem:[#allocation20 + $0x600] ss:$16 sps:$4 sm:$0xff]  }
 0xb44   : > { %7334 = vmatprep.subr.bf16.mxu0 %v9930_v21  ;;  %v5680_v21 = vpack.c.bf16 %v5672_v0, %v5672_v0  ;;  %v10077_v0 = vld [vmem:[#allocation20 + $0x7ac] ss:$16 sps:$4 sm:$0xff]  }
 0xb46   : > { %7497 = vmatpush1.bf16.msra.mxu1 %v9925_v40  ;;  %v9997_v40 = vld [vmem:[#allocation20 + $0x608] ss:$16 sps:$4 sm:$0xff]  }
 0xb47   : > { %7498 = vmatprep.subr.bf16.mxu1 %v9933_v2  ;;  %7335 = vmatpush1.bf16.msra.mxu0 %v9928_v3  ;;  %v5675_v2 = vsel %vm5659_vm6, %v5651_v43, %v5667_v63  ;;  %v10002_v3 = vld [vmem:[#allocation20 + $0x624] ss:$16 sps:$4 sm:$0xff]   ;;  %v10060_v43 = vld [vmem:[#allocation20 + $0x760] ss:$16 sps:$4 sm:$0xff]   ;;  %v5631_v63 = vrot.slane %v12246_v48, %v5552_v12  ;;  %v10089_v48 = vld [vmem:[#allocation20 + $0x7ec] ss:$16 sps:$4 sm:$0xff]  }
 0xb48   : > { %7336 = vmatprep.subr.bf16.mxu0 %v9936_v4  ;;  %v10000_v4 = vld [vmem:[#allocation20 + $0x620] ss:$16 sps:$4 sm:$0xff]   ;;  %v10086_v12 = vld [vmem:[#allocation20 + $0x7e4] ss:$16 sps:$4 sm:$0xff]  }
 0xb4a   : > { %7499 = vmatpush1.bf16.msra.mxu1 %v9931_v20  ;;  %v10005_v20 = vld [vmem:[#allocation20 + $0x62c] ss:$16 sps:$4 sm:$0xff]  }
 0xb4b   : > { %7500 = vmatprep.subr.bf16.mxu1 %v9939_v5  ;;  %7337 = vmatpush1.bf16.msra.mxu0 %v9934_v32  ;;  %v10003_v5 = vld [vmem:[#allocation20 + $0x628] ss:$16 sps:$4 sm:$0xff]   ;;  %v5683_v32 = vpack.c.bf16 %v5675_v2, %v5675_v2  ;;  %v10080_v2 = vld [vmem:[#allocation20 + $0x7c4] ss:$16 sps:$4 sm:$0xff]  }
 0xb4c   : > { %7338 = vmatprep.subr.bf16.mxu0 %v9942_v7  ;;  %v10011_v7 = vld [vmem:[#allocation20 + $0x64c] ss:$16 sps:$4 sm:$0xff]  }
 0xb4e   : > { %7501 = vmatpush1.bf16.msra.mxu1 %v9937_v18  ;;  %v10008_v18 = vld [vmem:[#allocation20 + $0x644] ss:$16 sps:$4 sm:$0xff]  }
 0xb4f   : > { %7502 = vmatprep.subr.bf16.mxu1 %v9945_v42  ;;  %7339 = vmatpush1.bf16.msra.mxu0 %v9940_v29  ;;  %v10006_v42 = vld [vmem:[#allocation20 + $0x640] ss:$16 sps:$4 sm:$0xff]   ;;  %v10009_v29 = vld [vmem:[#allocation20 + $0x648] ss:$16 sps:$4 sm:$0xff]  }
 0xb50   : > { %7340 = vmatprep.subr.bf16.mxu0 %v9948_v10  ;;  %v10017_v10 = vld [vmem:[#allocation20 + $0x66c] ss:$16 sps:$4 sm:$0xff]  }
 0xb52   : > { %7503 = vmatpush1.bf16.msra.mxu1 %v9943_v8  ;;  %v10014_v8 = vld [vmem:[#allocation20 + $0x664] ss:$16 sps:$4 sm:$0xff]  }
 0xb53   : > { %7504 = vmatprep.subr.bf16.mxu1 %v9951_v11  ;;  %7341 = vmatpush1.bf16.msra.mxu0 %v9946_v49  ;;  %v10012_v11 = vld [vmem:[#allocation20 + $0x660] ss:$16 sps:$4 sm:$0xff]   ;;  %v10015_v49 = vld [vmem:[#allocation20 + $0x668] ss:$16 sps:$4 sm:$0xff]  }
 0xb54   : > { %7342 = vmatprep.subr.bf16.mxu0 %v9954_v34  ;;  %v10023_v34 = vld [vmem:[#allocation20 + $0x68c] ss:$16 sps:$4 sm:$0xff]  }
 0xb56   : > { %7505 = vmatpush1.bf16.msra.mxu1 %v9949_v36  ;;  %v10020_v36 = vld [vmem:[#allocation20 + $0x684] ss:$16 sps:$4 sm:$0xff]  }
 0xb57   : > { %7506 = vmatprep.subr.bf16.mxu1 %v9957_v14  ;;  %7343 = vmatpush1.bf16.msra.mxu0 %v9952_v15  ;;  %v10018_v14 = vld [vmem:[#allocation20 + $0x680] ss:$16 sps:$4 sm:$0xff]   ;;  %v10021_v15 = vld [vmem:[#allocation20 + $0x688] ss:$16 sps:$4 sm:$0xff]  }
 0xb58   : > { %7344 = vmatprep.subr.bf16.mxu0 %v9960_v22  ;;  %v10029_v22 = vld [vmem:[#allocation20 + $0x6ac] ss:$16 sps:$4 sm:$0xff]  }
 0xb5a   : > { %7507 = vmatpush1.bf16.msra.mxu1 %v9955_v16  ;;  %v10026_v16 = vld [vmem:[#allocation20 + $0x6a4] ss:$16 sps:$4 sm:$0xff]  }
 0xb5b   : > { %7508 = vmatprep.subr.bf16.mxu1 %v9963_v23  ;;  %7345 = vmatpush1.bf16.msra.mxu0 %v9958_v24  ;;  %v10024_v23 = vld [vmem:[#allocation20 + $0x6a0] ss:$16 sps:$4 sm:$0xff]   ;;  %v10027_v24 = vld [vmem:[#allocation20 + $0x6a8] ss:$16 sps:$4 sm:$0xff]  }
 0xb5c   : > { %7346 = vmatprep.subr.bf16.mxu0 %v9966_v27  ;;  %v10035_v27 = vld [vmem:[#allocation20 + $0x6cc] ss:$16 sps:$4 sm:$0xff]  }
 0xb5e   : > { %7509 = vmatpush1.bf16.msra.mxu1 %v9961_v25  ;;  %v10032_v25 = vld [vmem:[#allocation20 + $0x6c4] ss:$16 sps:$4 sm:$0xff]  }
 0xb5f   : > { %7510 = vmatprep.subr.bf16.mxu1 %v9969_v28  ;;  %7347 = vmatpush1.bf16.msra.mxu0 %v9964_v33  ;;  %v10030_v28 = vld [vmem:[#allocation20 + $0x6c0] ss:$16 sps:$4 sm:$0xff]   ;;  %v10033_v33 = vld [vmem:[#allocation20 + $0x6c8] ss:$16 sps:$4 sm:$0xff]  }
 0xb60   : > { %7348 = vmatprep.subr.bf16.mxu0 %v9972_v55  ;;  %v10041_v55 = vld [vmem:[#allocation20 + $0x6ec] ss:$16 sps:$4 sm:$0xff]  }
 0xb62   : > { %7511 = vmatpush1.bf16.msra.mxu1 %v9967_v30  ;;  %v10038_v30 = vld [vmem:[#allocation20 + $0x6e4] ss:$16 sps:$4 sm:$0xff]  }
 0xb63   : > { %7512 = vmatprep.subr.bf16.mxu1 %v9975_v35  ;;  %7349 = vmatpush1.bf16.msra.mxu0 %v9970_v37  ;;  %v10036_v35 = vld [vmem:[#allocation20 + $0x6e0] ss:$16 sps:$4 sm:$0xff]   ;;  %v10039_v37 = vld [vmem:[#allocation20 + $0x6e8] ss:$16 sps:$4 sm:$0xff]  }
 0xb64   : > { %7350 = vmatprep.subr.bf16.mxu0 %v9978_v38  ;;  %v10042_v38 = vld [vmem:[#allocation20 + $0x700] ss:$16 sps:$4 sm:$0xff]  }
 0xb66   : > { %7513 = vmatpush1.bf16.msra.mxu1 %v9973_v6  ;;  %v10044_v6 = vld [vmem:[#allocation20 + $0x704] ss:$16 sps:$4 sm:$0xff]  }
 0xb67   : > { %7514 = vmatprep.subr.bf16.mxu1 %v9981_v44  ;;  %7351 = vmatpush1.bf16.msra.mxu0 %v9976_v47  ;;  %v10045_v44 = vld [vmem:[#allocation20 + $0x708] ss:$16 sps:$4 sm:$0xff]   ;;  %v10053_v47 = vld [vmem:[#allocation20 + $0x72c] ss:$16 sps:$4 sm:$0xff]  }
 0xb68   : > { %7352 = vmatprep.subr.bf16.mxu0 %v9984_v26  ;;  %v10051_v26 = vld [vmem:[#allocation20 + $0x728] ss:$16 sps:$4 sm:$0xff]  }
 0xb6a   : > { %7515 = vmatpush1.bf16.msra.mxu1 %v9979_v62  ;;  %v10048_v62 = vld [vmem:[#allocation20 + $0x720] ss:$16 sps:$4 sm:$0xff]  }
 0xb6b   : > { %7516 = vmatprep.subr.bf16.mxu1 %v9987_v52  ;;  %7353 = vmatpush1.bf16.msra.mxu0 %v9982_v41  ;;  %v10057_v52 = vld [vmem:[#allocation20 + $0x748] ss:$16 sps:$4 sm:$0xff]   ;;  %v10062_v41 = vld [vmem:[#allocation20 + $0x764] ss:$16 sps:$4 sm:$0xff]  }
 0xb6c   : > { %7354 = vmatprep.subr.bf16.mxu0 %v9990_v57  ;;  %v10063_v57 = vld [vmem:[#allocation20 + $0x768] ss:$16 sps:$4 sm:$0xff]  }
 0xb6e   : > { %7517 = vmatpush1.bf16.msra.mxu1 %v9985_v54  ;;  %v10065_v54 = vld [vmem:[#allocation20 + $0x76c] ss:$16 sps:$4 sm:$0xff]  }
 0xb6f   : > { %7518 = vmatprep.subr.bf16.mxu1 %v9993_v9  ;;  %7355 = vmatpush1.bf16.msra.mxu0 %v9988_v17  ;;  %v10071_v9 = vld [vmem:[#allocation20 + $0x78c] ss:$16 sps:$4 sm:$0xff]   ;;  %v10066_v17 = vld [vmem:[#allocation20 + $0x780] ss:$16 sps:$4 sm:$0xff]  }
 0xb70   : > { %7365 = vmatprep.subr.bf16.mxu0 %v9996_v51  ;;  %v10074_v51 = vld [vmem:[#allocation20 + $0x7a4] ss:$16 sps:$4 sm:$0xff]  }
 0xb72   : > { %7519 = vmatpush1.bf16.msra.mxu1 %v9991_v13  ;;  %7357 = vmatmul.mubr.bf16.vlgmr.msra.gmra.mrb[0].mxu0 %v5680_v21  ;;  %v10069_v13 = vld [vmem:[#allocation20 + $0x788] ss:$16 sps:$4 sm:$0xff]  }
 0xb73   : > { %7529 = vmatprep.subr.bf16.mxu1 %v9999_v39  ;;  %7366 = vmatpush1.bf16.msra.mxu0 %v9994_v1  ;;  %v5600_v39 = vld [vmem:[#allocation3 + $0x30] sm:$0xff]  ;;  %v10072_v1 = vld [vmem:[#allocation20 + $0x7a0] ss:$16 sps:$4 sm:$0xff]  }
 0xb74   : > { %7367 = vmatprep.subr.bf16.mxu0 %v10002_v3  ;;  %7397 = vmatprep.mubr.bf16.mxu0 %v5683_v32  ;;  %v10083_v3 = vld [vmem:[#allocation20 + $0x7cc] ss:$16 sps:$4 sm:$0xff]  }
 0xb75   : > { %7521 = vmatmul.mubr.bf16.vlgmr.msra.gmra.mrb[0].mxu1 %v5680_v21  ;;  %v5650_v21 = vadd.f32 %v5631_v63, %v5600_v39  ;;  %v10195_v63 = vld [vmem:[#allocation26 + $0x20] sm:$0xff]   ;;  %v12254_v39 = vld [vmem:[#allocation21] sm:$0xf] }
 0xb76   : > { %7530 = vmatpush1.bf16.msra.mxu1 %v9997_v40  ;;  %7561 = vmatprep.mubr.bf16.mxu1 %v5683_v32  ;;  %v10075_v40 = vld [vmem:[#allocation20 + $0x7a8] ss:$16 sps:$4 sm:$0xff]  }
 0xb77   : > { %7531 = vmatprep.subr.bf16.mxu1 %v10005_v20  ;;  %7368 = vmatpush1.bf16.msra.mxu0 %v10000_v4  ;;  %v10078_v20 = vld [vmem:[#allocation20 + $0x7c0] ss:$16 sps:$4 sm:$0xff]   ;;  %v5666_v4 = vmul.f32 0.01, %v5650_v21  ;;  %vm5658_vm7 = vcmp.ge.f32.partialorder %v5650_v21, 0.0 }
 0xb78   : > { %7369 = vmatprep.subr.bf16.mxu0 %v10008_v18  ;;  %v10087_v32 = vld [vmem:[#allocation20 + $0x7e8] ss:$16 sps:$4 sm:$0xff]  }
 0xb79   : > { %v5674_v18 = vsel %vm5658_vm7, %v5650_v21, %v5666_v4  ;;  %v5957_v21 = vrot.slane %v12254_v39, %v12211_v61 }
 0xb7a   : > { %7532 = vmatpush1.bf16.msra.mxu1 %v10003_v5  ;;  %v10084_v5 = vld [vmem:[#allocation20 + $0x7e0] ss:$16 sps:$4 sm:$0xff]  }
 0xb7b   : > { %7533 = vmatprep.subr.bf16.mxu1 %v10011_v7  ;;  %7370 = vmatpush1.bf16.msra.mxu0 %v10006_v42  ;;  %v10092_v7 = vld [vmem:[#allocation23 + $0x4] ss:$8 sps:$4 sm:$0xff]   ;;  %v5682_v42 = vpack.c.bf16 %v5674_v18, %v5674_v18 }
 0xb7c   : > { %7371 = vmatprep.subr.bf16.mxu0 %v10014_v8  ;;  %v10095_v8 = vld [vmem:[#allocation23 + $0x14] ss:$8 sps:$4 sm:$0xff]  }
 0xb7e   : > { %7534 = vmatpush1.bf16.msra.mxu1 %v10009_v29  ;;  %v10090_v29 = vld [vmem:[#allocation23] ss:$8 sps:$4 sm:$0xff]  }
 0xb7f   : > { %7535 = vmatprep.subr.bf16.mxu1 %v10017_v10  ;;  %7372 = vmatpush1.bf16.msra.mxu0 %v10012_v11  ;;  %v10093_v10 = vld [vmem:[#allocation23 + $0x10] ss:$8 sps:$4 sm:$0xff]   ;;  %v10098_v11 = vld [vmem:[#allocation23 + $0x24] ss:$8 sps:$4 sm:$0xff]  }
 0xb80   : > { %7373 = vmatprep.subr.bf16.mxu0 %v10020_v36  ;;  %v10101_v36 = vld [vmem:[#allocation23 + $0x34] ss:$8 sps:$4 sm:$0xff]  }
 0xb82   : > { %7536 = vmatpush1.bf16.msra.mxu1 %v10015_v49  ;;  %v10096_v49 = vld [vmem:[#allocation23 + $0x20] ss:$8 sps:$4 sm:$0xff]  }
 0xb83   : > { %7537 = vmatprep.subr.bf16.mxu1 %v10023_v34  ;;  %7374 = vmatpush1.bf16.msra.mxu0 %v10018_v14  ;;  %v10099_v34 = vld [vmem:[#allocation23 + $0x30] ss:$8 sps:$4 sm:$0xff]   ;;  %v10104_v14 = vld [vmem:[#allocation23 + $0x44] ss:$8 sps:$4 sm:$0xff]  }
 0xb84   : > { %7375 = vmatprep.subr.bf16.mxu0 %v10026_v16  ;;  %v10107_v16 = vld [vmem:[#allocation23 + $0x54] ss:$8 sps:$4 sm:$0xff]  }
 0xb86   : > { %7538 = vmatpush1.bf16.msra.mxu1 %v10021_v15  ;;  %v10102_v15 = vld [vmem:[#allocation23 + $0x40] ss:$8 sps:$4 sm:$0xff]  }
 0xb87   : > { %7539 = vmatprep.subr.bf16.mxu1 %v10029_v22  ;;  %7376 = vmatpush1.bf16.msra.mxu0 %v10024_v23  ;;  %v10105_v22 = vld [vmem:[#allocation23 + $0x50] ss:$8 sps:$4 sm:$0xff]   ;;  %v10110_v23 = vld [vmem:[#allocation23 + $0x64] ss:$8 sps:$4 sm:$0xff]  }
 0xb88   : > { %7377 = vmatprep.subr.bf16.mxu0 %v10032_v25  ;;  %v10113_v25 = vld [vmem:[#allocation23 + $0x74] ss:$8 sps:$4 sm:$0xff]  }
 0xb8a   : > { %7540 = vmatpush1.bf16.msra.mxu1 %v10027_v24  ;;  %v10108_v24 = vld [vmem:[#allocation23 + $0x60] ss:$8 sps:$4 sm:$0xff]  }
 0xb8b   : > { %7541 = vmatprep.subr.bf16.mxu1 %v10035_v27  ;;  %7378 = vmatpush1.bf16.msra.mxu0 %v10030_v28  ;;  %v10111_v27 = vld [vmem:[#allocation23 + $0x70] ss:$8 sps:$4 sm:$0xff]   ;;  %v10116_v28 = vld [vmem:[#allocation23 + $0x84] ss:$8 sps:$4 sm:$0xff]  }
 0xb8c   : > { %7379 = vmatprep.subr.bf16.mxu0 %v10038_v30  ;;  %v10119_v30 = vld [vmem:[#allocation23 + $0x94] ss:$8 sps:$4 sm:$0xff]  }
 0xb8e   : > { %7542 = vmatpush1.bf16.msra.mxu1 %v10033_v33  ;;  %v10114_v33 = vld [vmem:[#allocation23 + $0x80] ss:$8 sps:$4 sm:$0xff]  }
 0xb8f   : > { %7543 = vmatprep.subr.bf16.mxu1 %v10041_v55  ;;  %7380 = vmatpush1.bf16.msra.mxu0 %v10036_v35  ;;  %v10117_v55 = vld [vmem:[#allocation23 + $0x90] ss:$8 sps:$4 sm:$0xff]   ;;  %v10122_v35 = vld [vmem:[#allocation23 + $0xa4] ss:$8 sps:$4 sm:$0xff]  }
 0xb90   : > { %7381 = vmatprep.subr.bf16.mxu0 %v10044_v6  ;;  %v10125_v6 = vld [vmem:[#allocation23 + $0xb4] ss:$8 sps:$4 sm:$0xff]  }
 0xb92   : > { %7544 = vmatpush1.bf16.msra.mxu1 %v10039_v37  ;;  %v10120_v37 = vld [vmem:[#allocation23 + $0xa0] ss:$8 sps:$4 sm:$0xff]  }
 0xb93   : > { %7545 = vmatprep.subr.bf16.mxu1 %v10047_v31  ;;  %7382 = vmatpush1.bf16.msra.mxu0 %v10042_v38  ;;  %v10123_v31 = vld [vmem:[#allocation23 + $0xb0] ss:$8 sps:$4 sm:$0xff]   ;;  %v10128_v38 = vld [vmem:[#allocation23 + $0xc4] ss:$8 sps:$4 sm:$0xff]  }
 0xb94   : > { %7383 = vmatprep.subr.bf16.mxu0 %v10050_v46  ;;  %v10131_v46 = vld [vmem:[#allocation23 + $0xd4] ss:$8 sps:$4 sm:$0xff]  }
 0xb96   : > { %7546 = vmatpush1.bf16.msra.mxu1 %v10045_v44  ;;  %v10126_v44 = vld [vmem:[#allocation23 + $0xc0] ss:$8 sps:$4 sm:$0xff]  }
 0xb97   : > { %7547 = vmatprep.subr.bf16.mxu1 %v10053_v47  ;;  %7384 = vmatpush1.bf16.msra.mxu0 %v10048_v62  ;;  %v10129_v47 = vld [vmem:[#allocation23 + $0xd0] ss:$8 sps:$4 sm:$0xff]   ;;  %v10134_v62 = vld [vmem:[#allocation23 + $0xe4] ss:$8 sps:$4 sm:$0xff]  }
 0xb98   : > { %7385 = vmatprep.subr.bf16.mxu0 %v10056_v50  ;;  %v10137_v50 = vld [vmem:[#allocation23 + $0xf4] ss:$8 sps:$4 sm:$0xff]  }
 0xb9a   : > { %7548 = vmatpush1.bf16.msra.mxu1 %v10051_v26  ;;  %v10132_v26 = vld [vmem:[#allocation23 + $0xe0] ss:$8 sps:$4 sm:$0xff]  }
 0xb9b   : > { %7549 = vmatprep.subr.bf16.mxu1 %v10059_v53  ;;  %7386 = vmatpush1.bf16.msra.mxu0 %v10054_v19  ;;  %v10135_v53 = vld [vmem:[#allocation23 + $0xf0] ss:$8 sps:$4 sm:$0xff]   ;;  %v10140_v19 = vld [vmem:[#allocation23 + $0x104] ss:$8 sps:$4 sm:$0xff]  }
 0xb9c   : > { %7387 = vmatprep.subr.bf16.mxu0 %v10062_v41  ;;  %v10187_v41 = vld [vmem:[#allocation26] sm:$0xff]  }
 0xb9e   : > { %7550 = vmatpush1.bf16.msra.mxu1 %v10057_v52  ;;  %v10186_v52 = vld [vmem:[#allocation26 + $0x40] sm:$0xff]  }
 0xb9f   : > { %7551 = vmatprep.subr.bf16.mxu1 %v10065_v54  ;;  %7388 = vmatpush1.bf16.msra.mxu0 %v10060_v43  ;;  %v10188_v54 = vld [vmem:[#allocation26 + $0x48] sm:$0xff]  }
 0xba0   : > { %7389 = vmatprep.subr.bf16.mxu0 %v10068_v56  ;;  %v10189_v43 = vld [vmem:[#allocation26 + $0x8] sm:$0xff]   ;;  %v10191_v56 = vld [vmem:[#allocation26 + $0x10] sm:$0xff]  }
 0xba2   : > { %7552 = vmatpush1.bf16.msra.mxu1 %v10063_v57  ;;  %v10190_v57 = vld [vmem:[#allocation26 + $0x50] sm:$0xff]  }
 0xba3   : > { %7553 = vmatprep.subr.bf16.mxu1 %v10071_v9  ;;  %7390 = vmatpush1.bf16.msra.mxu0 %v10066_v17  ;;  %v10192_v9 = vld [vmem:[#allocation26 + $0x58] sm:$0xff]  }
 0xba4   : > { %7391 = vmatprep.subr.bf16.mxu0 %v10074_v51  ;;  %v10193_v17 = vld [vmem:[#allocation26 + $0x18] sm:$0xff]   ;;  %v10196_v51 = vld [vmem:[#allocation26 + $0x68] sm:$0xff]  }
 0xba6   : > { %7554 = vmatpush1.bf16.msra.mxu1 %v10069_v13  ;;  %v10194_v13 = vld [vmem:[#allocation26 + $0x60] sm:$0xff]  }
 0xba7   : > { %7555 = vmatprep.subr.bf16.mxu1 %v10077_v0  ;;  %7392 = vmatpush1.bf16.msra.mxu0 %v10072_v1  ;;  %v10197_v0 = vld [vmem:[#allocation26 + $0x28] sm:$0xff]   ;;  %v5945_v1 = vrot.slane %v12254_v39, %v12201_v58 }
 0xba8   : > { %7393 = vmatprep.subr.bf16.mxu0 %v10080_v2 }
 0xbaa   : > { %7556 = vmatpush1.bf16.msra.mxu1 %v10075_v40  ;;  %v5949_v40 = vrot.slane %v12254_v39, %v12208_v60 }
 0xbab   : > { %7557 = vmatprep.subr.bf16.mxu1 %v10083_v3  ;;  %7394 = vmatpush1.bf16.msra.mxu0 %v10078_v20 }
 0xbac   : > { %7395 = vmatprep.subr.bf16.mxu0 %v10086_v12 }
 0xbae   : > { %7558 = vmatpush1.bf16.msra.mxu1 %v10081_v45 }
 0xbaf   : > { %7559 = vmatprep.subr.bf16.mxu1 %v10089_v48  ;;  %7396 = vmatpush1.bf16.msra.mxu0 %v10084_v5 }
 0xbb0   : > { %7982 = vmatprep.subr.bf16.mxu0 %v10092_v7 }
 0xbb2   : > { %7560 = vmatpush1.bf16.msra.mxu1 %v10087_v32  ;;  %7398 = vmatmul.mubr.bf16.vlgmr.msra.gmra.mrb[0].mxu0 %v5682_v42 }
 0xbb3   : > { %7983 = vmatpush1.bf16.msra.mxu0 %v10090_v29  ;;  %9164 = vmatprep.subr.bf16.mxu1 %v10186_v52  ;;  %v10179_v52 = vld [vmem:[#allocation23 + $0x1d4] ss:$8 sps:$4 sm:$0xff]  }
 0xbb4   : > { %7984 = vmatprep.subr.bf16.mxu0 %v10095_v8 }
 0xbb5   : > { %7562 = vmatmul.mubr.bf16.vlgmr.msra.gmra.mrb[0].mxu1 %v5682_v42 }
 0xbb6   : > { %9165 = vmatpush3.bf16.msra.mxu1 %v10187_v41  ;;  %v5953_v41 = vrot.slane %v12254_v39, %v12204_v59  ;;  %v10198_v59 = vld [vmem:[#allocation26 + $0x70] sm:$0xff]   ;;  %v10200_v39 = vld [vmem:[#allocation26 + $0x78] sm:$0xff]  }
 0xbb7   : > { %7985 = vmatpush1.bf16.msra.mxu0 %v10093_v10  ;;  %9166 = vmatprep.subr.bf16.mxu1 %v10188_v54  ;;  %v10177_v54 = vld [vmem:[#allocation23 + $0x1d0] ss:$8 sps:$4 sm:$0xff]  }
 0xbb8   : > { %7986 = vmatprep.subr.bf16.mxu0 %v10098_v11 }
 0xbba   : > { %9167 = vmatpush3.bf16.msra.mxu1 %v10189_v43  ;;  %v10182_v43 = vld [vmem:[#allocation23 + $0x1e4] ss:$8 sps:$4 sm:$0xff]  }
 0xbbb   : > { %7987 = vmatpush1.bf16.msra.mxu0 %v10096_v49  ;;  %9168 = vmatprep.subr.bf16.mxu1 %v10190_v57 }
 0xbbc   : > { %7988 = vmatprep.subr.bf16.mxu0 %v10101_v36  ;;  %v10138_v36 = vld [vmem:[#allocation23 + $0x100] ss:$8 sps:$4 sm:$0xff]  }
 0xbbe   : > { %9169 = vmatpush3.bf16.msra.mxu1 %v10191_v56  ;;  %v10180_v56 = vld [vmem:[#allocation23 + $0x1e0] ss:$8 sps:$4 sm:$0xff]  }
 0xbbf   : > { %7989 = vmatpush1.bf16.msra.mxu0 %v10099_v34  ;;  %9170 = vmatprep.subr.bf16.mxu1 %v10192_v9  ;;  %v10185_v9 = vld [vmem:[#allocation23 + $0x1f4] ss:$8 sps:$4 sm:$0xff]  }
 0xbc0   : > { %7990 = vmatprep.subr.bf16.mxu0 %v10104_v14  ;;  %v10143_v14 = vld [vmem:[#allocation23 + $0x114] ss:$8 sps:$4 sm:$0xff]  }
 0xbc2   : > { %9171 = vmatpush3.bf16.msra.mxu1 %v10193_v17 }
 0xbc3   : > { %7991 = vmatpush1.bf16.msra.mxu0 %v10102_v15  ;;  %9172 = vmatprep.subr.bf16.mxu1 %v10194_v13  ;;  %v10183_v13 = vld [vmem:[#allocation23 + $0x1f0] ss:$8 sps:$4 sm:$0xff]  }
 0xbc4   : > { %7992 = vmatprep.subr.bf16.mxu0 %v10107_v16  ;;  %v10141_v16 = vld [vmem:[#allocation23 + $0x110] ss:$8 sps:$4 sm:$0xff]  }
 0xbc6   : > { %9173 = vmatpush3.bf16.msra.mxu1 %v10195_v63 }
 0xbc7   : > { %7993 = vmatpush1.bf16.msra.mxu0 %v10105_v22  ;;  %9174 = vmatprep.subr.bf16.mxu1 %v10196_v51  ;;  %v10146_v22 = vld [vmem:[#allocation23 + $0x124] ss:$8 sps:$4 sm:$0xff]  }
 0xbc8   : > { %7994 = vmatprep.subr.bf16.mxu0 %v10110_v23  ;;  %v10144_v23 = vld [vmem:[#allocation23 + $0x120] ss:$8 sps:$4 sm:$0xff]  }
 0xbca   : > { %9175 = vmatpush3.bf16.msra.mxu1 %v10197_v0  ;;  %v10199_v0 = vld [vmem:[#allocation26 + $0x30] sm:$0xff]  }
 0xbcb   : > { %7995 = vmatpush1.bf16.msra.mxu0 %v10108_v24  ;;  %v10149_v24 = vld [vmem:[#allocation23 + $0x134] ss:$8 sps:$4 sm:$0xff]   ;;  %9176 = vmatprep.subr.bf16.mxu1 %v10198_v59 }
 0xbcc   : > { %7996 = vmatprep.subr.bf16.mxu0 %v10113_v25  ;;  %v10147_v25 = vld [vmem:[#allocation23 + $0x130] ss:$8 sps:$4 sm:$0xff]  }
 0xbce   : > { %9177 = vmatpush3.bf16.msra.mxu1 %v10199_v0 }
 0xbcf   : > { %7997 = vmatpush1.bf16.msra.mxu0 %v10111_v27  ;;  %v10152_v27 = vld [vmem:[#allocation23 + $0x144] ss:$8 sps:$4 sm:$0xff]   ;;  %9178 = vmatprep.subr.bf16.mxu1 %v10200_v39 }
 0xbd0   : > { %7998 = vmatprep.subr.bf16.mxu0 %v10116_v28  ;;  %v10150_v28 = vld [vmem:[#allocation23 + $0x140] ss:$8 sps:$4 sm:$0xff]  }
 0xbd3   : > { %7999 = vmatpush1.bf16.msra.mxu0 %v10114_v33  ;;  %v10155_v33 = vld [vmem:[#allocation23 + $0x154] ss:$8 sps:$4 sm:$0xff]  }
 0xbd4   : > { %8000 = vmatprep.subr.bf16.mxu0 %v10119_v30  ;;  %v10153_v30 = vld [vmem:[#allocation23 + $0x150] ss:$8 sps:$4 sm:$0xff]  }
 0xbd7   : > { %8001 = vmatpush1.bf16.msra.mxu0 %v10117_v55  ;;  %v10158_v55 = vld [vmem:[#allocation23 + $0x164] ss:$8 sps:$4 sm:$0xff]  }
 0xbd8   : > { %8002 = vmatprep.subr.bf16.mxu0 %v10122_v35  ;;  %v10156_v35 = vld [vmem:[#allocation23 + $0x160] ss:$8 sps:$4 sm:$0xff]  }
 0xbdb   : > { %8003 = vmatpush1.bf16.msra.mxu0 %v10120_v37  ;;  %v10161_v37 = vld [vmem:[#allocation23 + $0x174] ss:$8 sps:$4 sm:$0xff]  }
 0xbdc   : > { %8004 = vmatprep.subr.bf16.mxu0 %v10125_v6  ;;  %v10159_v6 = vld [vmem:[#allocation23 + $0x170] ss:$8 sps:$4 sm:$0xff]  }
 0xbdf   : > { %8005 = vmatpush1.bf16.msra.mxu0 %v10123_v31  ;;  %v10164_v31 = vld [vmem:[#allocation23 + $0x184] ss:$8 sps:$4 sm:$0xff]  }
 0xbe0   : > { %8006 = vmatprep.subr.bf16.mxu0 %v10128_v38  ;;  %v10162_v38 = vld [vmem:[#allocation23 + $0x180] ss:$8 sps:$4 sm:$0xff]  }
 0xbe3   : > { %8007 = vmatpush1.bf16.msra.mxu0 %v10126_v44  ;;  %v10167_v44 = vld [vmem:[#allocation23 + $0x194] ss:$8 sps:$4 sm:$0xff]  }
 0xbe4   : > { %8008 = vmatprep.subr.bf16.mxu0 %v10131_v46  ;;  %v10165_v46 = vld [vmem:[#allocation23 + $0x190] ss:$8 sps:$4 sm:$0xff]  }
 0xbe7   : > { %8009 = vmatpush1.bf16.msra.mxu0 %v10129_v47  ;;  %v10170_v47 = vld [vmem:[#allocation23 + $0x1a4] ss:$8 sps:$4 sm:$0xff]  }
 0xbe8   : > { %8010 = vmatprep.subr.bf16.mxu0 %v10134_v62  ;;  %v10168_v62 = vld [vmem:[#allocation23 + $0x1a0] ss:$8 sps:$4 sm:$0xff]  }
 0xbeb   : > { %8011 = vmatpush1.bf16.msra.mxu0 %v10132_v26  ;;  %v10173_v26 = vld [vmem:[#allocation23 + $0x1b4] ss:$8 sps:$4 sm:$0xff]  }
 0xbec   : > { %8012 = vmatprep.subr.bf16.mxu0 %v10137_v50  ;;  %v10171_v50 = vld [vmem:[#allocation23 + $0x1b0] ss:$8 sps:$4 sm:$0xff]  }
 0xbef   : > { %8013 = vmatpush1.bf16.msra.mxu0 %v10135_v53  ;;  %v10176_v53 = vld [vmem:[#allocation23 + $0x1c4] ss:$8 sps:$4 sm:$0xff]  }
 0xbf0   : > { %8023 = vmatprep.subr.bf16.mxu0 %v10140_v19  ;;  %v10174_v19 = vld [vmem:[#allocation23 + $0x1c0] ss:$8 sps:$4 sm:$0xff]  }
 0xc85   : > { %v7399_v2 = vpop.f32.mrb[0].mxu0 }
 0xc86   : > { %v9344_v20 = vadd.f32 %v7399_v2, %v5945_v1  ;;  %v7401_v45 = vpop.f32.mrb[1].mxu0  ;;  %v10201_v1 = vld [vmem:[#allocation26 + $0x38] sm:$0xff]  }
 0xc87   : > { %v9345_v12 = vadd.f32 %v7401_v45, %v5949_v40  ;;  %v7403_v5 = vpop.f32.mrb[2].mxu0  ;;  %9179 = vmatpush3.bf16.msra.mxu1 %v10201_v1  ;;  %v10884_v40 = vmov 0.0  }
 0xc88   : > { %v12262_v3 = vpop.f32.mrb[0].mxu1  ;;  %vm7570_vm8 = vcmp.ge.f32.partialorder %v9344_v20, 0.0  ;;  %v7574_v18 = vmul.f32 0.01, %v9344_v20  ;;  %v7404_v8 = vpop.f32.mrb[3].mxu0  ;;  %9200 = vmatprep.subr.bf16.mxu1 %v10884_v40 }
 0xc89   : > { %v7565_v4 = vpop.f32.mrb[1].mxu1  ;;  %vm7571_vm9 = vcmp.ge.f32.partialorder %v9345_v12, 0.0  ;;  %v7575_v7 = vmul.f32 0.01, %v9345_v12  ;;  %v9346_v57 = vadd.f32 %v12262_v3, %v5953_v41  ;;  %v10202_v8 = vld [vmem:[%s12510_s30] sm:$0xff]  }
 0xc8a   : > { %v9347_v48 = vadd.f32 %v7565_v4, %v5957_v21  ;;  %v7567_v32 = vpop.f32.mrb[2].mxu1  ;;  %v7578_v29 = vsel %vm7570_vm8, %v9344_v20, %v7574_v18  ;;  %v7650_v21 = vld [vmem:[#allocation24] sm:$0x3] }
 0xc8b   : > { %v7568_v10 = vpop.f32.mrb[3].mxu1  ;;  %v7579_v61 = vsel %vm7571_vm9, %v9345_v12, %v7575_v7  ;;  %v7582_v34 = vpack.c.bf16 %v7578_v29, %v7578_v29  ;;  %v7576_v17 = vmul.f32 0.01, %v9346_v57  ;;  %vm7572_vm11 = vcmp.ge.f32.partialorder %v9346_v57, 0.0 }
 0xc8c   : > { %vm7573_vm10 = vcmp.ge.f32.partialorder %v9347_v48, 0.0  ;;  %v7577_v42 = vmul.f32 0.01, %v9347_v48  ;;  %v7583_v49 = vpack.c.bf16 %v7579_v61, %v7579_v61  ;;  %v7655_v2 = vrot.slane %v7650_v21, %v12201_v58  ;;  %v10204_v10 = vld [vmem:[%s12510_s30 + $0x10] sm:$0xff]   ;;  %v10205_v61 = vld [vmem:[%s12510_s30 + $0x18] sm:$0xff]  }
 0xc8d   : > { %v7580_v63 = vsel %vm7572_vm11, %v9346_v57, %v7576_v17  ;;  %v7659_v3 = vrot.slane %v7650_v21, %v12208_v60  ;;  %v10203_v60 = vld [vmem:[%s12510_s30 + $0x8] sm:$0xff]  }
 0xc8e   : > { %v7581_v11 = vsel %vm7573_vm10, %v9347_v48, %v7577_v42  ;;  %8014 = vmatprep.mubr.bf16.mxu0 %v7583_v49  ;;  %v7584_v51 = vpack.c.bf16 %v7580_v63, %v7580_v63  ;;  %v10207_v49 = vld [vmem:[%s12510_s30 + $0x28] sm:$0xff]  }
 0xc8f   : > { %v7585_v15 = vpack.c.bf16 %v7581_v11, %v7581_v11  ;;  %8015 = vmatmul.mubr.bf16.vlgmr.msra.gmra.mrb[4].mxu0 %v7582_v34  ;;  %v10206_v11 = vld [vmem:[%s12510_s30 + $0x20] sm:$0xff]   ;;  %v10209_v34 = vld [vmem:[%s12510_s30 + $0x38] sm:$0xff]  }
 0xc90   : > { %8024 = vmatpush1.bf16.msra.mxu0 %v10138_v36  ;;  %v10208_v36 = vld [vmem:[%s12510_s30 + $0x30] sm:$0xff]  }
 0xc91   : > { %8055 = vmatprep.mubr.bf16.mxu0 %v7585_v15  ;;  %8025 = vmatprep.subr.bf16.mxu0 %v10143_v14  ;;  %v9123_v15 = vld [vmem:[#allocation27] ss:$0 sm:$0xff] }
 0xc94   : > { %8026 = vmatpush1.bf16.msra.mxu0 %v10141_v16 }
 0xc95   : > { %8027 = vmatprep.subr.bf16.mxu0 %v10146_v22 }
 0xc98   : > { %8028 = vmatpush1.bf16.msra.mxu0 %v10144_v23 }
 0xc99   : > { %8029 = vmatprep.subr.bf16.mxu0 %v10149_v24 }
 0xc9c   : > { %8030 = vmatpush1.bf16.msra.mxu0 %v10147_v25 }
 0xc9d   : > { %8031 = vmatprep.subr.bf16.mxu0 %v10152_v27 }
 0xca0   : > { %8032 = vmatpush1.bf16.msra.mxu0 %v10150_v28 }
 0xca1   : > { %8033 = vmatprep.subr.bf16.mxu0 %v10155_v33  ;;  %v10210_v33 = vld [vmem:[#allocation30] sm:$0xff]  }
 0xca4   : > { %8034 = vmatpush1.bf16.msra.mxu0 %v10153_v30 }
 0xca5   : > { %8035 = vmatprep.subr.bf16.mxu0 %v10158_v55  ;;  %v10211_v55 = vld [vmem:[#allocation30 + $0x8] sm:$0xff]  }
 0xca8   : > { %8036 = vmatpush1.bf16.msra.mxu0 %v10156_v35  ;;  %v10212_v35 = vld [vmem:[#allocation30 + $0x10] sm:$0xff]  }
 0xca9   : > { %8037 = vmatprep.subr.bf16.mxu0 %v10161_v37  ;;  %v10213_v37 = vld [vmem:[#allocation30 + $0x18] sm:$0xff]  }
 0xcac   : > { %8038 = vmatpush1.bf16.msra.mxu0 %v10159_v6  ;;  %v9140_v6 = vld [vmem:[#allocation29] ss:$0 sm:$0xff] }
 0xcad   : > { %8039 = vmatprep.subr.bf16.mxu0 %v10164_v31 }
 0xcb0   : > { %8040 = vmatpush1.bf16.msra.mxu0 %v10162_v38 }
 0xcb1   : > { %8041 = vmatprep.subr.bf16.mxu0 %v10167_v44 }
 0xcb4   : > { %8042 = vmatpush1.bf16.msra.mxu0 %v10165_v46 }
 0xcb5   : > { %8043 = vmatprep.subr.bf16.mxu0 %v10170_v47 }
 0xcb8   : > { %8044 = vmatpush1.bf16.msra.mxu0 %v10168_v62 }
 0xcb9   : > { %8045 = vmatprep.subr.bf16.mxu0 %v10173_v26 }
 0xcbc   : > { %8046 = vmatpush1.bf16.msra.mxu0 %v10171_v50 }
 0xcbd   : > { %8047 = vmatprep.subr.bf16.mxu0 %v10176_v53  ;;  %v9149_v53 = vld [vmem:[#allocation32] ss:$0 sm:$0xff] }
 0xcc0   : > { %8048 = vmatpush1.bf16.msra.mxu0 %v10174_v19 }
 0xcc1   : > { %8049 = vmatprep.subr.bf16.mxu0 %v10179_v52 }
 0xcc4   : > { %8050 = vmatpush1.bf16.msra.mxu0 %v10177_v54 }
 0xcc5   : > { %8051 = vmatprep.subr.bf16.mxu0 %v10182_v43 }
 0xcc8   : > { %8052 = vmatpush1.bf16.msra.mxu0 %v10180_v56 }
 0xcc9   : > { %8053 = vmatprep.subr.bf16.mxu0 %v10185_v9 }
 0xccc   : > { %8054 = vmatpush1.bf16.msra.mxu0 %v10183_v13 }
 0xccf   : > { %8056 = vmatmul.mubr.bf16.vlgmr.msra.gmra.mrb[4].mxu0 %v7584_v51 }
 0xda2   : > { %v8057_v20 = vpop.f32.mrb[4].mxu0 }
 0xda3   : > { %v9348_v45 = vadd.f32 %v8057_v20, %v7655_v2  ;;  %v8059_v4 = vpop.f32.mrb[5].mxu0 }
 0xda4   : > { %v9349_v12 = vadd.f32 %v8059_v4, %v7659_v3  ;;  %v8061_v48 = vpop.f32.mrb[6].mxu0 }
 0xda5   : > { %vm8064_vm12 = vcmp.ge.f32.partialorder %v9348_v45, 0.0  ;;  %v8066_v5 = vmul.f32 0.01, %v9348_v45  ;;  %v8062_v32 = vpop.f32.mrb[7].mxu0 }
 0xda6   : > { %vm8065_vm13 = vcmp.ge.f32.partialorder %v9349_v12, 0.0  ;;  %v8067_v18 = vmul.f32 0.01, %v9349_v12 }
 0xda7   : > { %v8068_v7 = vsel %vm8064_vm12, %v9348_v45, %v8066_v5 }
 0xda8   : > { %v8069_v42 = vsel %vm8065_vm13, %v9349_v12, %v8067_v18  ;;  %v8070_v58 = vpack.c.bf16 %v8068_v7, %v8068_v7 }
 0xda9   : > { %v8071_v29 = vpack.c.bf16 %v8069_v42, %v8069_v42 }
 0xdab   : > { %8239 = vmatprep.mubr.bf16.mxu1 %v8071_v29 }
 0xdac   : > { %8240 = vmatmul.mubr.bf16.vlgmr.msra.gmra.mrb[4].mxu1 %v8070_v58 }
 0xdad   : > { %9201 = vmatpush3.bf16.msra.mxu1 %v10202_v8  ;;  %9216 = vmatprep.mubr.msk.bf16.mxu1 %vm10885_vm14, %v10884_v40 }
 0xdae   : > { %9202 = vmatprep.subr.bf16.mxu1 %v10884_v40 }
 0xdb1   : > { %9203 = vmatpush3.bf16.msra.mxu1 %v10203_v60 }
 0xdb2   : > { %9204 = vmatprep.subr.bf16.mxu1 %v10884_v40 }
 0xdb5   : > { %9205 = vmatpush3.bf16.msra.mxu1 %v10204_v10 }
 0xdb6   : > { %9206 = vmatprep.subr.bf16.mxu1 %v10884_v40 }
 0xdb9   : > { %9207 = vmatpush3.bf16.msra.mxu1 %v10205_v61 }
 0xdba   : > { %9208 = vmatprep.subr.bf16.mxu1 %v10884_v40 }
 0xdbd   : > { %9209 = vmatpush3.bf16.msra.mxu1 %v10206_v11 }
 0xdbe   : > { %9210 = vmatprep.subr.bf16.mxu1 %v10884_v40 }
 0xdc1   : > { %9211 = vmatpush3.bf16.msra.mxu1 %v10207_v49 }
 0xdc2   : > { %9212 = vmatprep.subr.bf16.mxu1 %v10884_v40 }
 0xdc5   : > { %9213 = vmatpush3.bf16.msra.mxu1 %v10208_v36 }
 0xdc6   : > { %9214 = vmatprep.subr.bf16.mxu1 %v10884_v40 }
 0xdc9   : > { %9215 = vmatpush3.bf16.msra.mxu1 %v10209_v34 }
 0xdca   : > { %9220 = vmatprep.subr.bf16.mxu1 %v10884_v40 }
 0xe7f   : > { %v9180_v14 = vpop.f32.mrb[4].mxu1 }
 0xe80   : > { %v9181_v16 = vpop.f32.mrb[5].mxu1 }
 0xe81   : > { %v9182_v22 = vadd.f32 %v9181_v16, %v9180_v14  ;;  %v9183_v23 = vpop.f32.mrb[6].mxu1 }
 0xe82   : > { %v9184_v24 = vpop.f32.mrb[7].mxu1 }
 0xe83   : > { %v8242_v25 = vadd.f32 %v9182_v22, %v9123_v15 }
 0xe85   : > { %vm8247_vm15 = vcmp.ge.f32.partialorder %v8242_v25, 0.0  ;;  %v8248_v27 = vmul.f32 0.01, %v8242_v25 }
 0xe87   : > { %v8249_v28 = vsel %vm8247_vm15, %v8242_v25, %v8248_v27 }
 0xe88   : > { %v8250_v30 = vpack.c.bf16 %v8249_v28, %v8249_v28 }
 0xe8a   : > { %9217 = vmatmul.mubr.bf16.vlgmr.msra.gmra.mrb[8].mxu1 %v8250_v30 }
 0xe8b   : > { %9221 = vmatpush3.bf16.msra.mxu1 %v10210_v33  ;;  %9228 = vmatprep.mubr.msk.bf16.mxu1 %vm10885_vm14, %v10884_v40 }
 0xe8c   : > { %9222 = vmatprep.subr.bf16.mxu1 %v10884_v40 }
 0xe8f   : > { %9223 = vmatpush3.bf16.msra.mxu1 %v10211_v55 }
 0xe90   : > { %9224 = vmatprep.subr.bf16.mxu1 %v10884_v40 }
 0xe93   : > { %9225 = vmatpush3.bf16.msra.mxu1 %v10212_v35 }
 0xe94   : > { %9226 = vmatprep.subr.bf16.mxu1 %v10884_v40 }
 0xe97   : > { %9227 = vmatpush3.bf16.msra.mxu1 %v10213_v37 }
 0xf5d   : > { %v8356_v31 = vpop.f32.mrb[8].mxu1 }
 0xf5e   : > { %v8357_v38 = vadd.f32 %v9140_v6, %v8356_v31  ;;  %v9218_v44 = vpop.f32.mrb[9].mxu1 }
 0xf5f   : > { %v8359_v46 = vpop.f32.mrb[10].mxu1 }
 0xf60   : > { %vm8362_vm0 = vcmp.ge.f32.partialorder %v8357_v38, 0.0  ;;  %v8363_v47 = vmul.f32 0.01, %v8357_v38  ;;  %v9219_v62 = vpop.f32.mrb[11].mxu1 }
 0xf62   : > { %v8364_v26 = vsel %vm8362_vm0, %v8357_v38, %v8363_v47 }
 0xf63   : > { %v8365_v50 = vpack.c.bf16 %v8364_v26, %v8364_v26 }
 0xf65   : > { %9229 = vmatmul.mubr.msk.bf16.vlgmr.msra.gmra.mrb[12].mxu1 %vm8405_vm1, %v8365_v50 }
0x1038   : > { %v8443_v19 = vpop.f32.mrb[12].mxu1 }
0x1039   : > { %v8444_v52 = vadd.f32 %v9149_v53, %v8443_v19  ;;  %v9230_v41 = vpop.f32.mrb[13].mxu1 }
0x103a   : > { %v8446_v54 = vpop.f32.mrb[14].mxu1 }
0x103b   : > { %8449 = vst [vmem:[%s12511_s7] sm:$0xff] %v8444_v52  ;;  %v9231_v43 = vpop.f32.mrb[15].mxu1 }
0x103c PF: > { %s12512_s3 = sld [smem:[#allocation46_spill]]  ;;  %s12513_s1 = sld [smem:[#allocation43_spill]] }
0x103d   : > { %s12514_s22 = sld [smem:[#allocation44_spill]]  ;;  %s12515_s23 = sld [smem:[#allocation49_spill]] }
0x103e   : > { %s12516_s17 = sld [smem:[#allocation48_spill]]  ;;  %s12517_s24 = smov %s10845_s2 }
0x103f   : > { %s12518_s2 = smov %s10849_s25 }
0x1042   : > { %p43_p13 = scmp.ge.s32.totalorder %s12512_s3, 8  }
0x1044   : > { %s12519_s25 = smov %s12516_s17  ;;  %45 = sbr.rel (!%p43_p13) target bundleno = 38 (0x26), region = 260 }
0x104b   :  { %8461 = vsyncpa [#allocation5], 1 }
0x104c   :  { %8463 = vsyncpa [#allocation5 + $0x1], 1 }
0x104d   :  { %8464 = vsyncpa [#allocation7], 1 }
0x104e   :  { %8465 = vsyncpa [#allocation10], 1 }
0x104f   :  { %8467 = vsyncpa [#allocation10 + $0x1], 1 }
0x1050   :  { %8468 = vsyncpa [#allocation13], 1 }
0x1051   :  { %8470 = vsyncpa [#allocation13 + $0x1], 1 }
0x1052   :  { %8471 = vsyncpa [#allocation16], 1 }
0x1053   :  { %8473 = vsyncpa [#allocation16 + $0x1], 1 }
0x1054   :  { %8474 = vsyncpa [#allocation19], 1 }
0x1055   :  { %8475 = vsyncpa [#allocation22], 1 }
0x1056   :  { %8476 = vsyncpa [#allocation25], 1 }
0x1057   :  { %8477 = vsyncpa [#allocation28], 1 }
0x1058   :  { %8478 = vsyncpa [#allocation31], 1 }

</bundles_post_ra>
